<compile_context>
chip_gen: v7x
topology: tpu7x:2x2x1
jax: 0.10.0
libtpu: 0.0.40
codegen_flags: <defaults>
</compile_context>

<pallas_src>
import math

import jax
import jax.numpy as jnp
from jax import lax
from jax.experimental import pallas as pl
from jax.experimental.pallas import tpu as pltpu

# ----------------------------- config (scaled down) -----------------------------
D_MODEL    = 64          # original 1024
HEADDIM    = 16          # original 64
N_LAYER    = 2           # original 4
D_STATE    = 16          # Mamba2Simple default 64 (scaled)
D_CONV     = 4
EXPAND     = 2
SMALL_SIDE = 4           # original 8   (8x8 small image)
ZOOM       = 4           # original 8   (-> 64x64 big image)
BIG_SIDE   = SMALL_SIDE * ZOOM
N_SMALL    = SMALL_SIDE * SMALL_SIDE
N_BIG      = BIG_SIDE * BIG_SIDE

D_INNER    = EXPAND * D_MODEL            # 128
NHEADS     = D_INNER // HEADDIM          # 8
CONV_DIM   = D_INNER + 2 * D_STATE       # 160
D_IN_PROJ  = 2 * D_INNER + 2 * D_STATE + NHEADS

T_REAL     = 1 + N_SMALL + N_BIG         # 273
TC         = 128                         # SSD chunk length
T_PAD      = ((T_REAL + TC - 1) // TC) * TC
N_CHUNK    = T_PAD // TC
RGB_PAD    = 128                         # lane-dense width for to_rgb output
PADR       = 8                           # sublane-aligned halo rows in the conv buffer

BF16 = jnp.bfloat16
F32  = jnp.float32


# ----------------------------- Pallas kernels -----------------------------
def _layernorm_kernel(x_ref, g_ref, b_ref, o_ref):
    x = x_ref[...].astype(F32)
    mu = jnp.mean(x, axis=-1, keepdims=True)
    xc = x - mu
    var = jnp.mean(xc * xc, axis=-1, keepdims=True)
    y = xc * lax.rsqrt(var + 1e-5) * g_ref[...].astype(F32) + b_ref[...].astype(F32)
    o_ref[...] = y.astype(o_ref.dtype)


def _mamba_fused_kernel(x_ref, g_ref, b_ref, wz_ref, wx_ref, wd_ref,
                        cw_ref, cb_ref, dtb_ref, a_ref, dch_ref, nw_ref, ow_ref,
                        tri_ref, triu_ref, e_ref,
                        o_ref, h_ref, xbcbuf_ref, yh_ref):
    """One Mamba direction, one (batch, chunk) tile per grid step.

    LayerNorm -> in_proj -> causal depthwise conv+SiLU -> chunked SSD (Mamba-2)
    -> gated RMSNorm -> out_proj -> + residual, all fused.
    Scratch: h_ref (S,P) inter-chunk SSD state; xbcbuf_ref conv halo buffer;
    yh_ref per-head intra-chunk accumulator.
    """
    cidx = pl.program_id(1)

    @pl.when(cidx == 0)
    def _():
        h_ref[...] = jnp.zeros_like(h_ref)
        xbcbuf_ref[0:PADR, :] = jnp.zeros((PADR, CONV_DIM), F32)   # causal zero halo

    tc = TC
    P = D_INNER
    H = NHEADS
    HD = HEADDIM
    KW = D_CONV

    # ---- LayerNorm + in_proj (z | xBC | dt_raw), weights resident in VMEM ----
    xin = x_ref[...].astype(F32)                               # (tc, D_MODEL) residual
    mu = jnp.mean(xin, axis=-1, keepdims=True)
    xc = xin - mu
    var = jnp.mean(xc * xc, axis=-1, keepdims=True)
    xn = (xc * lax.rsqrt(var + 1e-5) * g_ref[...].astype(F32)
          + b_ref[...].astype(F32)).astype(BF16)
    z = jnp.dot(xn, wz_ref[...], preferred_element_type=F32)    # (tc, P)
    xbc = jnp.dot(xn, wx_ref[...], preferred_element_type=F32)  # (tc, CONV_DIM)
    dtr = jnp.dot(xn, wd_ref[...], preferred_element_type=F32)  # (tc, H)

    # ---- causal depthwise conv (halo carried across chunks) + SiLU + split ----
    xbcbuf_ref[PADR:PADR + tc, :] = xbc                          # aligned chunk store
    acc = cb_ref[...].astype(F32)                                # (1, CONV_DIM)
    for k in range(KW):                                          # static unroll (KW=4)
        acc = acc + (xbcbuf_ref[PADR - (KW - 1) + k:PADR - (KW - 1) + k + tc, :]
                     * cw_ref[k:k + 1, :].astype(F32))
    # carry last KW-1 raw xBC rows into the halo slot for the next chunk
    xbcbuf_ref[PADR - (KW - 1):PADR, :] = xbc[tc - (KW - 1):, :]
    y_conv = acc * jax.nn.sigmoid(acc)                           # SiLU, (tc, CONV_DIM)
    x = y_conv[:, :P]                                            # (tc, P)
    Bm = y_conv[:, P:P + D_STATE]                                # (tc, S)
    Cm = y_conv[:, P + D_STATE:]                                 # (tc, S)

    # ---- dt = softplus(dt_raw + dt_bias) (stable), a = dt * A (A < 0) ----
    v = dtr + dtb_ref[...]                                       # (tc, H)
    dt = jnp.maximum(v, 0.0) + jnp.log(1.0 + jnp.exp(-jnp.abs(v)))
    a = dt * a_ref[...]                                          # (tc, H), all <= 0

    tri = tri_ref[...]                                           # (tc, tc) f32 const
    E = e_ref[...]                                               # (H, P)   f32 const

    # inclusive cumulative log-decay, both orientations (two tiny MXU matmuls)
    Lam = jnp.dot(tri, a, preferred_element_type=F32)            # (tc, H)
    LamT = lax.dot_general(a, triu_ref[...], (((0,), (0,)), ((), ())),
                           preferred_element_type=F32)           # (H, tc)

    expL_ch = jnp.dot(jnp.exp(Lam), E, preferred_element_type=F32)   # (tc, P)
    dt_ch = jnp.dot(dt, E, preferred_element_type=F32)               # (tc, P)
    dtx = dt_ch * x                                                   # (tc, P)
    dtx_b = dtx.astype(BF16)                                          # cast once

    Bm_b = Bm.astype(BF16)
    Cm_b = Cm.astype(BF16)
    h_prev = h_ref[...]                                          # (S, P) f32

    # inter-chunk contribution of the carried state
    y = jnp.dot(Cm, h_prev, preferred_element_type=F32) * expL_ch

    # intra-chunk: (C @ B^T) with per-head causal decay mask; per-head column slices
    G = lax.dot_general(Cm_b, Bm_b, (((1,), (1,)), ((), ())),
                        preferred_element_type=F32)              # (tc, tc)
    Gtri = G * tri                                               # hoisted out of loop
    for h in range(H):                                           # static unroll, H=8
        Mh = jnp.exp(jnp.minimum(Lam[:, h:h + 1] - LamT[h:h + 1, :], 0.0))
        part = jnp.dot((Gtri * Mh).astype(BF16),
                       dtx_b[:, h * HD:(h + 1) * HD],
                       preferred_element_type=F32)               # (tc, HD)
        yh_ref[:, h * HD:(h + 1) * HD] = part                    # disjoint column blocks
    y = y + yh_ref[...]

    # D skip connection (channel-expanded D precomputed at init)
    y = y + dch_ref[...] * x

    # carry chunk state: h_new = decay_to_end * h_prev + B^T @ (decay_to_end(s) * dt*x)
    lam_last = Lam[tc - 1:tc, :]                                 # (1, H)
    dec_end_ch = jnp.dot(jnp.exp(lam_last - Lam), E, preferred_element_type=F32)
    h_ref[...] = (jnp.dot(jnp.exp(lam_last), E, preferred_element_type=F32) * h_prev
                  + lax.dot_general(Bm, dec_end_ch * dtx,
                                    (((0,), (0,)), ((), ())),
                                    preferred_element_type=F32))  # (S, P)

    # fused epilogue: gated RMSNorm + out_proj + residual
    yg = y * (z * jax.nn.sigmoid(z))
    varn = jnp.mean(yg * yg, axis=-1, keepdims=True)
    yn = yg * lax.rsqrt(varn + 1e-5) * nw_ref[...].astype(F32)
    out = jnp.dot(yn.astype(BF16), ow_ref[...], preferred_element_type=F32)
    o_ref[...] = (out + xin).astype(o_ref.dtype)


def _from_rgb_kernel(x_ref, w_ref, b_ref, o_ref):
    # K=3 projection: done on the VPU (too small for the MXU), no K padding
    x = x_ref[...].astype(F32)                                   # (M, 3)
    w = w_ref[...].astype(F32)                                   # (3, D)
    acc = (b_ref[...].astype(F32)
           + x[:, 0:1] * w[0:1, :]
           + x[:, 1:2] * w[1:2, :]
           + x[:, 2:3] * w[2:3, :])
    o_ref[...] = acc.astype(o_ref.dtype)


def _to_rgb_mse_kernel(x_ref, w_ref, b_ref, t_ref, y_ref, ssq_ref):
    # to_rgb matmul (lane-dense padded output) + fused squared-error accumulation.
    # MSE computed from the f32 accumulator (not the bf16-rounded store).
    @pl.when(pl.program_id(0) == 0)
    def _():
        ssq_ref[...] = jnp.zeros_like(ssq_ref)
    y = (jnp.dot(x_ref[...], w_ref[...], preferred_element_type=F32)
         + b_ref[...].astype(F32))
    y_ref[...] = y.astype(y_ref.dtype)                           # (tm, 128) dense store
    d = y[:, :3] - t_ref[...].astype(F32)
    ssq_ref[...] += jnp.sum(d * d).reshape(1, 1)


# ----------------------------- Pallas wrappers -----------------------------
def layernorm(x, gamma, beta, tm=256):
    B, T, D = x.shape
    M = B * T
    assert M % tm == 0
    out = pl.pallas_call(
        _layernorm_kernel,
        out_shape=jax.ShapeDtypeStruct((M, D), x.dtype),
        grid=(M // tm,),
        in_specs=[pl.BlockSpec((tm, D), lambda i: (i, 0)),
                  pl.BlockSpec((1, D), lambda i: (0, 0)),
                  pl.BlockSpec((1, D), lambda i: (0, 0))],
        out_specs=pl.BlockSpec((tm, D), lambda i: (i, 0)),
        compiler_params=pltpu.CompilerParams(dimension_semantics=("parallel",)),
    )(x.reshape(M, D), gamma.reshape(1, D), beta.reshape(1, D))
    return out.reshape(B, T, D)


def mamba_block(p, x, tri, triu, E):
    """residual + Mamba2Simple(LayerNorm(x)); x: (B, T_PAD, d_model) bf16."""
    B, T, Dm = x.shape
    assert T % TC == 0
    A = (-jnp.exp(p["A_log"])).reshape(1, NHEADS).astype(F32)
    return pl.pallas_call(
        _mamba_fused_kernel,
        out_shape=jax.ShapeDtypeStruct((B, T, Dm), BF16),
        grid=(B, T // TC),
        in_specs=[
            pl.BlockSpec((None, TC, Dm), lambda b, c: (b, c, 0)),       # residual stream
            pl.BlockSpec((1, Dm), lambda b, c: (0, 0)),                 # ln gamma
            pl.BlockSpec((1, Dm), lambda b, c: (0, 0)),                 # ln beta
            pl.BlockSpec((Dm, D_INNER), lambda b, c: (0, 0)),           # in_proj z
            pl.BlockSpec((Dm, CONV_DIM), lambda b, c: (0, 0)),          # in_proj xBC
            pl.BlockSpec((Dm, NHEADS), lambda b, c: (0, 0)),            # in_proj dt
            pl.BlockSpec((D_CONV, CONV_DIM), lambda b, c: (0, 0)),      # conv weight
            pl.BlockSpec((1, CONV_DIM), lambda b, c: (0, 0)),           # conv bias
            pl.BlockSpec((1, NHEADS), lambda b, c: (0, 0)),             # dt_bias
            pl.BlockSpec((1, NHEADS), lambda b, c: (0, 0)),             # A (negative)
            pl.BlockSpec((1, D_INNER), lambda b, c: (0, 0)),            # D (chan-expanded)
            pl.BlockSpec((1, D_INNER), lambda b, c: (0, 0)),            # rmsnorm weight
            pl.BlockSpec((D_INNER, Dm), lambda b, c: (0, 0)),           # out_proj weight
            pl.BlockSpec((TC, TC), lambda b, c: (0, 0)),                # tri constant
            pl.BlockSpec((TC, TC), lambda b, c: (0, 0)),                # triu constant
            pl.BlockSpec((NHEADS, D_INNER), lambda b, c: (0, 0)),       # head->chan selector
        ],
        out_specs=pl.BlockSpec((None, TC, Dm), lambda b, c: (b, c, 0)),
        scratch_shapes=[pltpu.VMEM((D_STATE, D_INNER), F32),            # SSD state carry
                        pltpu.VMEM((TC + PADR, CONV_DIM), F32),         # conv halo buffer
                        pltpu.VMEM((TC, D_INNER), F32)],                # per-head intra acc
        compiler_params=pltpu.CompilerParams(
            dimension_semantics=("parallel", "arbitrary")),
    )(x, p["ln_g"].reshape(1, Dm), p["ln_b"].reshape(1, Dm),
      p["in_proj_wz"], p["in_proj_wx"], p["in_proj_wd"],
      p["conv_w"], p["conv_b"].reshape(1, CONV_DIM),
      p["dt_bias"].reshape(1, NHEADS).astype(F32), A,
      p["D_ch"], p["norm_w"].reshape(1, D_INNER), p["out_proj_w"],
      tri, triu, E)


def from_rgb(x, w, b):
    B, N, C = x.shape
    Dm = w.shape[1]
    M = B * N
    out = pl.pallas_call(
        _from_rgb_kernel,
        out_shape=jax.ShapeDtypeStruct((M, Dm), BF16),
        grid=(1,),
        in_specs=[pl.BlockSpec((M, C), lambda i: (0, 0)),
                  pl.BlockSpec((C, Dm), lambda i: (0, 0)),
                  pl.BlockSpec((1, Dm), lambda i: (0, 0))],
        out_specs=pl.BlockSpec((M, Dm), lambda i: (0, 0)),
    )(x.reshape(M, C), w, b.reshape(1, Dm))
    return out.reshape(B, N, Dm)


def to_rgb_mse(x, y_true, w_pad, b_pad, tm=256):
    B, N, Dm = x.shape
    M = B * N
    assert M % tm == 0
    Cp = w_pad.shape[1]
    y_full, ssq = pl.pallas_call(
        _to_rgb_mse_kernel,
        out_shape=(jax.ShapeDtypeStruct((M, Cp), BF16),
                   jax.ShapeDtypeStruct((1, 1), F32)),
        grid=(M // tm,),
        in_specs=[pl.BlockSpec((tm, Dm), lambda i: (i, 0)),
                  pl.BlockSpec((Dm, Cp), lambda i: (0, 0)),
                  pl.BlockSpec((1, Cp), lambda i: (0, 0)),
                  pl.BlockSpec((tm, 3), lambda i: (i, 0))],
        out_specs=(pl.BlockSpec((tm, Cp), lambda i: (i, 0)),
                   pl.BlockSpec((1, 1), lambda i: (0, 0))),
        compiler_params=pltpu.CompilerParams(dimension_semantics=("arbitrary",)),
    )(x.reshape(M, Dm), w_pad, b_pad.reshape(1, Cp), y_true.reshape(M, 3))
    y_hat = y_full[:, :3].reshape(B, N, 3)
    loss = ssq[0, 0] / (M * 3)
    return y_hat, loss


# ----------------------------- model pieces (glue in JAX) -----------------------------
def swap_order_padded(x, t_real, n_values):
    # flip only the last n_values *real* tokens; padded tail rows stay trailing
    head = x[:, :t_real - n_values]
    tail = jnp.flip(x[:, t_real - n_values:t_real], axis=1)
    pad = x[:, t_real:]
    return jnp.concatenate([head, tail, pad], axis=1)


def mamba_flipflop(p, x, tri, triu, E):
    x = mamba_block(p["fwd"], x, tri, triu, E)
    x = swap_order_padded(x, T_REAL, N_BIG)
    x = mamba_block(p["bwd"], x, tri, triu, E)
    x = swap_order_padded(x, T_REAL, N_BIG)
    return x


def zoom(feat8, suffix):
    B, _, D = feat8.shape
    a = feat8.reshape(B, SMALL_SIDE, SMALL_SIDE, D)
    a = jnp.repeat(a, ZOOM, axis=1)                            # 'B H W C -> B (H z) (W z) C'
    a = jnp.repeat(a, ZOOM, axis=2)
    a = a.reshape(B, N_BIG, D)
    return a + suffix[None].astype(a.dtype)


def model_forward(params, im8, im64):
    B = im8.shape[0]
    im8_1d = im8.reshape(B, N_SMALL, 3)                        # batch.as_1d()
    im64_1d = im64.reshape(B, N_BIG, 3)

    feat8 = from_rgb(im8_1d, params["from_rgb_w"], params["from_rgb_b"])
    s0 = jnp.broadcast_to(params["s0"], (B, 1, D_MODEL)).astype(BF16)
    s1 = zoom(feat8, params["suffix"])
    x = jnp.concatenate([s0, feat8, s1], axis=1)               # (B, T_REAL, D)
    # pad once to the SSD chunk multiple; pad rows stay trailing and are causally inert
    x = jnp.pad(x, ((0, 0), (0, T_PAD - T_REAL), (0, 0)))
    x = layernorm(x, params["norm0_g"], params["norm0_b"])
    tri, triu, E = params["tri"], params["triu"], params["E"]
    for layer_p in params["layers"]:
        x = mamba_flipflop(layer_p, x, tri, triu, E)
    xt = x[:, T_REAL - N_BIG:T_REAL]                           # last 16x16 real tokens
    y_hat, loss = to_rgb_mse(xt, im64_1d, params["to_rgb_w"], params["to_rgb_b"])
    return y_hat.reshape(B, BIG_SIDE, BIG_SIDE, 3), loss       # batch.as_2d()


# ----------------------------- deterministic parameter init -----------------------------
def init_mamba_wrap(key):
    ks = jax.random.split(key, 5)
    dt = jnp.exp(jax.random.uniform(ks[3], (NHEADS,), F32)
                 * (math.log(0.1) - math.log(0.001)) + math.log(0.001))
    dt = jnp.maximum(dt, 1e-4)
    dt_bias = dt + jnp.log(-jnp.expm1(-dt))                    # inverse softplus
    a = jax.random.uniform(ks[4], (NHEADS,), F32, 1.0, 16.0)
    w_in = 0.02 * jax.random.normal(ks[0], (D_MODEL, D_IN_PROJ))
    D_head = jnp.ones((NHEADS,), F32)
    return dict(
        ln_g=jnp.ones((D_MODEL,), BF16),
        ln_b=jnp.zeros((D_MODEL,), BF16),
        # in_proj weight pre-split once at init: z | xBC | dt
        in_proj_wz=w_in[:, :D_INNER].astype(BF16),
        in_proj_wx=w_in[:, D_INNER:D_INNER + CONV_DIM].astype(BF16),
        in_proj_wd=w_in[:, D_INNER + CONV_DIM:].astype(BF16),
        conv_w=(0.1 * jax.random.normal(ks[1], (D_CONV, CONV_DIM))).astype(BF16),
        conv_b=jnp.zeros((CONV_DIM,), BF16),
        dt_bias=dt_bias,
        A_log=jnp.log(a),
        # channel-expanded D precomputed once (review: no per-chunk head->chan matmul)
        D_ch=jnp.repeat(D_head, HEADDIM).reshape(1, D_INNER),
        norm_w=jnp.ones((D_INNER,), BF16),
        out_proj_w=(0.02 * jax.random.normal(ks[2], (D_INNER, D_MODEL))).astype(BF16),
    )


def init_params(key):
    ks = jax.random.split(key, 4 + 2 * N_LAYER)
    layers = []
    for i in range(N_LAYER):
        layers.append(dict(fwd=init_mamba_wrap(ks[4 + 2 * i]),
                           bwd=init_mamba_wrap(ks[4 + 2 * i + 1])))
    # to_rgb weight/bias pre-padded once to a lane-dense 128-wide output
    w_rgb = 0.02 * jax.random.normal(ks[1], (D_MODEL, 3))
    w_rgb_pad = jnp.zeros((D_MODEL, RGB_PAD), F32).at[:, :3].set(w_rgb).astype(BF16)
    # SSD constants: causal masks + head->channel selector, built once (resident in VMEM)
    r = jnp.arange(TC)[:, None]
    c = jnp.arange(TC)[None, :]
    tri = (r >= c).astype(F32)
    triu = (r <= c).astype(F32)
    hh = jnp.arange(NHEADS)[:, None]
    pp = jnp.arange(D_INNER)[None, :] // HEADDIM
    E = (hh == pp).astype(F32)
    return dict(
        from_rgb_w=(0.02 * jax.random.normal(ks[0], (3, D_MODEL))).astype(BF16),
        from_rgb_b=jnp.zeros((D_MODEL,), BF16),
        to_rgb_w=w_rgb_pad,
        to_rgb_b=jnp.zeros((RGB_PAD,), BF16),
        s0=jax.random.normal(ks[2], (1, 1, D_MODEL)).astype(BF16),
        suffix=jax.random.normal(ks[3], (N_BIG, D_MODEL)).astype(BF16),
        norm0_g=jnp.ones((D_MODEL,), BF16),
        norm0_b=jnp.zeros((D_MODEL,), BF16),
        tri=tri, triu=triu, E=E,
        layers=layers,
    )


# ----------------------------- main -----------------------------
if __name__ == "__main__":
    key = jax.random.PRNGKey(0)
    k_im8, k_im64, k_par = jax.random.split(key, 3)
    B = 2
    im8 = jax.random.normal(k_im8, (B, SMALL_SIDE, SMALL_SIDE, 3), jnp.float32).astype(BF16)
    im64 = jax.random.normal(k_im64, (B, BIG_SIDE, BIG_SIDE, 3), jnp.float32).astype(BF16)
    params = init_params(k_par)

    fwd = jax.jit(model_forward)
    y_hat, loss = fwd(params, im8, im64)
    jax.block_until_ready((y_hat, loss))
    assert y_hat.shape == (B, BIG_SIDE, BIG_SIDE, 3)
    assert bool(jnp.isfinite(loss))
    print("KERNEL_OK")
</pallas_src>

<mosaic_0001>
module attributes {stable_mosaic.version = 11 : i64} {
  func.func @_from_rgb_kernel(%arg0: i32, %arg1: memref<32x3xbf16, #tpu.memory_space<vmem>>, %arg2: memref<3x64xbf16, #tpu.memory_space<vmem>>, %arg3: memref<1x64xbf16, #tpu.memory_space<vmem>>, %arg4: memref<32x64xbf16, #tpu.memory_space<vmem>>) attributes {dimension_semantics = [#tpu.dimension_semantics<arbitrary>], iteration_bounds = array<i64: 1>, scalar_prefetch = 0 : i64, scratch_operands = 0 : i64, tpu.core_type = #tpu.core_type<tc>, window_params = [{pipeline_mode = #tpu.pipeline_mode<synchronous>, transform_indices = @transform_0, window_bounds = array<i64: 32, 3>}, {pipeline_mode = #tpu.pipeline_mode<synchronous>, transform_indices = @transform_1, window_bounds = array<i64: 3, 64>}, {pipeline_mode = #tpu.pipeline_mode<synchronous>, transform_indices = @transform_2, window_bounds = array<i64: 1, 64>}, {pipeline_mode = #tpu.pipeline_mode<synchronous>, transform_indices = @transform_3, window_bounds = array<i64: 32, 64>}]} {
    %c0 = arith.constant 0 : index
    %c0_0 = arith.constant 0 : index
    %0 = vector.load %arg1[%c0, %c0_0] : memref<32x3xbf16, #tpu.memory_space<vmem>>, vector<32x3xbf16>
    %1 = arith.extf %0 : vector<32x3xbf16> to vector<32x3xf32>
    %c0_1 = arith.constant 0 : index
    %c0_2 = arith.constant 0 : index
    %2 = vector.load %arg2[%c0_1, %c0_2] : memref<3x64xbf16, #tpu.memory_space<vmem>>, vector<3x64xbf16>
    %3 = arith.extf %2 : vector<3x64xbf16> to vector<3x64xf32>
    %c0_3 = arith.constant 0 : index
    %c0_4 = arith.constant 0 : index
    %4 = vector.load %arg3[%c0_3, %c0_4] : memref<1x64xbf16, #tpu.memory_space<vmem>>, vector<1x64xbf16>
    %5 = arith.extf %4 : vector<1x64xbf16> to vector<1x64xf32>
    %6 = vector.extract_strided_slice %1 {offsets = [0, 0], sizes = [32, 1], strides = [1, 1]} : vector<32x3xf32> to vector<32x1xf32>
    %7 = vector.extract_strided_slice %3 {offsets = [0, 0], sizes = [1, 64], strides = [1, 1]} : vector<3x64xf32> to vector<1x64xf32>
    %8 = vector.broadcast %6 : vector<32x1xf32> to vector<32x64xf32>
    %9 = vector.broadcast %7 : vector<1x64xf32> to vector<32x64xf32>
    %10 = arith.mulf %8, %9 : vector<32x64xf32>
    %11 = vector.broadcast %5 : vector<1x64xf32> to vector<32x64xf32>
    %12 = arith.addf %11, %10 : vector<32x64xf32>
    %13 = vector.extract_strided_slice %1 {offsets = [0, 1], sizes = [32, 1], strides = [1, 1]} : vector<32x3xf32> to vector<32x1xf32>
    %14 = vector.extract_strided_slice %3 {offsets = [1, 0], sizes = [1, 64], strides = [1, 1]} : vector<3x64xf32> to vector<1x64xf32>
    %15 = vector.broadcast %13 : vector<32x1xf32> to vector<32x64xf32>
    %16 = vector.broadcast %14 : vector<1x64xf32> to vector<32x64xf32>
    %17 = arith.mulf %15, %16 : vector<32x64xf32>
    %18 = arith.addf %12, %17 : vector<32x64xf32>
    %19 = vector.extract_strided_slice %1 {offsets = [0, 2], sizes = [32, 1], strides = [1, 1]} : vector<32x3xf32> to vector<32x1xf32>
    %20 = vector.extract_strided_slice %3 {offsets = [2, 0], sizes = [1, 64], strides = [1, 1]} : vector<3x64xf32> to vector<1x64xf32>
    %21 = vector.broadcast %19 : vector<32x1xf32> to vector<32x64xf32>
    %22 = vector.broadcast %20 : vector<1x64xf32> to vector<32x64xf32>
    %23 = arith.mulf %21, %22 : vector<32x64xf32>
    %24 = arith.addf %18, %23 : vector<32x64xf32>
    %25 = arith.truncf %24 : vector<32x64xf32> to vector<32x64xbf16>
    %c0_5 = arith.constant 0 : index
    %c0_6 = arith.constant 0 : index
    %26 = vector.load %arg4[%c0_5, %c0_6] : memref<32x64xbf16, #tpu.memory_space<vmem>>, vector<32x64xbf16>
    tpu.vector_store %arg4[%c0_5, %c0_6], %25 {strides = array<i32>} : memref<32x64xbf16, #tpu.memory_space<vmem>>, vector<32x64xbf16>,
    return
  }
  func.func @transform_0(%arg0: i32) -> (i32, i32) {
    %c0_i32 = arith.constant 0 : i32
    %c0_i32_0 = arith.constant 0 : i32
    %c0_i32_1 = arith.constant 0 : i32
    return %c0_i32, %c0_i32_0 : i32, i32
  }
  func.func @transform_1(%arg0: i32) -> (i32, i32) {
    %c0_i32 = arith.constant 0 : i32
    %c0_i32_0 = arith.constant 0 : i32
    %c0_i32_1 = arith.constant 0 : i32
    return %c0_i32, %c0_i32_0 : i32, i32
  }
  func.func @transform_2(%arg0: i32) -> (i32, i32) {
    %c0_i32 = arith.constant 0 : i32
    %c0_i32_0 = arith.constant 0 : i32
    %c0_i32_1 = arith.constant 0 : i32
    return %c0_i32, %c0_i32_0 : i32, i32
  }
  func.func @transform_3(%arg0: i32) -> (i32, i32) {
    %c0_i32 = arith.constant 0 : i32
    %c0_i32_0 = arith.constant 0 : i32
    %c0_i32_1 = arith.constant 0 : i32
    return %c0_i32, %c0_i32_0 : i32, i32
  }
}

module attributes {stable_mosaic.version = 11 : i64} {
  func.func @_layernorm_kernel(%arg0: i32, %arg1: memref<256x64xbf16, #tpu.memory_space<vmem>>, %arg2: memref<1x64xbf16, #tpu.memory_space<vmem>>, %arg3: memref<1x64xbf16, #tpu.memory_space<vmem>>, %arg4: memref<256x64xbf16, #tpu.memory_space<vmem>>) attributes {dimension_semantics = [#tpu.dimension_semantics<parallel>], iteration_bounds = array<i64: 3>, scalar_prefetch = 0 : i64, scratch_operands = 0 : i64, tpu.core_type = #tpu.core_type<tc>, window_params = [{transform_indices = @transform_0, window_bounds = array<i64: 256, 64>}, {pipeline_mode = #tpu.pipeline_mode<synchronous>, transform_indices = @transform_1, window_bounds = array<i64: 1, 64>}, {pipeline_mode = #tpu.pipeline_mode<synchronous>, transform_indices = @transform_2, window_bounds = array<i64: 1, 64>}, {transform_indices = @transform_3, window_bounds = array<i64: 256, 64>}]} {
    %c0 = arith.constant 0 : index
    %c0_0 = arith.constant 0 : index
    %0 = vector.load %arg1[%c0, %c0_0] : memref<256x64xbf16, #tpu.memory_space<vmem>>, vector<256x64xbf16>
    %1 = arith.extf %0 : vector<256x64xbf16> to vector<256x64xf32>
    %cst = arith.constant dense<0.000000e+00> : vector<256xf32>
    %2 = vector.multi_reduction <add>, %1, %cst [1] : vector<256x64xf32> to vector<256xf32>
    %3 = vector.shape_cast %2 : vector<256xf32> to vector<256x1xf32>
    %cst_1 = arith.constant 6.400000e+01 : f32
    %4 = vector.broadcast %cst_1 : f32 to vector<256x1xf32>
    %5 = arith.divf %3, %4 : vector<256x1xf32>
    %6 = vector.broadcast %5 : vector<256x1xf32> to vector<256x64xf32>
    %7 = arith.subf %1, %6 : vector<256x64xf32>
    %8 = arith.mulf %7, %7 : vector<256x64xf32>
    %cst_2 = arith.constant dense<0.000000e+00> : vector<256xf32>
    %9 = vector.multi_reduction <add>, %8, %cst_2 [1] : vector<256x64xf32> to vector<256xf32>
    %10 = vector.shape_cast %9 : vector<256xf32> to vector<256x1xf32>
    %cst_3 = arith.constant 6.400000e+01 : f32
    %11 = vector.broadcast %cst_3 : f32 to vector<256x1xf32>
    %12 = arith.divf %10, %11 : vector<256x1xf32>
    %cst_4 = arith.constant 9.99999974E-6 : f32
    %13 = vector.broadcast %cst_4 : f32 to vector<256x1xf32>
    %14 = arith.addf %12, %13 : vector<256x1xf32>
    %15 = math.rsqrt %14 : vector<256x1xf32>
    %16 = vector.broadcast %15 : vector<256x1xf32> to vector<256x64xf32>
    %17 = arith.mulf %7, %16 : vector<256x64xf32>
    %c0_5 = arith.constant 0 : index
    %c0_6 = arith.constant 0 : index
    %18 = vector.load %arg2[%c0_5, %c0_6] : memref<1x64xbf16, #tpu.memory_space<vmem>>, vector<1x64xbf16>
    %19 = arith.extf %18 : vector<1x64xbf16> to vector<1x64xf32>
    %20 = vector.broadcast %19 : vector<1x64xf32> to vector<256x64xf32>
    %21 = arith.mulf %17, %20 : vector<256x64xf32>
    %c0_7 = arith.constant 0 : index
    %c0_8 = arith.constant 0 : index
    %22 = vector.load %arg3[%c0_7, %c0_8] : memref<1x64xbf16, #tpu.memory_space<vmem>>, vector<1x64xbf16>
    %23 = arith.extf %22 : vector<1x64xbf16> to vector<1x64xf32>
    %24 = vector.broadcast %23 : vector<1x64xf32> to vector<256x64xf32>
    %25 = arith.addf %21, %24 : vector<256x64xf32>
    %26 = arith.truncf %25 : vector<256x64xf32> to vector<256x64xbf16>
    %c0_9 = arith.constant 0 : index
    %c0_10 = arith.constant 0 : index
    %27 = vector.load %arg4[%c0_9, %c0_10] : memref<256x64xbf16, #tpu.memory_space<vmem>>, vector<256x64xbf16>
    tpu.vector_store %arg4[%c0_9, %c0_10], %26 {strides = array<i32>} : memref<256x64xbf16, #tpu.memory_space<vmem>>, vector<256x64xbf16>,
    return
  }
  func.func @transform_0(%arg0: i32) -> (i32, i32) {
    %c0_i32 = arith.constant 0 : i32
    %c0_i32_0 = arith.constant 0 : i32
    return %arg0, %c0_i32 : i32, i32
  }
  func.func @transform_1(%arg0: i32) -> (i32, i32) {
    %c0_i32 = arith.constant 0 : i32
    %c0_i32_0 = arith.constant 0 : i32
    %c0_i32_1 = arith.constant 0 : i32
    return %c0_i32, %c0_i32_0 : i32, i32
  }
  func.func @transform_2(%arg0: i32) -> (i32, i32) {
    %c0_i32 = arith.constant 0 : i32
    %c0_i32_0 = arith.constant 0 : i32
    %c0_i32_1 = arith.constant 0 : i32
    return %c0_i32, %c0_i32_0 : i32, i32
  }
  func.func @transform_3(%arg0: i32) -> (i32, i32) {
    %c0_i32 = arith.constant 0 : i32
    %c0_i32_0 = arith.constant 0 : i32
    return %arg0, %c0_i32 : i32, i32
  }
}

module attributes {stable_mosaic.version = 11 : i64} {
  func.func @_mamba_fused_kernel(%arg0: i32, %arg1: i32, %arg2: memref<1x128x64xbf16, #tpu.memory_space<vmem>>, %arg3: memref<1x64xbf16, #tpu.memory_space<vmem>>, %arg4: memref<1x64xbf16, #tpu.memory_space<vmem>>, %arg5: memref<64x128xbf16, #tpu.memory_space<vmem>>, %arg6: memref<64x160xbf16, #tpu.memory_space<vmem>>, %arg7: memref<64x8xbf16, #tpu.memory_space<vmem>>, %arg8: memref<4x160xbf16, #tpu.memory_space<vmem>>, %arg9: memref<1x160xbf16, #tpu.memory_space<vmem>>, %arg10: memref<1x8xf32, #tpu.memory_space<vmem>>, %arg11: memref<1x8xf32, #tpu.memory_space<vmem>>, %arg12: memref<1x128xf32, #tpu.memory_space<vmem>>, %arg13: memref<1x128xbf16, #tpu.memory_space<vmem>>, %arg14: memref<128x64xbf16, #tpu.memory_space<vmem>>, %arg15: memref<128x128xf32, #tpu.memory_space<vmem>>, %arg16: memref<128x128xf32, #tpu.memory_space<vmem>>, %arg17: memref<8x128xf32, #tpu.memory_space<vmem>>, %arg18: memref<1x128x64xbf16, #tpu.memory_space<vmem>>, %arg19: memref<16x128xf32, #tpu.memory_space<vmem>>, %arg20: memref<136x160xf32, #tpu.memory_space<vmem>>, %arg21: memref<128x128xf32, #tpu.memory_space<vmem>>) attributes {dimension_semantics = [#tpu.dimension_semantics<parallel>, #tpu.dimension_semantics<arbitrary>], iteration_bounds = array<i64: 2, 3>, scalar_prefetch = 0 : i64, scratch_operands = 3 : i64, tpu.core_type = #tpu.core_type<tc>, window_params = [{transform_indices = @transform_0, window_bounds = array<i64: 1, 128, 64>}, {pipeline_mode = #tpu.pipeline_mode<synchronous>, transform_indices = @transform_1, window_bounds = array<i64: 1, 64>}, {pipeline_mode = #tpu.pipeline_mode<synchronous>, transform_indices = @transform_2, window_bounds = array<i64: 1, 64>}, {pipeline_mode = #tpu.pipeline_mode<synchronous>, transform_indices = @transform_3, window_bounds = array<i64: 64, 128>}, {pipeline_mode = #tpu.pipeline_mode<synchronous>, transform_indices = @transform_4, window_bounds = array<i64: 64, 160>}, {pipeline_mode = #tpu.pipeline_mode<synchronous>, transform_indices = @transform_5, window_bounds = array<i64: 64, 8>}, {pipeline_mode = #tpu.pipeline_mode<synchronous>, transform_indices = @transform_6, window_bounds = array<i64: 4, 160>}, {pipeline_mode = #tpu.pipeline_mode<synchronous>, transform_indices = @transform_7, window_bounds = array<i64: 1, 160>}, {pipeline_mode = #tpu.pipeline_mode<synchronous>, transform_indices = @transform_8, window_bounds = array<i64: 1, 8>}, {pipeline_mode = #tpu.pipeline_mode<synchronous>, transform_indices = @transform_9, window_bounds = array<i64: 1, 8>}, {pipeline_mode = #tpu.pipeline_mode<synchronous>, transform_indices = @transform_10, window_bounds = array<i64: 1, 128>}, {pipeline_mode = #tpu.pipeline_mode<synchronous>, transform_indices = @transform_11, window_bounds = array<i64: 1, 128>}, {pipeline_mode = #tpu.pipeline_mode<synchronous>, transform_indices = @transform_12, window_bounds = array<i64: 128, 64>}, {pipeline_mode = #tpu.pipeline_mode<synchronous>, transform_indices = @transform_13, window_bounds = array<i64: 128, 128>}, {pipeline_mode = #tpu.pipeline_mode<synchronous>, transform_indices = @transform_14, window_bounds = array<i64: 128, 128>}, {pipeline_mode = #tpu.pipeline_mode<synchronous>, transform_indices = @transform_15, window_bounds = array<i64: 8, 128>}, {transform_indices = @transform_16, window_bounds = array<i64: 1, 128, 64>}]} {
    %c0_i32 = arith.constant 0 : i32
    %0 = arith.cmpi eq, %arg1, %c0_i32 : i32
    %1 = arith.extui %0 : i1 to i32
    %c0_i32_0 = arith.constant 0 : i32
    %2 = arith.cmpi ne, %1, %c0_i32_0 : i32
    scf.if %2 {
      %cst_103 = arith.constant 0.000000e+00 : f32
      %261 = vector.broadcast %cst_103 : f32 to vector<16x128xf32>
      %c0_104 = arith.constant 0 : index
      %c0_105 = arith.constant 0 : index
      %262 = vector.load %arg19[%c0_104, %c0_105] : memref<16x128xf32, #tpu.memory_space<vmem>>, vector<16x128xf32>
      tpu.vector_store %arg19[%c0_104, %c0_105], %261 {strides = array<i32>} : memref<16x128xf32, #tpu.memory_space<vmem>>, vector<16x128xf32>,
      %cst_106 = arith.constant 0.000000e+00 : f32
      %263 = vector.broadcast %cst_106 : f32 to vector<8x160xf32>
      %c0_107 = arith.constant 0 : index
      %c0_108 = arith.constant 0 : index
      %264 = vector.load %arg20[%c0_107, %c0_108] : memref<136x160xf32, #tpu.memory_space<vmem>>, vector<8x160xf32>
      tpu.vector_store %arg20[%c0_107, %c0_108], %263 {strides = array<i32>} : memref<136x160xf32, #tpu.memory_space<vmem>>, vector<8x160xf32>,
    } else {
    }
    %c0 = arith.constant 0 : index
    %c0_1 = arith.constant 0 : index
    %c0_2 = arith.constant 0 : index
    %3 = vector.load %arg2[%c0, %c0_1, %c0_2] : memref<1x128x64xbf16, #tpu.memory_space<vmem>>, vector<1x128x64xbf16>
    %4 = vector.shape_cast %3 : vector<1x128x64xbf16> to vector<128x64xbf16>
    %5 = arith.extf %4 : vector<128x64xbf16> to vector<128x64xf32>
    %cst = arith.constant dense<0.000000e+00> : vector<128xf32>
    %6 = vector.multi_reduction <add>, %5, %cst [1] : vector<128x64xf32> to vector<128xf32>
    %7 = vector.shape_cast %6 : vector<128xf32> to vector<128x1xf32>
    %cst_3 = arith.constant 6.400000e+01 : f32
    %8 = vector.broadcast %cst_3 : f32 to vector<128x1xf32>
    %9 = arith.divf %7, %8 : vector<128x1xf32>
    %10 = vector.broadcast %9 : vector<128x1xf32> to vector<128x64xf32>
    %11 = arith.subf %5, %10 : vector<128x64xf32>
    %12 = arith.mulf %11, %11 : vector<128x64xf32>
    %cst_4 = arith.constant dense<0.000000e+00> : vector<128xf32>
    %13 = vector.multi_reduction <add>, %12, %cst_4 [1] : vector<128x64xf32> to vector<128xf32>
    %14 = vector.shape_cast %13 : vector<128xf32> to vector<128x1xf32>
    %cst_5 = arith.constant 6.400000e+01 : f32
    %15 = vector.broadcast %cst_5 : f32 to vector<128x1xf32>
    %16 = arith.divf %14, %15 : vector<128x1xf32>
    %cst_6 = arith.constant 9.99999974E-6 : f32
    %17 = vector.broadcast %cst_6 : f32 to vector<128x1xf32>
    %18 = arith.addf %16, %17 : vector<128x1xf32>
    %19 = math.rsqrt %18 : vector<128x1xf32>
    %20 = vector.broadcast %19 : vector<128x1xf32> to vector<128x64xf32>
    %21 = arith.mulf %11, %20 : vector<128x64xf32>
    %c0_7 = arith.constant 0 : index
    %c0_8 = arith.constant 0 : index
    %22 = vector.load %arg3[%c0_7, %c0_8] : memref<1x64xbf16, #tpu.memory_space<vmem>>, vector<1x64xbf16>
    %23 = arith.extf %22 : vector<1x64xbf16> to vector<1x64xf32>
    %24 = vector.broadcast %23 : vector<1x64xf32> to vector<128x64xf32>
    %25 = arith.mulf %21, %24 : vector<128x64xf32>
    %c0_9 = arith.constant 0 : index
    %c0_10 = arith.constant 0 : index
    %26 = vector.load %arg4[%c0_9, %c0_10] : memref<1x64xbf16, #tpu.memory_space<vmem>>, vector<1x64xbf16>
    %27 = arith.extf %26 : vector<1x64xbf16> to vector<1x64xf32>
    %28 = vector.broadcast %27 : vector<1x64xf32> to vector<128x64xf32>
    %29 = arith.addf %25, %28 : vector<128x64xf32>
    %30 = arith.truncf %29 : vector<128x64xf32> to vector<128x64xbf16>
    %c0_11 = arith.constant 0 : index
    %c0_12 = arith.constant 0 : index
    %31 = vector.load %arg5[%c0_11, %c0_12] : memref<64x128xbf16, #tpu.memory_space<vmem>>, vector<64x128xbf16>
    %cst_13 = arith.constant dense<0.000000e+00> : vector<128x128xf32>
    %32 = tpu.matmul %30, %31, %cst_13 {dimension_numbers = #tpu.dot_dimension_numbers<[1], [0], [0], [1], [0, 0, 1, 1], [], []>} : vector<128x64xbf16>, vector<64x128xbf16>, vector<128x128xf32> -> vector<128x128xf32>
    %c0_14 = arith.constant 0 : index
    %c0_15 = arith.constant 0 : index
    %33 = vector.load %arg6[%c0_14, %c0_15] : memref<64x160xbf16, #tpu.memory_space<vmem>>, vector<64x160xbf16>
    %cst_16 = arith.constant dense<0.000000e+00> : vector<128x160xf32>
    %34 = tpu.matmul %30, %33, %cst_16 {dimension_numbers = #tpu.dot_dimension_numbers<[1], [0], [0], [1], [0, 0, 1, 1], [], []>} : vector<128x64xbf16>, vector<64x160xbf16>, vector<128x160xf32> -> vector<128x160xf32>
    %c0_17 = arith.constant 0 : index
    %c0_18 = arith.constant 0 : index
    %35 = vector.load %arg7[%c0_17, %c0_18] : memref<64x8xbf16, #tpu.memory_space<vmem>>, vector<64x8xbf16>
    %cst_19 = arith.constant dense<0.000000e+00> : vector<128x8xf32>
    %36 = tpu.matmul %30, %35, %cst_19 {dimension_numbers = #tpu.dot_dimension_numbers<[1], [0], [0], [1], [0, 0, 1, 1], [], []>} : vector<128x64xbf16>, vector<64x8xbf16>, vector<128x8xf32> -> vector<128x8xf32>
    %c8 = arith.constant 8 : index
    %c0_20 = arith.constant 0 : index
    %37 = vector.load %arg20[%c8, %c0_20] : memref<136x160xf32, #tpu.memory_space<vmem>>, vector<128x160xf32>
    tpu.vector_store %arg20[%c8, %c0_20], %34 {strides = array<i32>} : memref<136x160xf32, #tpu.memory_space<vmem>>, vector<128x160xf32>,
    %c0_21 = arith.constant 0 : index
    %c0_22 = arith.constant 0 : index
    %38 = vector.load %arg9[%c0_21, %c0_22] : memref<1x160xbf16, #tpu.memory_space<vmem>>, vector<1x160xbf16>
    %39 = arith.extf %38 : vector<1x160xbf16> to vector<1x160xf32>
    %c5 = arith.constant 5 : index
    %c0_23 = arith.constant 0 : index
    %40 = vector.load %arg20[%c5, %c0_23] : memref<136x160xf32, #tpu.memory_space<vmem>>, vector<128x160xf32>
    %c0_24 = arith.constant 0 : index
    %c0_25 = arith.constant 0 : index
    %41 = vector.load %arg8[%c0_24, %c0_25] : memref<4x160xbf16, #tpu.memory_space<vmem>>, vector<1x160xbf16>
    %42 = arith.extf %41 : vector<1x160xbf16> to vector<1x160xf32>
    %43 = vector.broadcast %42 : vector<1x160xf32> to vector<128x160xf32>
    %44 = arith.mulf %40, %43 : vector<128x160xf32>
    %45 = vector.broadcast %39 : vector<1x160xf32> to vector<128x160xf32>
    %46 = arith.addf %45, %44 : vector<128x160xf32>
    %c6 = arith.constant 6 : index
    %c0_26 = arith.constant 0 : index
    %47 = vector.load %arg20[%c6, %c0_26] : memref<136x160xf32, #tpu.memory_space<vmem>>, vector<128x160xf32>
    %c1 = arith.constant 1 : index
    %c0_27 = arith.constant 0 : index
    %48 = vector.load %arg8[%c1, %c0_27] : memref<4x160xbf16, #tpu.memory_space<vmem>>, vector<1x160xbf16>
    %49 = arith.extf %48 : vector<1x160xbf16> to vector<1x160xf32>
    %50 = vector.broadcast %49 : vector<1x160xf32> to vector<128x160xf32>
    %51 = arith.mulf %47, %50 : vector<128x160xf32>
    %52 = arith.addf %46, %51 : vector<128x160xf32>
    %c7 = arith.constant 7 : index
    %c0_28 = arith.constant 0 : index
    %53 = vector.load %arg20[%c7, %c0_28] : memref<136x160xf32, #tpu.memory_space<vmem>>, vector<128x160xf32>
    %c2 = arith.constant 2 : index
    %c0_29 = arith.constant 0 : index
    %54 = vector.load %arg8[%c2, %c0_29] : memref<4x160xbf16, #tpu.memory_space<vmem>>, vector<1x160xbf16>
    %55 = arith.extf %54 : vector<1x160xbf16> to vector<1x160xf32>
    %56 = vector.broadcast %55 : vector<1x160xf32> to vector<128x160xf32>
    %57 = arith.mulf %53, %56 : vector<128x160xf32>
    %58 = arith.addf %52, %57 : vector<128x160xf32>
    %c8_30 = arith.constant 8 : index
    %c0_31 = arith.constant 0 : index
    %59 = vector.load %arg20[%c8_30, %c0_31] : memref<136x160xf32, #tpu.memory_space<vmem>>, vector<128x160xf32>
    %c3 = arith.constant 3 : index
    %c0_32 = arith.constant 0 : index
    %60 = vector.load %arg8[%c3, %c0_32] : memref<4x160xbf16, #tpu.memory_space<vmem>>, vector<1x160xbf16>
    %61 = arith.extf %60 : vector<1x160xbf16> to vector<1x160xf32>
    %62 = vector.broadcast %61 : vector<1x160xf32> to vector<128x160xf32>
    %63 = arith.mulf %59, %62 : vector<128x160xf32>
    %64 = arith.addf %58, %63 : vector<128x160xf32>
    %65 = vector.extract_strided_slice %34 {offsets = [125, 0], sizes = [3, 160], strides = [1, 1]} : vector<128x160xf32> to vector<3x160xf32>
    %c5_33 = arith.constant 5 : index
    %c0_34 = arith.constant 0 : index
    %66 = vector.load %arg20[%c5_33, %c0_34] : memref<136x160xf32, #tpu.memory_space<vmem>>, vector<3x160xf32>
    tpu.vector_store %arg20[%c5_33, %c0_34], %65 {strides = array<i32>} : memref<136x160xf32, #tpu.memory_space<vmem>>, vector<3x160xf32>,
    %67 = arith.negf %64 : vector<128x160xf32>
    %68 = math.exp %67 : vector<128x160xf32>
    %cst_35 = arith.constant 1.000000e+00 : f32
    %69 = vector.broadcast %cst_35 : f32 to vector<128x160xf32>
    %70 = arith.addf %69, %68 : vector<128x160xf32>
    %71 = arith.divf %69, %70 : vector<128x160xf32>
    %72 = arith.mulf %64, %71 : vector<128x160xf32>
    %73 = vector.extract_strided_slice %72 {offsets = [0, 0], sizes = [128, 128], strides = [1, 1]} : vector<128x160xf32> to vector<128x128xf32>
    %74 = vector.extract_strided_slice %72 {offsets = [0, 128], sizes = [128, 16], strides = [1, 1]} : vector<128x160xf32> to vector<128x16xf32>
    %75 = vector.extract_strided_slice %72 {offsets = [0, 144], sizes = [128, 16], strides = [1, 1]} : vector<128x160xf32> to vector<128x16xf32>
    %c0_36 = arith.constant 0 : index
    %c0_37 = arith.constant 0 : index
    %76 = vector.load %arg10[%c0_36, %c0_37] : memref<1x8xf32, #tpu.memory_space<vmem>>, vector<1x8xf32>
    %77 = vector.broadcast %76 : vector<1x8xf32> to vector<128x8xf32>
    %78 = arith.addf %36, %77 : vector<128x8xf32>
    %cst_38 = arith.constant 0.000000e+00 : f32
    %79 = vector.broadcast %cst_38 : f32 to vector<128x8xf32>
    %80 = arith.maximumf %78, %79 : vector<128x8xf32>
    %81 = math.absf %78 : vector<128x8xf32>
    %cst_39 = arith.constant 0.000000e+00 : f32
    %82 = vector.broadcast %cst_39 : f32 to vector<128x8xf32>
    %83 = arith.subf %82, %81 : vector<128x8xf32>
    %84 = math.exp %83 : vector<128x8xf32>
    %cst_40 = arith.constant 1.000000e+00 : f32
    %85 = vector.broadcast %cst_40 : f32 to vector<128x8xf32>
    %86 = arith.addf %85, %84 : vector<128x8xf32>
    %87 = math.log %86 : vector<128x8xf32>
    %88 = arith.addf %80, %87 : vector<128x8xf32>
    %c0_41 = arith.constant 0 : index
    %c0_42 = arith.constant 0 : index
    %89 = vector.load %arg11[%c0_41, %c0_42] : memref<1x8xf32, #tpu.memory_space<vmem>>, vector<1x8xf32>
    %90 = vector.broadcast %89 : vector<1x8xf32> to vector<128x8xf32>
    %91 = arith.mulf %88, %90 : vector<128x8xf32>
    %c0_43 = arith.constant 0 : index
    %c0_44 = arith.constant 0 : index
    %92 = vector.load %arg15[%c0_43, %c0_44] : memref<128x128xf32, #tpu.memory_space<vmem>>, vector<128x128xf32>
    %c0_45 = arith.constant 0 : index
    %c0_46 = arith.constant 0 : index
    %93 = vector.load %arg17[%c0_45, %c0_46] : memref<8x128xf32, #tpu.memory_space<vmem>>, vector<8x128xf32>
    %cst_47 = arith.constant dense<0.000000e+00> : vector<128x8xf32>
    %94 = tpu.matmul %92, %91, %cst_47 {dimension_numbers = #tpu.dot_dimension_numbers<[1], [0], [0], [1], [0, 0, 1, 1], [], []>} : vector<128x128xf32>, vector<128x8xf32>, vector<128x8xf32> -> vector<128x8xf32>
    %c0_48 = arith.constant 0 : index
    %c0_49 = arith.constant 0 : index
    %95 = vector.load %arg16[%c0_48, %c0_49] : memref<128x128xf32, #tpu.memory_space<vmem>>, vector<128x128xf32>
    %cst_50 = arith.constant dense<0.000000e+00> : vector<8x128xf32>
    %96 = tpu.matmul %91, %95, %cst_50 {dimension_numbers = #tpu.dot_dimension_numbers<[0], [0], [1], [1], [0, 1, 1, 1], [], []>} : vector<128x8xf32>, vector<128x128xf32>, vector<8x128xf32> -> vector<8x128xf32>
    %97 = math.exp %94 : vector<128x8xf32>
    %cst_51 = arith.constant dense<0.000000e+00> : vector<128x128xf32>
    %98 = tpu.matmul %97, %93, %cst_51 {dimension_numbers = #tpu.dot_dimension_numbers<[1], [0], [0], [1], [0, 0, 1, 1], [], []>} : vector<128x8xf32>, vector<8x128xf32>, vector<128x128xf32> -> vector<128x128xf32>
    %cst_52 = arith.constant dense<0.000000e+00> : vector<128x128xf32>
    %99 = tpu.matmul %88, %93, %cst_52 {dimension_numbers = #tpu.dot_dimension_numbers<[1], [0], [0], [1], [0, 0, 1, 1], [], []>} : vector<128x8xf32>, vector<8x128xf32>, vector<128x128xf32> -> vector<128x128xf32>
    %100 = arith.mulf %99, %73 : vector<128x128xf32>
    %101 = arith.truncf %100 : vector<128x128xf32> to vector<128x128xbf16>
    %102 = arith.truncf %74 : vector<128x16xf32> to vector<128x16xbf16>
    %103 = arith.truncf %75 : vector<128x16xf32> to vector<128x16xbf16>
    %c0_53 = arith.constant 0 : index
    %c0_54 = arith.constant 0 : index
    %104 = vector.load %arg19[%c0_53, %c0_54] : memref<16x128xf32, #tpu.memory_space<vmem>>, vector<16x128xf32>
    %cst_55 = arith.constant dense<0.000000e+00> : vector<128x128xf32>
    %105 = tpu.matmul %75, %104, %cst_55 {dimension_numbers = #tpu.dot_dimension_numbers<[1], [0], [0], [1], [0, 0, 1, 1], [], []>} : vector<128x16xf32>, vector<16x128xf32>, vector<128x128xf32> -> vector<128x128xf32>
    %106 = arith.mulf %105, %98 : vector<128x128xf32>
    %cst_56 = arith.constant dense<0.000000e+00> : vector<128x128xf32>
    %107 = tpu.matmul %103, %102, %cst_56 {dimension_numbers = #tpu.dot_dimension_numbers<[1], [1], [0], [0], [0, 0, 1, 0], [], []>} : vector<128x16xbf16>, vector<128x16xbf16>, vector<128x128xf32> -> vector<128x128xf32>
    %108 = arith.mulf %107, %92 : vector<128x128xf32>
    %109 = vector.extract_strided_slice %94 {offsets = [0, 0], sizes = [128, 1], strides = [1, 1]} : vector<128x8xf32> to vector<128x1xf32>
    %110 = vector.extract_strided_slice %96 {offsets = [0, 0], sizes = [1, 128], strides = [1, 1]} : vector<8x128xf32> to vector<1x128xf32>
    %111 = vector.broadcast %109 : vector<128x1xf32> to vector<128x128xf32>
    %112 = vector.broadcast %110 : vector<1x128xf32> to vector<128x128xf32>
    %113 = arith.subf %111, %112 : vector<128x128xf32>
    %cst_57 = arith.constant 0.000000e+00 : f32
    %114 = vector.broadcast %cst_57 : f32 to vector<128x128xf32>
    %115 = arith.minimumf %113, %114 : vector<128x128xf32>
    %116 = math.exp %115 : vector<128x128xf32>
    %117 = arith.mulf %108, %116 : vector<128x128xf32>
    %118 = arith.truncf %117 : vector<128x128xf32> to vector<128x128xbf16>
    %119 = vector.extract_strided_slice %101 {offsets = [0, 0], sizes = [128, 16], strides = [1, 1]} : vector<128x128xbf16> to vector<128x16xbf16>
    %cst_58 = arith.constant dense<0.000000e+00> : vector<128x16xf32>
    %120 = tpu.matmul %118, %119, %cst_58 {dimension_numbers = #tpu.dot_dimension_numbers<[1], [0], [0], [1], [0, 0, 1, 1], [], []>} : vector<128x128xbf16>, vector<128x16xbf16>, vector<128x16xf32> -> vector<128x16xf32>
    %c0_59 = arith.constant 0 : index
    %c0_60 = arith.constant 0 : index
    %121 = vector.load %arg21[%c0_59, %c0_60] : memref<128x128xf32, #tpu.memory_space<vmem>>, vector<128x16xf32>
    tpu.vector_store %arg21[%c0_59, %c0_60], %120 {strides = array<i32>} : memref<128x128xf32, #tpu.memory_space<vmem>>, vector<128x16xf32>,
    %122 = vector.extract_strided_slice %94 {offsets = [0, 1], sizes = [128, 1], strides = [1, 1]} : vector<128x8xf32> to vector<128x1xf32>
    %123 = vector.extract_strided_slice %96 {offsets = [1, 0], sizes = [1, 128], strides = [1, 1]} : vector<8x128xf32> to vector<1x128xf32>
    %124 = vector.broadcast %122 : vector<128x1xf32> to vector<128x128xf32>
    %125 = vector.broadcast %123 : vector<1x128xf32> to vector<128x128xf32>
    %126 = arith.subf %124, %125 : vector<128x128xf32>
    %cst_61 = arith.constant 0.000000e+00 : f32
    %127 = vector.broadcast %cst_61 : f32 to vector<128x128xf32>
    %128 = arith.minimumf %126, %127 : vector<128x128xf32>
    %129 = math.exp %128 : vector<128x128xf32>
    %130 = arith.mulf %108, %129 : vector<128x128xf32>
    %131 = arith.truncf %130 : vector<128x128xf32> to vector<128x128xbf16>
    %132 = vector.extract_strided_slice %101 {offsets = [0, 16], sizes = [128, 16], strides = [1, 1]} : vector<128x128xbf16> to vector<128x16xbf16>
    %cst_62 = arith.constant dense<0.000000e+00> : vector<128x16xf32>
    %133 = tpu.matmul %131, %132, %cst_62 {dimension_numbers = #tpu.dot_dimension_numbers<[1], [0], [0], [1], [0, 0, 1, 1], [], []>} : vector<128x128xbf16>, vector<128x16xbf16>, vector<128x16xf32> -> vector<128x16xf32>
    %c0_63 = arith.constant 0 : index
    %c16 = arith.constant 16 : index
    %134 = vector.load %arg21[%c0_63, %c16] : memref<128x128xf32, #tpu.memory_space<vmem>>, vector<128x16xf32>
    tpu.vector_store %arg21[%c0_63, %c16], %133 {strides = array<i32>} : memref<128x128xf32, #tpu.memory_space<vmem>>, vector<128x16xf32>,
    %135 = vector.extract_strided_slice %94 {offsets = [0, 2], sizes = [128, 1], strides = [1, 1]} : vector<128x8xf32> to vector<128x1xf32>
    %136 = vector.extract_strided_slice %96 {offsets = [2, 0], sizes = [1, 128], strides = [1, 1]} : vector<8x128xf32> to vector<1x128xf32>
    %137 = vector.broadcast %135 : vector<128x1xf32> to vector<128x128xf32>
    %138 = vector.broadcast %136 : vector<1x128xf32> to vector<128x128xf32>
    %139 = arith.subf %137, %138 : vector<128x128xf32>
    %cst_64 = arith.constant 0.000000e+00 : f32
    %140 = vector.broadcast %cst_64 : f32 to vector<128x128xf32>
    %141 = arith.minimumf %139, %140 : vector<128x128xf32>
    %142 = math.exp %141 : vector<128x128xf32>
    %143 = arith.mulf %108, %142 : vector<128x128xf32>
    %144 = arith.truncf %143 : vector<128x128xf32> to vector<128x128xbf16>
    %145 = vector.extract_strided_slice %101 {offsets = [0, 32], sizes = [128, 16], strides = [1, 1]} : vector<128x128xbf16> to vector<128x16xbf16>
    %cst_65 = arith.constant dense<0.000000e+00> : vector<128x16xf32>
    %146 = tpu.matmul %144, %145, %cst_65 {dimension_numbers = #tpu.dot_dimension_numbers<[1], [0], [0], [1], [0, 0, 1, 1], [], []>} : vector<128x128xbf16>, vector<128x16xbf16>, vector<128x16xf32> -> vector<128x16xf32>
    %c0_66 = arith.constant 0 : index
    %c32 = arith.constant 32 : index
    %147 = vector.load %arg21[%c0_66, %c32] : memref<128x128xf32, #tpu.memory_space<vmem>>, vector<128x16xf32>
    tpu.vector_store %arg21[%c0_66, %c32], %146 {strides = array<i32>} : memref<128x128xf32, #tpu.memory_space<vmem>>, vector<128x16xf32>,
    %148 = vector.extract_strided_slice %94 {offsets = [0, 3], sizes = [128, 1], strides = [1, 1]} : vector<128x8xf32> to vector<128x1xf32>
    %149 = vector.extract_strided_slice %96 {offsets = [3, 0], sizes = [1, 128], strides = [1, 1]} : vector<8x128xf32> to vector<1x128xf32>
    %150 = vector.broadcast %148 : vector<128x1xf32> to vector<128x128xf32>
    %151 = vector.broadcast %149 : vector<1x128xf32> to vector<128x128xf32>
    %152 = arith.subf %150, %151 : vector<128x128xf32>
    %cst_67 = arith.constant 0.000000e+00 : f32
    %153 = vector.broadcast %cst_67 : f32 to vector<128x128xf32>
    %154 = arith.minimumf %152, %153 : vector<128x128xf32>
    %155 = math.exp %154 : vector<128x128xf32>
    %156 = arith.mulf %108, %155 : vector<128x128xf32>
    %157 = arith.truncf %156 : vector<128x128xf32> to vector<128x128xbf16>
    %158 = vector.extract_strided_slice %101 {offsets = [0, 48], sizes = [128, 16], strides = [1, 1]} : vector<128x128xbf16> to vector<128x16xbf16>
    %cst_68 = arith.constant dense<0.000000e+00> : vector<128x16xf32>
    %159 = tpu.matmul %157, %158, %cst_68 {dimension_numbers = #tpu.dot_dimension_numbers<[1], [0], [0], [1], [0, 0, 1, 1], [], []>} : vector<128x128xbf16>, vector<128x16xbf16>, vector<128x16xf32> -> vector<128x16xf32>
    %c0_69 = arith.constant 0 : index
    %c48 = arith.constant 48 : index
    %160 = vector.load %arg21[%c0_69, %c48] : memref<128x128xf32, #tpu.memory_space<vmem>>, vector<128x16xf32>
    tpu.vector_store %arg21[%c0_69, %c48], %159 {strides = array<i32>} : memref<128x128xf32, #tpu.memory_space<vmem>>, vector<128x16xf32>,
    %161 = vector.extract_strided_slice %94 {offsets = [0, 4], sizes = [128, 1], strides = [1, 1]} : vector<128x8xf32> to vector<128x1xf32>
    %162 = vector.extract_strided_slice %96 {offsets = [4, 0], sizes = [1, 128], strides = [1, 1]} : vector<8x128xf32> to vector<1x128xf32>
    %163 = vector.broadcast %161 : vector<128x1xf32> to vector<128x128xf32>
    %164 = vector.broadcast %162 : vector<1x128xf32> to vector<128x128xf32>
    %165 = arith.subf %163, %164 : vector<128x128xf32>
    %cst_70 = arith.constant 0.000000e+00 : f32
    %166 = vector.broadcast %cst_70 : f32 to vector<128x128xf32>
    %167 = arith.minimumf %165, %166 : vector<128x128xf32>
    %168 = math.exp %167 : vector<128x128xf32>
    %169 = arith.mulf %108, %168 : vector<128x128xf32>
    %170 = arith.truncf %169 : vector<128x128xf32> to vector<128x128xbf16>
    %171 = vector.extract_strided_slice %101 {offsets = [0, 64], sizes = [128, 16], strides = [1, 1]} : vector<128x128xbf16> to vector<128x16xbf16>
    %cst_71 = arith.constant dense<0.000000e+00> : vector<128x16xf32>
    %172 = tpu.matmul %170, %171, %cst_71 {dimension_numbers = #tpu.dot_dimension_numbers<[1], [0], [0], [1], [0, 0, 1, 1], [], []>} : vector<128x128xbf16>, vector<128x16xbf16>, vector<128x16xf32> -> vector<128x16xf32>
    %c0_72 = arith.constant 0 : index
    %c64 = arith.constant 64 : index
    %173 = vector.load %arg21[%c0_72, %c64] : memref<128x128xf32, #tpu.memory_space<vmem>>, vector<128x16xf32>
    tpu.vector_store %arg21[%c0_72, %c64], %172 {strides = array<i32>} : memref<128x128xf32, #tpu.memory_space<vmem>>, vector<128x16xf32>,
    %174 = vector.extract_strided_slice %94 {offsets = [0, 5], sizes = [128, 1], strides = [1, 1]} : vector<128x8xf32> to vector<128x1xf32>
    %175 = vector.extract_strided_slice %96 {offsets = [5, 0], sizes = [1, 128], strides = [1, 1]} : vector<8x128xf32> to vector<1x128xf32>
    %176 = vector.broadcast %174 : vector<128x1xf32> to vector<128x128xf32>
    %177 = vector.broadcast %175 : vector<1x128xf32> to vector<128x128xf32>
    %178 = arith.subf %176, %177 : vector<128x128xf32>
    %cst_73 = arith.constant 0.000000e+00 : f32
    %179 = vector.broadcast %cst_73 : f32 to vector<128x128xf32>
    %180 = arith.minimumf %178, %179 : vector<128x128xf32>
    %181 = math.exp %180 : vector<128x128xf32>
    %182 = arith.mulf %108, %181 : vector<128x128xf32>
    %183 = arith.truncf %182 : vector<128x128xf32> to vector<128x128xbf16>
    %184 = vector.extract_strided_slice %101 {offsets = [0, 80], sizes = [128, 16], strides = [1, 1]} : vector<128x128xbf16> to vector<128x16xbf16>
    %cst_74 = arith.constant dense<0.000000e+00> : vector<128x16xf32>
    %185 = tpu.matmul %183, %184, %cst_74 {dimension_numbers = #tpu.dot_dimension_numbers<[1], [0], [0], [1], [0, 0, 1, 1], [], []>} : vector<128x128xbf16>, vector<128x16xbf16>, vector<128x16xf32> -> vector<128x16xf32>
    %c0_75 = arith.constant 0 : index
    %c80 = arith.constant 80 : index
    %186 = vector.load %arg21[%c0_75, %c80] : memref<128x128xf32, #tpu.memory_space<vmem>>, vector<128x16xf32>
    tpu.vector_store %arg21[%c0_75, %c80], %185 {strides = array<i32>} : memref<128x128xf32, #tpu.memory_space<vmem>>, vector<128x16xf32>,
    %187 = vector.extract_strided_slice %94 {offsets = [0, 6], sizes = [128, 1], strides = [1, 1]} : vector<128x8xf32> to vector<128x1xf32>
    %188 = vector.extract_strided_slice %96 {offsets = [6, 0], sizes = [1, 128], strides = [1, 1]} : vector<8x128xf32> to vector<1x128xf32>
    %189 = vector.broadcast %187 : vector<128x1xf32> to vector<128x128xf32>
    %190 = vector.broadcast %188 : vector<1x128xf32> to vector<128x128xf32>
    %191 = arith.subf %189, %190 : vector<128x128xf32>
    %cst_76 = arith.constant 0.000000e+00 : f32
    %192 = vector.broadcast %cst_76 : f32 to vector<128x128xf32>
    %193 = arith.minimumf %191, %192 : vector<128x128xf32>
    %194 = math.exp %193 : vector<128x128xf32>
    %195 = arith.mulf %108, %194 : vector<128x128xf32>
    %196 = arith.truncf %195 : vector<128x128xf32> to vector<128x128xbf16>
    %197 = vector.extract_strided_slice %101 {offsets = [0, 96], sizes = [128, 16], strides = [1, 1]} : vector<128x128xbf16> to vector<128x16xbf16>
    %cst_77 = arith.constant dense<0.000000e+00> : vector<128x16xf32>
    %198 = tpu.matmul %196, %197, %cst_77 {dimension_numbers = #tpu.dot_dimension_numbers<[1], [0], [0], [1], [0, 0, 1, 1], [], []>} : vector<128x128xbf16>, vector<128x16xbf16>, vector<128x16xf32> -> vector<128x16xf32>
    %c0_78 = arith.constant 0 : index
    %c96 = arith.constant 96 : index
    %199 = vector.load %arg21[%c0_78, %c96] : memref<128x128xf32, #tpu.memory_space<vmem>>, vector<128x16xf32>
    tpu.vector_store %arg21[%c0_78, %c96], %198 {strides = array<i32>} : memref<128x128xf32, #tpu.memory_space<vmem>>, vector<128x16xf32>,
    %200 = vector.extract_strided_slice %94 {offsets = [0, 7], sizes = [128, 1], strides = [1, 1]} : vector<128x8xf32> to vector<128x1xf32>
    %201 = vector.extract_strided_slice %96 {offsets = [7, 0], sizes = [1, 128], strides = [1, 1]} : vector<8x128xf32> to vector<1x128xf32>
    %202 = vector.broadcast %200 : vector<128x1xf32> to vector<128x128xf32>
    %203 = vector.broadcast %201 : vector<1x128xf32> to vector<128x128xf32>
    %204 = arith.subf %202, %203 : vector<128x128xf32>
    %cst_79 = arith.constant 0.000000e+00 : f32
    %205 = vector.broadcast %cst_79 : f32 to vector<128x128xf32>
    %206 = arith.minimumf %204, %205 : vector<128x128xf32>
    %207 = math.exp %206 : vector<128x128xf32>
    %208 = arith.mulf %108, %207 : vector<128x128xf32>
    %209 = arith.truncf %208 : vector<128x128xf32> to vector<128x128xbf16>
    %210 = vector.extract_strided_slice %101 {offsets = [0, 112], sizes = [128, 16], strides = [1, 1]} : vector<128x128xbf16> to vector<128x16xbf16>
    %cst_80 = arith.constant dense<0.000000e+00> : vector<128x16xf32>
    %211 = tpu.matmul %209, %210, %cst_80 {dimension_numbers = #tpu.dot_dimension_numbers<[1], [0], [0], [1], [0, 0, 1, 1], [], []>} : vector<128x128xbf16>, vector<128x16xbf16>, vector<128x16xf32> -> vector<128x16xf32>
    %c0_81 = arith.constant 0 : index
    %c112 = arith.constant 112 : index
    %212 = vector.load %arg21[%c0_81, %c112] : memref<128x128xf32, #tpu.memory_space<vmem>>, vector<128x16xf32>
    tpu.vector_store %arg21[%c0_81, %c112], %211 {strides = array<i32>} : memref<128x128xf32, #tpu.memory_space<vmem>>, vector<128x16xf32>,
    %c0_82 = arith.constant 0 : index
    %c0_83 = arith.constant 0 : index
    %213 = vector.load %arg21[%c0_82, %c0_83] : memref<128x128xf32, #tpu.memory_space<vmem>>, vector<128x128xf32>
    %214 = arith.addf %106, %213 : vector<128x128xf32>
    %c0_84 = arith.constant 0 : index
    %c0_85 = arith.constant 0 : index
    %215 = vector.load %arg12[%c0_84, %c0_85] : memref<1x128xf32, #tpu.memory_space<vmem>>, vector<1x128xf32>
    %216 = vector.broadcast %215 : vector<1x128xf32> to vector<128x128xf32>
    %217 = arith.mulf %216, %73 : vector<128x128xf32>
    %218 = arith.addf %214, %217 : vector<128x128xf32>
    %219 = vector.extract_strided_slice %94 {offsets = [127, 0], sizes = [1, 8], strides = [1, 1]} : vector<128x8xf32> to vector<1x8xf32>
    %220 = vector.broadcast %219 : vector<1x8xf32> to vector<128x8xf32>
    %221 = arith.subf %220, %94 : vector<128x8xf32>
    %222 = math.exp %221 : vector<128x8xf32>
    %cst_86 = arith.constant dense<0.000000e+00> : vector<128x128xf32>
    %223 = tpu.matmul %222, %93, %cst_86 {dimension_numbers = #tpu.dot_dimension_numbers<[1], [0], [0], [1], [0, 0, 1, 1], [], []>} : vector<128x8xf32>, vector<8x128xf32>, vector<128x128xf32> -> vector<128x128xf32>
    %224 = math.exp %219 : vector<1x8xf32>
    %cst_87 = arith.constant dense<0.000000e+00> : vector<1x128xf32>
    %225 = tpu.matmul %224, %93, %cst_87 {dimension_numbers = #tpu.dot_dimension_numbers<[1], [0], [0], [1], [0, 0, 1, 1], [], []>} : vector<1x8xf32>, vector<8x128xf32>, vector<1x128xf32> -> vector<1x128xf32>
    %226 = vector.broadcast %225 : vector<1x128xf32> to vector<16x128xf32>
    %227 = arith.mulf %226, %104 : vector<16x128xf32>
    %228 = arith.mulf %223, %100 : vector<128x128xf32>
    %cst_88 = arith.constant dense<0.000000e+00> : vector<16x128xf32>
    %229 = tpu.matmul %74, %228, %cst_88 {dimension_numbers = #tpu.dot_dimension_numbers<[0], [0], [1], [1], [0, 1, 1, 1], [], []>} : vector<128x16xf32>, vector<128x128xf32>, vector<16x128xf32> -> vector<16x128xf32>
    %230 = arith.addf %227, %229 : vector<16x128xf32>
    %c0_89 = arith.constant 0 : index
    %c0_90 = arith.constant 0 : index
    %231 = vector.load %arg19[%c0_89, %c0_90] : memref<16x128xf32, #tpu.memory_space<vmem>>, vector<16x128xf32>
    tpu.vector_store %arg19[%c0_89, %c0_90], %230 {strides = array<i32>} : memref<16x128xf32, #tpu.memory_space<vmem>>, vector<16x128xf32>,
    %232 = arith.negf %32 : vector<128x128xf32>
    %233 = math.exp %232 : vector<128x128xf32>
    %cst_91 = arith.constant 1.000000e+00 : f32
    %234 = vector.broadcast %cst_91 : f32 to vector<128x128xf32>
    %235 = arith.addf %234, %233 : vector<128x128xf32>
    %236 = arith.divf %234, %235 : vector<128x128xf32>
    %237 = arith.mulf %32, %236 : vector<128x128xf32>
    %238 = arith.mulf %218, %237 : vector<128x128xf32>
    %239 = arith.mulf %238, %238 : vector<128x128xf32>
    %cst_92 = arith.constant dense<0.000000e+00> : vector<128xf32>
    %240 = vector.multi_reduction <add>, %239, %cst_92 [1] : vector<128x128xf32> to vector<128xf32>
    %241 = vector.shape_cast %240 : vector<128xf32> to vector<128x1xf32>
    %cst_93 = arith.constant 1.280000e+02 : f32
    %242 = vector.broadcast %cst_93 : f32 to vector<128x1xf32>
    %243 = arith.divf %241, %242 : vector<128x1xf32>
    %cst_94 = arith.constant 9.99999974E-6 : f32
    %244 = vector.broadcast %cst_94 : f32 to vector<128x1xf32>
    %245 = arith.addf %243, %244 : vector<128x1xf32>
    %246 = math.rsqrt %245 : vector<128x1xf32>
    %247 = vector.broadcast %246 : vector<128x1xf32> to vector<128x128xf32>
    %248 = arith.mulf %238, %247 : vector<128x128xf32>
    %c0_95 = arith.constant 0 : index
    %c0_96 = arith.constant 0 : index
    %249 = vector.load %arg13[%c0_95, %c0_96] : memref<1x128xbf16, #tpu.memory_space<vmem>>, vector<1x128xbf16>
    %250 = arith.extf %249 : vector<1x128xbf16> to vector<1x128xf32>
    %251 = vector.broadcast %250 : vector<1x128xf32> to vector<128x128xf32>
    %252 = arith.mulf %248, %251 : vector<128x128xf32>
    %253 = arith.truncf %252 : vector<128x128xf32> to vector<128x128xbf16>
    %c0_97 = arith.constant 0 : index
    %c0_98 = arith.constant 0 : index
    %254 = vector.load %arg14[%c0_97, %c0_98] : memref<128x64xbf16, #tpu.memory_space<vmem>>, vector<128x64xbf16>
    %cst_99 = arith.constant dense<0.000000e+00> : vector<128x64xf32>
    %255 = tpu.matmul %253, %254, %cst_99 {dimension_numbers = #tpu.dot_dimension_numbers<[1], [0], [0], [1], [0, 0, 1, 1], [], []>} : vector<128x128xbf16>, vector<128x64xbf16>, vector<128x64xf32> -> vector<128x64xf32>
    %256 = arith.addf %255, %5 : vector<128x64xf32>
    %257 = arith.truncf %256 : vector<128x64xf32> to vector<128x64xbf16>
    %c0_100 = arith.constant 0 : index
    %c0_101 = arith.constant 0 : index
    %c0_102 = arith.constant 0 : index
    %258 = vector.load %arg18[%c0_100, %c0_101, %c0_102] : memref<1x128x64xbf16, #tpu.memory_space<vmem>>, vector<1x128x64xbf16>
    %259 = vector.shape_cast %258 : vector<1x128x64xbf16> to vector<128x64xbf16>
    %260 = vector.shape_cast %257 : vector<128x64xbf16> to vector<1x128x64xbf16>
    tpu.vector_store %arg18[%c0_100, %c0_101, %c0_102], %260 {strides = array<i32>} : memref<1x128x64xbf16, #tpu.memory_space<vmem>>, vector<1x128x64xbf16>,
    return
  }
  func.func @transform_0(%arg0: i32, %arg1: i32) -> (i32, i32, i32) {
    %c0_i32 = arith.constant 0 : i32
    %c0_i32_0 = arith.constant 0 : i32
    return %arg0, %arg1, %c0_i32 : i32, i32, i32
  }
  func.func @transform_1(%arg0: i32, %arg1: i32) -> (i32, i32) {
    %c0_i32 = arith.constant 0 : i32
    %c0_i32_0 = arith.constant 0 : i32
    %c0_i32_1 = arith.constant 0 : i32
    return %c0_i32, %c0_i32_0 : i32, i32
  }
  func.func @transform_2(%arg0: i32, %arg1: i32) -> (i32, i32) {
    %c0_i32 = arith.constant 0 : i32
    %c0_i32_0 = arith.constant 0 : i32
    %c0_i32_1 = arith.constant 0 : i32
    return %c0_i32, %c0_i32_0 : i32, i32
  }
  func.func @transform_3(%arg0: i32, %arg1: i32) -> (i32, i32) {
    %c0_i32 = arith.constant 0 : i32
    %c0_i32_0 = arith.constant 0 : i32
    %c0_i32_1 = arith.constant 0 : i32
    return %c0_i32, %c0_i32_0 : i32, i32
  }
  func.func @transform_4(%arg0: i32, %arg1: i32) -> (i32, i32) {
    %c0_i32 = arith.constant 0 : i32
    %c0_i32_0 = arith.constant 0 : i32
    %c0_i32_1 = arith.constant 0 : i32
    return %c0_i32, %c0_i32_0 : i32, i32
  }
  func.func @transform_5(%arg0: i32, %arg1: i32) -> (i32, i32) {
    %c0_i32 = arith.constant 0 : i32
    %c0_i32_0 = arith.constant 0 : i32
    %c0_i32_1 = arith.constant 0 : i32
    return %c0_i32, %c0_i32_0 : i32, i32
  }
  func.func @transform_6(%arg0: i32, %arg1: i32) -> (i32, i32) {
    %c0_i32 = arith.constant 0 : i32
    %c0_i32_0 = arith.constant 0 : i32
    %c0_i32_1 = arith.constant 0 : i32
    return %c0_i32, %c0_i32_0 : i32, i32
  }
  func.func @transform_7(%arg0: i32, %arg1: i32) -> (i32, i32) {
    %c0_i32 = arith.constant 0 : i32
    %c0_i32_0 = arith.constant 0 : i32
    %c0_i32_1 = arith.constant 0 : i32
    return %c0_i32, %c0_i32_0 : i32, i32
  }
  func.func @transform_8(%arg0: i32, %arg1: i32) -> (i32, i32) {
    %c0_i32 = arith.constant 0 : i32
    %c0_i32_0 = arith.constant 0 : i32
    %c0_i32_1 = arith.constant 0 : i32
    return %c0_i32, %c0_i32_0 : i32, i32
  }
  func.func @transform_9(%arg0: i32, %arg1: i32) -> (i32, i32) {
    %c0_i32 = arith.constant 0 : i32
    %c0_i32_0 = arith.constant 0 : i32
    %c0_i32_1 = arith.constant 0 : i32
    return %c0_i32, %c0_i32_0 : i32, i32
  }
  func.func @transform_10(%arg0: i32, %arg1: i32) -> (i32, i32) {
    %c0_i32 = arith.constant 0 : i32
    %c0_i32_0 = arith.constant 0 : i32
    %c0_i32_1 = arith.constant 0 : i32
    return %c0_i32, %c0_i32_0 : i32, i32
  }
  func.func @transform_11(%arg0: i32, %arg1: i32) -> (i32, i32) {
    %c0_i32 = arith.constant 0 : i32
    %c0_i32_0 = arith.constant 0 : i32
    %c0_i32_1 = arith.constant 0 : i32
    return %c0_i32, %c0_i32_0 : i32, i32
  }
  func.func @transform_12(%arg0: i32, %arg1: i32) -> (i32, i32) {
    %c0_i32 = arith.constant 0 : i32
    %c0_i32_0 = arith.constant 0 : i32
    %c0_i32_1 = arith.constant 0 : i32
    return %c0_i32, %c0_i32_0 : i32, i32
  }
  func.func @transform_13(%arg0: i32, %arg1: i32) -> (i32, i32) {
    %c0_i32 = arith.constant 0 : i32
    %c0_i32_0 = arith.constant 0 : i32
    %c0_i32_1 = arith.constant 0 : i32
    return %c0_i32, %c0_i32_0 : i32, i32
  }
  func.func @transform_14(%arg0: i32, %arg1: i32) -> (i32, i32) {
    %c0_i32 = arith.constant 0 : i32
    %c0_i32_0 = arith.constant 0 : i32
    %c0_i32_1 = arith.constant 0 : i32
    return %c0_i32, %c0_i32_0 : i32, i32
  }
  func.func @transform_15(%arg0: i32, %arg1: i32) -> (i32, i32) {
    %c0_i32 = arith.constant 0 : i32
    %c0_i32_0 = arith.constant 0 : i32
    %c0_i32_1 = arith.constant 0 : i32
    return %c0_i32, %c0_i32_0 : i32, i32
  }
  func.func @transform_16(%arg0: i32, %arg1: i32) -> (i32, i32, i32) {
    %c0_i32 = arith.constant 0 : i32
    %c0_i32_0 = arith.constant 0 : i32
    return %arg0, %arg1, %c0_i32 : i32, i32, i32
  }
}

module attributes {stable_mosaic.version = 11 : i64} {
  func.func @_to_rgb_mse_kernel(%arg0: i32, %arg1: memref<256x64xbf16, #tpu.memory_space<vmem>>, %arg2: memref<64x128xbf16, #tpu.memory_space<vmem>>, %arg3: memref<1x128xbf16, #tpu.memory_space<vmem>>, %arg4: memref<256x3xbf16, #tpu.memory_space<vmem>>, %arg5: memref<256x128xbf16, #tpu.memory_space<vmem>>, %arg6: memref<1x1xf32, #tpu.memory_space<vmem>>) attributes {dimension_semantics = [#tpu.dimension_semantics<arbitrary>], iteration_bounds = array<i64: 2>, scalar_prefetch = 0 : i64, scratch_operands = 0 : i64, tpu.core_type = #tpu.core_type<tc>, window_params = [{transform_indices = @transform_0, window_bounds = array<i64: 256, 64>}, {pipeline_mode = #tpu.pipeline_mode<synchronous>, transform_indices = @transform_1, window_bounds = array<i64: 64, 128>}, {pipeline_mode = #tpu.pipeline_mode<synchronous>, transform_indices = @transform_2, window_bounds = array<i64: 1, 128>}, {transform_indices = @transform_3, window_bounds = array<i64: 256, 3>}, {transform_indices = @transform_4, window_bounds = array<i64: 256, 128>}, {pipeline_mode = #tpu.pipeline_mode<synchronous>, transform_indices = @transform_5, window_bounds = array<i64: 1, 1>}]} {
    %c0_i32 = arith.constant 0 : i32
    %0 = arith.cmpi eq, %arg0, %c0_i32 : i32
    %1 = arith.extui %0 : i1 to i32
    %c0_i32_0 = arith.constant 0 : i32
    %2 = arith.cmpi ne, %1, %c0_i32_0 : i32
    scf.if %2 {
      %cst_15 = arith.constant 0.000000e+00 : f32
      %25 = vector.broadcast %cst_15 : f32 to vector<1x1xf32>
      %c0_16 = arith.constant 0 : index
      %c0_17 = arith.constant 0 : index
      %26 = vector.load %arg6[%c0_16, %c0_17] : memref<1x1xf32, #tpu.memory_space<vmem>>, vector<1x1xf32>
      tpu.vector_store %arg6[%c0_16, %c0_17], %25 {strides = array<i32>} : memref<1x1xf32, #tpu.memory_space<vmem>>, vector<1x1xf32>,
    } else {
    }
    %c0 = arith.constant 0 : index
    %c0_1 = arith.constant 0 : index
    %3 = vector.load %arg1[%c0, %c0_1] : memref<256x64xbf16, #tpu.memory_space<vmem>>, vector<256x64xbf16>
    %c0_2 = arith.constant 0 : index
    %c0_3 = arith.constant 0 : index
    %4 = vector.load %arg2[%c0_2, %c0_3] : memref<64x128xbf16, #tpu.memory_space<vmem>>, vector<64x128xbf16>
    %cst = arith.constant dense<0.000000e+00> : vector<256x128xf32>
    %5 = tpu.matmul %3, %4, %cst {dimension_numbers = #tpu.dot_dimension_numbers<[1], [0], [0], [1], [0, 0, 1, 1], [], []>} : vector<256x64xbf16>, vector<64x128xbf16>, vector<256x128xf32> -> vector<256x128xf32>
    %c0_4 = arith.constant 0 : index
    %c0_5 = arith.constant 0 : index
    %6 = vector.load %arg3[%c0_4, %c0_5] : memref<1x128xbf16, #tpu.memory_space<vmem>>, vector<1x128xbf16>
    %7 = arith.extf %6 : vector<1x128xbf16> to vector<1x128xf32>
    %8 = vector.broadcast %7 : vector<1x128xf32> to vector<256x128xf32>
    %9 = arith.addf %5, %8 : vector<256x128xf32>
    %10 = arith.truncf %9 : vector<256x128xf32> to vector<256x128xbf16>
    %c0_6 = arith.constant 0 : index
    %c0_7 = arith.constant 0 : index
    %11 = vector.load %arg5[%c0_6, %c0_7] : memref<256x128xbf16, #tpu.memory_space<vmem>>, vector<256x128xbf16>
    tpu.vector_store %arg5[%c0_6, %c0_7], %10 {strides = array<i32>} : memref<256x128xbf16, #tpu.memory_space<vmem>>, vector<256x128xbf16>,
    %12 = vector.extract_strided_slice %9 {offsets = [0, 0], sizes = [256, 3], strides = [1, 1]} : vector<256x128xf32> to vector<256x3xf32>
    %c0_8 = arith.constant 0 : index
    %c0_9 = arith.constant 0 : index
    %13 = vector.load %arg4[%c0_8, %c0_9] : memref<256x3xbf16, #tpu.memory_space<vmem>>, vector<256x3xbf16>
    %14 = arith.extf %13 : vector<256x3xbf16> to vector<256x3xf32>
    %15 = arith.subf %12, %14 : vector<256x3xf32>
    %c0_10 = arith.constant 0 : index
    %c0_11 = arith.constant 0 : index
    %16 = vector.load %arg6[%c0_10, %c0_11] : memref<1x1xf32, #tpu.memory_space<vmem>>, vector<1x1xf32>
    %17 = arith.mulf %15, %15 : vector<256x3xf32>
    %18 = vector.shape_cast %17 : vector<256x3xf32> to vector<1x256x3xf32>
    %cst_12 = arith.constant dense<0.000000e+00> : vector<1xf32>
    %19 = vector.multi_reduction <add>, %18, %cst_12 [1, 2] : vector<1x256x3xf32> to vector<1xf32>
    %20 = vector.shape_cast %19 : vector<1xf32> to vector<1x1x1xf32>
    %21 = vector.extract %20[0, 0, 0] : f32 from vector<1x1x1xf32>
    %22 = vector.broadcast %21 : f32 to vector<1x1xf32>
    %23 = arith.addf %16, %22 : vector<1x1xf32>
    %c0_13 = arith.constant 0 : index
    %c0_14 = arith.constant 0 : index
    %24 = vector.load %arg6[%c0_13, %c0_14] : memref<1x1xf32, #tpu.memory_space<vmem>>, vector<1x1xf32>
    tpu.vector_store %arg6[%c0_13, %c0_14], %23 {strides = array<i32>} : memref<1x1xf32, #tpu.memory_space<vmem>>, vector<1x1xf32>,
    return
  }
  func.func @transform_0(%arg0: i32) -> (i32, i32) {
    %c0_i32 = arith.constant 0 : i32
    %c0_i32_0 = arith.constant 0 : i32
    return %arg0, %c0_i32 : i32, i32
  }
  func.func @transform_1(%arg0: i32) -> (i32, i32) {
    %c0_i32 = arith.constant 0 : i32
    %c0_i32_0 = arith.constant 0 : i32
    %c0_i32_1 = arith.constant 0 : i32
    return %c0_i32, %c0_i32_0 : i32, i32
  }
  func.func @transform_2(%arg0: i32) -> (i32, i32) {
    %c0_i32 = arith.constant 0 : i32
    %c0_i32_0 = arith.constant 0 : i32
    %c0_i32_1 = arith.constant 0 : i32
    return %c0_i32, %c0_i32_0 : i32, i32
  }
  func.func @transform_3(%arg0: i32) -> (i32, i32) {
    %c0_i32 = arith.constant 0 : i32
    %c0_i32_0 = arith.constant 0 : i32
    return %arg0, %c0_i32 : i32, i32
  }
  func.func @transform_4(%arg0: i32) -> (i32, i32) {
    %c0_i32 = arith.constant 0 : i32
    %c0_i32_0 = arith.constant 0 : i32
    return %arg0, %c0_i32 : i32, i32
  }
  func.func @transform_5(%arg0: i32) -> (i32, i32) {
    %c0_i32 = arith.constant 0 : i32
    %c0_i32_0 = arith.constant 0 : i32
    %c0_i32_1 = arith.constant 0 : i32
    return %c0_i32, %c0_i32_0 : i32, i32
  }
}

</mosaic_0001>

<bundles_post_ra>
// kernel: model_forward.7
= control target key start
LH: loop header
LB: loop body
LE: loop exit
PB: predicated region body
PF: predicated region fallthrough
CT: control target
= control target key end

     0   :  { %v197_v0 = vmov 1   ;;  %v198_v1 = vmov 0   ;;  %v199_v10 = vmov 2   ;;  %v46_v11 = vlaneseq  ;;  %s244_s0 = inlined_call_operand.vmem [shape: bf16[32,3], index: 0, kind: input, shape index: {}]   ;;  %s245_s1 = inlined_call_operand.vmem [shape: bf16[3,64], index: 1, kind: input, shape index: {}]   ;;  %s246_s2 = inlined_call_operand.vmem [shape: bf16[1,64], index: 2, kind: input, shape index: {}]   ;;  %s247_s3 = inlined_call_operand.vmem [shape: bf16[32,64], index: 3, kind: output, shape index: {}]  }
   0x1   :  { %174 = vset.pattern.permute.xlu1 %v197_v0  ;;  %163 = vset.pattern.permute.xlu0 %v198_v1  ;;  %v152_v2 = vld [vmem:[%s244_s0] sm:$0xff]   ;;  %v159_v3 = vld [vmem:[%s244_s0 + $0x8] sm:$0xff]   ;;  %vm134_vm0 = vcmask 519168  }
   0x2   :  { %v153_v4 = vunpack.c.l.bf16 %v152_v2  ;;  %v154_v5 = vunpack.c.h.bf16 %v152_v2  ;;  %v157_v6 = vunpack.c.l.bf16 %v159_v3  ;;  %v158_v7 = vunpack.c.h.bf16 %v159_v3  ;;  %v22_v13 = vld [vmem:[%s245_s1] sm:$0x3] }
   0x3   :  { %v47_v12 = vshrl.u32 %v46_v11, 7  ;;  %v23_v14 = vunpack.c.l.bf16 %v22_v13  ;;  %v24_v15 = vld [vmem:[%s246_s2] sm:$0x1] }
   0x4   :  { %v175_v8 = vpack.i.bf16 %v154_v5, %v153_v4  ;;  %v180_v9 = vpack.i.bf16 %v158_v7, %v157_v6  ;;  %v25_v18 = vunpack.c.l.bf16 %v24_v15 }
   0x5   :  { %v48_v16 = vsub.s32 0, %v47_v12  ;;  %v80_v23 = vsub.s32 1, %v47_v12  ;;  %v108_v27 = vsub.s32 2, %v47_v12 }
   0x6   :  { %176 = vperm.xlu1 %174, %v175_v8   ;;  %165 = vperm.xlu0 %163, %v175_v8  }
   0x7   :  { %v49_v20 = vrot.slane %v23_v14, %v48_v16  ;;  %v57_v24 = vrot.slane %v25_v18, %v48_v16  ;;  %v81_v34 = vrot.slane %v23_v14, %v80_v23  ;;  %v109_v39 = vrot.slane %v23_v14, %v108_v27 }
   0xa   :  { %181 = vperm.xlu1 %174, %v180_v9   ;;  %170 = vperm.xlu0 %163, %v180_v9  }
   0xe   :  { %191 = vset.pattern.permute.xlu1 %v199_v10  ;;  %185 = vset.pattern.permute.xlu0 %v199_v10 }
   0xf   :  { %193 = vperm.xlu1 %191, %v180_v9   ;;  %187 = vperm.xlu0 %185, %v175_v8  }
  0x85   :  { %v177_v17 = vpop.permute.xlu1 %176  ;;  %v166_v19 = vpop.permute.xlu0 %165 }
  0x86   :  { %v168_v21 = vunpack.i.h.bf16 %v166_v19  ;;  %v167_v22 = vunpack.i.l.bf16 %v166_v19  ;;  %v179_v35 = vunpack.i.h.bf16 %v177_v17  ;;  %v178_v36 = vunpack.i.l.bf16 %v177_v17 }
  0x88   :  { %v51_v28 = vmul.f32 %v168_v21, %v49_v20  ;;  %v50_v29 = vmul.f32 %v167_v22, %v49_v20  ;;  %v83_v50 = vmul.f32 %v179_v35, %v81_v34  ;;  %v82_v51 = vmul.f32 %v178_v36, %v81_v34 }
  0x89   :  { %v182_v25 = vpop.permute.xlu1 %181  ;;  %v171_v26 = vpop.permute.xlu0 %170 }
  0x8a   :  { %v184_v30 = vunpack.i.h.bf16 %v182_v25  ;;  %v183_v31 = vunpack.i.l.bf16 %v182_v25  ;;  %v173_v32 = vunpack.i.h.bf16 %v171_v26  ;;  %v172_v33 = vunpack.i.l.bf16 %v171_v26 }
  0x8b   :  { %v59_v40 = vadd.f32 %v57_v24, %v51_v28  ;;  %v58_v41 = vadd.f32 %v57_v24, %v50_v29 }
  0x8c   :  { %v53_v37 = vmul.f32 %v173_v32, %v49_v20  ;;  %v52_v38 = vmul.f32 %v172_v33, %v49_v20  ;;  %v85_v42 = vmul.f32 %v184_v30, %v81_v34  ;;  %v84_v43 = vmul.f32 %v183_v31, %v81_v34 }
  0x8d   :  { %v86_v59 = vadd.f32 %v82_v51, %v58_v41  ;;  %v87_v60 = vadd.f32 %v83_v50, %v59_v40 }
  0x8e   :  { %v194_v44 = vpop.permute.xlu1 %193  ;;  %v188_v45 = vpop.permute.xlu0 %187  ;;  %v61_v46 = vadd.f32 %v57_v24, %v53_v37  ;;  %v60_v47 = vadd.f32 %v57_v24, %v52_v38 }
  0x8f   :  { %v196_v48 = vunpack.i.h.bf16 %v194_v44  ;;  %v195_v49 = vunpack.i.l.bf16 %v194_v44  ;;  %v190_v52 = vunpack.i.h.bf16 %v188_v45  ;;  %v189_v53 = vunpack.i.l.bf16 %v188_v45 }
  0x90   :  { %v88_v55 = vadd.f32 %v84_v43, %v60_v47  ;;  %v89_v56 = vadd.f32 %v85_v42, %v61_v46 }
  0x91   :  { %v113_v54 = vmul.f32 %v196_v48, %v109_v39  ;;  %v112_v57 = vmul.f32 %v195_v49, %v109_v39  ;;  %v111_v58 = vmul.f32 %v190_v52, %v109_v39  ;;  %v110_v61 = vmul.f32 %v189_v53, %v109_v39 }
  0x93   :  { %v116_v62 = vadd.f32 %v112_v57, %v88_v55  ;;  %v117_v63 = vadd.f32 %v113_v54, %v89_v56  ;;  %v114_v0 = vadd.f32 %v110_v61, %v86_v59  ;;  %v115_v1 = vadd.f32 %v111_v58, %v87_v60 }
  0x95   :  { %v149_v2 = vpack.c.bf16 %v116_v62, %v116_v62  ;;  %v150_v3 = vpack.c.bf16 %v117_v63, %v117_v63  ;;  %v147_v4 = vpack.c.bf16 %v114_v0, %v114_v0  ;;  %v148_v5 = vpack.c.bf16 %v115_v1, %v115_v1 }
  0x97   :  { %137 = vst.msk [vmem:[%s247_s3 + $0x8] sm:$0xf] %vm134_vm0, %v149_v2  ;;  %138 = vst.msk [vmem:[%s247_s3 + $0xc] sm:$0xf] %vm134_vm0, %v150_v3 }
  0x98   :  { %135 = vst.msk [vmem:[%s247_s3] sm:$0xf] %vm134_vm0, %v147_v4  ;;  %136 = vst.msk [vmem:[%s247_s3 + $0x4] sm:$0xf] %vm134_vm0, %v148_v5 }

// kernel: model_forward.8
= control target key start
LH: loop header
LB: loop body
LE: loop exit
PB: predicated region body
PF: predicated region fallthrough
CT: control target
= control target key end

     0   :  { %s1203_s12 = smov 0   ;;  %s1801_s0 = inlined_call_operand.vmem [shape: bf16[768,64], index: 0, kind: input, shape index: {}]   ;;  %s1802_s1 = inlined_call_operand.vmem [shape: bf16[1,64], index: 1, kind: input, shape index: {}]   ;;  %s1803_s2 = inlined_call_operand.vmem [shape: bf16[1,64], index: 2, kind: input, shape index: {}]   ;;  %s1804_s3 = inlined_call_operand.vmem [shape: bf16[768,64], index: 3, kind: output, shape index: {}]  }
   0x1 LB: > { %s949_s13 = sadd.s32 4294967295, %s1181_s12   ;;  %p953_p0 = scmp.ge.s32.totalorder %s1181_s12, 1  ;;  %s1181_s12 = sphi %s1203_s12, %s13_s12  }
   0x2   : > { %p138_p1 = scmp.lt.s32.totalorder %s1181_s12, 4 }
   0x4   : > { %p139_p2 = pnand %p953_p0, %p138_p1 }
   0x5   : > { %s954_s14 = sshll.u32 (!%p139_p2), %s949_s13, 5  ;;  %vm238_vm0 = vcmask (!%p139_p2), 523264   ;;  %vm860_vm1 = vcmask (!%p139_p2), 519168  }
   0x6   : > { %142 = sbr.rel (%p139_p2) target bundleno = 399 (0x18f), region = 32  ;;  %p163_p3 = scmp.lt.s32.totalorder (!%p139_p2), %s954_s14, 95 }
   0xd   : > { %s1806_s14 = smov (!%p163_p3, %s954_s14), 95 }
   0xe   : > { %s955_s15 = sshll.u32 %s1806_s14, 2 }
   0xf   : > { %s1219_s18 = scalar_lea.vmem %s1801_s0, %s955_s15  ;;  %s1640_s25 = scalar_lea.vmem %s1804_s3, %s955_s15 }
  0x10   : > { %v1222_v0 = vld [vmem:[%s1219_s18] sm:$0xff]   ;;  %v1225_v1 = vld [vmem:[%s1219_s18 + $0x8] sm:$0xff]   ;;  %v1232_v6 = vld [vmem:[%s1219_s18 + $0x10] sm:$0xff]  }
  0x11   : > { %v1026_v2 = vunpack.c.l.bf16 %v1222_v0  ;;  %v1030_v3 = vunpack.c.l.bf16 %v1225_v1  ;;  %v1027_v4 = vunpack.c.h.bf16 %v1222_v0  ;;  %v1031_v5 = vunpack.c.h.bf16 %v1225_v1  ;;  %v1249_v13 = vld [vmem:[%s1219_s18 + $0x18] sm:$0xff]   ;;  %v1260_v18 = vld [vmem:[%s1219_s18 + $0x20] sm:$0xff]   ;;  %v1271_v23 = vld [vmem:[%s1219_s18 + $0x28] sm:$0xff]  }
  0x12   : > { %v1034_v11 = vunpack.c.l.bf16 %v1232_v6  ;;  %v1035_v12 = vunpack.c.h.bf16 %v1232_v6  ;;  %v1038_v16 = vunpack.c.l.bf16 %v1249_v13  ;;  %v1039_v17 = vunpack.c.h.bf16 %v1249_v13  ;;  %v1282_v28 = vld [vmem:[%s1219_s18 + $0x30] sm:$0xff]   ;;  %v1293_v33 = vld [vmem:[%s1219_s18 + $0x38] sm:$0xff]   ;;  %v1304_v38 = vld [vmem:[%s1219_s18 + $0x40] sm:$0xff]  }
  0x13   : > { %v239_v7 = vsel %vm238_vm0, %v1026_v2, 0.0  ;;  %v245_v8 = vsel %vm238_vm0, %v1030_v3, 0.0  ;;  %v242_v9 = vsel %vm238_vm0, %v1027_v4, 0.0  ;;  %v248_v10 = vsel %vm238_vm0, %v1031_v5, 0.0  ;;  %v1315_v43 = vld [vmem:[%s1219_s18 + $0x48] sm:$0xff]   ;;  %v1326_v48 = vld [vmem:[%s1219_s18 + $0x50] sm:$0xff]  }
  0x14   : > { %240 = vadd.xlane.f32.xlu0 %v239_v7  ;;  %246 = vadd.xlane.f32.xlu1 %v245_v8  ;;  %v251_v14 = vsel %vm238_vm0, %v1034_v11, 0.0  ;;  %v254_v15 = vsel %vm238_vm0, %v1035_v12, 0.0  ;;  %v257_v19 = vsel %vm238_vm0, %v1038_v16, 0.0  ;;  %v260_v20 = vsel %vm238_vm0, %v1039_v17, 0.0  ;;  %v1337_v53 = vld [vmem:[%s1219_s18 + $0x58] sm:$0xff]   ;;  %v1348_v58 = vld [vmem:[%s1219_s18 + $0x60] sm:$0xff]  }
  0x15   : > { %v1042_v21 = vunpack.c.l.bf16 %v1260_v18  ;;  %v1043_v22 = vunpack.c.h.bf16 %v1260_v18  ;;  %v1046_v26 = vunpack.c.l.bf16 %v1271_v23  ;;  %v1047_v27 = vunpack.c.h.bf16 %v1271_v23  ;;  %v1359_v63 = vld [vmem:[%s1219_s18 + $0x68] sm:$0xff]  }
  0x16   : > { %v1050_v31 = vunpack.c.l.bf16 %v1282_v28  ;;  %v1051_v32 = vunpack.c.h.bf16 %v1282_v28  ;;  %v1054_v36 = vunpack.c.l.bf16 %v1293_v33  ;;  %v1055_v37 = vunpack.c.h.bf16 %v1293_v33 }
  0x17   : > { %v263_v24 = vsel %vm238_vm0, %v1042_v21, 0.0  ;;  %v266_v25 = vsel %vm238_vm0, %v1043_v22, 0.0  ;;  %v269_v29 = vsel %vm238_vm0, %v1046_v26, 0.0  ;;  %v272_v30 = vsel %vm238_vm0, %v1047_v27, 0.0 }
  0x18   : > { %243 = vadd.xlane.f32.xlu0 %v242_v9  ;;  %249 = vadd.xlane.f32.xlu1 %v248_v10  ;;  %v275_v34 = vsel %vm238_vm0, %v1050_v31, 0.0  ;;  %v278_v35 = vsel %vm238_vm0, %v1051_v32, 0.0  ;;  %v281_v39 = vsel %vm238_vm0, %v1054_v36, 0.0  ;;  %v284_v40 = vsel %vm238_vm0, %v1055_v37, 0.0 }
  0x19   : > { %v1058_v41 = vunpack.c.l.bf16 %v1304_v38  ;;  %v1059_v42 = vunpack.c.h.bf16 %v1304_v38  ;;  %v1062_v46 = vunpack.c.l.bf16 %v1315_v43  ;;  %v1063_v47 = vunpack.c.h.bf16 %v1315_v43 }
  0x1a   : > { %v1066_v51 = vunpack.c.l.bf16 %v1326_v48  ;;  %v1067_v52 = vunpack.c.h.bf16 %v1326_v48  ;;  %v1070_v56 = vunpack.c.l.bf16 %v1337_v53  ;;  %v1071_v57 = vunpack.c.h.bf16 %v1337_v53 }
  0x1b   : > { %v287_v44 = vsel %vm238_vm0, %v1058_v41, 0.0  ;;  %v290_v45 = vsel %vm238_vm0, %v1059_v42, 0.0  ;;  %v293_v49 = vsel %vm238_vm0, %v1062_v46, 0.0  ;;  %v296_v50 = vsel %vm238_vm0, %v1063_v47, 0.0 }
  0x1c   : > { %252 = vadd.xlane.f32.xlu0 %v251_v14  ;;  %255 = vadd.xlane.f32.xlu1 %v254_v15  ;;  %v299_v54 = vsel %vm238_vm0, %v1066_v51, 0.0  ;;  %v302_v55 = vsel %vm238_vm0, %v1067_v52, 0.0  ;;  %v305_v59 = vsel %vm238_vm0, %v1070_v56, 0.0  ;;  %v308_v60 = vsel %vm238_vm0, %v1071_v57, 0.0  ;;  %v1370_v14 = vld [vmem:[%s1219_s18 + $0x70] sm:$0xff]  }
  0x1d   : > { %v1074_v61 = vunpack.c.l.bf16 %v1348_v58  ;;  %v1075_v62 = vunpack.c.h.bf16 %v1348_v58  ;;  %v1078_v9 = vunpack.c.l.bf16 %v1359_v63  ;;  %v1079_v10 = vunpack.c.h.bf16 %v1359_v63 }
  0x1f   : > { %v311_v7 = vsel %vm238_vm0, %v1074_v61, 0.0  ;;  %v314_v8 = vsel %vm238_vm0, %v1075_v62, 0.0  ;;  %v317_v15 = vsel %vm238_vm0, %v1078_v9, 0.0 }
  0x20   : > { %258 = vadd.xlane.f32.xlu0 %v257_v19  ;;  %261 = vadd.xlane.f32.xlu1 %v260_v20  ;;  %v320_v19 = vsel %vm238_vm0, %v1079_v10, 0.0  ;;  %v1082_v20 = vunpack.c.l.bf16 %v1370_v14 }
  0x24   : > { %264 = vadd.xlane.f32.xlu0 %v263_v24  ;;  %267 = vadd.xlane.f32.xlu1 %v266_v25  ;;  %v1083_v24 = vunpack.c.h.bf16 %v1370_v14  ;;  %v1381_v25 = vld [vmem:[%s1219_s18 + $0x78] sm:$0xff]  }
  0x28   : > { %270 = vadd.xlane.f32.xlu0 %v269_v29  ;;  %273 = vadd.xlane.f32.xlu1 %v272_v30  ;;  %v323_v29 = vsel %vm238_vm0, %v1082_v20, 0.0  ;;  %v326_v30 = vsel %vm238_vm0, %v1083_v24, 0.0 }
  0x2c   : > { %276 = vadd.xlane.f32.xlu0 %v275_v34  ;;  %279 = vadd.xlane.f32.xlu1 %v278_v35  ;;  %v1086_v34 = vunpack.c.l.bf16 %v1381_v25  ;;  %v1087_v35 = vunpack.c.h.bf16 %v1381_v25 }
  0x30   : > { %282 = vadd.xlane.f32.xlu0 %v281_v39  ;;  %285 = vadd.xlane.f32.xlu1 %v284_v40  ;;  %v329_v39 = vsel %vm238_vm0, %v1086_v34, 0.0  ;;  %v332_v40 = vsel %vm238_vm0, %v1087_v35, 0.0 }
  0x34   : > { %288 = vadd.xlane.f32.xlu0 %v287_v44  ;;  %291 = vadd.xlane.f32.xlu1 %v290_v45 }
  0x38   : > { %294 = vadd.xlane.f32.xlu0 %v293_v49  ;;  %297 = vadd.xlane.f32.xlu1 %v296_v50 }
  0x3c   : > { %300 = vadd.xlane.f32.xlu0 %v299_v54  ;;  %303 = vadd.xlane.f32.xlu1 %v302_v55 }
  0x40   : > { %306 = vadd.xlane.f32.xlu0 %v305_v59  ;;  %309 = vadd.xlane.f32.xlu1 %v308_v60 }
  0x44   : > { %312 = vadd.xlane.f32.xlu0 %v311_v7  ;;  %315 = vadd.xlane.f32.xlu1 %v314_v8 }
  0x48   : > { %318 = vadd.xlane.f32.xlu0 %v317_v15  ;;  %321 = vadd.xlane.f32.xlu1 %v320_v19 }
  0x4c   : > { %324 = vadd.xlane.f32.xlu0 %v323_v29  ;;  %327 = vadd.xlane.f32.xlu1 %v326_v30 }
  0x50   : > { %330 = vadd.xlane.f32.xlu0 %v329_v39  ;;  %333 = vadd.xlane.f32.xlu1 %v332_v40 }
  0xa1   : > { %v241_v44 = vpop.xlane.xlu0 %240  ;;  %v247_v45 = vpop.xlane.xlu1 %246 }
  0xa2   : > { %v336_v49 = vmul.f32 0.015625, %v241_v44  ;;  %v338_v50 = vmul.f32 0.015625, %v247_v45 }
  0xa4   : > { %v1399_v54 = vsub.f32 %v1026_v2, %v336_v49  ;;  %v1403_v55 = vsub.f32 %v1030_v3, %v338_v50 }
  0xa5   : > { %v244_v59 = vpop.xlane.xlu0 %243  ;;  %v250_v60 = vpop.xlane.xlu1 %249 }
  0xa6   : > { %v337_v7 = vmul.f32 0.015625, %v244_v59  ;;  %v339_v8 = vmul.f32 0.015625, %v250_v60  ;;  %v400_v15 = vmul.f32 %v1399_v54, %v1399_v54  ;;  %v402_v19 = vmul.f32 %v1403_v55, %v1403_v55 }
  0xa8   : > { %v1411_v29 = vsub.f32 %v1027_v4, %v337_v7  ;;  %v1415_v2 = vsub.f32 %v1031_v5, %v339_v8  ;;  %v432_v3 = vsel %vm238_vm0, %v400_v15, 0.0  ;;  %v438_v40 = vsel %vm238_vm0, %v402_v19, 0.0 }
  0xa9   : > { %433 = vadd.xlane.f32.xlu0 %v432_v3  ;;  %v253_v30 = vpop.xlane.xlu0 %252  ;;  %v256_v39 = vpop.xlane.xlu1 %255 }
  0xaa   : > { %v340_v44 = vmul.f32 0.015625, %v253_v30  ;;  %v341_v45 = vmul.f32 0.015625, %v256_v39  ;;  %v401_v49 = vmul.f32 %v1411_v29, %v1411_v29  ;;  %v403_v0 = vmul.f32 %v1415_v2, %v1415_v2 }
  0xac   : > { %v1425_v1 = vsub.f32 %v1034_v11, %v340_v44  ;;  %v1429_v4 = vsub.f32 %v1035_v12, %v341_v45  ;;  %v435_v5 = vsel %vm238_vm0, %v401_v49, 0.0  ;;  %v441_v60 = vsel %vm238_vm0, %v403_v0, 0.0 }
  0xad   : > { %439 = vadd.xlane.f32.xlu0 %v438_v40  ;;  %436 = vadd.xlane.f32.xlu1 %v435_v5  ;;  %v259_v50 = vpop.xlane.xlu0 %258  ;;  %v262_v59 = vpop.xlane.xlu1 %261 }
  0xae   : > { %v342_v7 = vmul.f32 0.015625, %v259_v50  ;;  %v343_v8 = vmul.f32 0.015625, %v262_v59  ;;  %v404_v15 = vmul.f32 %v1425_v1, %v1425_v1  ;;  %v405_v11 = vmul.f32 %v1429_v4, %v1429_v4 }
  0xb0   : > { %v1439_v6 = vsub.f32 %v1038_v16, %v342_v7  ;;  %v1443_v12 = vsub.f32 %v1039_v17, %v343_v8  ;;  %v444_v19 = vsel %vm238_vm0, %v404_v15, 0.0  ;;  %v447_v39 = vsel %vm238_vm0, %v405_v11, 0.0 }
  0xb1   : > { %442 = vadd.xlane.f32.xlu1 %v441_v60  ;;  %445 = vadd.xlane.f32.xlu0 %v444_v19  ;;  %v265_v3 = vpop.xlane.xlu0 %264  ;;  %v268_v30 = vpop.xlane.xlu1 %267 }
  0xb2   : > { %v344_v40 = vmul.f32 0.015625, %v265_v3  ;;  %v345_v44 = vmul.f32 0.015625, %v268_v30  ;;  %v406_v45 = vmul.f32 %v1439_v6, %v1439_v6  ;;  %v407_v16 = vmul.f32 %v1443_v12, %v1443_v12 }
  0xb4   : > { %v1453_v13 = vsub.f32 %v1042_v21, %v344_v40  ;;  %v1457_v17 = vsub.f32 %v1043_v22, %v345_v44  ;;  %v450_v49 = vsel %vm238_vm0, %v406_v45, 0.0  ;;  %v453_v50 = vsel %vm238_vm0, %v407_v16, 0.0 }
  0xb5   : > { %448 = vadd.xlane.f32.xlu1 %v447_v39  ;;  %451 = vadd.xlane.f32.xlu0 %v450_v49  ;;  %v271_v0 = vpop.xlane.xlu0 %270  ;;  %v274_v5 = vpop.xlane.xlu1 %273 }
  0xb6   : > { %v346_v59 = vmul.f32 0.015625, %v271_v0  ;;  %v347_v60 = vmul.f32 0.015625, %v274_v5  ;;  %v408_v7 = vmul.f32 %v1453_v13, %v1453_v13  ;;  %v409_v21 = vmul.f32 %v1457_v17, %v1457_v17 }
  0xb8   : > { %v1467_v18 = vsub.f32 %v1046_v26, %v346_v59  ;;  %v1471_v22 = vsub.f32 %v1047_v27, %v347_v60  ;;  %v456_v8 = vsel %vm238_vm0, %v408_v7, 0.0  ;;  %v459_v19 = vsel %vm238_vm0, %v409_v21, 0.0 }
  0xb9   : > { %454 = vadd.xlane.f32.xlu1 %v453_v50  ;;  %457 = vadd.xlane.f32.xlu0 %v456_v8  ;;  %v277_v15 = vpop.xlane.xlu0 %276  ;;  %v280_v11 = vpop.xlane.xlu1 %279 }
  0xba   : > { %v348_v3 = vmul.f32 0.015625, %v277_v15  ;;  %v349_v30 = vmul.f32 0.015625, %v280_v11  ;;  %v410_v39 = vmul.f32 %v1467_v18, %v1467_v18  ;;  %v411_v26 = vmul.f32 %v1471_v22, %v1471_v22 }
  0xbc   : > { %v1481_v23 = vsub.f32 %v1050_v31, %v348_v3  ;;  %v1485_v27 = vsub.f32 %v1051_v32, %v349_v30  ;;  %v462_v40 = vsel %vm238_vm0, %v410_v39, 0.0  ;;  %v465_v16 = vsel %vm238_vm0, %v411_v26, 0.0 }
  0xbd   : > { %460 = vadd.xlane.f32.xlu1 %v459_v19  ;;  %463 = vadd.xlane.f32.xlu0 %v462_v40  ;;  %v283_v44 = vpop.xlane.xlu0 %282  ;;  %v286_v45 = vpop.xlane.xlu1 %285 }
  0xbe   : > { %v350_v49 = vmul.f32 0.015625, %v283_v44  ;;  %v351_v0 = vmul.f32 0.015625, %v286_v45  ;;  %v412_v5 = vmul.f32 %v1481_v23, %v1481_v23  ;;  %v413_v31 = vmul.f32 %v1485_v27, %v1485_v27 }
  0xc0   : > { %v1495_v28 = vsub.f32 %v1054_v36, %v350_v49  ;;  %v1499_v32 = vsub.f32 %v1055_v37, %v351_v0  ;;  %v468_v50 = vsel %vm238_vm0, %v412_v5, 0.0  ;;  %v471_v7 = vsel %vm238_vm0, %v413_v31, 0.0 }
  0xc1   : > { %466 = vadd.xlane.f32.xlu1 %v465_v16  ;;  %469 = vadd.xlane.f32.xlu0 %v468_v50  ;;  %v289_v59 = vpop.xlane.xlu0 %288  ;;  %v292_v60 = vpop.xlane.xlu1 %291 }
  0xc2   : > { %v352_v21 = vmul.f32 0.015625, %v289_v59  ;;  %v353_v8 = vmul.f32 0.015625, %v292_v60  ;;  %v414_v15 = vmul.f32 %v1495_v28, %v1495_v28  ;;  %v415_v36 = vmul.f32 %v1499_v32, %v1499_v32 }
  0xc4   : > { %v1509_v33 = vsub.f32 %v1058_v41, %v352_v21  ;;  %v1513_v37 = vsub.f32 %v1059_v42, %v353_v8  ;;  %v474_v11 = vsel %vm238_vm0, %v414_v15, 0.0  ;;  %v477_v30 = vsel %vm238_vm0, %v415_v36, 0.0 }
  0xc5   : > { %472 = vadd.xlane.f32.xlu1 %v471_v7  ;;  %475 = vadd.xlane.f32.xlu0 %v474_v11  ;;  %v295_v19 = vpop.xlane.xlu0 %294  ;;  %v298_v3 = vpop.xlane.xlu1 %297 }
  0xc6   : > { %v354_v39 = vmul.f32 0.015625, %v295_v19  ;;  %v355_v26 = vmul.f32 0.015625, %v298_v3  ;;  %v416_v40 = vmul.f32 %v1509_v33, %v1509_v33  ;;  %v417_v41 = vmul.f32 %v1513_v37, %v1513_v37 }
  0xc8   : > { %v1523_v38 = vsub.f32 %v1062_v46, %v354_v39  ;;  %v1527_v42 = vsub.f32 %v1063_v47, %v355_v26  ;;  %v480_v44 = vsel %vm238_vm0, %v416_v40, 0.0  ;;  %v483_v49 = vsel %vm238_vm0, %v417_v41, 0.0 }
  0xc9   : > { %478 = vadd.xlane.f32.xlu1 %v477_v30  ;;  %481 = vadd.xlane.f32.xlu0 %v480_v44  ;;  %v301_v45 = vpop.xlane.xlu0 %300  ;;  %v304_v16 = vpop.xlane.xlu1 %303 }
  0xca   : > { %v356_v0 = vmul.f32 0.015625, %v301_v45  ;;  %v357_v5 = vmul.f32 0.015625, %v304_v16  ;;  %v418_v31 = vmul.f32 %v1523_v38, %v1523_v38  ;;  %v419_v46 = vmul.f32 %v1527_v42, %v1527_v42 }
  0xcc   : > { %v1537_v43 = vsub.f32 %v1066_v51, %v356_v0  ;;  %v1541_v47 = vsub.f32 %v1067_v52, %v357_v5  ;;  %v486_v50 = vsel %vm238_vm0, %v418_v31, 0.0  ;;  %v489_v7 = vsel %vm238_vm0, %v419_v46, 0.0 }
  0xcd   : > { %484 = vadd.xlane.f32.xlu1 %v483_v49  ;;  %487 = vadd.xlane.f32.xlu0 %v486_v50  ;;  %v307_v59 = vpop.xlane.xlu0 %306  ;;  %v310_v60 = vpop.xlane.xlu1 %309 }
  0xce   : > { %v358_v21 = vmul.f32 0.015625, %v307_v59  ;;  %v359_v8 = vmul.f32 0.015625, %v310_v60  ;;  %v420_v15 = vmul.f32 %v1537_v43, %v1537_v43  ;;  %v421_v51 = vmul.f32 %v1541_v47, %v1541_v47 }
  0xd0   : > { %v1551_v48 = vsub.f32 %v1070_v56, %v358_v21  ;;  %v1555_v52 = vsub.f32 %v1071_v57, %v359_v8  ;;  %v492_v36 = vsel %vm238_vm0, %v420_v15, 0.0  ;;  %v495_v3 = vsel %vm238_vm0, %v421_v51, 0.0 }
  0xd1   : > { %490 = vadd.xlane.f32.xlu1 %v489_v7  ;;  %493 = vadd.xlane.f32.xlu0 %v492_v36  ;;  %v313_v11 = vpop.xlane.xlu0 %312  ;;  %v316_v19 = vpop.xlane.xlu1 %315 }
  0xd2   : > { %v360_v30 = vmul.f32 0.015625, %v313_v11  ;;  %v361_v39 = vmul.f32 0.015625, %v316_v19  ;;  %v422_v26 = vmul.f32 %v1551_v48, %v1551_v48  ;;  %v423_v56 = vmul.f32 %v1555_v52, %v1555_v52 }
  0xd4   : > { %v1565_v53 = vsub.f32 %v1074_v61, %v360_v30  ;;  %v1569_v57 = vsub.f32 %v1075_v62, %v361_v39  ;;  %v498_v40 = vsel %vm238_vm0, %v422_v26, 0.0  ;;  %v501_v45 = vsel %vm238_vm0, %v423_v56, 0.0 }
  0xd5   : > { %496 = vadd.xlane.f32.xlu1 %v495_v3  ;;  %499 = vadd.xlane.f32.xlu0 %v498_v40  ;;  %v319_v41 = vpop.xlane.xlu0 %318  ;;  %v322_v44 = vpop.xlane.xlu1 %321  ;;  %v658_v40 = vlaneseq }
  0xd6   : > { %v362_v16 = vmul.f32 0.015625, %v319_v41  ;;  %v363_v49 = vmul.f32 0.015625, %v322_v44  ;;  %v424_v0 = vmul.f32 %v1565_v53, %v1565_v53  ;;  %v425_v61 = vmul.f32 %v1569_v57, %v1569_v57 }
  0xd8   : > { %v1579_v58 = vsub.f32 %v1078_v9, %v362_v16  ;;  %v1583_v62 = vsub.f32 %v1079_v10, %v363_v49  ;;  %v504_v5 = vsel %vm238_vm0, %v424_v0, 0.0  ;;  %v507_v50 = vsel %vm238_vm0, %v425_v61, 0.0  ;;  %v656_v61 = vld [vmem:[%s1802_s1] sm:$0x1] }
  0xd9   : > { %502 = vadd.xlane.f32.xlu1 %v501_v45  ;;  %505 = vadd.xlane.f32.xlu0 %v504_v5  ;;  %v325_v31 = vpop.xlane.xlu0 %324  ;;  %v328_v46 = vpop.xlane.xlu1 %327  ;;  %v659_v0 = vshrl.u32 %v658_v40, 7 }
  0xda   : > { %v364_v59 = vmul.f32 0.015625, %v325_v31  ;;  %v365_v60 = vmul.f32 0.015625, %v328_v46  ;;  %v426_v7 = vmul.f32 %v1579_v58, %v1579_v58  ;;  %v427_v9 = vmul.f32 %v1583_v62, %v1583_v62 }
  0xdc   : > { %v1593_v63 = vsub.f32 %v1082_v20, %v364_v59  ;;  %v1597_v10 = vsub.f32 %v1083_v24, %v365_v60  ;;  %v510_v21 = vsel %vm238_vm0, %v426_v7, 0.0  ;;  %v513_v51 = vsel %vm238_vm0, %v427_v9, 0.0  ;;  %v694_v59 = vld [vmem:[%s1803_s2] sm:$0x1] }
  0xdd   : > { %508 = vadd.xlane.f32.xlu1 %v507_v50  ;;  %511 = vadd.xlane.f32.xlu0 %v510_v21  ;;  %v331_v8 = vpop.xlane.xlu0 %330  ;;  %v334_v15 = vpop.xlane.xlu1 %333  ;;  %v657_v9 = vunpack.c.l.bf16 %v656_v61  ;;  %v660_v21 = vsub.s32 0, %v659_v0 }
  0xde   : > { %v366_v36 = vmul.f32 0.015625, %v331_v8  ;;  %v367_v11 = vmul.f32 0.015625, %v334_v15  ;;  %v428_v19 = vmul.f32 %v1593_v63, %v1593_v63  ;;  %v429_v20 = vmul.f32 %v1597_v10, %v1597_v10 }
  0xe0   : > { %v1607_v14 = vsub.f32 %v1086_v34, %v366_v36  ;;  %v1611_v24 = vsub.f32 %v1087_v35, %v367_v11  ;;  %v516_v3 = vsel %vm238_vm0, %v428_v19, 0.0  ;;  %v519_v30 = vsel %vm238_vm0, %v429_v20, 0.0 }
  0xe1   : > { %514 = vadd.xlane.f32.xlu1 %v513_v51  ;;  %517 = vadd.xlane.f32.xlu0 %v516_v3  ;;  %v695_v51 = vunpack.c.l.bf16 %v694_v59  ;;  %v1627_v3 = vrot.slane %v657_v9, %v660_v21 }
  0xe2   : > { %v430_v39 = vmul.f32 %v1607_v14, %v1607_v14  ;;  %v431_v26 = vmul.f32 %v1611_v24, %v1611_v24 }
  0xe4   : > { %v522_v56 = vsel %vm238_vm0, %v430_v39, 0.0  ;;  %v525_v25 = vsel %vm238_vm0, %v431_v26, 0.0 }
  0xe5   : > { %520 = vadd.xlane.f32.xlu1 %v519_v30  ;;  %523 = vadd.xlane.f32.xlu0 %v522_v56  ;;  %v1629_v56 = vrot.slane %v695_v51, %v660_v21 }
  0xe9   : > { %526 = vadd.xlane.f32.xlu1 %v525_v25 }
 0x136   : > { %v434_v34 = vpop.xlane.xlu0 %433 }
 0x137   : > { %v528_v35 = vmul.f32 0.015625, %v434_v34 }
 0x139   : > { %v560_v41 = vadd.f32 1e-05, %v528_v35 }
 0x13a   : > { %v437_v44 = vpop.xlane.xlu1 %436  ;;  %v440_v45 = vpop.xlane.xlu0 %439 }
 0x13b   : > { %1111 = vrsqrt.f32 %v560_v41  ;;  %v529_v16 = vmul.f32 0.015625, %v437_v44  ;;  %v530_v49 = vmul.f32 0.015625, %v440_v45 }
 0x13d   : > { %v561_v5 = vadd.f32 1e-05, %v529_v16  ;;  %v562_v31 = vadd.f32 1e-05, %v530_v49 }
 0x13e   : > { %v443_v46 = vpop.xlane.xlu1 %442  ;;  %v446_v50 = vpop.xlane.xlu0 %445 }
 0x13f   : > { %1113 = vrsqrt.f32 %v561_v5  ;;  %v531_v60 = vmul.f32 0.015625, %v443_v46  ;;  %v532_v7 = vmul.f32 0.015625, %v446_v50 }
 0x140   : > { %1115 = vrsqrt.f32 %v562_v31 }
 0x141   : > { %v563_v8 = vadd.f32 1e-05, %v531_v60  ;;  %v564_v15 = vadd.f32 1e-05, %v532_v7 }
 0x142   : > { %v449_v36 = vpop.xlane.xlu1 %448  ;;  %v452_v11 = vpop.xlane.xlu0 %451 }
 0x143   : > { %1117 = vrsqrt.f32 %v563_v8  ;;  %v533_v19 = vmul.f32 0.015625, %v449_v36  ;;  %v534_v20 = vmul.f32 0.015625, %v452_v11 }
 0x144   : > { %1119 = vrsqrt.f32 %v564_v15 }
 0x145   : > { %v1112_v30 = vpop.eup %1111  ;;  %v565_v39 = vadd.f32 1e-05, %v533_v19  ;;  %v566_v26 = vadd.f32 1e-05, %v534_v20 }
 0x146   : > { %v624_v25 = vmul.f32 %v1112_v30, %v1399_v54  ;;  %v455_v34 = vpop.xlane.xlu1 %454  ;;  %v458_v35 = vpop.xlane.xlu0 %457 }
 0x147   : > { %1121 = vrsqrt.f32 %v565_v39  ;;  %v535_v40 = vmul.f32 0.015625, %v455_v34  ;;  %v536_v41 = vmul.f32 0.015625, %v458_v35 }
 0x148   : > { %v662_v44 = vmul.f32 %v1627_v3, %v624_v25  ;;  %1123 = vrsqrt.f32 %v566_v26 }
 0x149   : > { %v1114_v45 = vpop.eup %1113  ;;  %v567_v16 = vadd.f32 1e-05, %v535_v40  ;;  %v568_v49 = vadd.f32 1e-05, %v536_v41 }
 0x14a   : > { %v1116_v0 = vpop.eup %1115  ;;  %v700_v61 = vadd.f32 %v1629_v56, %v662_v44  ;;  %v625_v5 = vmul.f32 %v1114_v45, %v1411_v29  ;;  %v461_v31 = vpop.xlane.xlu1 %460 }
 0x14b   : > { %v464_v54 = vpop.xlane.xlu0 %463  ;;  %v626_v46 = vmul.f32 %v1116_v0, %v1403_v55  ;;  %1125 = vrsqrt.f32 %v567_v16  ;;  %v537_v50 = vmul.f32 0.015625, %v461_v31 }
 0x14c   : > { %v538_v59 = vmul.f32 0.015625, %v464_v54  ;;  %v992_v60 = vpack.c.bf16 %v700_v61, %v700_v61  ;;  %v663_v7 = vmul.f32 %v1627_v3, %v625_v5  ;;  %1127 = vrsqrt.f32 %v568_v49 }
 0x14d   : > { %v1118_v9 = vpop.eup %1117  ;;  %v664_v29 = vmul.f32 %v1627_v3, %v626_v46  ;;  %v569_v21 = vadd.f32 1e-05, %v537_v50 }
 0x14e   : > { %v570_v8 = vadd.f32 1e-05, %v538_v59  ;;  %v1120_v15 = vpop.eup %1119  ;;  %861 = vst.msk [vmem:[%s1640_s25] sm:$0xf] %vm860_vm1, %v992_v60  ;;  %v701_v51 = vadd.f32 %v1629_v56, %v663_v7  ;;  %v627_v36 = vmul.f32 %v1118_v9, %v1415_v2  ;;  %v467_v55 = vpop.xlane.xlu1 %466 }
 0x14f   : > { %v470_v11 = vpop.xlane.xlu0 %469  ;;  %v702_v19 = vadd.f32 %v1629_v56, %v664_v29  ;;  %v628_v20 = vmul.f32 %v1120_v15, %v1425_v1  ;;  %1129 = vrsqrt.f32 %v569_v21  ;;  %v539_v30 = vmul.f32 0.015625, %v467_v55 }
 0x150   : > { %v993_v39 = vpack.c.bf16 %v701_v51, %v701_v51  ;;  %v665_v26 = vmul.f32 %v1627_v3, %v627_v36  ;;  %1131 = vrsqrt.f32 %v570_v8  ;;  %v540_v25 = vmul.f32 0.015625, %v470_v11 }
 0x151   : > { %v1122_v34 = vpop.eup %1121  ;;  %v994_v35 = vpack.c.bf16 %v702_v19, %v702_v19  ;;  %v666_v40 = vmul.f32 %v1627_v3, %v628_v20  ;;  %v571_v2 = vadd.f32 1e-05, %v539_v30 }
 0x152   : > { %v1124_v41 = vpop.eup %1123  ;;  %862 = vst.msk [vmem:[%s1640_s25 + $0x4] sm:$0xf] %vm860_vm1, %v993_v39  ;;  %v703_v44 = vadd.f32 %v1629_v56, %v665_v26  ;;  %v629_v1 = vmul.f32 %v1122_v34, %v1429_v4  ;;  %v572_v45 = vadd.f32 1e-05, %v540_v25  ;;  %v473_v16 = vpop.xlane.xlu1 %472 }
 0x153   : > { %v476_v49 = vpop.xlane.xlu0 %475  ;;  %863 = vst.msk [vmem:[%s1640_s25 + $0x8] sm:$0xf] %vm860_vm1, %v994_v35  ;;  %v704_v0 = vadd.f32 %v1629_v56, %v666_v40  ;;  %v630_v61 = vmul.f32 %v1124_v41, %v1439_v6  ;;  %1133 = vrsqrt.f32 %v571_v2  ;;  %v541_v5 = vmul.f32 0.015625, %v473_v16 }
 0x154   : > { %v995_v31 = vpack.c.bf16 %v703_v44, %v703_v44  ;;  %v667_v54 = vmul.f32 %v1627_v3, %v629_v1  ;;  %1135 = vrsqrt.f32 %v572_v45  ;;  %v542_v46 = vmul.f32 0.015625, %v476_v49 }
 0x155   : > { %v1126_v50 = vpop.eup %1125  ;;  %v996_v4 = vpack.c.bf16 %v704_v0, %v704_v0  ;;  %v668_v59 = vmul.f32 %v1627_v3, %v630_v61  ;;  %v573_v60 = vadd.f32 1e-05, %v541_v5 }
 0x156   : > { %v1128_v7 = vpop.eup %1127  ;;  %864 = vst.msk [vmem:[%s1640_s25 + $0xc] sm:$0xf] %vm860_vm1, %v995_v31  ;;  %v705_v9 = vadd.f32 %v1629_v56, %v667_v54  ;;  %v631_v6 = vmul.f32 %v1126_v50, %v1443_v12  ;;  %v574_v29 = vadd.f32 1e-05, %v542_v46  ;;  %v479_v21 = vpop.xlane.xlu1 %478 }
 0x157   : > { %v482_v8 = vpop.xlane.xlu0 %481  ;;  %865 = vst.msk [vmem:[%s1640_s25 + $0x10] sm:$0xf] %vm860_vm1, %v996_v4  ;;  %v706_v15 = vadd.f32 %v1629_v56, %v668_v59  ;;  %v632_v51 = vmul.f32 %v1128_v7, %v1453_v13  ;;  %1137 = vrsqrt.f32 %v573_v60  ;;  %v543_v36 = vmul.f32 0.015625, %v479_v21 }
 0x158   : > { %v997_v55 = vpack.c.bf16 %v705_v9, %v705_v9  ;;  %v669_v11 = vmul.f32 %v1627_v3, %v631_v6  ;;  %1139 = vrsqrt.f32 %v574_v29  ;;  %v544_v19 = vmul.f32 0.015625, %v482_v8 }
 0x159   : > { %v1130_v20 = vpop.eup %1129  ;;  %v998_v12 = vpack.c.bf16 %v706_v15, %v706_v15  ;;  %v670_v30 = vmul.f32 %v1627_v3, %v632_v51  ;;  %v575_v39 = vadd.f32 1e-05, %v543_v36 }
 0x15a   : > { %v1132_v26 = vpop.eup %1131  ;;  %866 = vst.msk [vmem:[%s1640_s25 + $0x14] sm:$0xf] %vm860_vm1, %v997_v55  ;;  %v707_v25 = vadd.f32 %v1629_v56, %v669_v11  ;;  %v633_v13 = vmul.f32 %v1130_v20, %v1457_v17  ;;  %v576_v34 = vadd.f32 1e-05, %v544_v19  ;;  %v485_v35 = vpop.xlane.xlu1 %484 }
 0x15b   : > { %v488_v40 = vpop.xlane.xlu0 %487  ;;  %867 = vst.msk [vmem:[%s1640_s25 + $0x18] sm:$0xf] %vm860_vm1, %v998_v12  ;;  %v708_v2 = vadd.f32 %v1629_v56, %v670_v30  ;;  %v634_v41 = vmul.f32 %v1132_v26, %v1467_v18  ;;  %1141 = vrsqrt.f32 %v575_v39  ;;  %v545_v44 = vmul.f32 0.015625, %v485_v35 }
 0x15c   : > { %v999_v1 = vpack.c.bf16 %v707_v25, %v707_v25  ;;  %v671_v45 = vmul.f32 %v1627_v3, %v633_v13  ;;  %1143 = vrsqrt.f32 %v576_v34  ;;  %v546_v16 = vmul.f32 0.015625, %v488_v40 }
 0x15d   : > { %v1134_v49 = vpop.eup %1133  ;;  %v1000_v17 = vpack.c.bf16 %v708_v2, %v708_v2  ;;  %v672_v0 = vmul.f32 %v1627_v3, %v634_v41  ;;  %v577_v61 = vadd.f32 1e-05, %v545_v44 }
 0x15e   : > { %v1136_v5 = vpop.eup %1135  ;;  %868 = vst.msk [vmem:[%s1640_s25 + $0x1c] sm:$0xf] %vm860_vm1, %v999_v1  ;;  %v709_v31 = vadd.f32 %v1629_v56, %v671_v45  ;;  %v635_v18 = vmul.f32 %v1134_v49, %v1471_v22  ;;  %v578_v54 = vadd.f32 1e-05, %v546_v16  ;;  %v491_v46 = vpop.xlane.xlu1 %490 }
 0x15f   : > { %v494_v50 = vpop.xlane.xlu0 %493  ;;  %869 = vst.msk [vmem:[%s1640_s25 + $0x20] sm:$0xf] %vm860_vm1, %v1000_v17  ;;  %v710_v4 = vadd.f32 %v1629_v56, %v672_v0  ;;  %v636_v59 = vmul.f32 %v1136_v5, %v1481_v23  ;;  %1145 = vrsqrt.f32 %v577_v61  ;;  %v547_v60 = vmul.f32 0.015625, %v491_v46 }
 0x160   : > { %v1001_v7 = vpack.c.bf16 %v709_v31, %v709_v31  ;;  %v673_v9 = vmul.f32 %v1627_v3, %v635_v18  ;;  %1147 = vrsqrt.f32 %v578_v54  ;;  %v548_v6 = vmul.f32 0.015625, %v494_v50 }
 0x161   : > { %v1138_v29 = vpop.eup %1137  ;;  %v1002_v22 = vpack.c.bf16 %v710_v4, %v710_v4  ;;  %v674_v21 = vmul.f32 %v1627_v3, %v636_v59  ;;  %v579_v8 = vadd.f32 1e-05, %v547_v60 }
 0x162   : > { %v1140_v15 = vpop.eup %1139  ;;  %870 = vst.msk [vmem:[%s1640_s25 + $0x24] sm:$0xf] %vm860_vm1, %v1001_v7  ;;  %v711_v51 = vadd.f32 %v1629_v56, %v673_v9  ;;  %v637_v23 = vmul.f32 %v1138_v29, %v1485_v27  ;;  %v580_v36 = vadd.f32 1e-05, %v548_v6  ;;  %v497_v55 = vpop.xlane.xlu1 %496 }
 0x163   : > { %v500_v11 = vpop.xlane.xlu0 %499  ;;  %871 = vst.msk [vmem:[%s1640_s25 + $0x28] sm:$0xf] %vm860_vm1, %v1002_v22  ;;  %v712_v19 = vadd.f32 %v1629_v56, %v674_v21  ;;  %v638_v20 = vmul.f32 %v1140_v15, %v1495_v28  ;;  %1149 = vrsqrt.f32 %v579_v8  ;;  %v549_v12 = vmul.f32 0.015625, %v497_v55 }
 0x164   : > { %v1003_v30 = vpack.c.bf16 %v711_v51, %v711_v51  ;;  %v675_v39 = vmul.f32 %v1627_v3, %v637_v23  ;;  %1151 = vrsqrt.f32 %v580_v36  ;;  %v550_v26 = vmul.f32 0.015625, %v500_v11 }
 0x165   : > { %v1142_v25 = vpop.eup %1141  ;;  %v1004_v27 = vpack.c.bf16 %v712_v19, %v712_v19  ;;  %v676_v13 = vmul.f32 %v1627_v3, %v638_v20  ;;  %v581_v34 = vadd.f32 1e-05, %v549_v12 }
 0x166   : > { %v1144_v35 = vpop.eup %1143  ;;  %872 = vst.msk [vmem:[%s1640_s25 + $0x2c] sm:$0xf] %vm860_vm1, %v1003_v30  ;;  %v713_v40 = vadd.f32 %v1629_v56, %v675_v39  ;;  %v639_v28 = vmul.f32 %v1142_v25, %v1499_v32  ;;  %v582_v2 = vadd.f32 1e-05, %v550_v26  ;;  %v503_v41 = vpop.xlane.xlu1 %502 }
 0x167   : > { %v506_v44 = vpop.xlane.xlu0 %505  ;;  %873 = vst.msk [vmem:[%s1640_s25 + $0x30] sm:$0xf] %vm860_vm1, %v1004_v27  ;;  %v714_v1 = vadd.f32 %v1629_v56, %v676_v13  ;;  %v640_v45 = vmul.f32 %v1144_v35, %v1509_v33  ;;  %1153 = vrsqrt.f32 %v581_v34  ;;  %v551_v16 = vmul.f32 0.015625, %v503_v41 }
 0x168   : > { %v1005_v49 = vpack.c.bf16 %v713_v40, %v713_v40  ;;  %v677_v17 = vmul.f32 %v1627_v3, %v639_v28  ;;  %1155 = vrsqrt.f32 %v582_v2  ;;  %v552_v0 = vmul.f32 0.015625, %v506_v44 }
 0x169   : > { %v1146_v61 = vpop.eup %1145  ;;  %v1006_v32 = vpack.c.bf16 %v714_v1, %v714_v1  ;;  %v678_v5 = vmul.f32 %v1627_v3, %v640_v45  ;;  %v583_v31 = vadd.f32 1e-05, %v551_v16 }
 0x16a   : > { %v1148_v18 = vpop.eup %1147  ;;  %874 = vst.msk [vmem:[%s1640_s25 + $0x34] sm:$0xf] %vm860_vm1, %v1005_v49  ;;  %v715_v54 = vadd.f32 %v1629_v56, %v677_v17  ;;  %v641_v33 = vmul.f32 %v1146_v61, %v1513_v37  ;;  %v584_v46 = vadd.f32 1e-05, %v552_v0  ;;  %v509_v50 = vpop.xlane.xlu1 %508 }
 0x16b   : > { %v512_v4 = vpop.xlane.xlu0 %511  ;;  %875 = vst.msk [vmem:[%s1640_s25 + $0x38] sm:$0xf] %vm860_vm1, %v1006_v32  ;;  %v716_v59 = vadd.f32 %v1629_v56, %v678_v5  ;;  %v642_v60 = vmul.f32 %v1148_v18, %v1523_v38  ;;  %1157 = vrsqrt.f32 %v583_v31  ;;  %v553_v7 = vmul.f32 0.015625, %v509_v50 }
 0x16c   : > { %v1007_v9 = vpack.c.bf16 %v715_v54, %v715_v54  ;;  %v679_v6 = vmul.f32 %v1627_v3, %v641_v33  ;;  %1159 = vrsqrt.f32 %v584_v46  ;;  %v554_v29 = vmul.f32 0.015625, %v512_v4 }
 0x16d   : > { %v1150_v22 = vpop.eup %1149  ;;  %v1008_v37 = vpack.c.bf16 %v716_v59, %v716_v59  ;;  %v680_v21 = vmul.f32 %v1627_v3, %v642_v60  ;;  %v585_v8 = vadd.f32 1e-05, %v553_v7 }
 0x16e   : > { %v1152_v15 = vpop.eup %1151  ;;  %876 = vst.msk [vmem:[%s1640_s25 + $0x3c] sm:$0xf] %vm860_vm1, %v1007_v9  ;;  %v717_v51 = vadd.f32 %v1629_v56, %v679_v6  ;;  %v643_v38 = vmul.f32 %v1150_v22, %v1527_v42  ;;  %v586_v23 = vadd.f32 1e-05, %v554_v29  ;;  %v515_v36 = vpop.xlane.xlu1 %514 }
 0x16f   : > { %v518_v55 = vpop.xlane.xlu0 %517  ;;  %877 = vst.msk [vmem:[%s1640_s25 + $0x40] sm:$0xf] %vm860_vm1, %v1008_v37  ;;  %v718_v11 = vadd.f32 %v1629_v56, %v680_v21  ;;  %v644_v19 = vmul.f32 %v1152_v15, %v1537_v43  ;;  %1161 = vrsqrt.f32 %v585_v8  ;;  %v555_v20 = vmul.f32 0.015625, %v515_v36 }
 0x170   : > { %v1009_v12 = vpack.c.bf16 %v717_v51, %v717_v51  ;;  %v681_v30 = vmul.f32 %v1627_v3, %v643_v38  ;;  %1163 = vrsqrt.f32 %v586_v23  ;;  %v556_v39 = vmul.f32 0.015625, %v518_v55 }
 0x171   : > { %v1154_v26 = vpop.eup %1153  ;;  %v1010_v42 = vpack.c.bf16 %v718_v11, %v718_v11  ;;  %v682_v25 = vmul.f32 %v1627_v3, %v644_v19  ;;  %v587_v27 = vadd.f32 1e-05, %v555_v20 }
 0x172   : > { %v1156_v13 = vpop.eup %1155  ;;  %878 = vst.msk [vmem:[%s1640_s25 + $0x44] sm:$0xf] %vm860_vm1, %v1009_v12  ;;  %v719_v34 = vadd.f32 %v1629_v56, %v681_v30  ;;  %v645_v43 = vmul.f32 %v1154_v26, %v1541_v47  ;;  %v588_v35 = vadd.f32 1e-05, %v556_v39  ;;  %v521_v40 = vpop.xlane.xlu1 %520 }
 0x173   : > { %v524_v28 = vpop.xlane.xlu0 %523  ;;  %879 = vst.msk [vmem:[%s1640_s25 + $0x48] sm:$0xf] %vm860_vm1, %v1010_v42  ;;  %v720_v2 = vadd.f32 %v1629_v56, %v682_v25  ;;  %v646_v41 = vmul.f32 %v1156_v13, %v1551_v48  ;;  %1165 = vrsqrt.f32 %v587_v27  ;;  %v557_v44 = vmul.f32 0.015625, %v521_v40 }
 0x174   : > { %v1011_v1 = vpack.c.bf16 %v719_v34, %v719_v34  ;;  %v683_v45 = vmul.f32 %v1627_v3, %v645_v43  ;;  %1167 = vrsqrt.f32 %v588_v35  ;;  %v558_v16 = vmul.f32 0.015625, %v524_v28 }
 0x175   : > { %v1158_v49 = vpop.eup %1157  ;;  %v1012_v47 = vpack.c.bf16 %v720_v2, %v720_v2  ;;  %v684_v17 = vmul.f32 %v1627_v3, %v646_v41  ;;  %v589_v0 = vadd.f32 1e-05, %v557_v44 }
 0x176   : > { %v1160_v61 = vpop.eup %1159  ;;  %880 = vst.msk [vmem:[%s1640_s25 + $0x4c] sm:$0xf] %vm860_vm1, %v1011_v1  ;;  %v721_v32 = vadd.f32 %v1629_v56, %v683_v45  ;;  %v647_v48 = vmul.f32 %v1158_v49, %v1555_v52  ;;  %v590_v5 = vadd.f32 1e-05, %v558_v16  ;;  %v527_v31 = vpop.xlane.xlu1 %526 }
 0x177   : > { %881 = vst.msk [vmem:[%s1640_s25 + $0x50] sm:$0xf] %vm860_vm1, %v1012_v47  ;;  %v722_v18 = vadd.f32 %v1629_v56, %v684_v17  ;;  %v648_v54 = vmul.f32 %v1160_v61, %v1565_v53  ;;  %1169 = vrsqrt.f32 %v589_v0  ;;  %v559_v33 = vmul.f32 0.015625, %v527_v31 }
 0x178   : > { %v1013_v46 = vpack.c.bf16 %v721_v32, %v721_v32  ;;  %v685_v50 = vmul.f32 %v1627_v3, %v647_v48  ;;  %1171 = vrsqrt.f32 %v590_v5 }
 0x179   : > { %v1162_v4 = vpop.eup %1161  ;;  %v1014_v59 = vpack.c.bf16 %v722_v18, %v722_v18  ;;  %v686_v52 = vmul.f32 %v1627_v3, %v648_v54  ;;  %v591_v60 = vadd.f32 1e-05, %v559_v33 }
 0x17a   : > { %v1164_v7 = vpop.eup %1163  ;;  %882 = vst.msk [vmem:[%s1640_s25 + $0x54] sm:$0xf] %vm860_vm1, %v1013_v46  ;;  %v723_v9 = vadd.f32 %v1629_v56, %v685_v50  ;;  %v649_v53 = vmul.f32 %v1162_v4, %v1569_v57 }
 0x17b   : > { %883 = vst.msk [vmem:[%s1640_s25 + $0x58] sm:$0xf] %vm860_vm1, %v1014_v59  ;;  %v724_v6 = vadd.f32 %v1629_v56, %v686_v52  ;;  %v650_v29 = vmul.f32 %v1164_v7, %v1579_v58  ;;  %1173 = vrsqrt.f32 %v591_v60 }
 0x17c   : > { %v1015_v22 = vpack.c.bf16 %v723_v9, %v723_v9  ;;  %v687_v37 = vmul.f32 %v1627_v3, %v649_v53 }
 0x17d   : > { %v1166_v21 = vpop.eup %1165  ;;  %v1016_v8 = vpack.c.bf16 %v724_v6, %v724_v6  ;;  %v688_v15 = vmul.f32 %v1627_v3, %v650_v29 }
 0x17e   : > { %v1168_v51 = vpop.eup %1167  ;;  %884 = vst.msk [vmem:[%s1640_s25 + $0x5c] sm:$0xf] %vm860_vm1, %v1015_v22  ;;  %v725_v57 = vadd.f32 %v1629_v56, %v687_v37  ;;  %v651_v38 = vmul.f32 %v1166_v21, %v1583_v62 }
 0x17f   : > { %885 = vst.msk [vmem:[%s1640_s25 + $0x60] sm:$0xf] %vm860_vm1, %v1016_v8  ;;  %v726_v58 = vadd.f32 %v1629_v56, %v688_v15  ;;  %v652_v23 = vmul.f32 %v1168_v51, %v1593_v63 }
 0x180   : > { %v1017_v36 = vpack.c.bf16 %v725_v57, %v725_v57  ;;  %v689_v55 = vmul.f32 %v1627_v3, %v651_v38 }
 0x181   : > { %v1170_v11 = vpop.eup %1169  ;;  %v1018_v19 = vpack.c.bf16 %v726_v58, %v726_v58  ;;  %v690_v20 = vmul.f32 %v1627_v3, %v652_v23 }
 0x182   : > { %v1172_v12 = vpop.eup %1171  ;;  %886 = vst.msk [vmem:[%s1640_s25 + $0x64] sm:$0xf] %vm860_vm1, %v1017_v36  ;;  %v727_v62 = vadd.f32 %v1629_v56, %v689_v55  ;;  %v653_v30 = vmul.f32 %v1170_v11, %v1597_v10 }
 0x183   : > { %887 = vst.msk [vmem:[%s1640_s25 + $0x68] sm:$0xf] %vm860_vm1, %v1018_v19  ;;  %v728_v63 = vadd.f32 %v1629_v56, %v690_v20  ;;  %v654_v39 = vmul.f32 %v1172_v12, %v1607_v14 }
 0x184   : > { %v1019_v26 = vpack.c.bf16 %v727_v62, %v727_v62  ;;  %v691_v42 = vmul.f32 %v1627_v3, %v653_v30 }
 0x185   : > { %v1174_v25 = vpop.eup %1173  ;;  %v1020_v27 = vpack.c.bf16 %v728_v63, %v728_v63  ;;  %v692_v13 = vmul.f32 %v1627_v3, %v654_v39 }
 0x186   : > { %888 = vst.msk [vmem:[%s1640_s25 + $0x6c] sm:$0xf] %vm860_vm1, %v1019_v26  ;;  %v729_v10 = vadd.f32 %v1629_v56, %v691_v42  ;;  %v655_v34 = vmul.f32 %v1174_v25, %v1611_v24 }
 0x187   : > { %889 = vst.msk [vmem:[%s1640_s25 + $0x70] sm:$0xf] %vm860_vm1, %v1020_v27  ;;  %v730_v43 = vadd.f32 %v1629_v56, %v692_v13 }
 0x188   : > { %v1021_v14 = vpack.c.bf16 %v729_v10, %v729_v10  ;;  %v693_v35 = vmul.f32 %v1627_v3, %v655_v34 }
 0x189   : > { %v1022_v40 = vpack.c.bf16 %v730_v43, %v730_v43 }
 0x18a   : > { %890 = vst.msk [vmem:[%s1640_s25 + $0x74] sm:$0xf] %vm860_vm1, %v1021_v14  ;;  %v731_v28 = vadd.f32 %v1629_v56, %v693_v35 }
 0x18b   : > { %891 = vst.msk [vmem:[%s1640_s25 + $0x78] sm:$0xf] %vm860_vm1, %v1022_v40 }
 0x18c   : > { %v1023_v2 = vpack.c.bf16 %v731_v28, %v731_v28 }
 0x18e   : > { %892 = vst.msk [vmem:[%s1640_s25 + $0x7c] sm:$0xf] %vm860_vm1, %v1023_v2 }
 0x18f PF: > { %s13_s12 = sadd.s32 1, %s1181_s12  }
 0x190   : > { %p10_p4 = scmp.ge.s32.totalorder %s13_s12, 5  }
 0x192   :  { %12 = sbr.rel (!%p10_p4) target bundleno = 1 (0x1), region = 62 }

// kernel: model_forward.13
= control target key start
LH: loop header
LB: loop body
LE: loop exit
PB: predicated region body
PF: predicated region fallthrough
CT: control target
= control target key end

     0   :  { %11 = vsyncpa [#allocation3], 0  ;;  %s1540_s18 = smov 0   ;;  %s1806_s0 = inlined_call_operand.vmem [shape: bf16[512,64], index: 0, kind: input, shape index: {}]   ;;  %s1807_s1 = inlined_call_operand.vmem [shape: bf16[64,128], index: 1, kind: input, shape index: {}]   ;;  %s1808_s2 = inlined_call_operand.vmem [shape: bf16[1,128], index: 2, kind: input, shape index: {}]   ;;  %s1809_s3 = inlined_call_operand.vmem [shape: bf16[512,3], index: 3, kind: input, shape index: {}]   ;;  %s1810_s4 = inlined_call_operand.vmem [shape: bf16[512,128], index: 4, kind: output, shape index: {0}]   ;;  %s1811_s5 = inlined_call_operand.hbm [shape: f32[1,1], index: 5, kind: output, shape index: {1}]  }
   0x1 LB: > { %s1546_s19 = sadd.s32 4294967295, %s1506_s18   ;;  %p1078_p0 = scmp.ge.s32.totalorder %s1506_s18, 1  ;;  %s1506_s18 = sphi %s1540_s18, %s17_s18  }
   0x2   : > { %p198_p1 = scmp.lt.s32.totalorder %s1506_s18, 3 }
   0x4   : > { %p199_p2 = pnand %p1078_p0, %p198_p1 }
   0x5   : > { %s1079_s20 = sshll.u32 (!%p199_p2), %s1546_s19, 5  ;;  %p1085_p4 = scmp.ne.s32.totalorder (!%p199_p2), %s1546_s19, 0 }
   0x6   : > { %202 = sbr.rel (%p199_p2) target bundleno = 543 (0x21f), region = 36  ;;  %p232_p3 = scmp.lt.s32.totalorder (!%p199_p2), %s1079_s20, 63 }
   0xd   : > { %s1813_s20 = smov (!%p232_p3, %s1079_s20), 63  ;;  %253 = sbr.rel (%p1085_p4) target bundleno = 20 (0x14), region = 40 }
   0xe   : > { %s1080_s21 = sshll.u32 %s1813_s20, 2  ;;  %vm254_vm0 = vcmask (!%p1085_p4), 0   ;;  %v1508_v0 = vmov (!%p1085_p4), 0.0  }
   0xf   : > { %s1554_s24 = scalar_lea.vmem %s1806_s0, %s1080_s21  ;;  %s1559_s27 = scalar_lea.vmem %s1809_s3, %s1080_s21  ;;  %255 = vst.msk [vmem:[#allocation2] sm:$0x1] (!%p1085_p4), %vm254_vm0, %v1508_v0 }
  0x10   : > { %s1564_s30 = scalar_lea.vmem %s1810_s4, %s1080_s21 }
  0x14 PF: > { %v1450_v1 = vld [vmem:[%s1807_s1] sm:$0xff]   ;;  %v1451_v2 = vld [vmem:[%s1807_s1 + $0x8] sm:$0xff]   ;;  %v1452_v3 = vld [vmem:[%s1807_s1 + $0x10] sm:$0xff]   ;;  %vm406_vm1 = vcmask 523264   ;;  %v298_v21 = vlaneseq  ;;  %vm905_vm2 = vcmask 23552   ;;  %s1509_s16 = smov [#allocation2]  }
  0x15   : > { %1384 = vmatprep.subr.bf16.mxu0 %v1450_v1  ;;  %1424 = vmatprep.subr.bf16.mxu1 %v1450_v1  ;;  %v1454_v4 = vld [vmem:[%s1554_s24] sm:$0xff]   ;;  %v1453_v5 = vld [vmem:[%s1807_s1 + $0x18] sm:$0xff]   ;;  %v1455_v6 = vld [vmem:[%s1554_s24 + $0x8] sm:$0xff]   ;;  %s998_s17 = sshll.u32 %s1509_s16, 4  ;;  %vm980_vm3 = vcmask 0   ;;  %p1438_p5 = scmp.eq.s32.totalorder %s1546_s19, 1  ;;  %s999_s17 = int_to_ptr.vmem [resolvable:$true] %s998_s17 }
  0x16   : > { %1385 = vmatpush3.bf16.msra.mxu0 %v1450_v1  ;;  %1428 = vmatpush3.bf16.msra.mxu1 %v1450_v1  ;;  %v1462_v7 = vld [vmem:[%s1554_s24 + $0x40] sm:$0xff]   ;;  %v1456_v8 = vld [vmem:[%s1554_s24 + $0x10] sm:$0xff]   ;;  %v1463_v9 = vld [vmem:[%s1554_s24 + $0x48] sm:$0xff]   ;;  %v299_v22 = vshrl.u32 %v298_v21, 7  ;;  %s1470_s21 = scalar_lea.vmem %s999_s17, 16  ;;  %s1476_s22 = scalar_lea.vmem %s999_s17, 32 }
  0x17   : > { %1386 = vmatprep.subr.bf16.mxu0 %v1451_v2  ;;  %1425 = vmatprep.subr.bf16.mxu1 %v1451_v2  ;;  %v1464_v10 = vld [vmem:[%s1554_s24 + $0x50] sm:$0xff]   ;;  %v1457_v11 = vld [vmem:[%s1554_s24 + $0x18] sm:$0xff]   ;;  %v1458_v13 = vld [vmem:[%s1554_s24 + $0x20] sm:$0xff]   ;;  %p1471_p6 = scmp.ne.s32.totalorder %s999_s17, %s1470_s21  ;;  %p1477_p9 = scmp.lt.s32.totalorder %s999_s17, %s999_s17 }
  0x18   : > { %1392 = vmatprep.mubr.msk.bf16.mxu0 %vm406_vm1, %v1454_v4  ;;  %1408 = vmatprep.mubr.msk.bf16.mxu1 %vm406_vm1, %v1462_v7  ;;  %v1465_v12 = vld [vmem:[%s1554_s24 + $0x58] sm:$0xff]   ;;  %v1466_v14 = vld [vmem:[%s1554_s24 + $0x60] sm:$0xff]   ;;  %v1459_v15 = vld [vmem:[%s1554_s24 + $0x28] sm:$0xff]   ;;  %v300_v25 = vsub.s32 0, %v299_v22  ;;  %p1478_p10 = scmp.lt.s32.totalorder %s1476_s22, %s1470_s21 }
  0x19   : > { %v1467_v16 = vld [vmem:[%s1554_s24 + $0x68] sm:$0xff]   ;;  %v1460_v17 = vld [vmem:[%s1554_s24 + $0x30] sm:$0xff]   ;;  %v1461_v19 = vld [vmem:[%s1554_s24 + $0x38] sm:$0xff]   ;;  %p1472_p7 = pnand %p1471_p6, %p1438_p5 }
  0x1a   : > { %1387 = vmatpush3.bf16.msra.mxu0 %v1451_v2  ;;  %1429 = vmatpush3.bf16.msra.mxu1 %v1451_v2  ;;  %v1468_v18 = vld [vmem:[%s1554_s24 + $0x70] sm:$0xff]   ;;  %v1469_v20 = vld [vmem:[%s1554_s24 + $0x78] sm:$0xff]   ;;  %v296_v23 = vld [vmem:[%s1808_s2] sm:$0x1]  ;;  %p1479_p11 = por %p1478_p10, %p1477_p9 }
  0x1b   : > { %1388 = vmatprep.subr.bf16.mxu0 %v1452_v3  ;;  %1426 = vmatprep.subr.bf16.mxu1 %v1452_v3  ;;  %v297_v24 = vunpack.c.l.bf16 %v296_v23  ;;  %v1349_v27 = vld [vmem:[%s1559_s27 + $0x8] sm:$0xff]   ;;  %v1271_v28 = vld [vmem:[%s1559_s27] sm:$0xff]   ;;  %v1351_v49 = vld [vmem:[%s1559_s27 + $0x18] sm:$0xff]   ;;  %p1473_p8 = pneg %p1472_p7 }
  0x1c   : > { %v1276_v30 = vunpack.c.l.bf16 %v1349_v27  ;;  %v1272_v31 = vunpack.c.l.bf16 %v1271_v28  ;;  %v1277_v35 = vunpack.c.h.bf16 %v1349_v27  ;;  %v1273_v39 = vunpack.c.h.bf16 %v1271_v28  ;;  %v1350_v52 = vld [vmem:[%s1559_s27 + $0x10] sm:$0xff]   ;;  %v1353_v21 = vld [vmem:[%s1559_s27 + $0x28] sm:$0xff]  }
  0x1d   : > { %v1614_v26 = vrot.slane %v297_v24, %v300_v25  ;;  %v1284_v58 = vunpack.c.l.bf16 %v1351_v49  ;;  %v1280_v63 = vunpack.c.l.bf16 %v1350_v52  ;;  %v1285_v4 = vunpack.c.h.bf16 %v1351_v49  ;;  %v1352_v25 = vld [vmem:[%s1559_s27 + $0x20] sm:$0xff]   ;;  %p1480_p12 = pnand %p1479_p11, %p1473_p8 }
  0x1e   : > { %1389 = vmatpush3.bf16.msra.mxu0 %v1452_v3  ;;  %1430 = vmatpush3.bf16.msra.mxu1 %v1452_v3 }
  0x1f   : > { %1390 = vmatprep.subr.bf16.mxu0 %v1453_v5  ;;  %1427 = vmatprep.subr.bf16.mxu1 %v1453_v5 }
  0x22   : > { %1391 = vmatpush3.bf16.msra.mxu0 %v1453_v5  ;;  %1431 = vmatpush3.bf16.msra.mxu1 %v1453_v5 }
  0x25   : > { %1393 = vmatmul.mubr.msk.bf16.vlgmr.msra.gmra.mrb[0].mxu0 %vm406_vm1, %v1455_v6  ;;  %1409 = vmatmul.mubr.msk.bf16.vlgmr.msra.gmra.mrb[0].mxu1 %vm406_vm1, %v1463_v9 }
  0x26   : > { %1396 = vmatprep.mubr.msk.bf16.mxu0 %vm406_vm1, %v1456_v8  ;;  %1412 = vmatprep.mubr.msk.bf16.mxu1 %vm406_vm1, %v1464_v10 }
  0x2d   : > { %1397 = vmatmul.mubr.msk.bf16.gmra.mrb[4].mxu0 %vm406_vm1, %v1457_v11  ;;  %1413 = vmatmul.mubr.msk.bf16.gmra.mrb[4].mxu1 %vm406_vm1, %v1465_v12  ;;  %v1281_v11 = vunpack.c.h.bf16 %v1350_v52 }
  0x2e   : > { %1400 = vmatprep.mubr.msk.bf16.mxu0 %vm406_vm1, %v1458_v13  ;;  %1416 = vmatprep.mubr.msk.bf16.mxu1 %vm406_vm1, %v1466_v14 }
  0x35   : > { %1401 = vmatmul.mubr.msk.bf16.gmra.mrb[8].mxu0 %vm406_vm1, %v1459_v15  ;;  %1417 = vmatmul.mubr.msk.bf16.gmra.mrb[8].mxu1 %vm406_vm1, %v1467_v16 }
  0x36   : > { %1404 = vmatprep.mubr.msk.bf16.mxu0 %vm406_vm1, %v1460_v17  ;;  %1420 = vmatprep.mubr.msk.bf16.mxu1 %vm406_vm1, %v1468_v18 }
  0x3d   : > { %1405 = vmatmul.mubr.msk.bf16.gmra.mrb[12].mxu0 %vm406_vm1, %v1461_v19  ;;  %1421 = vmatmul.mubr.msk.bf16.gmra.mrb[12].mxu1 %vm406_vm1, %v1469_v20 }
  0xf8   : > { %v1394_v29 = vpop.f32.mrb[0].mxu0  ;;  %v1410_v32 = vpop.f32.mrb[0].mxu1 }
  0xf9   : > { %v498_v33 = vadd.f32 %v1394_v29, %v1614_v26  ;;  %v489_v34 = vpop.f32.mrb[1].mxu0  ;;  %v553_v36 = vpop.f32.mrb[1].mxu1  ;;  %v1622_v43 = vadd.f32 %v1410_v32, %v1614_v26 }
  0xfa   : > { %v490_v37 = vadd.f32 %v489_v34, %v1614_v26  ;;  %v1395_v38 = vpop.f32.mrb[2].mxu0  ;;  %v1411_v40 = vpop.f32.mrb[2].mxu1  ;;  %v1631_v53 = vadd.f32 %v553_v36, %v1614_v26  ;;  %v1292_v34 = vunpack.c.l.bf16 %v1353_v21 }
  0xfb   : > { %v501_v41 = vadd.f32 %v1395_v38, %v1614_v26  ;;  %v492_v42 = vpop.f32.mrb[3].mxu0  ;;  %v1625_v44 = vadd.f32 %v1411_v40, %v1614_v26  ;;  %v556_v45 = vpop.f32.mrb[3].mxu1  ;;  %v842_v46 = vsub.f32 %v498_v33, %v1276_v30  ;;  %v1288_v38 = vunpack.c.l.bf16 %v1352_v25 }
  0xfc   : > { %v840_v47 = vsub.f32 %v490_v37, %v1272_v31  ;;  %v493_v48 = vadd.f32 %v492_v42, %v1614_v26  ;;  %v1634_v54 = vadd.f32 %v556_v45, %v1614_v26 }
  0xfd   : > { %v1198_v50 = vpack.c.bf16 %v501_v41, %v498_v33  ;;  %v843_v51 = vsub.f32 %v501_v41, %v1277_v35  ;;  %v1238_v59 = vpack.c.bf16 %v1625_v44, %v1622_v43  ;;  %v875_v60 = vmul.f32 %v842_v46, %v842_v46 }
  0xfe   : > { %v873_v55 = vmul.f32 %v840_v47, %v840_v47  ;;  %v1193_v56 = vpack.c.bf16 %v493_v48, %v490_v37  ;;  %v841_v57 = vsub.f32 %v493_v48, %v1273_v39  ;;  %v1233_v5 = vpack.c.bf16 %v1634_v54, %v1631_v53 }
  0xff   : > { %1334 = vst [vmem:[%s1564_s30 + $0x8] sm:$0xff] %v1198_v50   ;;  %v876_v1 = vmul.f32 %v843_v51, %v843_v51  ;;  %1342 = vst [vmem:[%s1564_s30 + $0x48] sm:$0xff] %v1238_v59   ;;  %v909_v18 = vsel %vm905_vm2, %v875_v60, 0.0  ;;  %v1293_v46 = vunpack.c.h.bf16 %v1353_v21  ;;  %v1289_v47 = vunpack.c.h.bf16 %v1352_v25 }
 0x100   : > { %1194 = vst [vmem:[%s1564_s30] sm:$0xff] %v1193_v56   ;;  %v874_v61 = vmul.f32 %v841_v57, %v841_v57  ;;  %v1398_v62 = vpop.f32.mrb[4].mxu0  ;;  %v1414_v0 = vpop.f32.mrb[4].mxu1  ;;  %v906_v7 = vsel %vm905_vm2, %v873_v55, 0.0  ;;  %1341 = vst [vmem:[%s1564_s30 + $0x40] sm:$0xff] %v1233_v5  }
 0x101   : > { %v514_v2 = vadd.f32 %v1398_v62, %v1614_v26  ;;  %v505_v3 = vpop.f32.mrb[5].mxu0  ;;  %v569_v6 = vpop.f32.mrb[5].mxu1  ;;  %v911_v22 = vsel %vm905_vm2, %v876_v1, 0.0  ;;  %v1655_v27 = vadd.f32 %v1414_v0, %v1614_v26 }
 0x102   : > { %v907_v8 = vsel %vm905_vm2, %v874_v61, 0.0  ;;  %v506_v9 = vadd.f32 %v505_v3, %v1614_v26  ;;  %v1399_v10 = vpop.f32.mrb[6].mxu0  ;;  %v1415_v12 = vpop.f32.mrb[6].mxu1  ;;  %v1677_v61 = vadd.f32 %v569_v6, %v1614_v26  ;;  %v1354_v3 = vld [vmem:[%s1559_s27 + $0x30] sm:$0xff]  }
 0x103   : > { %v908_v13 = vadd.f32 %v907_v8, %v906_v7  ;;  %v846_v14 = vsub.f32 %v514_v2, %v1284_v58  ;;  %v517_v15 = vadd.f32 %v1399_v10, %v1614_v26  ;;  %v508_v16 = vpop.f32.mrb[7].mxu0  ;;  %v572_v17 = vpop.f32.mrb[7].mxu1  ;;  %v1661_v39 = vadd.f32 %v1415_v12, %v1614_v26 }
 0x104   : > { %v844_v19 = vsub.f32 %v506_v9, %v1280_v63  ;;  %v509_v20 = vadd.f32 %v508_v16, %v1614_v26  ;;  %v1689_v5 = vadd.f32 %v572_v17, %v1614_v26  ;;  %v1694_v16 = vld [vmem:[%s1559_s27 + $0x48] sm:$0xff]  }
 0x105   : > { %v910_v23 = vadd.f32 %v909_v18, %v908_v13  ;;  %v1208_v24 = vpack.c.bf16 %v517_v15, %v514_v2  ;;  %v847_v29 = vsub.f32 %v517_v15, %v1285_v4  ;;  %v879_v32 = vmul.f32 %v846_v14, %v846_v14  ;;  %v1355_v2 = vld [vmem:[%s1559_s27 + $0x38] sm:$0xff]   ;;  %v1685_v4 = vld [vmem:[%s1559_s27 + $0x40] sm:$0xff]  }
 0x106   : > { %v877_v28 = vmul.f32 %v844_v19, %v844_v19  ;;  %v1203_v30 = vpack.c.bf16 %v509_v20, %v506_v9  ;;  %v845_v31 = vsub.f32 %v509_v20, %v1281_v11  ;;  %v1248_v55 = vpack.c.bf16 %v1661_v39, %v1655_v27 }
 0x107   : > { %v912_v33 = vadd.f32 %v911_v22, %v910_v23  ;;  %1336 = vst [vmem:[%s1564_s30 + $0x18] sm:$0xff] %v1208_v24   ;;  %v880_v49 = vmul.f32 %v847_v29, %v847_v29  ;;  %v917_v57 = vsel %vm905_vm2, %v879_v32, 0.0  ;;  %v1300_v14 = vunpack.c.l.bf16 %v1355_v2 }
 0x108   : > { %v913_v35 = vsel %vm905_vm2, %v877_v28, 0.0  ;;  %1335 = vst [vmem:[%s1564_s30 + $0x10] sm:$0xff] %v1203_v30   ;;  %v878_v36 = vmul.f32 %v845_v31, %v845_v31  ;;  %v1402_v37 = vpop.f32.mrb[8].mxu0  ;;  %v1663_v40 = vpop.f32.mrb[8].mxu1  ;;  %1344 = vst [vmem:[%s1564_s30 + $0x58] sm:$0xff] %v1248_v55   ;;  %v1296_v15 = vunpack.c.l.bf16 %v1354_v3  ;;  %v1304_v18 = vunpack.c.l.bf16 %v1685_v4  ;;  %v1358_v55 = vld [vmem:[%s1559_s27 + $0x50] sm:$0xff]  }
 0x109   : > { %v914_v41 = vadd.f32 %v913_v35, %v912_v33  ;;  %v530_v42 = vadd.f32 %v1402_v37, %v1614_v26  ;;  %v521_v45 = vpop.f32.mrb[9].mxu0  ;;  %v1666_v48 = vpop.f32.mrb[9].mxu1  ;;  %v919_v9 = vsel %vm905_vm2, %v880_v49, 0.0  ;;  %v1243_v22 = vpack.c.bf16 %v1689_v5, %v1677_v61 }
 0x10a   : > { %v915_v50 = vsel %vm905_vm2, %v878_v36, 0.0  ;;  %v522_v51 = vadd.f32 %v521_v45, %v1614_v26  ;;  %v1403_v52 = vpop.f32.mrb[10].mxu0  ;;  %v1672_v56 = vpop.f32.mrb[10].mxu1  ;;  %v1301_v30 = vunpack.c.h.bf16 %v1355_v2  ;;  %v1297_v35 = vunpack.c.h.bf16 %v1354_v3 }
 0x10b   : > { %v916_v58 = vadd.f32 %v915_v50, %v914_v41  ;;  %v533_v59 = vadd.f32 %v1403_v52, %v1614_v26  ;;  %v524_v60 = vpop.f32.mrb[11].mxu0  ;;  %v1679_v62 = vpop.f32.mrb[11].mxu1  ;;  %v850_v63 = vsub.f32 %v530_v42, %v1292_v34  ;;  %v1308_v36 = vunpack.c.l.bf16 %v1694_v16  ;;  %1343 = vst [vmem:[%s1564_s30 + $0x50] sm:$0xff] %v1243_v22  }
 0x10c   : > { %v848_v0 = vsub.f32 %v522_v51, %v1288_v38  ;;  %v525_v1 = vadd.f32 %v524_v60, %v1614_v26  ;;  %v856_v45 = vsub.f32 %v1631_v53, %v1304_v18  ;;  %v1715_v60 = vadd.f32 %v1663_v40, %v1614_v26 }
 0x10d   : > { %v918_v7 = vadd.f32 %v917_v57, %v916_v58  ;;  %v1218_v6 = vpack.c.bf16 %v533_v59, %v530_v42  ;;  %v851_v8 = vsub.f32 %v533_v59, %v1293_v46  ;;  %v883_v19 = vmul.f32 %v850_v63, %v850_v63 }
 0x10e   : > { %v881_v10 = vmul.f32 %v848_v0, %v848_v0  ;;  %v1213_v11 = vpack.c.bf16 %v525_v1, %v522_v51  ;;  %v849_v12 = vsub.f32 %v525_v1, %v1289_v47  ;;  %v1305_v46 = vunpack.c.h.bf16 %v1685_v4 }
 0x10f   : > { %v920_v13 = vadd.f32 %v919_v9, %v918_v7  ;;  %1338 = vst [vmem:[%s1564_s30 + $0x28] sm:$0xff] %v1218_v6   ;;  %v884_v25 = vmul.f32 %v851_v8, %v851_v8  ;;  %v925_v49 = vsel %vm905_vm2, %v883_v19, 0.0  ;;  %v1309_v3 = vunpack.c.h.bf16 %v1694_v16 }
 0x110   : > { %v921_v17 = vsel %vm905_vm2, %v881_v10, 0.0  ;;  %1337 = vst [vmem:[%s1564_s30 + $0x20] sm:$0xff] %v1213_v11   ;;  %v882_v20 = vmul.f32 %v849_v12, %v849_v12  ;;  %v1406_v21 = vpop.f32.mrb[12].mxu0  ;;  %v1422_v23 = vpop.f32.mrb[12].mxu1  ;;  %v1312_v4 = vunpack.c.l.bf16 %v1358_v55  ;;  %v586_v7 = vadd.f32 %v1666_v48, %v1614_v26 }
 0x111   : > { %v922_v24 = vadd.f32 %v921_v17, %v920_v13  ;;  %v546_v28 = vadd.f32 %v1406_v21, %v1614_v26  ;;  %v537_v29 = vpop.f32.mrb[13].mxu0  ;;  %v601_v31 = vpop.f32.mrb[13].mxu1  ;;  %v927_v57 = vsel %vm905_vm2, %v884_v25, 0.0  ;;  %v1725_v40 = vadd.f32 %v1672_v56, %v1614_v26 }
 0x112   : > { %v923_v32 = vsel %vm905_vm2, %v882_v20, 0.0  ;;  %v538_v33 = vadd.f32 %v537_v29, %v1614_v26  ;;  %v1407_v34 = vpop.f32.mrb[14].mxu0  ;;  %v1423_v37 = vpop.f32.mrb[14].mxu1  ;;  %v889_v11 = vmul.f32 %v856_v45, %v856_v45  ;;  %v857_v12 = vsub.f32 %v1634_v54, %v1305_v46 }
 0x113   : > { %v924_v38 = vadd.f32 %v923_v32, %v922_v24  ;;  %v549_v41 = vadd.f32 %v1407_v34, %v1614_v26  ;;  %v540_v42 = vpop.f32.mrb[15].mxu0  ;;  %v604_v47 = vpop.f32.mrb[15].mxu1  ;;  %v854_v50 = vsub.f32 %v546_v28, %v1300_v14  ;;  %v589_v13 = vadd.f32 %v1679_v62, %v1614_v26  ;;  %v1359_v24 = vld [vmem:[%s1559_s27 + $0x58] sm:$0xff]  }
 0x114   : > { %v852_v51 = vsub.f32 %v538_v33, %v1296_v15  ;;  %v541_v52 = vadd.f32 %v540_v42, %v1614_v26  ;;  %v1258_v15 = vpack.c.bf16 %v1725_v40, %v1715_v60  ;;  %v1734_v16 = vadd.f32 %v1422_v23, %v1614_v26 }
 0x115   : > { %v926_v58 = vadd.f32 %v925_v49, %v924_v38  ;;  %v1228_v59 = vpack.c.bf16 %v549_v41, %v546_v28  ;;  %v855_v63 = vsub.f32 %v549_v41, %v1301_v30  ;;  %v887_v6 = vmul.f32 %v854_v50, %v854_v50  ;;  %v1360_v30 = vld [vmem:[%s1559_s27 + $0x60] sm:$0xff]   ;;  %v1361_v50 = vld [vmem:[%s1559_s27 + $0x68] sm:$0xff]  }
 0x116   : > { %v885_v53 = vmul.f32 %v852_v51, %v852_v51  ;;  %v1223_v0 = vpack.c.bf16 %v541_v52, %v538_v33  ;;  %v853_v1 = vsub.f32 %v541_v52, %v1297_v35  ;;  %v1313_v18 = vunpack.c.h.bf16 %v1358_v55  ;;  %1346 = vst [vmem:[%s1564_s30 + $0x68] sm:$0xff] %v1258_v15  }
 0x117   : > { %v928_v2 = vadd.f32 %v927_v57, %v926_v58  ;;  %1340 = vst [vmem:[%s1564_s30 + $0x38] sm:$0xff] %v1228_v59   ;;  %v888_v14 = vmul.f32 %v855_v63, %v855_v63  ;;  %v1253_v19 = vpack.c.bf16 %v589_v13, %v586_v7  ;;  %v933_v54 = vsel %vm905_vm2, %v887_v6, 0.0 }
 0x118   : > { %v929_v8 = vsel %vm905_vm2, %v885_v53, 0.0  ;;  %1339 = vst [vmem:[%s1564_s30 + $0x30] sm:$0xff] %v1223_v0   ;;  %v886_v9 = vmul.f32 %v853_v1, %v853_v1  ;;  %v858_v17 = vsub.f32 %v1622_v43, %v1308_v36  ;;  %v602_v62 = vadd.f32 %v601_v31, %v1614_v26  ;;  %v1362_v53 = vld [vmem:[%s1559_s27 + $0x70] sm:$0xff]  }
 0x119   : > { %v930_v10 = vadd.f32 %v929_v8, %v928_v2  ;;  %v1741_v20 = vadd.f32 %v1423_v37, %v1614_v26  ;;  %v937_v22 = vsel %vm905_vm2, %v889_v11, 0.0  ;;  %v859_v23 = vsub.f32 %v1625_v44, %v1309_v3  ;;  %1345 = vst [vmem:[%s1564_s30 + $0x60] sm:$0xff] %v1253_v19   ;;  %v1363_v11 = vld [vmem:[%s1559_s27 + $0x78] sm:$0xff]  }
 0x11a   : > { %v931_v48 = vsel %vm905_vm2, %v886_v9, 0.0  ;;  %v605_v25 = vadd.f32 %v604_v47, %v1614_v26  ;;  %v935_v28 = vsel %vm905_vm2, %v888_v14, 0.0  ;;  %v890_v43 = vmul.f32 %v857_v12, %v857_v12 }
 0x11b   : > { %v932_v56 = vadd.f32 %v931_v48, %v930_v10  ;;  %v860_v29 = vsub.f32 %v1677_v61, %v1312_v4  ;;  %v1268_v31 = vpack.c.bf16 %v1741_v20, %v1734_v16  ;;  %v891_v34 = vmul.f32 %v858_v17, %v858_v17 }
 0x11c   : > { %v1263_v33 = vpack.c.bf16 %v605_v25, %v602_v62  ;;  %v1316_v35 = vunpack.c.l.bf16 %v1359_v24  ;;  %v1317_v36 = vunpack.c.h.bf16 %v1359_v24  ;;  %v1320_v37 = vunpack.c.l.bf16 %v1360_v30 }
 0x11d   : > { %v934_v21 = vadd.f32 %v933_v54, %v932_v56  ;;  %1348 = vst [vmem:[%s1564_s30 + $0x78] sm:$0xff] %v1268_v31   ;;  %v892_v26 = vmul.f32 %v859_v23, %v859_v23  ;;  %v939_v38 = vsel %vm905_vm2, %v890_v43, 0.0  ;;  %v893_v41 = vmul.f32 %v860_v29, %v860_v29 }
 0x11e   : > { %1347 = vst [vmem:[%s1564_s30 + $0x70] sm:$0xff] %v1263_v33   ;;  %v861_v61 = vsub.f32 %v1689_v5, %v1313_v18  ;;  %v941_v45 = vsel %vm905_vm2, %v891_v34, 0.0  ;;  %v862_v46 = vsub.f32 %v1655_v27, %v1316_v35  ;;  %v863_v49 = vsub.f32 %v1661_v39, %v1317_v36 }
 0x11f   : > { %v936_v32 = vadd.f32 %v935_v28, %v934_v21  ;;  %v1321_v51 = vunpack.c.h.bf16 %v1360_v30  ;;  %v943_v52 = vsel %vm905_vm2, %v892_v26, 0.0  ;;  %v945_v55 = vsel %vm905_vm2, %v893_v41, 0.0 }
 0x120   : > { %v894_v57 = vmul.f32 %v861_v61, %v861_v61  ;;  %v864_v58 = vsub.f32 %v586_v7, %v1320_v37  ;;  %v895_v5 = vmul.f32 %v862_v46, %v862_v46  ;;  %v1324_v63 = vunpack.c.l.bf16 %v1361_v50 }
 0x121   : > { %v938_v44 = vadd.f32 %v937_v22, %v936_v32  ;;  %v896_v1 = vmul.f32 %v863_v49, %v863_v49  ;;  %v1325_v2 = vunpack.c.h.bf16 %v1361_v50  ;;  %v865_v39 = vsub.f32 %v589_v13, %v1321_v51 }
 0x122   : > { %v947_v27 = vsel %vm905_vm2, %v894_v57, 0.0  ;;  %v897_v3 = vmul.f32 %v864_v58, %v864_v58  ;;  %v1328_v4 = vunpack.c.l.bf16 %v1362_v53  ;;  %v949_v8 = vsel %vm905_vm2, %v895_v5, 0.0 }
 0x123   : > { %v940_v42 = vadd.f32 %v939_v38, %v938_v44  ;;  %v866_v9 = vsub.f32 %v1715_v60, %v1324_v63  ;;  %v951_v7 = vsel %vm905_vm2, %v896_v1, 0.0  ;;  %v1329_v12 = vunpack.c.h.bf16 %v1362_v53 }
 0x124   : > { %v953_v14 = vsel %vm905_vm2, %v897_v3, 0.0  ;;  %v867_v48 = vsub.f32 %v1725_v40, %v1325_v2  ;;  %v898_v15 = vmul.f32 %v865_v39, %v865_v39  ;;  %v868_v56 = vsub.f32 %v602_v62, %v1328_v4 }
 0x125   : > { %v942_v47 = vadd.f32 %v941_v45, %v940_v42  ;;  %v899_v19 = vmul.f32 %v866_v9, %v866_v9  ;;  %v1332_v13 = vunpack.c.l.bf16 %v1363_v11  ;;  %v1333_v17 = vunpack.c.h.bf16 %v1363_v11 }
 0x126   : > { %v900_v21 = vmul.f32 %v867_v48, %v867_v48  ;;  %v955_v22 = vsel %vm905_vm2, %v898_v15, 0.0  ;;  %v901_v60 = vmul.f32 %v868_v56, %v868_v56  ;;  %v869_v23 = vsub.f32 %v605_v25, %v1329_v12 }
 0x127   : > { %v944_v59 = vadd.f32 %v943_v52, %v942_v47  ;;  %v957_v28 = vsel %vm905_vm2, %v899_v19, 0.0  ;;  %v870_v43 = vsub.f32 %v1734_v16, %v1332_v13  ;;  %v871_v30 = vsub.f32 %v1741_v20, %v1333_v17  ;;  %v872_v47 = vld [vmem:[#allocation2] sm:$0x1] }
 0x128   : > { %v959_v40 = vsel %vm905_vm2, %v900_v21, 0.0  ;;  %v961_v62 = vsel %vm905_vm2, %v901_v60, 0.0  ;;  %v902_v31 = vmul.f32 %v869_v23, %v869_v23 }
 0x129   : > { %v946_v0 = vadd.f32 %v945_v55, %v944_v59  ;;  %v903_v33 = vmul.f32 %v870_v43, %v870_v43  ;;  %v904_v35 = vmul.f32 %v871_v30, %v871_v30 }
 0x12a   : > { %v963_v44 = vsel %vm905_vm2, %v902_v31, 0.0 }
 0x12b   : > { %v948_v6 = vadd.f32 %v947_v27, %v946_v0  ;;  %v965_v36 = vsel %vm905_vm2, %v903_v33, 0.0  ;;  %v967_v16 = vsel %vm905_vm2, %v904_v35, 0.0 }
 0x12d   : > { %v950_v10 = vadd.f32 %v949_v8, %v948_v6 }
 0x12f   : > { %v952_v18 = vadd.f32 %v951_v7, %v950_v10 }
 0x131   : > { %v954_v54 = vadd.f32 %v953_v14, %v952_v18 }
 0x133   : > { %v956_v24 = vadd.f32 %v955_v22, %v954_v54 }
 0x135   : > { %v958_v29 = vadd.f32 %v957_v28, %v956_v24 }
 0x137   : > { %v960_v32 = vadd.f32 %v959_v40, %v958_v29 }
 0x139   : > { %v962_v34 = vadd.f32 %v961_v62, %v960_v32 }
 0x13b   : > { %v964_v25 = vadd.f32 %v963_v44, %v962_v34 }
 0x13d   : > { %v966_v37 = vadd.f32 %v965_v36, %v964_v25 }
 0x13f   : > { %v968_v26 = vadd.f32 %v967_v16, %v966_v37 }
 0x141   : > { %969 = vadd.xlane.f32.xlu0 %v968_v26 }
 0x1ce   : > { %v970_v38 = vpop.xlane.xlu0 %969 }
 0x1cf   : > { %v971_v41 = vrot.slane %v970_v38, 4 }
 0x1d1   : > { %v972_v61 = vadd.f32 %v971_v41, %v970_v38 }
 0x1d3   : > { %v973_v20 = vrot.slane %v972_v61, 2 }
 0x1d5   : > { %v974_v42 = vadd.f32 %v973_v20, %v972_v61 }
 0x1d7   : > { %v975_v45 = vrot.slane %v974_v42, 1 }
 0x1d9   : > { %v976_v46 = vadd.f32 %v975_v45, %v974_v42 }
 0x1db   : > { %1432 = vpush %v976_v46 }
 0x20c   : > { %s1433_s20 = spop %1432 }
 0x20d   : > { %v978_v49 = vstv %s1433_s20 }
 0x20e   : > { %v979_v50 = vadd.f32 %v978_v49, %v872_v47 }
 0x210   : > { %981 = vst.msk [vmem:[#allocation2] sm:$0x1] %vm980_vm3, %v979_v50 }
 0x211   : > { %1483 = shalt.err (!%p1480_p12)
}
 0x212   : > { %s1484_s25 = scalar_lea.hbm %s1811_s5, 16 }
 0x213   : > { %p1485_p13 = scmp.ne.s32.totalorder %s1811_s5, %s1484_s25  ;;  %p1490_p2 = scmp.lt.u32.totalorder %s1484_s25, %s1811_s5 }
 0x215   : > { %p1486_p0 = pnand %p1485_p13, %p1438_p5 }
 0x217   : > { %p1487_p1 = pneg %p1486_p0 }
 0x219   : > { %p1492_p3 = pnand %p1490_p2, %p1487_p1 }
 0x21b   : > { %1495 = shalt.err (!%p1492_p3)
}
 0x21c   : > { %1435 = dma.vmem_to_hbm [thread:$0]  (%p1438_p5), %s999_s17, 16, %s1811_s5, [#allocation3]  }
 0x21d   : > { %1501 = dma.done.wait (%p1438_p5), [#allocation3], 16  }
 0x21e   : > { %1503 = vsyncadd (%p1438_p5), [#allocation3], 4294967280 }
 0x21f PF: > { %s17_s18 = sadd.s32 1, %s1506_s18  }
 0x220   : > { %p14_p4 = scmp.ge.s32.totalorder %s17_s18, 4  }
 0x222   :  { %16 = sbr.rel (!%p14_p4) target bundleno = 1 (0x1), region = 82 }
 0x229   :  { %1019 = vsyncpa [#allocation3], 1 }
 0x22a   :  { %1021 = vsyncpa [#allocation3 + $0x1], 1 }

// kernel: model_forward.9
= control target key start
LH: loop header
LB: loop body
LE: loop exit
PB: predicated region body
PF: predicated region fallthrough
CT: control target
= control target key end

     0   :  { %s10204_s21 = smov 0   ;;  %s10206_s22 = smov 0   ;;  %s15094_s0 = inlined_call_operand.vmem [shape: bf16[2,384,64], index: 0, kind: input, shape index: {}]   ;;  %s15095_s1 = inlined_call_operand.vmem [shape: bf16[1,64], index: 1, kind: input, shape index: {}]   ;;  %s15096_s2 = inlined_call_operand.vmem [shape: bf16[1,64], index: 2, kind: input, shape index: {}]   ;;  %s15097_s3 = inlined_call_operand.vmem [shape: bf16[64,128], index: 3, kind: input, shape index: {}]   ;;  %s15098_s4 = inlined_call_operand.vmem [shape: bf16[64,160], index: 4, kind: input, shape index: {}]   ;;  %s15099_s5 = inlined_call_operand.vmem [shape: bf16[64,8], index: 5, kind: input, shape index: {}]   ;;  %s15100_s6 = inlined_call_operand.vmem [shape: bf16[4,160], index: 6, kind: input, shape index: {}]   ;;  %s15101_s7 = inlined_call_operand.vmem [shape: bf16[1,160], index: 7, kind: input, shape index: {}]   ;;  %s15102_s8 = inlined_call_operand.vmem [shape: f32[1,8], index: 8, kind: input, shape index: {}]   ;;  %s15103_s9 = inlined_call_operand.vmem [shape: f32[1,8], index: 9, kind: input, shape index: {}]   ;;  %s15104_s10 = inlined_call_operand.vmem [shape: f32[1,128], index: 10, kind: input, shape index: {}]   ;;  %s15105_s11 = inlined_call_operand.vmem [shape: bf16[1,128], index: 11, kind: input, shape index: {}]   ;;  %s15106_s12 = inlined_call_operand.vmem [shape: bf16[128,64], index: 12, kind: input, shape index: {}]   ;;  %s15107_s13 = inlined_call_operand.vmem [shape: f32[128,128], index: 13, kind: input, shape index: {}]   ;;  %s15108_s14 = inlined_call_operand.vmem [shape: f32[128,128], index: 14, kind: input, shape index: {}]   ;;  %s15109_s15 = inlined_call_operand.vmem [shape: f32[8,128], index: 15, kind: input, shape index: {}]   ;;  %s15110_s16 = inlined_call_operand.vmem [shape: bf16[2,384,64], index: 16, kind: output, shape index: {}]  }
   0x1   :  { %15346 = sst [smem:[#allocation196_spill]] %s15094_s0  ;;  %s10208_s23 = smov 0  }
   0x2   :  { %s10210_s24 = smov 0   ;;  %s10212_s25 = smov 0  }
   0x3 LB: > { %15347 = sst [smem:[#allocation5_spill]] %s10090_s23  ;;  %s35_s26 = sadd.s32 1, %s10090_s23  ;;  %s10098_s25 = sphi %s10212_s25, %s26_s25   ;;  %s10094_s24 = sphi %s10210_s24, %s16003_s24   ;;  %s10090_s23 = sphi %s10208_s23, %s16002_s23   ;;  %s10086_s22 = sphi %s10206_s22, %s16001_s22   ;;  %s10082_s21 = sphi %s10204_s21, %s16000_s21  }
   0x4   : > { %15348 = sst [smem:[#allocation6_spill]] %s10094_s24  ;;  %s38_s27 = sadd.s32 1, %s10094_s24 }
   0x5   : > { %p36_p0 = scmp.ge.s32.totalorder %s35_s26, 3  ;;  %p7914_p1 = scmp.ge.s32.totalorder %s10098_s25, 1 }
   0x6   : > { %p483_p2 = scmp.lt.s32.totalorder %s10098_s25, 7 }
   0x7   : > { %s16005_s26 = smov (%p36_p0, %s35_s26), 0  ;;  %s16007_s27 = smov (!%p36_p0, %s38_s27), %s10094_s24 }
   0x8   : > { %15349 = sst [smem:[#allocation7_spill]] %s16005_s26  ;;  %p484_p3 = pnand %p7914_p1, %p483_p2 }
   0x9   : > { %p40_p4 = scmp.ge.s32.totalorder %s16007_s27, 2 }
   0xa   : > { %487 = sbr.rel (%p484_p3) target bundleno = 2457 (0x999), region = 84 }
   0xb   : > { %s16009_s27 = smov (%p40_p4, %s16007_s27), 0 }
  0x11   : > { %s7915_s28 = sshll.u32 %s10082_s21, 4  ;;  %p542_p5 = scmp.lt.s32.totalorder %s10086_s22, 1 }
  0x12   : > { %p544_p6 = scmp.lt.s32.totalorder %s7915_s28, 47  ;;  %s15350_s19 = sld [smem:[#allocation196_spill]] }
  0x13   : > { %s16011_s22 = smov (!%p542_p5, %s10086_s22), 1  ;;  %p7919_p7 = scmp.ne.s32.totalorder %s10082_s21, 0 }
  0x14   : > { %s16013_s28 = smov (!%p544_p6, %s7915_s28), 47  ;;  %s9202_s29 = smul.u32 48, %s16011_s22  ;;  %vm569_vm0 = vcmask (!%p7919_p7), 261120   ;;  %v10100_v0 = vmov (!%p7919_p7), 0.0  }
  0x15   : > { %565 = sbr.rel (%p7919_p7) target bundleno = 28 (0x1c), region = 88  ;;  %566 = vst [vmem:[#allocation2] sm:$0xff] (!%p7919_p7), %v10100_v0  ;;  %567 = vst [vmem:[#allocation2 + $0x8] sm:$0xff] (!%p7919_p7), %v10100_v0 }
  0x16   : > { %s547_s30 = sadd.s32 %s9202_s29, %s16013_s28  ;;  %568 = vst [vmem:[#allocation3] sm:$0xff] (!%p7919_p7), %v10100_v0  ;;  %570 = vst.msk [vmem:[#allocation3 + $0x8] sm:$0xff] (!%p7919_p7), %vm569_vm0, %v10100_v0 }
  0x17   : > { %s7916_s0 = sshll.u32 %s547_s30, 2 }
  0x18   : > { %s10237_s20 = scalar_lea.vmem %s15350_s19, %s7916_s0  ;;  %s10242_s23 = scalar_lea.vmem %s15110_s16, %s7916_s0 }
  0x1c PF: > { %v8129_v1 = vld [vmem:[%s10237_s20] sm:$0xff]   ;;  %vm603_vm1 = vcmask 523264   ;;  %v8160_v2 = vld [vmem:[%s10237_s20 + $0x8] sm:$0xff]   ;;  %v8161_v7 = vld [vmem:[%s10237_s20 + $0x10] sm:$0xff]   ;;  %vm1188_vm2 = vcmask 261120   ;;  %vm1454_vm3 = vcmask 1046528  }
  0x1d   : > { %v10246_v3 = vunpack.c.l.bf16 %v8129_v1  ;;  %v10248_v4 = vunpack.c.l.bf16 %v8160_v2  ;;  %v10250_v5 = vunpack.c.h.bf16 %v8129_v1  ;;  %v10252_v6 = vunpack.c.h.bf16 %v8160_v2  ;;  %v8162_v8 = vld [vmem:[%s10237_s20 + $0x18] sm:$0xff]   ;;  %v8163_v9 = vld [vmem:[%s10237_s20 + $0x20] sm:$0xff]   ;;  %v8164_v26 = vld [vmem:[%s10237_s20 + $0x28] sm:$0xff]   ;;  %s10102_s19 = smov 112   ;;  %s10111_s21 = smov 96  }
  0x1e   : > { %v10261_v12 = vunpack.c.l.bf16 %v8161_v7  ;;  %v10263_v13 = vunpack.c.h.bf16 %v8161_v7  ;;  %v10265_v14 = vunpack.c.l.bf16 %v8162_v8  ;;  %v10271_v17 = vunpack.c.h.bf16 %v8162_v8  ;;  %v8165_v29 = vld [vmem:[%s10237_s20 + $0x30] sm:$0xff]   ;;  %v8166_v34 = vld [vmem:[%s10237_s20 + $0x38] sm:$0xff]   ;;  %s10112_s22 = smov 64   ;;  %s10113_s20 = smov 32  }
  0x1f   : > { %15351 = vst [vmem:[#allocation8_spill] sm:$0xff] %v10246_v3  ;;  %15352 = vst [vmem:[#allocation9_spill] sm:$0xff] %v10248_v4  ;;  %v604_v10 = vsel %vm603_vm1, %v10246_v3, 0.0  ;;  %v610_v11 = vsel %vm603_vm1, %v10248_v4, 0.0  ;;  %v607_v15 = vsel %vm603_vm1, %v10250_v5, 0.0  ;;  %v613_v16 = vsel %vm603_vm1, %v10252_v6, 0.0 }
  0x20   : > { %15353 = vst [vmem:[#allocation10_spill] sm:$0xff] %v10250_v5  ;;  %15354 = vst [vmem:[#allocation11_spill] sm:$0xff] %v10252_v6  ;;  %605 = vadd.xlane.f32.xlu0 %v604_v10  ;;  %611 = vadd.xlane.f32.xlu1 %v610_v11  ;;  %v10273_v18 = vunpack.c.l.bf16 %v8163_v9  ;;  %v10275_v19 = vunpack.c.h.bf16 %v8163_v9  ;;  %v616_v20 = vsel %vm603_vm1, %v10261_v12, 0.0  ;;  %v619_v21 = vsel %vm603_vm1, %v10263_v13, 0.0  ;;  %s10115_s24 = smov 80   ;;  %s10116_s26 = smov 48  }
  0x21   : > { %15355 = vst [vmem:[#allocation12_spill] sm:$0xff] %v10261_v12  ;;  %15356 = vst [vmem:[#allocation13_spill] sm:$0xff] %v10263_v13  ;;  %v622_v22 = vsel %vm603_vm1, %v10265_v14, 0.0  ;;  %v625_v23 = vsel %vm603_vm1, %v10271_v17, 0.0  ;;  %v10290_v27 = vunpack.c.l.bf16 %v8164_v26  ;;  %v10292_v28 = vunpack.c.h.bf16 %v8164_v26  ;;  %s10118_s30 = smov 16  }
  0x22   : > { %15357 = vst [vmem:[#allocation14_spill] sm:$0xff] %v10265_v14  ;;  %15358 = vst [vmem:[#allocation15_spill] sm:$0xff] %v10271_v17  ;;  %v628_v24 = vsel %vm603_vm1, %v10273_v18, 0.0  ;;  %v631_v25 = vsel %vm603_vm1, %v10275_v19, 0.0  ;;  %v10299_v32 = vunpack.c.l.bf16 %v8165_v29  ;;  %v10301_v33 = vunpack.c.h.bf16 %v8165_v29 }
  0x23   : > { %15359 = vst [vmem:[#allocation16_spill] sm:$0xff] %v10273_v18  ;;  %15360 = vst [vmem:[#allocation17_spill] sm:$0xff] %v10275_v19  ;;  %v634_v30 = vsel %vm603_vm1, %v10290_v27, 0.0  ;;  %v637_v31 = vsel %vm603_vm1, %v10292_v28, 0.0  ;;  %v10308_v37 = vunpack.c.l.bf16 %v8166_v34  ;;  %v10310_v38 = vunpack.c.h.bf16 %v8166_v34 }
  0x24   : > { %608 = vadd.xlane.f32.xlu0 %v607_v15  ;;  %614 = vadd.xlane.f32.xlu1 %v613_v16  ;;  %15361 = vst [vmem:[#allocation18_spill] sm:$0xff] %v10290_v27  ;;  %15362 = vst [vmem:[#allocation19_spill] sm:$0xff] %v10292_v28  ;;  %v640_v35 = vsel %vm603_vm1, %v10299_v32, 0.0  ;;  %v643_v36 = vsel %vm603_vm1, %v10301_v33, 0.0  ;;  %vm1682_vm4 = vcmask 1045504   ;;  %vm1901_vm5 = vcmask 1044480  }
  0x25   : > { %15363 = vst [vmem:[#allocation20_spill] sm:$0xff] %v10299_v32  ;;  %15364 = vst [vmem:[#allocation21_spill] sm:$0xff] %v10301_v33  ;;  %v646_v39 = vsel %vm603_vm1, %v10308_v37, 0.0  ;;  %v649_v40 = vsel %vm603_vm1, %v10310_v38, 0.0  ;;  %vm2033_vm6 = vcmask 261125   ;;  %vm3284_vm7 = vcmask 1042432  }
  0x26   : > { %15365 = vst [vmem:[#allocation22_spill] sm:$0xff] %v10308_v37  ;;  %15366 = vst [vmem:[#allocation23_spill] sm:$0xff] %v10310_v38  ;;  %vm3645_vm8 = vsmask.f32 5376  ;;  %vm2880_vm9 = vcmask 64512   ;;  %vm3451_vm10 = vcmask 130048  }
  0x27   : > { %vm10104_vm11 = vmmov 0   ;;  %vm4537_vm12 = vcmask 261248   ;;  %vm4895_vm13 = vcmask 392448   ;;  %vm5253_vm14 = vcmask 523648  }
  0x28   : > { %617 = vadd.xlane.f32.xlu0 %v616_v20  ;;  %620 = vadd.xlane.f32.xlu1 %v619_v21  ;;  %vm5611_vm15 = vcmask 654848   ;;  %vm5969_vm0 = vcmask 786048  }
  0x2c   : > { %623 = vadd.xlane.f32.xlu0 %v622_v22  ;;  %626 = vadd.xlane.f32.xlu1 %v625_v23 }
  0x30   : > { %629 = vadd.xlane.f32.xlu0 %v628_v24  ;;  %632 = vadd.xlane.f32.xlu1 %v631_v25 }
  0x34   : > { %635 = vadd.xlane.f32.xlu0 %v634_v30  ;;  %638 = vadd.xlane.f32.xlu1 %v637_v31 }
  0x38   : > { %641 = vadd.xlane.f32.xlu0 %v640_v35  ;;  %644 = vadd.xlane.f32.xlu1 %v643_v36 }
  0x3c   : > { %647 = vadd.xlane.f32.xlu0 %v646_v39  ;;  %650 = vadd.xlane.f32.xlu1 %v649_v40 }
  0xad   : > { %v606_v41 = vpop.xlane.xlu0 %605  ;;  %v612_v42 = vpop.xlane.xlu1 %611 }
  0xae   : > { %v653_v43 = vmul.f32 0.015625, %v606_v41  ;;  %v655_v44 = vmul.f32 0.015625, %v612_v42 }
  0xb0   : > { %v10317_v45 = vsub.f32 %v10246_v3, %v653_v43  ;;  %v10320_v46 = vsub.f32 %v10248_v4, %v655_v44 }
  0xb1   : > { %v609_v47 = vpop.xlane.xlu0 %608  ;;  %v615_v48 = vpop.xlane.xlu1 %614 }
  0xb2   : > { %v654_v49 = vmul.f32 0.015625, %v609_v47  ;;  %v656_v50 = vmul.f32 0.015625, %v615_v48  ;;  %v685_v51 = vmul.f32 %v10317_v45, %v10317_v45  ;;  %v687_v52 = vmul.f32 %v10320_v46, %v10320_v46 }
  0xb4   : > { %v10327_v53 = vsub.f32 %v10250_v5, %v654_v49  ;;  %v10330_v54 = vsub.f32 %v10252_v6, %v656_v50  ;;  %v701_v55 = vsel %vm603_vm1, %v685_v51, 0.0  ;;  %v707_v58 = vsel %vm603_vm1, %v687_v52, 0.0 }
  0xb5   : > { %702 = vadd.xlane.f32.xlu0 %v701_v55  ;;  %v618_v56 = vpop.xlane.xlu0 %617  ;;  %v621_v57 = vpop.xlane.xlu1 %620 }
  0xb6   : > { %v657_v59 = vmul.f32 0.015625, %v618_v56  ;;  %v658_v60 = vmul.f32 0.015625, %v621_v57  ;;  %v686_v61 = vmul.f32 %v10327_v53, %v10327_v53  ;;  %v688_v62 = vmul.f32 %v10330_v54, %v10330_v54 }
  0xb8   : > { %v10339_v63 = vsub.f32 %v10261_v12, %v657_v59  ;;  %v10342_v0 = vsub.f32 %v10263_v13, %v658_v60  ;;  %v704_v1 = vsel %vm603_vm1, %v686_v61, 0.0  ;;  %v710_v8 = vsel %vm603_vm1, %v688_v62, 0.0  ;;  %v1365_v12 = vld [vmem:[#allocation3 + $0x8] sm:$0xc0] }
  0xb9   : > { %708 = vadd.xlane.f32.xlu0 %v707_v58  ;;  %705 = vadd.xlane.f32.xlu1 %v704_v1  ;;  %v624_v2 = vpop.xlane.xlu0 %623  ;;  %v627_v7 = vpop.xlane.xlu1 %626 }
  0xba   : > { %v659_v9 = vmul.f32 0.015625, %v624_v2  ;;  %v660_v10 = vmul.f32 0.015625, %v627_v7  ;;  %v689_v11 = vmul.f32 %v10339_v63, %v10339_v63  ;;  %v690_v15 = vmul.f32 %v10342_v0, %v10342_v0 }
  0xbc   : > { %v10351_v16 = vsub.f32 %v10265_v14, %v659_v9  ;;  %v10354_v20 = vsub.f32 %v10271_v17, %v660_v10  ;;  %v713_v21 = vsel %vm603_vm1, %v689_v11, 0.0  ;;  %v716_v24 = vsel %vm603_vm1, %v690_v15, 0.0 }
  0xbd   : > { %711 = vadd.xlane.f32.xlu1 %v710_v8  ;;  %714 = vadd.xlane.f32.xlu0 %v713_v21  ;;  %v630_v22 = vpop.xlane.xlu0 %629  ;;  %v633_v23 = vpop.xlane.xlu1 %632 }
  0xbe   : > { %v661_v25 = vmul.f32 0.015625, %v630_v22  ;;  %v662_v26 = vmul.f32 0.015625, %v633_v23  ;;  %v691_v29 = vmul.f32 %v10351_v16, %v10351_v16  ;;  %v692_v30 = vmul.f32 %v10354_v20, %v10354_v20 }
  0xc0   : > { %v10363_v31 = vsub.f32 %v10273_v18, %v661_v25  ;;  %v10366_v34 = vsub.f32 %v10275_v19, %v662_v26  ;;  %v719_v35 = vsel %vm603_vm1, %v691_v29, 0.0  ;;  %v722_v40 = vsel %vm603_vm1, %v692_v30, 0.0  ;;  %v9363_v26 = vld [vmem:[%s15097_s3] sm:$0xff]   ;;  %v9364_v30 = vld [vmem:[%s15097_s3 + $0x8] sm:$0xff]  }
  0xc1   : > { %717 = vadd.xlane.f32.xlu1 %v716_v24  ;;  %720 = vadd.xlane.f32.xlu0 %v719_v35  ;;  %v636_v36 = vpop.xlane.xlu0 %635  ;;  %v639_v39 = vpop.xlane.xlu1 %638  ;;  %v9365_v35 = vld [vmem:[%s15098_s4 + $0x4] ss:$8 sps:$4 sm:$0xff]  }
  0xc2   : > { %v663_v41 = vmul.f32 0.015625, %v636_v36  ;;  %v664_v42 = vmul.f32 0.015625, %v639_v39  ;;  %v693_v43 = vmul.f32 %v10363_v31, %v10363_v31  ;;  %v694_v44 = vmul.f32 %v10366_v34, %v10366_v34  ;;  %8489 = vmatprep.subr.bf16.mxu0 %v9363_v26  ;;  %v10424_v36 = vld [vmem:[%s15098_s4] ss:$8 sps:$4 sm:$0xff]   ;;  %9186 = vmatprep.subr.bf16.mxu1 %v9365_v35  ;;  %v9368_v39 = vld [vmem:[%s15097_s3 + $0x10] sm:$0xff]  }
  0xc3   : > { %8490 = vmatpush3.bf16.msra.mxu0 %v9363_v26  ;;  %9190 = vmatpush1.bf16.msra.mxu1 %v10424_v36 }
  0xc4   : > { %v10375_v47 = vsub.f32 %v10290_v27, %v663_v41  ;;  %v10378_v48 = vsub.f32 %v10292_v28, %v664_v42  ;;  %v725_v49 = vsel %vm603_vm1, %v693_v43, 0.0  ;;  %v728_v52 = vsel %vm603_vm1, %v694_v44, 0.0  ;;  %8491 = vmatprep.subr.bf16.mxu0 %v9364_v30  ;;  %v10438_v41 = vld [vmem:[%s15098_s4 + $0x10] ss:$8 sps:$4 sm:$0xff]   ;;  %v10448_v43 = vld [vmem:[%s15098_s4 + $0x24] ss:$8 sps:$4 sm:$0xff]  }
  0xc5   : > { %723 = vadd.xlane.f32.xlu1 %v722_v40  ;;  %726 = vadd.xlane.f32.xlu0 %v725_v49  ;;  %v642_v50 = vpop.xlane.xlu0 %641  ;;  %v645_v51 = vpop.xlane.xlu1 %644  ;;  %v10433_v40 = vld [vmem:[%s15098_s4 + $0x14] ss:$8 sps:$4 sm:$0xff]   ;;  %v10453_v44 = vld [vmem:[%s15098_s4 + $0x20] ss:$8 sps:$4 sm:$0xff]  }
  0xc6   : > { %v665_v55 = vmul.f32 0.015625, %v642_v50  ;;  %v666_v56 = vmul.f32 0.015625, %v645_v51  ;;  %v695_v57 = vmul.f32 %v10375_v47, %v10375_v47  ;;  %v696_v58 = vmul.f32 %v10378_v48, %v10378_v48  ;;  %9187 = vmatprep.subr.bf16.mxu1 %v10433_v40  ;;  %v9372_v42 = vld [vmem:[%s15097_s3 + $0x18] sm:$0xff]  }
  0xc7   : > { %8492 = vmatpush3.bf16.msra.mxu0 %v9364_v30  ;;  %9191 = vmatpush1.bf16.msra.mxu1 %v10438_v41  ;;  %v10460_v49 = vld [vmem:[%s15098_s4 + $0x34] ss:$8 sps:$4 sm:$0xff]   ;;  %v10465_v50 = vld [vmem:[%s15098_s4 + $0x30] ss:$8 sps:$4 sm:$0xff]   ;;  %v15116_v51 = vmov 0  }
  0xc8   : > { %v10387_v59 = vsub.f32 %v10299_v32, %v665_v55  ;;  %v10390_v60 = vsub.f32 %v10301_v33, %v666_v56  ;;  %v731_v61 = vsel %vm603_vm1, %v695_v57, 0.0  ;;  %v734_v2 = vsel %vm603_vm1, %v696_v58, 0.0  ;;  %8493 = vmatprep.subr.bf16.mxu0 %v9368_v39  ;;  %9188 = vmatprep.subr.bf16.mxu1 %v10448_v43  ;;  %v1364_v32 = vld [vmem:[#allocation3] sm:$0xc0] }
  0xc9   : > { %729 = vadd.xlane.f32.xlu1 %v728_v52  ;;  %732 = vadd.xlane.f32.xlu0 %v731_v61  ;;  %v648_v62 = vpop.xlane.xlu0 %647  ;;  %v651_v1 = vpop.xlane.xlu1 %650  ;;  %v815_v61 = vlaneseq }
  0xca   : > { %v667_v7 = vmul.f32 0.015625, %v648_v62  ;;  %v668_v8 = vmul.f32 0.015625, %v651_v1  ;;  %v697_v9 = vmul.f32 %v10387_v59, %v10387_v59  ;;  %v698_v10 = vmul.f32 %v10390_v60, %v10390_v60  ;;  %1118 = vmatprep.mubr.bf16.mxu1 %v15116_v51  ;;  %9262 = vset.pattern.permute.xlu1 %v15116_v51 }
  0xcb   : > { %8494 = vmatpush3.bf16.msra.mxu0 %v9368_v39  ;;  %9192 = vmatpush1.bf16.msra.mxu1 %v10453_v44 }
  0xcc   : > { %v10399_v11 = vsub.f32 %v10308_v37, %v667_v7  ;;  %v10402_v15 = vsub.f32 %v10310_v38, %v668_v8  ;;  %v737_v21 = vsel %vm603_vm1, %v697_v9, 0.0  ;;  %v740_v22 = vsel %vm603_vm1, %v698_v10, 0.0  ;;  %8495 = vmatprep.subr.bf16.mxu0 %v9372_v42  ;;  %9189 = vmatprep.subr.bf16.mxu1 %v10460_v49 }
  0xcd   : > { %735 = vadd.xlane.f32.xlu1 %v734_v2  ;;  %738 = vadd.xlane.f32.xlu0 %v737_v21  ;;  %v10471_v10 = vshrl.u32 %v815_v61, 7 }
  0xce   : > { %v699_v23 = vmul.f32 %v10399_v11, %v10399_v11  ;;  %v700_v24 = vmul.f32 %v10402_v15, %v10402_v15 }
  0xcf   : > { %8496 = vmatpush3.bf16.msra.mxu0 %v9372_v42  ;;  %9193 = vmatpush1.bf16.msra.mxu1 %v10465_v50  ;;  %15367 = vst [vmem:[#allocation24_spill] sm:$0xff] %v10471_v10 }
  0xd0   : > { %v743_v25 = vsel %vm603_vm1, %v699_v23, 0.0  ;;  %v746_v29 = vsel %vm603_vm1, %v700_v24, 0.0  ;;  %1066 = vmatprep.subr.bf16.mxu0 %v9365_v35  ;;  %v813_v23 = vld [vmem:[%s15095_s1] sm:$0x1]  ;;  %v10477_v35 = vsub.s32 0, %v10471_v10 }
  0xd1   : > { %741 = vadd.xlane.f32.xlu1 %v740_v22  ;;  %744 = vadd.xlane.f32.xlu0 %v743_v25  ;;  %v814_v30 = vunpack.c.l.bf16 %v813_v23 }
  0xd2   : > { %15368 = vst [vmem:[#allocation25_spill] sm:$0xff] %v10477_v35 }
  0xd5   : > { %747 = vadd.xlane.f32.xlu1 %v746_v29 }
 0x142   : > { %v703_v52 = vpop.xlane.xlu0 %702 }
 0x143   : > { %v749_v55 = vmul.f32 0.015625, %v703_v52  ;;  %v835_v52 = vld [vmem:[%s15096_s2] sm:$0x1] }
 0x145   : > { %v765_v56 = vadd.f32 1e-05, %v749_v55 }
 0x146   : > { %v706_v57 = vpop.xlane.xlu1 %705  ;;  %v709_v58 = vpop.xlane.xlu0 %708 }
 0x147   : > { %9391 = vrsqrt.f32 %v765_v56  ;;  %v750_v62 = vmul.f32 0.015625, %v706_v57  ;;  %v751_v1 = vmul.f32 0.015625, %v709_v58 }
 0x149   : > { %v766_v2 = vadd.f32 1e-05, %v750_v62  ;;  %v767_v7 = vadd.f32 1e-05, %v751_v1  ;;  %v10484_v1 = vrot.slane %v814_v30, %v10477_v35 }
 0x14a   : > { %v712_v8 = vpop.xlane.xlu1 %711  ;;  %v715_v9 = vpop.xlane.xlu0 %714 }
 0x14b   : > { %9393 = vrsqrt.f32 %v766_v2  ;;  %v752_v21 = vmul.f32 0.015625, %v712_v8  ;;  %v753_v22 = vmul.f32 0.015625, %v715_v9  ;;  %v836_v2 = vunpack.c.l.bf16 %v835_v52 }
 0x14c   : > { %9395 = vrsqrt.f32 %v767_v7 }
 0x14d   : > { %v768_v24 = vadd.f32 1e-05, %v752_v21  ;;  %v769_v25 = vadd.f32 1e-05, %v753_v22 }
 0x14e   : > { %v718_v26 = vpop.xlane.xlu1 %717  ;;  %v721_v29 = vpop.xlane.xlu0 %720 }
 0x14f   : > { %9397 = vrsqrt.f32 %v768_v24  ;;  %v754_v39 = vmul.f32 0.015625, %v718_v26  ;;  %v755_v42 = vmul.f32 0.015625, %v721_v29 }
 0x150   : > { %9399 = vrsqrt.f32 %v769_v25 }
 0x151   : > { %v9392_v55 = vpop.eup %9391  ;;  %v770_v56 = vadd.f32 1e-05, %v754_v39  ;;  %v771_v57 = vadd.f32 1e-05, %v755_v42 }
 0x152   : > { %v724_v58 = vpop.xlane.xlu1 %723  ;;  %v727_v61 = vpop.xlane.xlu0 %726  ;;  %v797_v62 = vmul.f32 %v9392_v55, %v10317_v45  ;;  %v10489_v45 = vrot.slane %v836_v2, %v10477_v35 }
 0x153   : > { %9401 = vrsqrt.f32 %v770_v56  ;;  %v756_v7 = vmul.f32 0.015625, %v724_v58  ;;  %v757_v8 = vmul.f32 0.015625, %v727_v61 }
 0x154   : > { %9403 = vrsqrt.f32 %v771_v57  ;;  %v819_v29 = vmul.f32 %v10484_v1, %v797_v62 }
 0x155   : > { %v9394_v9 = vpop.eup %9393  ;;  %v772_v21 = vadd.f32 1e-05, %v756_v7  ;;  %v773_v22 = vadd.f32 1e-05, %v757_v8 }
 0x156   : > { %v9396_v23 = vpop.eup %9395  ;;  %v730_v24 = vpop.xlane.xlu1 %729  ;;  %v798_v26 = vmul.f32 %v9394_v9, %v10327_v53  ;;  %v841_v53 = vadd.f32 %v10489_v45, %v819_v29 }
 0x157   : > { %v733_v25 = vpop.xlane.xlu0 %732  ;;  %9405 = vrsqrt.f32 %v772_v21  ;;  %v758_v30 = vmul.f32 0.015625, %v730_v24  ;;  %v799_v42 = vmul.f32 %v9396_v23, %v10320_v46 }
 0x158   : > { %v759_v39 = vmul.f32 0.015625, %v733_v25  ;;  %9407 = vrsqrt.f32 %v773_v22  ;;  %v820_v52 = vmul.f32 %v10484_v1, %v798_v26 }
 0x159   : > { %v9398_v55 = vpop.eup %9397  ;;  %v774_v56 = vadd.f32 1e-05, %v758_v30  ;;  %v821_v8 = vmul.f32 %v10484_v1, %v799_v42 }
 0x15a   : > { %v775_v57 = vadd.f32 1e-05, %v759_v39  ;;  %v9400_v58 = vpop.eup %9399  ;;  %v736_v61 = vpop.xlane.xlu1 %735  ;;  %v842_v62 = vadd.f32 %v10489_v45, %v820_v52  ;;  %v800_v2 = vmul.f32 %v9398_v55, %v10330_v54 }
 0x15b   : > { %v739_v7 = vpop.xlane.xlu0 %738  ;;  %9409 = vrsqrt.f32 %v774_v56  ;;  %v760_v9 = vmul.f32 0.015625, %v736_v61  ;;  %v801_v23 = vmul.f32 %v9400_v58, %v10339_v63  ;;  %v843_v39 = vadd.f32 %v10489_v45, %v821_v8 }
 0x15c   : > { %v761_v46 = vmul.f32 0.015625, %v739_v7  ;;  %9411 = vrsqrt.f32 %v775_v57  ;;  %v10497_v21 = vpack.c.bf16 %v842_v62, %v841_v53  ;;  %v822_v22 = vmul.f32 %v10484_v1, %v800_v2 }
 0x15d   : > { %v9402_v24 = vpop.eup %9401  ;;  %v776_v25 = vadd.f32 1e-05, %v760_v9  ;;  %v823_v55 = vmul.f32 %v10484_v1, %v801_v23 }
 0x15e   : > { %v777_v26 = vadd.f32 1e-05, %v761_v46  ;;  %v9404_v29 = vpop.eup %9403  ;;  %v742_v30 = vpop.xlane.xlu1 %741  ;;  %8497 = vmatprep.mubr.msk.bf16.mxu0 %vm603_vm1, %v10497_v21  ;;  %v844_v42 = vadd.f32 %v10489_v45, %v822_v22  ;;  %v802_v52 = vmul.f32 %v9402_v24, %v10342_v0 }
 0x15f   : > { %v745_v54 = vpop.xlane.xlu0 %744  ;;  %9413 = vrsqrt.f32 %v776_v25  ;;  %v762_v56 = vmul.f32 0.015625, %v742_v30  ;;  %v803_v57 = vmul.f32 %v9404_v29, %v10351_v16  ;;  %v845_v0 = vadd.f32 %v10489_v45, %v823_v55 }
 0x160   : > { %v763_v63 = vmul.f32 0.015625, %v745_v54  ;;  %9415 = vrsqrt.f32 %v777_v26  ;;  %v10508_v58 = vpack.c.bf16 %v844_v42, %v843_v39  ;;  %v824_v61 = vmul.f32 %v10484_v1, %v802_v52 }
 0x161   : > { %v9406_v7 = vpop.eup %9405  ;;  %v778_v53 = vadd.f32 1e-05, %v762_v56  ;;  %v825_v2 = vmul.f32 %v10484_v1, %v803_v57 }
 0x162   : > { %v779_v62 = vadd.f32 1e-05, %v763_v63  ;;  %v9408_v8 = vpop.eup %9407  ;;  %v748_v9 = vpop.xlane.xlu1 %747  ;;  %8498 = vmatmul.mubr.msk.bf16.vlgmr.msra.gmra.mrb[0].mxu0 %vm603_vm1, %v10508_v58  ;;  %v846_v46 = vadd.f32 %v10489_v45, %v824_v61  ;;  %v804_v16 = vmul.f32 %v9406_v7, %v10354_v20  ;;  %v9379_v61 = vld [vmem:[%s15099_s5] sm:$0xff]  }
 0x163   : > { %9417 = vrsqrt.f32 %v778_v53  ;;  %v764_v22 = vmul.f32 0.015625, %v748_v9  ;;  %1067 = vmatpush1.bf16.msra.mxu0 %v10424_v36  ;;  %v805_v23 = vmul.f32 %v9408_v8, %v10363_v31  ;;  %v847_v30 = vadd.f32 %v10489_v45, %v825_v2 }
 0x164   : > { %9419 = vrsqrt.f32 %v779_v62  ;;  %v10519_v24 = vpack.c.bf16 %v846_v46, %v845_v0  ;;  %v826_v25 = vmul.f32 %v10484_v1, %v804_v16  ;;  %1068 = vmatprep.subr.bf16.mxu0 %v10433_v40 }
 0x165   : > { %v9410_v26 = vpop.eup %9409  ;;  %v780_v29 = vadd.f32 1e-05, %v764_v22  ;;  %v827_v36 = vmul.f32 %v10484_v1, %v805_v23 }
 0x166   : > { %v9412_v54 = vpop.eup %9411  ;;  %8501 = vmatprep.mubr.msk.bf16.mxu0 %vm603_vm1, %v10519_v24  ;;  %7942 = vmatmul.mubr.msk.bf16.vlgmr.msra.gmra.mrb[0].mxu1 %vm603_vm1, %v10519_v24  ;;  %v848_v20 = vadd.f32 %v10489_v45, %v826_v25  ;;  %v806_v31 = vmul.f32 %v9410_v26, %v10366_v34 }
 0x167   : > { %9421 = vrsqrt.f32 %v780_v29  ;;  %1069 = vmatpush1.bf16.msra.mxu0 %v10438_v41  ;;  %1128 = vmatprep.mubr.bf16.mxu1 %v15116_v51  ;;  %v807_v40 = vmul.f32 %v9412_v54, %v10375_v47  ;;  %v849_v34 = vadd.f32 %v10489_v45, %v827_v36 }
 0x168   : > { %v10534_v39 = vpack.c.bf16 %v848_v20, %v847_v30  ;;  %v828_v42 = vmul.f32 %v10484_v1, %v806_v31  ;;  %1070 = vmatprep.subr.bf16.mxu0 %v10448_v43  ;;  %v1222_v20 = vld [vmem:[#allocation3] sm:$0xe0] }
 0x169   : > { %v9414_v52 = vpop.eup %9413  ;;  %v829_v55 = vmul.f32 %v10484_v1, %v807_v40 }
 0x16a   : > { %v9416_v56 = vpop.eup %9415  ;;  %8502 = vmatmul.mubr.msk.bf16.gmra.mrb[4].mxu0 %vm603_vm1, %v10534_v39  ;;  %v850_v41 = vadd.f32 %v10489_v45, %v828_v42  ;;  %v808_v63 = vmul.f32 %v9414_v52, %v10378_v48 }
 0x16b   : > { %1071 = vmatpush1.bf16.msra.mxu0 %v10453_v44  ;;  %v809_v47 = vmul.f32 %v9416_v56, %v10387_v59  ;;  %v851_v53 = vadd.f32 %v10489_v45, %v829_v55  ;;  %v15114_v56 = vsub.s32 5, %v10471_v10 }
 0x16c   : > { %v861_v57 = vpack.c.bf16 %v850_v41, %v849_v34  ;;  %v830_v43 = vmul.f32 %v10484_v1, %v808_v63  ;;  %1072 = vmatprep.subr.bf16.mxu0 %v10460_v49 }
 0x16d   : > { %v9418_v7 = vpop.eup %9417  ;;  %v831_v44 = vmul.f32 %v10484_v1, %v809_v47  ;;  %v1593_v47 = vld [vmem:[%s15100_s6] sm:$0xa] }
 0x16e   : > { %v9420_v62 = vpop.eup %9419  ;;  %8505 = vmatprep.mubr.msk.bf16.mxu0 %vm603_vm1, %v861_v57  ;;  %7943 = vmatmul.mubr.msk.bf16.gmra.mrb[4].mxu1 %vm603_vm1, %v10534_v39  ;;  %v852_v48 = vadd.f32 %v10489_v45, %v830_v43  ;;  %v810_v59 = vmul.f32 %v9418_v7, %v10390_v60 }
 0x16f   : > { %1138 = vmatprep.mubr.bf16.mxu1 %v15116_v51  ;;  %v811_v49 = vmul.f32 %v9420_v62, %v10399_v11  ;;  %1073 = vmatpush1.bf16.msra.mxu0 %v10465_v50  ;;  %v853_v0 = vadd.f32 %v10489_v45, %v831_v44  ;;  %v10650_v62 = vsub.s32 1, %v10471_v10 }
 0x170   : > { %v862_v2 = vpack.c.bf16 %v852_v48, %v851_v53  ;;  %v832_v8 = vmul.f32 %v10484_v1, %v810_v59  ;;  %8513 = vmatprep.subr.bf16.mxu0 %v9379_v61  ;;  %v10652_v48 = vunpack.c.l.bf16 %v1593_v47  ;;  %v15113_v59 = vsub.s32 6, %v10471_v10 }
 0x171   : > { %v9422_v9 = vpop.eup %9421  ;;  %v833_v16 = vmul.f32 %v10484_v1, %v811_v49  ;;  %15376 = vst [vmem:[#allocation33_spill] sm:$0xff] %v10650_v62 }
 0x172   : > { %8506 = vmatmul.mubr.msk.bf16.gmra.mrb[8].mxu0 %vm603_vm1, %v862_v2  ;;  %v854_v46 = vadd.f32 %v10489_v45, %v832_v8  ;;  %v812_v60 = vmul.f32 %v9422_v9, %v10402_v15  ;;  %v9380_v15 = vld [vmem:[%s15099_s5 + $0x8] sm:$0xff]  }
 0x173   : > { %v855_v50 = vadd.f32 %v10489_v45, %v833_v16  ;;  %v1603_v16 = vrot.slane %v10652_v48, %v15113_v59 }
 0x174   : > { %v863_v22 = vpack.c.bf16 %v854_v46, %v853_v0  ;;  %v834_v11 = vmul.f32 %v10484_v1, %v812_v60  ;;  %v9381_v1 = vld [vmem:[%s15099_s5 + $0x10] sm:$0xff]   ;;  %v10666_v0 = vsub.s32 2, %v10471_v10  ;;  %v10669_v46 = vsub.s32 7, %v10471_v10 }
 0x176   : > { %8509 = vmatprep.mubr.msk.bf16.mxu0 %vm603_vm1, %v863_v22  ;;  %7944 = vmatmul.mubr.msk.bf16.gmra.mrb[8].mxu1 %vm603_vm1, %v861_v57  ;;  %v856_v23 = vadd.f32 %v10489_v45, %v834_v11  ;;  %v9382_v45 = vld [vmem:[%s15099_s5 + $0x18] sm:$0xff]   ;;  %15379 = vst [vmem:[#allocation36_spill] sm:$0xff] %v10669_v46 }
 0x177   : > { %1148 = vmatprep.mubr.bf16.mxu1 %v15116_v51 }
 0x178   : > { %v864_v25 = vpack.c.bf16 %v856_v23, %v855_v50 }
 0x17a   : > { %8510 = vmatmul.mubr.msk.bf16.gmra.mrb[12].mxu0 %vm603_vm1, %v864_v25 }
 0x17b   : > { %1098 = vmatprep.mubr.bf16.mxu0 %v15116_v51 }
 0x17e   : > { %7945 = vmatmul.mubr.msk.bf16.gmra.mrb[12].mxu1 %vm603_vm1, %v862_v2 }
 0x17f   : > { %1158 = vmatprep.mubr.bf16.mxu1 %v15116_v51 }
 0x182   : > { %7940 = vmatmul.mubr.msk.bf16.vlgmr.msra.gmra.mrb[16].mxu0 %vm603_vm1, %v10497_v21 }
 0x183   : > { %8514 = vmatpush3.bf16.msra.mxu0 %v9379_v61  ;;  %1108 = vmatprep.mubr.bf16.mxu0 %v15116_v51 }
 0x184   : > { %8515 = vmatprep.subr.bf16.mxu0 %v9380_v15 }
 0x186   : > { %7946 = vmatmul.mubr.msk.bf16.gmra.mrb[16].mxu1 %vm603_vm1, %v863_v22 }
 0x187   : > { %8516 = vmatpush3.bf16.msra.mxu0 %v9380_v15  ;;  %1168 = vmatprep.mubr.bf16.mxu1 %v15116_v51 }
 0x188   : > { %8517 = vmatprep.subr.bf16.mxu0 %v9381_v1 }
 0x18a   : > { %7941 = vmatmul.mubr.msk.bf16.gmra.mrb[20].mxu0 %vm603_vm1, %v10508_v58 }
 0x18b   : > { %8518 = vmatpush3.bf16.msra.mxu0 %v9381_v1  ;;  %8521 = vmatprep.mubr.msk.bf16.mxu0 %vm603_vm1, %v10497_v21  ;;  %v1256_v21 = vld [vmem:[%s15100_s6] sm:$0x5] }
 0x18c   : > { %8519 = vmatprep.subr.bf16.mxu0 %v9382_v45 }
 0x18e   : > { %7947 = vmatmul.mubr.msk.bf16.gmra.mrb[20].mxu1 %vm603_vm1, %v864_v25 }
 0x18f   : > { %8520 = vmatpush3.bf16.msra.mxu0 %v9382_v45 }
 0x192   : > { %8522 = vmatmul.mubr.msk.bf16.vlgmr.msra.gmra.mrb[24].mxu0 %vm603_vm1, %v10508_v58  ;;  %v1220_v58 = vld [vmem:[%s15101_s7] sm:$0x3] }
 0x193   : > { %8525 = vmatprep.mubr.msk.bf16.mxu0 %vm603_vm1, %v10519_v24  ;;  %v10612_v24 = vunpack.c.l.bf16 %v1256_v21  ;;  %v1221_v26 = vunpack.c.l.bf16 %v1220_v58  ;;  %v1826_v21 = vrot.slane %v10652_v48, %v10669_v46 }
 0x195   : > { %v1262_v29 = vrot.slane %v10612_v24, %v10477_v35  ;;  %v1315_v30 = vrot.slane %v1221_v26, %v10477_v35  ;;  %v1375_v61 = vrot.slane %v10612_v24, %v15114_v56  ;;  %v1319_v23 = vrot.slane %v1221_v26, %v10666_v0 }
 0x196   : > { %v1371_v59 = vrot.slane %v10612_v24, %v10650_v62 }
 0x197   : > { %v10618_v54 = vrot.slane %v1262_v29, %v10477_v35  ;;  %v10622_v36 = vrot.slane %v1315_v30, %v10477_v35  ;;  %v10663_v8 = vrot.slane %v1375_v61, %v10650_v62  ;;  %v10690_v29 = vrot.slane %v1603_v16, %v10666_v0 }
 0x199   : > { %v1277_v31 = vmul.f32 %v10618_v54, %v1222_v20  ;;  %15369 = vst [vmem:[#allocation26_spill] sm:$0xff] %v10622_v36  ;;  %v10696_v20 = vrot.slane %v1319_v23, %v10477_v35 }
 0x19a   : > { %8526 = vmatmul.mubr.msk.bf16.gmra.mrb[28].mxu0 %vm603_vm1, %v10534_v39 }
 0x19b   : > { %8529 = vmatprep.mubr.msk.bf16.mxu0 %vm603_vm1, %v861_v57  ;;  %v10625_v40 = vadd.f32 %v10622_v36, %v1277_v31  ;;  %v15115_v57 = vsub.s32 4, %v10471_v10 }
 0x19d   : > { %v1266_v49 = vrot.slane %v10612_v24, %v15115_v57 }
 0x19f   : > { %v10676_v50 = vrot.slane %v1266_v49, %v10477_v35 }
 0x1a2   : > { %8530 = vmatmul.mubr.msk.bf16.gmra.mrb[32].mxu0 %vm603_vm1, %v862_v2 }
 0x1a3   : > { %8533 = vmatprep.mubr.msk.bf16.mxu0 %vm603_vm1, %v863_v22 }
 0x1aa   : > { %8534 = vmatmul.mubr.msk.bf16.gmra.mrb[36].mxu0 %vm603_vm1, %v864_v25  ;;  %vm6327_vm1 = vcmask 917248  }
 0x235   : > { %v10627_v39 = vpop.f32.mrb[0].mxu0 }
 0x236   : > { %15370 = vst [vmem:[#allocation27_spill] sm:$0xff] %v10627_v39  ;;  %v10629_v42 = vpop.f32.mrb[1].mxu0 }
 0x237   : > { %15371 = vst [vmem:[#allocation28_spill] sm:$0xff] %v10629_v42  ;;  %v10631_v52 = vpop.f32.mrb[2].mxu0 }
 0x238   : > { %15372 = vst [vmem:[#allocation29_spill] sm:$0xff] %v10631_v52  ;;  %v10633_v55 = vpop.f32.mrb[3].mxu0 }
 0x239   : > { %15373 = vst [vmem:[#allocation30_spill] sm:$0xff] %v10633_v55  ;;  %v1120_v34 = vpop.f32.mrb[0].mxu1 }
 0x23a   : > { %1196 = vst [vmem:[#allocation3 + $0x50] sm:$0xff] %v1120_v34  ;;  %v1122_v41 = vpop.f32.mrb[1].mxu1  ;;  %v10700_v34 = vsub.s32 3, %v10471_v10 }
 0x23b   : > { %1197 = vst.msk [vmem:[#allocation3 + $0x58] sm:$0xff] %vm1188_vm2, %v1122_v41  ;;  %v1124_v63 = vpop.f32.mrb[2].mxu1 }
 0x23c   : > { %1198 = vst [vmem:[#allocation3 + $0x60] sm:$0xff] %v1124_v63  ;;  %v1126_v43 = vpop.f32.mrb[3].mxu1  ;;  %15383 = vst [vmem:[#allocation40_spill] sm:$0xff] %v10700_v34  ;;  %v10707_v49 = vrot.slane %v1826_v21, %v10700_v34 }
 0x23d   : > { %1199 = vst.msk [vmem:[#allocation3 + $0x68] sm:$0xff] %vm1188_vm2, %v1126_v43  ;;  %v10645_v7 = vpop.f32.mrb[4].mxu0 }
 0x23e   : > { %15374 = vst [vmem:[#allocation31_spill] sm:$0xff] %v10645_v7  ;;  %v10647_v53 = vpop.f32.mrb[5].mxu0 }
 0x23f   : > { %15375 = vst [vmem:[#allocation32_spill] sm:$0xff] %v10647_v53  ;;  %v10655_v44 = vpop.f32.mrb[6].mxu0 }
 0x240   : > { %15377 = vst [vmem:[#allocation34_spill] sm:$0xff] %v10655_v44  ;;  %v10660_v2 = vpop.f32.mrb[7].mxu0 }
 0x241   : > { %15378 = vst [vmem:[#allocation35_spill] sm:$0xff] %v10660_v2  ;;  %v1130_v9 = vpop.f32.mrb[4].mxu1 }
 0x242   : > { %1200 = vst [vmem:[#allocation3 + $0x70] sm:$0xff] %v1130_v9  ;;  %v1132_v60 = vpop.f32.mrb[5].mxu1  ;;  %v1233_v22 = vld [vmem:[#allocation3 + $0x58] sm:$0xff] }
 0x243   : > { %1201 = vst.msk [vmem:[#allocation3 + $0x78] sm:$0xff] %vm1188_vm2, %v1132_v60  ;;  %v1134_v11 = vpop.f32.mrb[6].mxu1  ;;  %v10680_v1 = vmul.f32 %v10663_v8, %v1233_v22  ;;  %v1288_v31 = vmul.f32 %v10676_v50, %v1233_v22  ;;  %v10714_v23 = vmul.f32 %v10690_v29, %v1233_v22 }
 0x244   : > { %1202 = vst [vmem:[#allocation3 + $0x80] sm:$0xff] %v1134_v11  ;;  %v1136_v25 = vpop.f32.mrb[7].mxu1  ;;  %v1235_v15 = vld [vmem:[#allocation3 + $0x68] sm:$0xff] }
 0x245   : > { %1203 = vst.msk [vmem:[#allocation3 + $0x88] sm:$0xff] %vm1188_vm2, %v1136_v25  ;;  %v10683_v45 = vpop.f32.mrb[8].mxu0  ;;  %v1399_v26 = vmul.f32 %v10663_v8, %v1235_v15  ;;  %v15118_v63 = vrot.slane %v10680_v1, 1  ;;  %v1627_v43 = vmul.f32 %v10690_v29, %v1235_v15  ;;  %v1290_v16 = vmul.f32 %v10676_v50, %v1235_v15 }
 0x246   : > { %15380 = vst [vmem:[#allocation37_spill] sm:$0xff] %v10683_v45  ;;  %v10687_v58 = vpop.f32.mrb[9].mxu0  ;;  %v15128_v24 = vrot.slane %v10714_v23, 2 }
 0x247   : > { %15381 = vst [vmem:[#allocation38_spill] sm:$0xff] %v10687_v58  ;;  %v10693_v30 = vpop.f32.mrb[10].mxu0  ;;  %v1479_v47 = vrot.slane %v1399_v26, 1  ;;  %v1341_v26 = vadd.f32 %v10696_v20, %v1288_v31  ;;  %v1707_v57 = vrot.slane %v1627_v43, 2  ;;  %v10731_v31 = vmul.f32 %v10707_v49, %v1233_v22 }
 0x248   : > { %15382 = vst [vmem:[#allocation39_spill] sm:$0xff] %v10693_v30  ;;  %v10702_v41 = vpop.f32.mrb[11].mxu0  ;;  %v1343_v33 = vadd.f32 %v10696_v20, %v1290_v16  ;;  %v1848_v43 = vmul.f32 %v10707_v49, %v1235_v15 }
 0x249   : > { %15384 = vst [vmem:[#allocation41_spill] sm:$0xff] %v10702_v41  ;;  %v1140_v61 = vpop.f32.mrb[8].mxu1  ;;  %v1480_v11 = vsel %vm1454_vm3, %v15118_v63, %v1479_v47  ;;  %v1708_v38 = vsel %vm1682_vm4, %v15128_v24, %v1707_v57 }
 0x24a   : > { %1204 = vst [vmem:[#allocation3 + $0x90] sm:$0xff] %v1140_v61  ;;  %v1142_v9 = vpop.f32.mrb[9].mxu1  ;;  %v1237_v60 = vld [vmem:[#allocation3 + $0x78] sm:$0xff]  ;;  %v1566_v63 = vadd.f32 %v1480_v11, %v1341_v26  ;;  %v10748_v26 = vrot.slane %v1371_v59, %v10650_v62  ;;  %v15130_v59 = vrot.slane %v10731_v31, 3 }
 0x24b   : > { %1205 = vst.msk [vmem:[#allocation3 + $0x98] sm:$0xff] %vm1188_vm2, %v1142_v9  ;;  %v1144_v25 = vpop.f32.mrb[10].mxu1  ;;  %v10719_v21 = vmul.f32 %v10663_v8, %v1237_v60  ;;  %v10724_v56 = vmul.f32 %v10690_v29, %v1237_v60  ;;  %v10743_v11 = vmul.f32 %v10707_v49, %v1237_v60 }
 0x24c   : > { %1206 = vst [vmem:[#allocation3 + $0xa0] sm:$0xff] %v1144_v25  ;;  %v1146_v61 = vpop.f32.mrb[11].mxu1  ;;  %15389 = vst [vmem:[#allocation46_spill] sm:$0xff] %v10748_v26  ;;  %v1794_v28 = vadd.f32 %v1708_v38, %v1566_v63  ;;  %v1386_v27 = vmul.f32 %v10748_v26, %v1364_v32 }
 0x24d   : > { %1207 = vst.msk [vmem:[#allocation3 + $0xa8] sm:$0xff] %vm1188_vm2, %v1146_v61  ;;  %v10727_v51 = vpop.f32.mrb[12].mxu0  ;;  %v1483_v9 = vrot.slane %v10719_v21, 1  ;;  %v15390_v15 = vrot.slane %v10724_v56, 2  ;;  %v15131_v24 = vrot.slane %v10743_v11, 3 }
 0x24e   : > { %15385 = vst [vmem:[#allocation42_spill] sm:$0xff] %v10727_v51  ;;  %v10733_v25 = vpop.f32.mrb[13].mxu0 }
 0x24f   : > { %15386 = vst [vmem:[#allocation43_spill] sm:$0xff] %v10733_v25  ;;  %v10739_v61 = vpop.f32.mrb[14].mxu0  ;;  %v1484_v21 = vsel %vm1454_vm3, %v1479_v47, %v1483_v9  ;;  %v1712_v19 = vsel %vm1682_vm4, %v1707_v57, %v15390_v15  ;;  %v1239_v47 = vld [vmem:[#allocation3 + $0x88] sm:$0xff] }
 0x250   : > { %15387 = vst [vmem:[#allocation44_spill] sm:$0xff] %v10739_v61  ;;  %v10745_v22 = vpop.f32.mrb[15].mxu0  ;;  %v1568_v16 = vadd.f32 %v1484_v21, %v1343_v33  ;;  %v1922_v33 = vrot.slane %v1848_v43, 3  ;;  %v10765_v57 = vmul.f32 %v10663_v8, %v1239_v47  ;;  %v1294_v14 = vmul.f32 %v10676_v50, %v1239_v47 }
 0x251   : > { %15388 = vst [vmem:[#allocation45_spill] sm:$0xff] %v10745_v22  ;;  %v1150_v37 = vpop.f32.mrb[12].mxu1 }
 0x252   : > { %1208 = vst [vmem:[#allocation3 + $0xb0] sm:$0xff] %v1150_v37  ;;  %v1152_v18 = vpop.f32.mrb[13].mxu1  ;;  %v1796_v13 = vadd.f32 %v1712_v19, %v1568_v16  ;;  %v1923_v38 = vsel %vm1901_vm5, %v15130_v59, %v1922_v33  ;;  %v1292_v37 = vmul.f32 %v10676_v50, %v1237_v60  ;;  %v1455_v16 = vrot.slane %v1386_v27, 1 }
 0x253   : > { %1209 = vst.msk [vmem:[#allocation3 + $0xb8] sm:$0xff] %vm1188_vm2, %v1152_v18  ;;  %v1154_v21 = vpop.f32.mrb[14].mxu1  ;;  %v1927_v18 = vsel %vm1901_vm5, %v1922_v33, %v15131_v24  ;;  %v10771_v32 = vadd.f32 %v1923_v38, %v1794_v28 }
 0x254   : > { %1210 = vst [vmem:[#allocation3 + $0xc0] sm:$0xff] %v1154_v21  ;;  %v1156_v17 = vpop.f32.mrb[15].mxu1  ;;  %v10776_v15 = vadd.f32 %v1927_v18, %v1796_v13  ;;  %v1487_v21 = vrot.slane %v10765_v57, 1  ;;  %v1345_v38 = vadd.f32 %v10696_v20, %v1292_v37  ;;  %v10789_v18 = vld [vmem:[#allocation3 + $0x98] sm:$0xff] }
 0x255   : > { %1211 = vst.msk [vmem:[#allocation3 + $0xc8] sm:$0xff] %vm1188_vm2, %v1156_v17  ;;  %v1100_v19 = vpop.f32.mrb[16].mxu0  ;;  %v7959_v17 = vmul.f32 -1.442695, %v10771_v32  ;;  %v1296_v3 = vmul.f32 %v10676_v50, %v10789_v18 }
 0x256   : > { %1187 = vst [vmem:[#allocation3 + $0x10] sm:$0xff] %v1100_v19  ;;  %v1102_v63 = vpop.f32.mrb[17].mxu0  ;;  %v10774_v43 = vmul.f32 %v10748_v26, %v1100_v19  ;;  %v7961_v33 = vmul.f32 -1.442695, %v10776_v15  ;;  %v1488_v13 = vsel %vm1454_vm3, %v1483_v9, %v1487_v21  ;;  %v10787_v19 = vmul.f32 %v10690_v29, %v1239_v47 }
 0x257   : > { %1189 = vst.msk [vmem:[#allocation3 + $0x18] sm:$0xff] %vm1188_vm2, %v1102_v63  ;;  %v1104_v60 = vpop.f32.mrb[18].mxu0  ;;  %9423 = vpow2.f32 %v7959_v17 }
 0x258   : > { %15391 = vst [vmem:[#allocation47_spill] sm:$0xff] %v10774_v43  ;;  %1190 = vst [vmem:[#allocation3 + $0x20] sm:$0xff] %v1104_v60  ;;  %v1106_v59 = vpop.f32.mrb[19].mxu0  ;;  %v15134_v28 = vrot.slane %v10774_v43, 1  ;;  %v1570_v60 = vadd.f32 %v1488_v13, %v1345_v38  ;;  %9425 = vpow2.f32 %v7961_v33  ;;  %v1715_v9 = vrot.slane %v10787_v19, 2 }
 0x259   : > { %1191 = vst.msk [vmem:[#allocation3 + $0x28] sm:$0xff] %vm1188_vm2, %v1106_v59  ;;  %v1160_v27 = vpop.f32.mrb[16].mxu1  ;;  %v15393_v33 = vrot.slane %v10724_v56, 2  ;;  %v10813_v13 = vmul.f32 %v10690_v29, %v10789_v18  ;;  %v10823_v56 = vmul.f32 %v10707_v49, %v10789_v18 }
 0x25a   : > { %1212 = vst [vmem:[#allocation3 + $0xd0] sm:$0xff] %v1160_v27  ;;  %v1162_v57 = vpop.f32.mrb[17].mxu1  ;;  %v1457_v63 = vsel %vm1454_vm3, %v1455_v16, %v15134_v28  ;;  %v10800_v27 = vmul.f32 %v10707_v49, %v1239_v47  ;;  %v10805_v16 = vmul.f32 %v10663_v8, %v10789_v18  ;;  %v1223_v28 = vld [vmem:[#allocation3 + $0x8] sm:$0xe0] }
 0x25b   : > { %1213 = vst.msk [vmem:[#allocation3 + $0xd8] sm:$0xff] %vm1188_vm2, %v1162_v57  ;;  %v1164_v37 = vpop.f32.mrb[18].mxu1  ;;  %v10796_v59 = vadd.f32 %v1457_v63, %v10625_v40  ;;  %v1590_v40 = vld [vmem:[#allocation3 + $0x8] sm:$0x80]  ;;  %v1716_v38 = vsel %vm1682_vm4, %v15393_v33, %v1715_v9 }
 0x25c   : > { %1214 = vst [vmem:[#allocation3 + $0xe0] sm:$0xff] %v1164_v37  ;;  %v1166_v24 = vpop.f32.mrb[19].mxu1  ;;  %v1798_v57 = vadd.f32 %v1716_v38, %v1570_v60  ;;  %v1930_v47 = vrot.slane %v10800_v27, 3  ;;  %v15394_v60 = vrot.slane %v10743_v11, 3  ;;  %v1347_v38 = vadd.f32 %v10696_v20, %v1294_v14  ;;  %v10841_v11 = vld [vmem:[#allocation3] sm:$0x80] }
 0x25d   : > { %15392 = vst [vmem:[#allocation48_spill] sm:$0xff] %v10796_v59  ;;  %1215 = vst.msk [vmem:[#allocation3 + $0xe8] sm:$0xff] %vm1188_vm2, %v1166_v24  ;;  %v1110_v17 = vpop.f32.mrb[20].mxu0  ;;  %v10818_v24 = vmul.f32 %v10663_v8, %v1365_v12 }
 0x25e   : > { %1192 = vst [vmem:[#allocation3 + $0x30] sm:$0xff] %v1110_v17  ;;  %v1112_v19 = vpop.f32.mrb[21].mxu0  ;;  %v10826_v17 = vmul.f32 %v10690_v29, %v1590_v40  ;;  %v1931_v27 = vsel %vm1901_vm5, %v15394_v60, %v1930_v47 }
 0x25f   : > { %1193 = vst.msk [vmem:[#allocation3 + $0x38] sm:$0xff] %vm1188_vm2, %v1112_v19  ;;  %v1114_v63 = vpop.f32.mrb[22].mxu0  ;;  %v10833_v19 = vld [vmem:[#allocation3 + $0xa8] sm:$0xff]  ;;  %v10836_v5 = vadd.f32 %v1931_v27, %v1798_v57  ;;  %v10850_v57 = vld [vmem:[%s15102_s8] ss:$0 sm:$0xff] }
 0x260   : > { %1194 = vst [vmem:[#allocation3 + $0x40] sm:$0xff] %v1114_v63  ;;  %v1116_v33 = vpop.f32.mrb[23].mxu0  ;;  %v15395_v63 = vrot.slane %v10805_v16, 1  ;;  %v10856_v27 = vmul.f32 %v10663_v8, %v10833_v19 }
 0x261   : > { %1195 = vst.msk [vmem:[#allocation3 + $0x48] sm:$0xff] %vm1188_vm2, %v1116_v33  ;;  %v1170_v37 = vpop.f32.mrb[20].mxu1  ;;  %v1278_v33 = vmul.f32 %v10676_v50, %v1223_v28  ;;  %v10873_v28 = vmul.f32 %v10707_v49, %v10833_v19 }
 0x262   : > { %v1492_v40 = vsel %vm1454_vm3, %v1487_v21, %v15395_v63  ;;  %1216 = vst [vmem:[#allocation3 + $0xf0] sm:$0xff] %v1170_v37  ;;  %v1172_v6 = vpop.f32.mrb[21].mxu1  ;;  %v7963_v21 = vmul.f32 -1.442695, %v10836_v5  ;;  %v9424_v63 = vpop.eup %9423 }
 0x263   : > { %v1572_v60 = vadd.f32 %v1492_v40, %v1347_v38  ;;  %1217 = vst.msk [vmem:[#allocation3 + $0xf8] sm:$0xff] %vm1188_vm2, %v1172_v6  ;;  %v1174_v12 = vpop.f32.mrb[22].mxu1  ;;  %v15396_v40 = vrot.slane %v10813_v13, 2  ;;  %v9426_v37 = vpop.eup %9425  ;;  %v2148_v61 = vadd.f32 1.0, %v9424_v63  ;;  %v10869_v38 = vmul.f32 %v10690_v29, %v10833_v19 }
 0x264   : > { %1218 = vst [vmem:[#allocation3 + $0x100] sm:$0xff] %v1174_v12  ;;  %2032 = vst [vmem:[#allocation3] sm:$0xe0] %v1174_v12  ;;  %v1176_v6 = vpop.f32.mrb[23].mxu1  ;;  %9427 = vpow2.f32 %v7963_v21  ;;  %v15397_v63 = vrot.slane %v10823_v56, 3 }
 0x265   : > { %v1720_v14 = vsel %vm1682_vm4, %v1715_v9, %v15396_v40  ;;  %1219 = vst.msk [vmem:[#allocation3 + $0x108] sm:$0xff] %vm1188_vm2, %v1176_v6  ;;  %v8523_v4 = vpop.f32.mrb[24].mxu0  ;;  %v2150_v40 = vadd.f32 1.0, %v9426_v37  ;;  %9429 = vrcp.f32 %v2148_v61  ;;  %v1349_v37 = vadd.f32 %v10696_v20, %v1296_v3 }
 0x266   : > { %2034 = vst.msk [vmem:[#allocation3 + $0x8] sm:$0xe0] %vm2033_vm6, %v1176_v6  ;;  %v1800_v12 = vadd.f32 %v1720_v14, %v1572_v60  ;;  %v10876_v9 = vadd.f32 %v8523_v4, %v10850_v57  ;;  %v2338_v18 = vpop.f32.mrb[25].mxu0  ;;  %v10880_v6 = vadd.f32 %v10696_v20, %v1278_v33  ;;  %v1935_v22 = vsel %vm1901_vm5, %v1930_v47, %v15397_v63 }
 0x267   : > { %v10883_v14 = vadd.f32 %v10850_v57, %v2338_v18  ;;  %v8524_v60 = vpop.f32.mrb[26].mxu0  ;;  %9431 = vrcp.f32 %v2150_v40  ;;  %v15398_v63 = vrot.slane %v10856_v27, 1  ;;  %v15149_v3 = vrot.slane %v10873_v28, 3 }
 0x268   : > { %v2419_v4 = vand.u32 2147483647, %v10876_v9  ;;  %v10890_v51 = vadd.f32 %v8524_v60, %v10850_v57  ;;  %v2341_v21 = vpop.f32.mrb[27].mxu0  ;;  %v10897_v25 = vadd.f32 %v1935_v22, %v1800_v12  ;;  %v15399_v60 = vrot.slane %v10805_v16, 1 }
 0x269   : > { %v2417_v33 = vand.u32 2147483647, %v10883_v14  ;;  %v10895_v18 = vadd.f32 %v10850_v57, %v2341_v21  ;;  %vm6685_vm2 = vcmask 1048448  }
 0x26a   : > { %v2435_v41 = vsub.f32 0.0, %v2419_v4  ;;  %v2420_v47 = vand.u32 2147483647, %v10890_v51  ;;  %v1496_v40 = vsel %vm1454_vm3, %v15399_v60, %v15398_v63  ;;  %v7965_v63 = vmul.f32 -1.442695, %v10897_v25 }
 0x26b   : > { %v2433_v45 = vsub.f32 0.0, %v2417_v33  ;;  %v2418_v22 = vand.u32 2147483647, %v10895_v18  ;;  %v1574_v60 = vadd.f32 %v1496_v40, %v1349_v37  ;;  %v15401_v4 = vrot.slane %v10813_v13, 2 }
 0x26c   : > { %v2453_v12 = vmul.f32 1.442695, %v2435_v41  ;;  %v2436_v61 = vsub.f32 0.0, %v2420_v47  ;;  %v15400_v41 = vrot.slane %v10869_v38, 2  ;;  %v15402_v37 = vrot.slane %v10823_v56, 3 }
 0x26d   : > { %v2449_v2 = vmul.f32 1.442695, %v2433_v45  ;;  %v2434_v16 = vsub.f32 0.0, %v2418_v22  ;;  %v8527_v53 = vpop.f32.mrb[28].mxu0 }
 0x26e   : > { %9433 = vpow2.f32 %v2453_v12  ;;  %v2455_v58 = vmul.f32 1.442695, %v2436_v61  ;;  %v10914_v21 = vadd.f32 %v8527_v53, %v10850_v57  ;;  %v2354_v33 = vpop.f32.mrb[29].mxu0  ;;  %v1724_v47 = vsel %vm1682_vm4, %v15401_v4, %v15400_v41  ;;  %v9428_v61 = vpop.eup %9427 }
 0x26f   : > { %9435 = vpow2.f32 %v2449_v2  ;;  %v2451_v30 = vmul.f32 1.442695, %v2434_v16  ;;  %v10922_v45 = vadd.f32 %v10850_v57, %v2354_v33  ;;  %v8528_v22 = vpop.f32.mrb[30].mxu0  ;;  %v1939_v53 = vsel %vm1901_vm5, %v15402_v37, %v15149_v3  ;;  %v9430_v4 = vpop.eup %9429 }
 0x270   : > { %9437 = vpow2.f32 %v2455_v58  ;;  %v2423_v40 = vand.u32 2147483647, %v10914_v21  ;;  %v10931_v13 = vadd.f32 %v8528_v22, %v10850_v57  ;;  %v2357_v12 = vpop.f32.mrb[31].mxu0  ;;  %v1802_v2 = vadd.f32 %v1724_v47, %v1574_v60  ;;  %v2568_v58 = vld [vmem:[%s15107_s13] sm:$0xff] }
 0x271   : > { %9439 = vpow2.f32 %v2451_v30  ;;  %v2421_v33 = vand.u32 2147483647, %v10922_v45  ;;  %v10936_v41 = vadd.f32 %v10850_v57, %v2357_v12  ;;  %v9432_v56 = vpop.eup %9431  ;;  %v10941_v22 = vmul.f32 %v9430_v4, %v10771_v32  ;;  %8569 = vmatprep.mubr.f32.mxu0 %v2568_v58 }
 0x272   : > { %v2439_v37 = vsub.f32 0.0, %v2423_v40  ;;  %v2424_v3 = vand.u32 2147483647, %v10931_v13  ;;  %v10946_v47 = vmul.f32 %v9432_v56, %v10776_v15  ;;  %9441 = vpow2.f32 %v7965_v63 }
 0x273   : > { %15403 = vst [vmem:[#allocation49_spill] sm:$0xff] %v10941_v22  ;;  %v2437_v44 = vsub.f32 0.0, %v2421_v33  ;;  %v2422_v30 = vand.u32 2147483647, %v10936_v41  ;;  %v15152_v40 = vrot.slane %v10941_v22, 5 }
 0x274   : > { %v2461_v16 = vmul.f32 1.442695, %v2439_v37  ;;  %v2440_v12 = vsub.f32 0.0, %v2424_v3  ;;  %v15153_v33 = vrot.slane %v10946_v47, 5  ;;  %v2152_v37 = vadd.f32 1.0, %v9428_v61 }
 0x275   : > { %v2457_v32 = vmul.f32 1.442695, %v2437_v44  ;;  %v2438_v4 = vsub.f32 0.0, %v2422_v30  ;;  %v8531_v60 = vpop.f32.mrb[32].mxu0 }
 0x276   : > { %9443 = vpow2.f32 %v2461_v16  ;;  %v2463_v15 = vmul.f32 1.442695, %v2440_v12  ;;  %v10955_v56 = vadd.f32 %v8531_v60, %v10850_v57  ;;  %v2370_v3 = vpop.f32.mrb[33].mxu0  ;;  %v10962_v44 = vsel %vm3284_vm7, %v15152_v40, %v15153_v33 }
 0x277   : > { %9445 = vpow2.f32 %v2457_v32  ;;  %v2459_v7 = vmul.f32 1.442695, %v2438_v4  ;;  %15404 = vst [vmem:[#allocation50_spill] sm:$0xff] %v10962_v44  ;;  %v10965_v30 = vadd.f32 %v10850_v57, %v2370_v3  ;;  %v8532_v63 = vpop.f32.mrb[34].mxu0  ;;  %3429 = vrot.lane.b32.xlu1 %v10962_v44, %s10102_s19  ;;  %v10973_v12 = vadd.f32 %v1939_v53, %v1802_v2 }
 0x278   : > { %v9434_v16 = vpop.eup %9433  ;;  %9447 = vpow2.f32 %v2463_v15  ;;  %v2427_v61 = vand.u32 2147483647, %v10955_v56  ;;  %v10971_v58 = vadd.f32 %v8532_v63, %v10850_v57  ;;  %v2373_v60 = vpop.f32.mrb[35].mxu0 }
 0x279   : > { %v9436_v32 = vpop.eup %9435  ;;  %v2483_v4 = vadd.f32 1.0, %v9434_v16  ;;  %9449 = vpow2.f32 %v2459_v7  ;;  %v2425_v40 = vand.u32 2147483647, %v10965_v30  ;;  %v10980_v53 = vadd.f32 %v10850_v57, %v2373_v60 }
 0x27a   : > { %v9438_v15 = vpop.eup %9437  ;;  %v2481_v33 = vadd.f32 1.0, %v9436_v32  ;;  %v2443_v55 = vsub.f32 0.0, %v2427_v61  ;;  %v2428_v42 = vand.u32 2147483647, %v10971_v58 }
 0x27b   : > { %v9440_v52 = vpop.eup %9439  ;;  %9451 = vlog2.f32 %v2483_v4  ;;  %v2484_v63 = vadd.f32 1.0, %v9438_v15  ;;  %v2441_v39 = vsub.f32 0.0, %v2425_v40  ;;  %v2426_v61 = vand.u32 2147483647, %v10980_v53 }
 0x27c   : > { %9453 = vlog2.f32 %v2481_v33  ;;  %v2482_v7 = vadd.f32 1.0, %v9440_v52  ;;  %v2469_v2 = vmul.f32 1.442695, %v2443_v55  ;;  %v2444_v16 = vsub.f32 0.0, %v2428_v42  ;;  %v9442_v15 = vpop.eup %9441 }
 0x27d   : > { %9455 = vlog2.f32 %v2484_v63  ;;  %v2465_v3 = vmul.f32 1.442695, %v2441_v39  ;;  %v8535_v44 = vpop.f32.mrb[36].mxu0  ;;  %v2442_v52 = vsub.f32 0.0, %v2426_v61  ;;  %v10992_v55 = vmul.f32 -1.442695, %v10973_v12 }
 0x27e   : > { %9457 = vlog2.f32 %v2482_v7  ;;  %v2471_v10 = vmul.f32 1.442695, %v2444_v16  ;;  %v10986_v40 = vadd.f32 %v8535_v44, %v10850_v57  ;;  %v2386_v60 = vpop.f32.mrb[37].mxu0  ;;  %v2154_v63 = vadd.f32 1.0, %v9442_v15 }
 0x27f   : > { %9459 = vpow2.f32 %v2469_v2  ;;  %v10989_v42 = vadd.f32 %v10850_v57, %v2386_v60  ;;  %v8536_v39 = vpop.f32.mrb[38].mxu0  ;;  %v1298_v44 = vmul.f32 %v10676_v50, %v10833_v19  ;;  %v2467_v2 = vmul.f32 1.442695, %v2442_v52 }
 0x280   : > { %v9444_v33 = vpop.eup %9443  ;;  %9461 = vpow2.f32 %v2465_v3  ;;  %v2431_v7 = vand.u32 2147483647, %v10986_v40  ;;  %v2389_v16 = vpop.f32.mrb[39].mxu0  ;;  %v11000_v22 = vadd.f32 %v8536_v39, %v10850_v57 }
 0x281   : > { %v9446_v4 = vpop.eup %9445  ;;  %v2487_v32 = vadd.f32 1.0, %v9444_v33  ;;  %9463 = vpow2.f32 %v2471_v10  ;;  %v2429_v46 = vand.u32 2147483647, %v10989_v42  ;;  %v11003_v19 = vadd.f32 %v10850_v57, %v2389_v16 }
 0x282   : > { %v9448_v60 = vpop.eup %9447  ;;  %v2485_v62 = vadd.f32 1.0, %v9446_v4  ;;  %9465 = vrcp.f32 %v2152_v37  ;;  %v2447_v35 = vsub.f32 0.0, %v2431_v7  ;;  %v2432_v7 = vand.u32 2147483647, %v11000_v22 }
 0x283   : > { %v9450_v3 = vpop.eup %9449  ;;  %9467 = vlog2.f32 %v2487_v32  ;;  %v2488_v15 = vadd.f32 1.0, %v9448_v60  ;;  %v2445_v33 = vsub.f32 0.0, %v2429_v46  ;;  %v2430_v59 = vand.u32 2147483647, %v11003_v19 }
 0x284   : > { %9469 = vlog2.f32 %v2485_v62  ;;  %v2486_v10 = vadd.f32 1.0, %v9450_v3  ;;  %v2477_v37 = vmul.f32 1.442695, %v2447_v35  ;;  %v2448_v62 = vsub.f32 0.0, %v2432_v7 }
 0x285   : > { %v9452_v61 = vpop.eup %9451  ;;  %9471 = vlog2.f32 %v2488_v15  ;;  %v2473_v39 = vmul.f32 1.442695, %v2445_v33  ;;  %v2446_v35 = vsub.f32 0.0, %v2430_v59  ;;  %v1245_v15 = vld [vmem:[#allocation3 + $0xb8] sm:$0xff]  ;;  %v1351_v4 = vadd.f32 %v10696_v20, %v1298_v44 }
 0x286   : > { %v9454_v32 = vpop.eup %9453  ;;  %v2502_v60 = vmul.f32 0.6931472, %v9452_v61  ;;  %9473 = vlog2.f32 %v2486_v10  ;;  %v15405_v61 = vmax.f32 %v10876_v9, 0.0  ;;  %v2479_v26 = vmul.f32 1.442695, %v2448_v62 }
 0x287   : > { %v9456_v57 = vpop.eup %9455  ;;  %v2498_v16 = vmul.f32 0.6931472, %v9454_v32  ;;  %9475 = vpow2.f32 %v2467_v2  ;;  %v15407_v2 = vmax.f32 %v10883_v14, 0.0  ;;  %v2475_v9 = vmul.f32 1.442695, %v2446_v35 }
 0x288   : > { %v9458_v46 = vpop.eup %9457  ;;  %v2504_v52 = vmul.f32 0.6931472, %v9456_v57  ;;  %9477 = vrcp.f32 %v2154_v63  ;;  %v11013_v10 = vadd.f32 %v2502_v60, %v15405_v61  ;;  %v15409_v57 = vmax.f32 %v10890_v51, 0.0 }
 0x289   : > { %v9460_v43 = vpop.eup %9459  ;;  %v2500_v33 = vmul.f32 0.6931472, %v9458_v46  ;;  %9479 = vpow2.f32 %v2477_v37  ;;  %v11017_v7 = vadd.f32 %v2498_v16, %v15407_v2  ;;  %v11024_v60 = vmul.f32 %v10663_v8, %v1245_v15 }
 0x28a   : > { %15406 = vst [vmem:[#allocation51_spill] sm:$0xff] %v11013_v10  ;;  %v9462_v32 = vpop.eup %9461  ;;  %v11021_v63 = vadd.f32 %v2504_v52, %v15409_v57  ;;  %v2491_v59 = vadd.f32 1.0, %v9460_v43  ;;  %9481 = vpow2.f32 %v2473_v39  ;;  %v11027_v14 = vmul.f32 %v10690_v29, %v1245_v15 }
 0x28b   : > { %15408 = vst [vmem:[#allocation52_spill] sm:$0xff] %v11017_v7  ;;  %v9464_v44 = vpop.eup %9463  ;;  %v2489_v3 = vadd.f32 1.0, %v9462_v32  ;;  %9483 = vpow2.f32 %v2479_v26  ;;  %v11030_v16 = vmul.f32 %v10707_v49, %v1245_v15  ;;  %v15411_v43 = vmax.f32 %v10895_v18, 0.0 }
 0x28c   : > { %15410 = vst [vmem:[#allocation53_spill] sm:$0xff] %v11021_v63  ;;  %v9466_v37 = vpop.eup %9465  ;;  %9485 = vlog2.f32 %v2491_v59  ;;  %v2492_v62 = vadd.f32 1.0, %v9464_v44  ;;  %v15171_v39 = vrot.slane %v11024_v60, 1  ;;  %v15173_v61 = vrot.slane %v11027_v14, 2 }
 0x28d   : > { %v9468_v51 = vpop.eup %9467  ;;  %v11034_v52 = vadd.f32 %v2500_v33, %v15411_v43  ;;  %9487 = vlog2.f32 %v2489_v3  ;;  %v2254_v26 = vmul.f32 %v9466_v37, %v10836_v5  ;;  %v1300_v32 = vmul.f32 %v10676_v50, %v1245_v15 }
 0x28e   : > { %v9470_v46 = vpop.eup %9469  ;;  %v2510_v35 = vmul.f32 0.6931472, %v9468_v51  ;;  %9489 = vlog2.f32 %v2492_v62  ;;  %v15413_v5 = vrot.slane %v10856_v27, 1  ;;  %v15414_v15 = vmax.f32 %v10914_v21, 0.0 }
 0x28f   : > { %15412 = vst [vmem:[#allocation54_spill] sm:$0xff] %v11034_v52  ;;  %v9472_v2 = vpop.eup %9471  ;;  %v2506_v57 = vmul.f32 0.6931472, %v9470_v46  ;;  %v3399_v59 = vrot.slane %v2254_v26, 5  ;;  %v3361_v44 = vpack.c.bf16 %v2254_v26, %v10946_v47  ;;  %9491 = vpow2.f32 %v2475_v9 }
 0x290   : > { %v9474_v18 = vpop.eup %9473  ;;  %v2512_v33 = vmul.f32 0.6931472, %v9472_v2  ;;  %9493 = vpow2.f32 %v10992_v55  ;;  %v1500_v3 = vsel %vm1454_vm3, %v15413_v5, %v15171_v39  ;;  %v11050_v51 = vadd.f32 %v2510_v35, %v15414_v15 }
 0x291   : > { %v9476_v62 = vpop.eup %9475  ;;  %v2508_v43 = vmul.f32 0.6931472, %v9474_v18  ;;  %v15416_v9 = vrot.slane %v10946_v47, 5  ;;  %v3673_v55 = vshrl.u32 %v3361_v44, 16  ;;  %v15418_v2 = vmax.f32 %v10922_v45, 0.0 }
 0x292   : > { %15415 = vst [vmem:[#allocation55_spill] sm:$0xff] %v11050_v51  ;;  %v9478_v46 = vpop.eup %9477  ;;  %v2490_v5 = vadd.f32 1.0, %v9476_v62  ;;  %v3676_v39 = vshll.u32 %v3361_v44, 16  ;;  %v1576_v21 = vadd.f32 %v1500_v3, %v1351_v4  ;;  %v15420_v18 = vmax.f32 %v10931_v13, 0.0 }
 0x293   : > { %v11055_v26 = vsel %vm3284_vm7, %v15416_v9, %v3399_v59  ;;  %v11059_v27 = vadd.f32 %v2506_v57, %v15418_v2  ;;  %v9480_v35 = vpop.eup %9479  ;;  %v15422_v47 = vmax.f32 %v10936_v41, 0.0  ;;  %v11072_v37 = vmul.f32 %v9478_v46, %v10897_v25 }
 0x294   : > { %15417 = vst [vmem:[#allocation56_spill] sm:$0xff] %v11055_v26  ;;  %3431 = vrot.lane.b32.xlu1 %v11055_v26, %s10102_s19  ;;  %v11065_v15 = vadd.f32 %v2512_v33, %v15420_v18  ;;  %v15424_v45 = vrot.slane %v10869_v38, 2  ;;  %v9482_v44 = vpop.eup %9481  ;;  %9495 = vlog2.f32 %v2490_v5  ;;  %v2495_v4 = vadd.f32 1.0, %v9480_v35  ;;  %v1247_v33 = vld [vmem:[#allocation3 + $0xc8] sm:$0xff] }
 0x295   : > { %15419 = vst [vmem:[#allocation57_spill] sm:$0xff] %v11059_v27  ;;  %v11069_v9 = vadd.f32 %v2508_v43, %v15422_v47  ;;  %v3675_v3 = vrot.slane %v3673_v55, 2  ;;  %v9484_v62 = vpop.eup %9483  ;;  %v15172_v41 = vrot.slane %v11072_v37, 5  ;;  %v2493_v43 = vadd.f32 1.0, %v9482_v44 }
 0x296   : > { %15421 = vst [vmem:[#allocation58_spill] sm:$0xff] %v11065_v15  ;;  %v1728_v57 = vsel %vm1682_vm4, %v15424_v45, %v15173_v61  ;;  %v3678_v2 = vrot.slane %v3676_v39, 3  ;;  %v15425_v25 = vrot.slane %v11030_v16, 3  ;;  %v15426_v46 = vrot.slane %v10873_v28, 3  ;;  %v9486_v38 = vpop.eup %9485 }
 0x297   : > { %15423 = vst [vmem:[#allocation59_spill] sm:$0xff] %v11069_v9  ;;  %v1804_v13 = vadd.f32 %v1728_v57, %v1576_v21  ;;  %9497 = vlog2.f32 %v2495_v4  ;;  %v2496_v47 = vadd.f32 1.0, %v9484_v62  ;;  %v1353_v55 = vadd.f32 %v10696_v20, %v1300_v32  ;;  %v9488_v5 = vpop.eup %9487 }
 0x298   : > { %v1943_v18 = vsel %vm1901_vm5, %v15426_v46, %v15425_v25  ;;  %v2518_v21 = vmul.f32 0.6931472, %v9486_v38  ;;  %v11091_v35 = vsel %vm3284_vm7, %v3399_v59, %v15172_v41  ;;  %9499 = vlog2.f32 %v2493_v43  ;;  %v9490_v28 = vpop.eup %9489  ;;  %v11112_v46 = vld [vmem:[%s15103_s9] ss:$0 sm:$0xff]  ;;  %v11123_v41 = vld [vmem:[#allocation3 + $0xd8] sm:$0xff] }
 0x299   : > { %v11085_v45 = vadd.f32 %v1943_v18, %v1804_v13  ;;  %15427 = vst [vmem:[#allocation60_spill] sm:$0xff] %v11091_v35  ;;  %v1411_v39 = vmul.f32 %v10663_v8, %v1247_v33  ;;  %v2514_v57 = vmul.f32 0.6931472, %v9488_v5  ;;  %3433 = vrot.lane.b32.xlu1 %v11091_v35, %s10102_s19  ;;  %9501 = vlog2.f32 %v2496_v47  ;;  %v9492_v4 = vpop.eup %9491 }
 0x29a   : > { %v11098_v32 = vmul.f32 %v10690_v29, %v1247_v33  ;;  %v15428_v13 = vmax.f32 %v10955_v56, 0.0  ;;  %v11104_v59 = vor.u32 %v3678_v2, %v3675_v3  ;;  %v11107_v25 = vmul.f32 %v10707_v49, %v1247_v33  ;;  %v9494_v18 = vpop.eup %9493 }
 0x29b   : > { %v7969_v44 = vmul.f32 -1.442695, %v11085_v45  ;;  %v1503_v43 = vrot.slane %v1411_v39, 1  ;;  %v2520_v38 = vmul.f32 0.6931472, %v9490_v28  ;;  %v2494_v47 = vadd.f32 1.0, %v9492_v4 }
 0x29c   : > { %v11102_v62 = vadd.f32 %v2518_v21, %v15428_v13  ;;  %15429 = vst [vmem:[#allocation61_spill] sm:$0xff] %v11104_v59  ;;  %v1731_v5 = vrot.slane %v11098_v32, 2  ;;  %v15430_v56 = vmax.f32 %v10965_v30, 0.0  ;;  %v2156_v3 = vadd.f32 1.0, %v9494_v18 }
 0x29d   : > { %9503 = vpow2.f32 %v7969_v44  ;;  %v15432_v2 = vrot.slane %v11024_v60, 1  ;;  %v1946_v13 = vrot.slane %v11107_v25, 3  ;;  %v15433_v28 = vrot.slane %v11027_v14, 2 }
 0x29e   : > { %v11117_v21 = vadd.f32 %v2514_v57, %v15430_v56  ;;  %9505 = vlog2.f32 %v2494_v47  ;;  %v11130_v30 = vmul.f32 %v11112_v46, %v11017_v7  ;;  %v15435_v57 = vrot.slane %v11030_v16, 3  ;;  %v9496_v14 = vpop.eup %9495 }
 0x29f   : > { %v1504_v39 = vsel %vm1454_vm3, %v15432_v2, %v1503_v43  ;;  %v1732_v44 = vsel %vm1682_vm4, %v15433_v28, %v1731_v5  ;;  %9507 = vrcp.f32 %v2156_v3  ;;  %v11137_v32 = vmul.f32 %v11112_v46, %v11034_v52 }
 0x2a0   : > { %15431 = vst [vmem:[#allocation62_spill] sm:$0xff] %v11117_v21  ;;  %v1578_v61 = vadd.f32 %v1504_v39, %v1353_v55  ;;  %15434 = vst [vmem:[#allocation63_spill] sm:$0xff] %v11130_v30  ;;  %v1947_v60 = vsel %vm1901_vm5, %v15435_v57, %v1946_v13  ;;  %v11141_v55 = vmul.f32 %v11112_v46, %v11013_v10  ;;  %v2516_v47 = vmul.f32 0.6931472, %v9496_v14  ;;  %v1253_v14 = vld [vmem:[#allocation3 + $0xf8] sm:$0xff] }
 0x2a1   : > { %15436 = vst [vmem:[#allocation64_spill] sm:$0xff] %v11137_v32  ;;  %v11145_v25 = vmul.f32 %v11112_v46, %v11021_v63  ;;  %v1302_v18 = vmul.f32 %v10676_v50, %v1247_v33  ;;  %v11150_v16 = vmul.f32 %v10663_v8, %v11123_v41  ;;  %v9094_v56 = vpack.c.bf16 %v11137_v32, %v11130_v30  ;;  %v9498_v2 = vpop.eup %9497 }
 0x2a2   : > { %15437 = vst [vmem:[#allocation65_spill] sm:$0xff] %v11141_v55  ;;  %v1806_v4 = vadd.f32 %v1732_v44, %v1578_v61  ;;  %v11156_v3 = vmul.f32 %v10690_v29, %v11123_v41  ;;  %v11160_v61 = vmul.f32 %v10707_v49, %v11123_v41  ;;  %v15439_v39 = vmax.f32 %v10971_v58, 0.0  ;;  %v9500_v35 = vpop.eup %9499  ;;  %v1255_v58 = vld [vmem:[#allocation3 + $0x108] sm:$0x1f] }
 0x2a3   : > { %15438 = vst [vmem:[#allocation66_spill] sm:$0xff] %v11145_v25  ;;  %v9098_v44 = vpack.c.bf16 %v11145_v25, %v11141_v55  ;;  %v15182_v57 = vrot.slane %v11150_v16, 1  ;;  %v2526_v26 = vmul.f32 0.6931472, %v9498_v2  ;;  %9095 = vmatprep.subr.bf16.mxu0 %v9094_v56  ;;  %v1355_v63 = vadd.f32 %v10696_v20, %v1302_v18 }
 0x2a4   : > { %v11164_v33 = vadd.f32 %v2520_v38, %v15439_v39  ;;  %v11166_v28 = vadd.f32 %v1947_v60, %v1806_v4  ;;  %v9502_v38 = vpop.eup %9501  ;;  %v15440_v60 = vmax.f32 %v10980_v53, 0.0  ;;  %v2522_v39 = vmul.f32 0.6931472, %v9500_v35  ;;  %9097 = vmatpush3.bf16.msra.mxu0 %v9094_v56  ;;  %v1367_v53 = vld [vmem:[#allocation3 + $0x108] sm:$0x3f] }
 0x2a5   : > { %v1508_v2 = vsel %vm1454_vm3, %v1503_v43, %v15182_v57  ;;  %v15441_v18 = vmax.f32 %v10986_v40, 0.0  ;;  %v2528_v10 = vmul.f32 0.6931472, %v9502_v38  ;;  %9099 = vmatprep.subr.bf16.mxu0 %v9098_v44  ;;  %v1308_v32 = vmul.f32 %v10676_v50, %v1253_v14 }
 0x2a6   : > { %v11176_v4 = vadd.f32 %v2516_v47, %v15440_v60  ;;  %v7971_v25 = vmul.f32 -1.442695, %v11166_v28  ;;  %v1580_v52 = vadd.f32 %v1508_v2, %v1355_v63  ;;  %v15442_v35 = vmax.f32 %v10989_v42, 0.0 }
 0x2a7   : > { %v11184_v55 = vadd.f32 %v2526_v26, %v15441_v18  ;;  %v9504_v47 = vpop.eup %9503  ;;  %v15443_v56 = vrot.slane %v11156_v3, 2  ;;  %v1310_v40 = vmul.f32 %v10676_v50, %v1255_v58  ;;  %v1592_v26 = vld [vmem:[#allocation3 + $0x108] sm:$0x7f]  ;;  %v15444_v38 = vmax.f32 %v11000_v22, 0.0 }
 0x2a8   : > { %v11189_v60 = vadd.f32 %v2522_v39, %v15442_v35  ;;  %9509 = vpow2.f32 %v7971_v25  ;;  %v2158_v63 = vadd.f32 1.0, %v9504_v47  ;;  %v15445_v57 = vrot.slane %v11160_v61, 3  ;;  %v9506_v39 = vpop.eup %9505  ;;  %9101 = vmatpush3.bf16.msra.mxu0 %v9098_v44 }
 0x2a9   : > { %v1736_v43 = vsel %vm1682_vm4, %v1731_v5, %v15443_v56  ;;  %v11197_v18 = vadd.f32 %v2528_v10, %v15444_v38  ;;  %v1363_v25 = vadd.f32 %v10696_v20, %v1310_v40  ;;  %v11204_v35 = vmul.f32 %v10663_v8, %v1253_v14  ;;  %v9508_v22 = vpop.eup %9507  ;;  %v1818_v56 = vld [vmem:[#allocation3 + $0x108] sm:$0xff] }
 0x2aa   : > { %v1808_v2 = vadd.f32 %v1736_v43, %v1580_v52  ;;  %v1951_v42 = vsel %vm1901_vm5, %v1946_v13, %v15445_v57  ;;  %v1419_v5 = vmul.f32 %v10663_v8, %v1367_v53  ;;  %v11208_v58 = vmul.f32 %v10690_v29, %v1253_v14 }
 0x2ab   : > { %9511 = vrcp.f32 %v2158_v63  ;;  %v1361_v52 = vadd.f32 %v10696_v20, %v1308_v32  ;;  %v1647_v13 = vmul.f32 %v10690_v29, %v1592_v26  ;;  %v11214_v44 = vmul.f32 0.6931472, %v9506_v39 }
 0x2ac   : > { %v11210_v10 = vadd.f32 %v1951_v42, %v1808_v2  ;;  %v11217_v57 = vmul.f32 %v9508_v22, %v10973_v12  ;;  %v15186_v47 = vrot.slane %v11204_v35, 1  ;;  %v1519_v53 = vrot.slane %v1419_v5, 1 }
 0x2ad   : > { %v15185_v40 = vrot.slane %v11208_v58, 2  ;;  %v1747_v38 = vrot.slane %v1647_v13, 2  ;;  %v11223_v63 = vmul.f32 %v10707_v49, %v1253_v14  ;;  %v1868_v5 = vmul.f32 %v10707_v49, %v1818_v56  ;;  %v11235_v14 = vld [vmem:[#allocation3 + $0xe8] sm:$0xff] }
 0x2ae   : > { %v7973_v43 = vmul.f32 -1.442695, %v11210_v10  ;;  %v3403_v32 = vrot.slane %v11217_v57, 5  ;;  %v3362_v26 = vpack.c.bf16 %v11217_v57, %v11072_v37  ;;  %v1520_v12 = vsel %vm1454_vm3, %v15186_v47, %v1519_v53 }
 0x2af   : > { %v1588_v2 = vadd.f32 %v1519_v53, %v1363_v25  ;;  %v1586_v42 = vadd.f32 %v1520_v12, %v1361_v52  ;;  %v1748_v39 = vsel %vm1682_vm4, %v15185_v40, %v1747_v38  ;;  %v15446_v22 = vrot.slane %v11072_v37, 5 }
 0x2b0   : > { %9513 = vpow2.f32 %v7973_v43  ;;  %v3682_v57 = vshrl.u32 %v3362_v26, 16  ;;  %v3685_v7 = vshll.u32 %v3362_v26, 16  ;;  %v15187_v52 = vrot.slane %v11223_v63, 3 }
 0x2b1   : > { %v11240_v13 = vsel %vm3284_vm7, %v15446_v22, %v3403_v32  ;;  %v1816_v30 = vadd.f32 %v1747_v38, %v1588_v2  ;;  %v1814_v25 = vadd.f32 %v1748_v39, %v1586_v42  ;;  %v1962_v53 = vrot.slane %v1868_v5, 3 }
 0x2b2   : > { %15447 = vst [vmem:[#allocation67_spill] sm:$0xff] %v11240_v13  ;;  %3435 = vrot.lane.b32.xlu1 %v11240_v13, %s10102_s19  ;;  %v1304_v56 = vmul.f32 %v10676_v50, %v11123_v41  ;;  %v9510_v43 = vpop.eup %9509  ;;  %v3684_v12 = vrot.slane %v3682_v57, 2  ;;  %v3687_v40 = vrot.slane %v3685_v7, 3  ;;  %v11249_v37 = vmul.f32 %v10663_v8, %v11235_v14 }
 0x2b3   : > { %v11253_v38 = vmul.f32 %v10690_v29, %v11235_v14  ;;  %v2160_v26 = vadd.f32 1.0, %v9510_v43  ;;  %v1963_v2 = vsel %vm1901_vm5, %v15187_v52, %v1962_v53  ;;  %v11258_v42 = vadd.f32 %v1962_v53, %v1816_v30 }
 0x2b4   : > { %v1357_v41 = vadd.f32 %v10696_v20, %v1304_v56  ;;  %v11261_v39 = vor.u32 %v3687_v40, %v3684_v12  ;;  %v11263_v7 = vadd.f32 %v1963_v2, %v1814_v25  ;;  %v15190_v5 = vrot.slane %v11249_v37, 1 }
 0x2b5   : > { %v15189_v22 = vrot.slane %v11253_v38, 2  ;;  %v9512_v57 = vpop.eup %9511  ;;  %9515 = vrcp.f32 %v2160_v26  ;;  %v7981_v43 = vmul.f32 -1.442695, %v11258_v42  ;;  %v11270_v47 = vmul.f32 %v10707_v49, %v11235_v14  ;;  %v1225_v26 = vld [vmem:[#allocation3 + $0x18] sm:$0xff] }
 0x2b6   : > { %v11274_v30 = vmul.f32 %v11112_v46, %v11059_v27  ;;  %v11279_v40 = vsel %vm3645_vm8, %v11104_v59, %v11261_v39  ;;  %v11282_v25 = vmul.f32 %v9512_v57, %v11085_v45  ;;  %v7979_v53 = vmul.f32 -1.442695, %v11263_v7 }
 0x2b7   : > { %15449 = vst [vmem:[#allocation69_spill] sm:$0xff] %v11279_v40  ;;  %v15450_v56 = vrot.slane %v11150_v16, 1  ;;  %3732 = vrot.lane.b32.xlu1 %v11279_v40, %s10102_s19  ;;  %9517 = vpow2.f32 %v7981_v43  ;;  %v15451_v52 = vrot.slane %v11156_v3, 2  ;;  %v15194_v57 = vrot.slane %v11270_v47, 3 }
 0x2b8   : > { %15448 = vst [vmem:[#allocation68_spill] sm:$0xff] %v11274_v30  ;;  %v3405_v13 = vrot.slane %v11282_v25, 5  ;;  %9519 = vpow2.f32 %v7979_v53  ;;  %v11301_v16 = vmul.f32 %v11112_v46, %v11069_v9  ;;  %v15454_v3 = vrot.slane %v11160_v61, 3 }
 0x2b9   : > { %v1512_v12 = vsel %vm1454_vm3, %v15450_v56, %v15190_v5  ;;  %v1740_v45 = vsel %vm1682_vm4, %v15451_v52, %v15189_v22  ;;  %v11305_v56 = vmul.f32 %v11112_v46, %v11050_v51  ;;  %v11316_v53 = vmul.f32 %v11112_v46, %v11065_v15 }
 0x2ba   : > { %v1582_v2 = vadd.f32 %v1512_v12, %v1357_v41  ;;  %15452 = vst [vmem:[#allocation70_spill] sm:$0xff] %v11301_v16  ;;  %v11307_v41 = vld [vmem:[#allocation3 + $0x28] sm:$0xff]  ;;  %v9514_v43 = vpop.eup %9513  ;;  %v1955_v52 = vsel %vm1901_vm5, %v15454_v3, %v15194_v57  ;;  %v1280_v22 = vmul.f32 %v10676_v50, %v1225_v26  ;;  %v11320_v5 = vsel %vm3284_vm7, %v3403_v32, %v3405_v13 }
 0x2bb   : > { %15453 = vst [vmem:[#allocation71_spill] sm:$0xff] %v11305_v56  ;;  %15455 = vst [vmem:[#allocation72_spill] sm:$0xff] %v11316_v53  ;;  %v2162_v40 = vadd.f32 1.0, %v9514_v43  ;;  %v9102_v59 = vpack.c.bf16 %v11301_v16, %v11274_v30  ;;  %3437 = vrot.lane.b32.xlu1 %v11320_v5, %s10102_s19  ;;  %v11334_v32 = vmul.f32 %v10663_v8, %v11307_v41 }
 0x2bc   : > { %v1810_v12 = vadd.f32 %v1740_v45, %v1582_v2  ;;  %15456 = vst [vmem:[#allocation73_spill] sm:$0xff] %v11320_v5  ;;  %v1389_v2 = vmul.f32 %v10663_v8, %v1225_v26  ;;  %v9106_v45 = vpack.c.bf16 %v11316_v53, %v11305_v56  ;;  %v1333_v3 = vadd.f32 %v10696_v20, %v1280_v22 }
 0x2bd   : > { %9521 = vrcp.f32 %v2162_v40  ;;  %9103 = vmatprep.subr.bf16.mxu0 %v9102_v59  ;;  %v1617_v57 = vmul.f32 %v10690_v29, %v1225_v26  ;;  %v11339_v16 = vmul.f32 %v10690_v29, %v11307_v41  ;;  %v1838_v22 = vmul.f32 %v10707_v49, %v1225_v26 }
 0x2be   : > { %v11327_v61 = vadd.f32 %v1955_v52, %v1810_v12  ;;  %v1459_v43 = vrot.slane %v1389_v2, 1  ;;  %9105 = vmatpush3.bf16.msra.mxu0 %v9102_v59  ;;  %v1463_v52 = vrot.slane %v11334_v32, 1  ;;  %v11346_v5 = vmul.f32 %v10707_v49, %v11307_v41 }
 0x2bf   : > { %9107 = vmatprep.subr.bf16.mxu0 %v9106_v45  ;;  %v15457_v40 = vrot.slane %v10818_v24, 1  ;;  %v1687_v53 = vrot.slane %v1617_v57, 2  ;;  %v1691_v56 = vrot.slane %v11339_v16, 2  ;;  %v11354_v15 = vmul.f32 %v11112_v46, %v11117_v21  ;;  %v9516_v59 = vpop.eup %9515 }
 0x2c0   : > { %v7975_v12 = vmul.f32 -1.442695, %v11327_v61  ;;  %v1464_v26 = vsel %vm1454_vm3, %v1459_v43, %v1463_v52  ;;  %v1903_v51 = vrot.slane %v1838_v22, 3  ;;  %v2262_v24 = vmul.f32 %v9516_v59, %v11166_v28 }
 0x2c1   : > { %v1460_v2 = vsel %vm1454_vm3, %v15457_v40, %v1459_v43  ;;  %v1558_v9 = vadd.f32 %v1464_v26, %v1333_v3  ;;  %v15458_v57 = vrot.slane %v10826_v17, 2  ;;  %v1692_v21 = vsel %vm1682_vm4, %v1687_v53, %v1691_v56  ;;  %v9518_v27 = vpop.eup %9517 }
 0x2c2   : > { %9523 = vpow2.f32 %v7975_v12  ;;  %v1556_v30 = vadd.f32 %v1460_v2, %v10880_v6  ;;  %v1906_v36 = vrot.slane %v11346_v5, 3  ;;  %9109 = vmatpush3.bf16.msra.mxu0 %v9106_v45  ;;  %v11370_v6 = vmul.f32 %v11112_v46, %v11176_v4  ;;  %v9520_v17 = vpop.eup %9519 }
 0x2c3   : > { %v1688_v40 = vsel %vm1682_vm4, %v15458_v57, %v1687_v53  ;;  %v11374_v28 = vmul.f32 %v11112_v46, %v11102_v62  ;;  %v3407_v3 = vrot.slane %v2262_v24, 5  ;;  %v3363_v43 = vpack.c.bf16 %v2262_v24, %v11282_v25 }
 0x2c4   : > { %v1784_v12 = vadd.f32 %v1688_v40, %v1556_v30  ;;  %v2170_v22 = vadd.f32 1.0, %v9518_v27  ;;  %v1786_v2 = vadd.f32 %v1692_v21, %v1558_v9  ;;  %v2168_v53 = vadd.f32 1.0, %v9520_v17 }
 0x2c5   : > { %v1907_v30 = vsel %vm1901_vm5, %v1903_v51, %v1906_v36  ;;  %v9110_v59 = vpack.c.bf16 %v11370_v6, %v11354_v15  ;;  %v11385_v26 = vsel %vm3284_vm7, %v3405_v13, %v3407_v3  ;;  %v3691_v57 = vshrl.u32 %v3363_v43, 16 }
 0x2c6   : > { %v11380_v45 = vadd.f32 %v1903_v51, %v1784_v12  ;;  %15459 = vst [vmem:[#allocation74_spill] sm:$0xff] %v11385_v26  ;;  %v3694_v40 = vshll.u32 %v3363_v43, 16  ;;  %9525 = vrcp.f32 %v2170_v22  ;;  %3439 = vrot.lane.b32.xlu1 %v11385_v26, %s10102_s19  ;;  %v11389_v27 = vadd.f32 %v1907_v30, %v1786_v2  ;;  %v1229_v22 = vld [vmem:[#allocation3 + $0x38] sm:$0xff] }
 0x2c7   : > { %9527 = vrcp.f32 %v2168_v53  ;;  %9111 = vmatprep.subr.bf16.mxu0 %v9110_v59  ;;  %v11394_v51 = vmul.f32 %v11112_v46, %v11164_v33  ;;  %v9522_v21 = vpop.eup %9521  ;;  %v3693_v25 = vrot.slane %v3691_v57, 2  ;;  %v1306_v24 = vmul.f32 %v10676_v50, %v11235_v14 }
 0x2c8   : > { %v7949_v9 = vmul.f32 -1.442695, %v11380_v45  ;;  %v3696_v13 = vrot.slane %v3694_v40, 3  ;;  %9113 = vmatpush3.bf16.msra.mxu0 %v9110_v59  ;;  %v15460_v12 = vrot.slane %v11204_v35, 1  ;;  %v15461_v17 = vrot.slane %v11249_v37, 1 }
 0x2c9   : > { %v11404_v2 = vmul.f32 %v9522_v21, %v11210_v10  ;;  %v7951_v53 = vmul.f32 -1.442695, %v11389_v27  ;;  %v9114_v30 = vpack.c.bf16 %v11394_v51, %v11374_v28  ;;  %v15462_v59 = vmax.f32 %v11003_v19, 0.0 }
 0x2ca   : > { %v1516_v43 = vsel %vm1454_vm3, %v15461_v17, %v15460_v12  ;;  %9529 = vpow2.f32 %v7949_v9  ;;  %v11414_v35 = vor.u32 %v3696_v13, %v3693_v25  ;;  %v1359_v37 = vadd.f32 %v10696_v20, %v1306_v24 }
 0x2cb   : > { %v11412_v14 = vadd.f32 %v11214_v44, %v15462_v59  ;;  %v15463_v57 = vrot.slane %v11208_v58, 2  ;;  %v15464_v10 = vrot.slane %v11253_v38, 2  ;;  %v3409_v21 = vrot.slane %v11404_v2, 5  ;;  %9115 = vmatprep.subr.bf16.mxu0 %v9114_v30 }
 0x2cc   : > { %v9524_v9 = vpop.eup %9523  ;;  %9531 = vpow2.f32 %v7951_v53  ;;  %v1282_v19 = vmul.f32 %v10676_v50, %v11307_v41  ;;  %v1393_v44 = vmul.f32 %v10663_v8, %v1229_v22  ;;  %v11429_v25 = vsel %vm3645_vm8, %v11261_v39, %v11414_v35  ;;  %9117 = vmatpush3.bf16.msra.mxu0 %v9114_v30 }
 0x2cd   : > { %v1744_v40 = vsel %vm1682_vm4, %v15464_v10, %v15463_v57  ;;  %v2164_v58 = vadd.f32 1.0, %v9524_v9  ;;  %v1584_v13 = vadd.f32 %v1516_v43, %v1359_v37  ;;  %v11432_v38 = vmul.f32 %v10690_v29, %v1229_v22  ;;  %3734 = vrot.lane.b32.xlu1 %v11429_v25, %s10102_s19 }
 0x2ce   : > { %v11439_v41 = vsel %vm3284_vm7, %v3407_v3, %v3409_v21  ;;  %v15466_v24 = vrot.slane %v11223_v63, 3  ;;  %v15467_v12 = vrot.slane %v11270_v47, 3  ;;  %v1467_v17 = vrot.slane %v1393_v44, 1 }
 0x2cf   : > { %15465 = vst [vmem:[#allocation75_spill] sm:$0xff] %v11439_v41  ;;  %v11447_v43 = vmul.f32 %v10707_v49, %v1229_v22  ;;  %9533 = vrcp.f32 %v2164_v58  ;;  %v1812_v53 = vadd.f32 %v1744_v40, %v1584_v13  ;;  %v1335_v30 = vadd.f32 %v10696_v20, %v1282_v19 }
 0x2d0   : > { %v1959_v39 = vsel %vm1901_vm5, %v15467_v12, %v15466_v24  ;;  %v1695_v59 = vrot.slane %v11432_v38, 2  ;;  %v1468_v3 = vsel %vm1454_vm3, %v1463_v52, %v1467_v17  ;;  %v11457_v47 = vmul.f32 %v11112_v46, %v11189_v60  ;;  %v9526_v57 = vpop.eup %9525  ;;  %v1231_v52 = vld [vmem:[#allocation3 + $0x48] sm:$0xff] }
 0x2d1   : > { %v1910_v63 = vrot.slane %v11447_v43, 3  ;;  %v11461_v37 = vmul.f32 %v11112_v46, %v11412_v14  ;;  %v11463_v10 = vadd.f32 %v1959_v39, %v1812_v53  ;;  %v1560_v40 = vadd.f32 %v1468_v3, %v1335_v30  ;;  %v9528_v19 = vpop.eup %9527  ;;  %3441 = vrot.lane.b32.xlu1 %v11439_v41, %s10102_s19 }
 0x2d2   : > { %v11467_v9 = vmul.f32 %v11112_v46, %v11184_v55  ;;  %v11471_v32 = vmul.f32 %v11112_v46, %v11197_v18  ;;  %v2272_v44 = vmul.f32 %v9526_v57, %v11258_v42  ;;  %v1696_v58 = vsel %vm1682_vm4, %v1691_v56, %v1695_v59 }
 0x2d3   : > { %v9118_v13 = vpack.c.bf16 %v11461_v37, %v11457_v47  ;;  %v1284_v38 = vmul.f32 %v10676_v50, %v1229_v22  ;;  %v15468_v46 = vrot.slane %v10652_v48, %v10666_v0  ;;  %v11489_v12 = vmul.f32 %v9528_v19, %v11263_v7 }
 0x2d4   : > { %v7977_v42 = vmul.f32 -1.442695, %v11463_v10  ;;  %v1788_v39 = vadd.f32 %v1696_v58, %v1560_v40  ;;  %v9530_v16 = vpop.eup %9529  ;;  %v3417_v53 = vrot.slane %v2272_v44, 5  ;;  %v1911_v56 = vsel %vm1901_vm5, %v1906_v36, %v1910_v63 }
 0x2d5   : > { %v11486_v24 = vrot.slane %v15468_v46, %v10666_v0  ;;  %9119 = vmatprep.subr.bf16.mxu0 %v9118_v13  ;;  %v9122_v22 = vpack.c.bf16 %v11471_v32, %v11467_v9  ;;  %v1395_v30 = vmul.f32 %v10663_v8, %v1231_v52  ;;  %v15207_v7 = vrot.slane %v11489_v12, 5 }
 0x2d6   : > { %v2138_v3 = vadd.f32 1.0, %v9530_v16  ;;  %9535 = vpow2.f32 %v7977_v42  ;;  %v11501_v57 = vadd.f32 %v1911_v56, %v1788_v39  ;;  %9121 = vmatpush3.bf16.msra.mxu0 %v9118_v13  ;;  %v9532_v40 = vpop.eup %9531  ;;  %v1337_v19 = vadd.f32 %v10696_v20, %v1284_v38  ;;  %v11515_v13 = vld [vmem:[%s15109_s15] sm:$0xff]  ;;  %v2569_v56 = vld [vmem:[%s15107_s13 + $0x8] sm:$0xff] }
 0x2d7   : > { %9123 = vmatprep.subr.bf16.mxu0 %v9122_v22  ;;  %v1471_v5 = vrot.slane %v1395_v30, 1  ;;  %v1623_v36 = vmul.f32 %v10690_v29, %v1231_v52  ;;  %v1844_v58 = vmul.f32 %v10707_v49, %v1231_v52  ;;  %v11509_v8 = vsel %vm3284_vm7, %v15207_v7, %v3417_v53 }
 0x2d8   : > { %15469 = vst [vmem:[#allocation76_spill] sm:$0xff] %v11509_v8  ;;  %v2140_v46 = vadd.f32 1.0, %v9532_v40  ;;  %9537 = vrcp.f32 %v2138_v3  ;;  %v7953_v42 = vmul.f32 -1.442695, %v11501_v57  ;;  %3449 = vrot.lane.b32.xlu0 %v11509_v8, %s10102_s19  ;;  %v1286_v39 = vmul.f32 %v10676_v50, %v1231_v52  ;;  %v2578_v8 = vld [vmem:[%s15107_s13 + $0x50] sm:$0xff] }
 0x2d9   : > { %v1472_v29 = vsel %vm1454_vm3, %v1467_v17, %v1471_v5  ;;  %v1699_v49 = vrot.slane %v1623_v36, 2  ;;  %v1914_v38 = vrot.slane %v1844_v58, 3  ;;  %v9534_v16 = vpop.eup %9533  ;;  %v11523_v53 = vmul.f32 %v11486_v24, %v10841_v11  ;;  %v2570_v11 = vld [vmem:[%s15107_s13 + $0x10] sm:$0xff] }
 0x2da   : > { %9539 = vrcp.f32 %v2140_v46  ;;  %9125 = vmatpush3.bf16.msra.mxu0 %v9122_v22  ;;  %v1562_v30 = vadd.f32 %v1472_v29, %v1337_v19  ;;  %v11529_v3 = vmul.f32 %v9534_v16, %v11327_v61  ;;  %v15470_v17 = vrot.slane %v10680_v1, 1  ;;  %v2572_v29 = vld [vmem:[%s15107_s13 + $0x20] sm:$0xff] }
 0x2db   : > { %9541 = vpow2.f32 %v7953_v42  ;;  %8654 = vmatprep.subr.mxu0 %v11515_v13  ;;  %v1700_v50 = vsel %vm1682_vm4, %v1695_v59, %v1699_v49  ;;  %v1339_v40 = vadd.f32 %v10696_v20, %v1286_v39  ;;  %v1915_v59 = vsel %vm1901_vm5, %v1910_v63, %v1914_v38  ;;  %v2571_v20 = vld [vmem:[%s15107_s13 + $0x18] sm:$0xff] }
 0x2dc   : > { %v1476_v52 = vsel %vm1454_vm3, %v1471_v5, %v15470_v17  ;;  %v1790_v22 = vadd.f32 %v1700_v50, %v1562_v30  ;;  %v15208_v19 = vrot.slane %v11529_v3, 5  ;;  %v3364_v61 = vpack.c.bf16 %v11529_v3, %v11404_v2 }
 0x2dd   : > { %8570 = vmatmul.mubr.f32.vlgmr.msra.gmra.mrb[40].mxu0 %v2569_v56  ;;  %v11547_v58 = vpack.c.bf16 %v2272_v44, %v2272_v44  ;;  %v1564_v5 = vadd.f32 %v1476_v52, %v1339_v40  ;;  %v15472_v46 = vrot.slane %v10714_v23, 2  ;;  %v2730_v23 = vld [vmem:[%s15108_s14] sm:$0xff]  ;;  %v11579_v56 = vld [vmem:[#allocation3 + $0x20] sm:$0xff]  ;;  %v15473_v17 = vrot.slane %v10731_v31, 3 }
 0x2de   : > { %v11549_v1 = vadd.f32 %v1915_v59, %v1790_v22  ;;  %8655 = vmatpush3.msra.mxu0 %v11515_v13  ;;  %8572 = vmatprep.mubr.f32.mxu0 %v2570_v11  ;;  %v11560_v43 = vsel %vm3284_vm7, %v3409_v21, %v15208_v19  ;;  %v3700_v63 = vshrl.u32 %v3364_v61, 16  ;;  %v3703_v44 = vshll.u32 %v3364_v61, 16  ;;  %v11585_v40 = vld [vmem:[#allocation3 + $0x30] sm:$0xff] }
 0x2df   : > { %15471 = vst [vmem:[#allocation77_spill] sm:$0xff] %v11560_v43  ;;  %v1704_v42 = vsel %vm1682_vm4, %v1699_v49, %v15472_v46  ;;  %3443 = vrot.lane.b32.xlu1 %v11560_v43, %s10102_s19  ;;  %v2731_v49 = vld [vmem:[%s15108_s14 + $0x8] sm:$0xff]  ;;  %v1919_v52 = vsel %vm1901_vm5, %v1914_v38, %v15473_v17  ;;  %v15210_v22 = vmov 0.0|0.0   ;;  %v3718_v46 = vshrl.u32 %v11547_v58, 16 }
 0x2e0   : > { %v9536_v39 = vpop.eup %9535  ;;  %v7955_v2 = vmul.f32 -1.442695, %v11549_v1  ;;  %v1792_v21 = vadd.f32 %v1704_v42, %v1564_v5  ;;  %v3702_v30 = vrot.slane %v3700_v63, 2  ;;  %v3705_v50 = vrot.slane %v3703_v44, 3  ;;  %9126 = vmatprep.subr.bf16.mxu1 %v15210_v22  ;;  %v2573_v5 = vld [vmem:[%s15107_s13 + $0x28] sm:$0xff]  ;;  %v2574_v44 = vld [vmem:[%s15107_s13 + $0x30] sm:$0xff] }
 0x2e1   : > { %v2166_v11 = vadd.f32 1.0, %v9536_v39  ;;  %8573 = vmatmul.mubr.f32.gmra.mrb[42].mxu0 %v2571_v20  ;;  %v9127_v63 = vpack.c.bf16 %v2731_v49, %v2730_v23  ;;  %v11592_v20 = vld [vmem:[#allocation3 + $0x10] sm:$0xff]  ;;  %v1281_v42 = vmul.f32 %v10618_v54, %v11579_v56  ;;  %v15475_v23 = vld [vmem:[#allocation46_spill] sm:$0xff] }
 0x2e2   : > { %v9538_v61 = vpop.eup %9537  ;;  %9543 = vpow2.f32 %v7955_v2  ;;  %v11587_v59 = vadd.f32 %v1919_v52, %v1792_v21  ;;  %8575 = vmatprep.mubr.f32.mxu0 %v2572_v29  ;;  %v1279_v31 = vmul.f32 %v11592_v20, %v10618_v54  ;;  %v15474_v2 = vld [vmem:[#allocation26_spill] sm:$0xff]  ;;  %v1390_v49 = vmul.f32 %v15475_v23, %v11579_v56 }
 0x2e3   : > { %v2240_v38 = vmul.f32 %v9538_v61, %v11380_v45  ;;  %9545 = vrcp.f32 %v2166_v11  ;;  %9128 = vmatpush3.bf16.msra.mxu1 %v9127_v63  ;;  %v11609_v45 = vmul.f32 %v15475_v23, %v11585_v40  ;;  %v11614_v52 = vor.u32 %v3705_v50, %v3702_v30  ;;  %v2732_v63 = vld [vmem:[%s15108_s14 + $0x10] sm:$0xff] }
 0x2e4   : > { %v9540_v29 = vpop.eup %9539  ;;  %v7957_v39 = vmul.f32 -1.442695, %v11587_v59  ;;  %v1332_v21 = vadd.f32 %v15474_v2, %v1279_v31  ;;  %v3721_v61 = vshll.u32 %v11547_v58, 16  ;;  %9129 = vmatprep.subr.bf16.mxu1 %v15210_v22  ;;  %v2733_v31 = vld [vmem:[%s15108_s14 + $0x18] sm:$0xff]  ;;  %v1334_v7 = vadd.f32 %v15474_v2, %v1281_v42 }
 0x2e5   : > { %v9542_v11 = vpop.eup %9541  ;;  %v11612_v17 = vmul.f32 %v9540_v29, %v11389_v27  ;;  %8576 = vmatmul.mubr.f32.gmra.mrb[44].mxu0 %v2573_v5  ;;  %v3386_v19 = vrot.slane %v2240_v38, 5  ;;  %v2575_v58 = vld [vmem:[%s15107_s13 + $0x38] sm:$0xff]  ;;  %v9130_v30 = vpack.c.bf16 %v2733_v31, %v2732_v63  ;;  %v2576_v29 = vld [vmem:[%s15107_s13 + $0x40] sm:$0xff]  ;;  %v1461_v36 = vrot.slane %v1390_v49, 1 }
 0x2e6   : > { %v2142_v27 = vadd.f32 1.0, %v9542_v11  ;;  %9547 = vpow2.f32 %v7957_v39  ;;  %8578 = vmatprep.mubr.f32.mxu0 %v2574_v44  ;;  %v15217_v42 = vrot.slane %v11609_v45, 1  ;;  %v1616_v44 = vmul.f32 %v11592_v20, %v11486_v24  ;;  %v15477_v31 = vld [vmem:[#allocation47_spill] sm:$0xff] }
 0x2e7   : > { %v15209_v50 = vrot.slane %v11612_v17, 5  ;;  %v11630_v5 = vpack.c.bf16 %v11612_v17, %v2240_v38  ;;  %9131 = vmatpush3.bf16.msra.mxu1 %v9130_v30  ;;  %v1618_v39 = vmul.f32 %v11486_v24, %v11579_v56  ;;  %v11642_v11 = vmul.f32 %v11486_v24, %v11585_v40 }
 0x2e8   : > { %9549 = vrcp.f32 %v2142_v27  ;;  %v11650_v63 = vrot.slane %v3718_v46, 2  ;;  %9132 = vmatprep.subr.bf16.mxu1 %v15210_v22  ;;  %v15478_v27 = vrot.slane %v15477_v31, 1  ;;  %v2735_v46 = vld [vmem:[%s15108_s14 + $0x28] sm:$0xff]  ;;  %v1466_v31 = vsel %vm1454_vm3, %v1461_v36, %v15217_v42 }
 0x2e9   : > { %v11647_v38 = vsel %vm3284_vm7, %v3386_v19, %v15209_v50  ;;  %v3647_v49 = vshrl.u32 %v11630_v5, 16  ;;  %8579 = vmatmul.mubr.f32.gmra.mrb[46].mxu0 %v2575_v58  ;;  %v2577_v19 = vld [vmem:[%s15107_s13 + $0x48] sm:$0xff]  ;;  %v2734_v58 = vld [vmem:[%s15108_s14 + $0x20] sm:$0xff]  ;;  %v1684_v50 = vrot.slane %v1616_v44, 2  ;;  %v1689_v22 = vrot.slane %v1618_v39, 2 }
 0x2ea   : > { %15476 = vst [vmem:[#allocation26_spill] sm:$0xff] %v11647_v38  ;;  %v1462_v30 = vsel %vm1454_vm3, %v15478_v27, %v1461_v36  ;;  %3419 = vrot.lane.b32.xlu1 %v11647_v38, %s10102_s19  ;;  %8581 = vmatprep.mubr.f32.mxu0 %v2576_v29  ;;  %v11673_v29 = vsel %vm3645_vm8, %v11414_v35, %v11614_v52  ;;  %v11675_v16 = vrot.slane %v3721_v61, 3  ;;  %v15218_v36 = vrot.slane %v11642_v11, 2 }
 0x2eb   : > { %v1557_v27 = vadd.f32 %v1462_v30, %v1332_v21  ;;  %v9133_v43 = vpack.c.bf16 %v2735_v46, %v2734_v58  ;;  %v1559_v41 = vadd.f32 %v1466_v31, %v1334_v7  ;;  %v1690_v38 = vsel %vm1682_vm4, %v1684_v50, %v1689_v22  ;;  %v2579_v7 = vld [vmem:[%s15107_s13 + $0x58] sm:$0xff]  ;;  %v15481_v31 = vld [vmem:[#allocation48_spill] sm:$0xff] }
 0x2ec   : > { %v9544_v26 = vpop.eup %9543  ;;  %v15479_v21 = vrot.slane %v10652_v48, %v10700_v34  ;;  %v15480_v35 = vrot.slane %v11523_v53, 2  ;;  %v3650_v58 = vshll.u32 %v11630_v5, 16  ;;  %v11701_v53 = vrot.slane %v3647_v49, 2 }
 0x2ed   : > { %v9546_v39 = vpop.eup %9545  ;;  %v2144_v30 = vadd.f32 1.0, %v9544_v26  ;;  %8582 = vmatmul.mubr.f32.gmra.mrb[48].mxu0 %v2577_v19  ;;  %9134 = vmatpush3.bf16.msra.mxu1 %v9133_v43  ;;  %v1785_v46 = vadd.f32 %v1690_v38, %v1557_v27  ;;  %v2736_v26 = vld [vmem:[%s15108_s14 + $0x30] sm:$0xff]  ;;  %v2737_v43 = vld [vmem:[%s15108_s14 + $0x38] sm:$0xff]  ;;  %v15482_v38 = vmov 0.0|0.0  }
 0x2ee   : > { %v11686_v44 = vrot.slane %v15479_v21, %v10700_v34  ;;  %v1685_v61 = vsel %vm1682_vm4, %v15480_v35, %v1684_v50  ;;  %3736 = vrot.lane.b32.xlu1 %v11673_v29, %s10102_s19  ;;  %v11699_v48 = vmul.f32 %v9546_v39, %v11463_v10  ;;  %8584 = vmatprep.mubr.f32.mxu0 %v2578_v8  ;;  %v11714_v10 = vld [vmem:[#allocation3 + $0x40] sm:$0xff]  ;;  %v2580_v8 = vld [vmem:[%s15107_s13 + $0x60] sm:$0xff] }
 0x2ef   : > { %v1783_v42 = vadd.f32 %v1685_v61, %v15481_v31  ;;  %v1694_v50 = vsel %vm1682_vm4, %v1689_v22, %v15218_v36  ;;  %9551 = vrcp.f32 %v2144_v30  ;;  %9135 = vmatprep.subr.bf16.mxu1 %v15482_v38  ;;  %v9136_v49 = vpack.c.bf16 %v2737_v43, %v2736_v26 }
 0x2f0   : > { %v1837_v5 = vmul.f32 %v11592_v20, %v11686_v44  ;;  %v1787_v19 = vadd.f32 %v1694_v50, %v1559_v41  ;;  %v1839_v27 = vmul.f32 %v11686_v44, %v11579_v56  ;;  %v9548_v21 = vpop.eup %9547  ;;  %v3365_v22 = vpack.c.bf16 %v11489_v12, %v11699_v48 }
 0x2f1   : > { %v3413_v20 = vrot.slane %v11699_v48, 5  ;;  %v11727_v35 = vmul.f32 %v11686_v44, %v11585_v40  ;;  %v2146_v39 = vadd.f32 1.0, %v9548_v21  ;;  %8585 = vmatmul.mubr.f32.gmra.mrb[50].mxu0 %v2579_v7  ;;  %9137 = vmatpush3.bf16.msra.mxu1 %v9136_v49  ;;  %v1283_v41 = vmul.f32 %v10618_v54, %v11585_v40  ;;  %v2581_v7 = vld [vmem:[%s15107_s13 + $0x68] sm:$0xff]  ;;  %v2738_v40 = vld [vmem:[%s15108_s14 + $0x40] sm:$0xff] }
 0x2f2   : > { %v1902_v61 = vrot.slane %v1837_v5, 3  ;;  %v1904_v30 = vrot.slane %v1839_v27, 3  ;;  %v1285_v56 = vmul.f32 %v10618_v54, %v11714_v10  ;;  %v9550_v31 = vpop.eup %9549  ;;  %v15483_v26 = vrot.slane %v11529_v3, 5  ;;  %8587 = vmatprep.mubr.f32.mxu0 %v2580_v8  ;;  %9138 = vmatprep.subr.bf16.mxu1 %v15482_v38  ;;  %v2739_v3 = vld [vmem:[%s15108_s14 + $0x48] sm:$0xff]  ;;  %v2582_v8 = vld [vmem:[%s15107_s13 + $0x70] sm:$0xff] }
 0x2f3   : > { %v11738_v43 = vrot.slane %v3650_v58, 3  ;;  %v3709_v50 = vshrl.u32 %v3365_v22, 16  ;;  %v3712_v5 = vshll.u32 %v3365_v22, 16  ;;  %v11753_v58 = vmul.f32 %v9550_v31, %v11501_v57 }
 0x2f4   : > { %v11736_v48 = vsel %vm3284_vm7, %v15483_v26, %v3413_v20  ;;  %9553 = vrcp.f32 %v2146_v39  ;;  %v9139_v49 = vpack.c.bf16 %v2739_v3, %v2738_v40  ;;  %v1905_v27 = vsel %vm1901_vm5, %v1902_v61, %v1904_v30  ;;  %v11765_v39 = vld [vmem:[#allocation3 + $0x50] sm:$0xff] }
 0x2f5   : > { %15484 = vst [vmem:[#allocation46_spill] sm:$0xff] %v11736_v48  ;;  %3445 = vrot.lane.b32.xlu1 %v11736_v48, %s10102_s19  ;;  %v3711_v21 = vrot.slane %v3709_v50, 2  ;;  %v3714_v22 = vrot.slane %v3712_v5, 3  ;;  %v15220_v26 = vrot.slane %v11727_v35, 3  ;;  %v11760_v36 = vadd.f32 %v1905_v27, %v1785_v46  ;;  %8588 = vmatmul.mubr.f32.gmra.mrb[52].mxu0 %v2581_v7  ;;  %v2583_v46 = vld [vmem:[%s15107_s13 + $0x78] sm:$0xff] }
 0x2f6   : > { %v3389_v34 = vrot.slane %v11753_v58, 5  ;;  %9140 = vmatpush3.bf16.msra.mxu1 %v9139_v49  ;;  %v11763_v57 = vadd.f32 %v1902_v61, %v1783_v42  ;;  %v1336_v31 = vadd.f32 %v15474_v2, %v1283_v41  ;;  %v1338_v40 = vadd.f32 %v15474_v2, %v1285_v56  ;;  %8590 = vmatprep.mubr.f32.mxu0 %v2582_v8  ;;  %v2740_v42 = vld [vmem:[%s15108_s14 + $0x50] sm:$0xff]  ;;  %v2741_v61 = vld [vmem:[%s15108_s14 + $0x58] sm:$0xff] }
 0x2f7   : > { %v11769_v3 = vor.u32 %v3714_v22, %v3711_v21  ;;  %9141 = vmatprep.subr.bf16.mxu1 %v15482_v38  ;;  %v1909_v41 = vsel %vm1901_vm5, %v1904_v30, %v15220_v26  ;;  %v7950_v56 = vmul.f32 -1.442695, %v11760_v36  ;;  %v1394_v50 = vmul.f32 %v15475_v23, %v11714_v10  ;;  %v15487_v8 = vld [vmem:[#allocation63_spill] sm:$0xff] }
 0x2f8   : > { %v15485_v5 = vrot.slane %v11612_v17, 5  ;;  %2746 = vxpose.xlu0.b32.start [1/16] (narrow) %v15487_v8, 8  ;;  %v9142_v49 = vpack.c.bf16 %v2741_v61, %v2740_v42  ;;  %v11793_v27 = vadd.f32 %v1909_v41, %v1787_v19  ;;  %v7948_v21 = vmul.f32 -1.442695, %v11763_v57  ;;  %v15490_v8 = vld [vmem:[#allocation52_spill] sm:$0xff]  ;;  %v15495_v48 = vld [vmem:[#allocation51_spill] sm:$0xff] }
 0x2f9   : > { %9555 = vpow2.f32 %v7950_v56  ;;  %v11804_v17 = vmul.f32 %v15475_v23, %v11765_v39  ;;  %v15488_v19 = vrot.slane %v11489_v12, 5  ;;  %v11814_v61 = vsel %vm3645_vm8, %v11614_v52, %v11769_v3  ;;  %8591 = vmatmul.mubr.f32.gmra.mrb[54].mxu0 %v2583_v46  ;;  %v2742_v12 = vld [vmem:[%s15108_s14 + $0x60] sm:$0xff]  ;;  %v2743_v52 = vld [vmem:[%s15108_s14 + $0x68] sm:$0xff] }
 0x2fa   : > { %v11790_v7 = vsel %vm3284_vm7, %v15485_v5, %v3389_v34  ;;  %v9552_v5 = vpop.eup %9551  ;;  %9143 = vmatpush3.bf16.msra.mxu1 %v9142_v49  ;;  %v7952_v41 = vmul.f32 -1.442695, %v11793_v27  ;;  %9557 = vpow2.f32 %v7948_v21  ;;  %8656 = vmatprep.mubr.msk.f32.mxu0 %vm2880_vm9, %v15490_v8  ;;  %v1622_v49 = vmul.f32 %v11486_v24, %v11714_v10 }
 0x2fb   : > { %15486 = vst [vmem:[#allocation47_spill] sm:$0xff] %v11790_v7  ;;  %3421 = vrot.lane.b32.xlu1 %v11790_v7, %s10102_s19  ;;  %v11809_v42 = vsel %vm3284_vm7, %v3413_v20, %v15488_v19  ;;  %v2246_v56 = vmul.f32 %v9552_v5, %v11549_v1  ;;  %9144 = vmatprep.subr.bf16.mxu1 %v15482_v38  ;;  %v1469_v20 = vrot.slane %v1394_v50, 1  ;;  %v15224_v46 = vrot.slane %v11804_v17, 1  ;;  %v15491_v1 = vld [vmem:[#allocation64_spill] sm:$0xff] }
 0x2fc   : > { %15489 = vst [vmem:[#allocation48_spill] sm:$0xff] %v11809_v42  ;;  %2747 = vxpose.xlu0.b32.cont [2/16] (narrow) %v15491_v1, 8  ;;  %v9145_v21 = vpack.c.bf16 %v2743_v52, %v2742_v12  ;;  %9559 = vpow2.f32 %v7952_v41  ;;  %v11833_v5 = vmul.f32 %v11486_v24, %v11765_v39  ;;  %v11837_v19 = vmul.f32 %v11686_v44, %v11714_v10  ;;  %v15493_v1 = vld [vmem:[#allocation54_spill] sm:$0xff] }
 0x2fd   : > { %v3391_v50 = vrot.slane %v2246_v56, 5  ;;  %v3359_v8 = vpack.c.bf16 %v2246_v56, %v11753_v58  ;;  %v15492_v22 = vrot.slane %v11609_v45, 1  ;;  %v1474_v41 = vsel %vm1454_vm3, %v1469_v20, %v15224_v46  ;;  %8657 = vmatmul.mubr.msk.f32.vlgmr.msra.gmra.mrb[56].mxu0 %vm2880_vm9, %v15493_v1  ;;  %v15499_v1 = vld [vmem:[#allocation53_spill] sm:$0xff] }
 0x2fe   : > { %v9554_v52 = vpop.eup %9553  ;;  %9146 = vmatpush3.bf16.msra.mxu1 %v9145_v21  ;;  %v1563_v26 = vadd.f32 %v1474_v41, %v1338_v40  ;;  %v1697_v30 = vrot.slane %v1622_v49, 2  ;;  %8659 = vmatprep.mubr.msk.f32.mxu0 %vm2880_vm9, %v15495_v48  ;;  %v2745_v40 = vld [vmem:[%s15108_s14 + $0x78] sm:$0xff]  ;;  %v15497_v49 = vrot.slane %v11642_v11, 2  ;;  %v15498_v41 = vld [vmem:[#allocation49_spill] sm:$0xff] }
 0x2ff   : > { %3447 = vrot.lane.b32.xlu1 %v11809_v42, %s10102_s19  ;;  %v1470_v12 = vsel %vm1454_vm3, %v15492_v22, %v1469_v20  ;;  %v15223_v42 = vrot.slane %v11833_v5, 2  ;;  %v11852_v58 = vsel %vm3284_vm7, %v3389_v34, %v3391_v50  ;;  %v3655_v45 = vshrl.u32 %v3359_v8, 16  ;;  %9147 = vmatprep.subr.bf16.mxu1 %v15482_v38  ;;  %v15496_v20 = vld [vmem:[#allocation65_spill] sm:$0xff] }
 0x300   : > { %v1561_v10 = vadd.f32 %v1470_v12, %v1336_v31  ;;  %15494 = vst [vmem:[#allocation63_spill] sm:$0xff] %v11852_v58  ;;  %v3658_v56 = vshll.u32 %v3359_v8, 16  ;;  %v2248_v22 = vmul.f32 %v9554_v52, %v11587_v59  ;;  %v2744_v31 = vld [vmem:[%s15108_s14 + $0x70] sm:$0xff]  ;;  %2748 = vxpose.xlu0.b32.cont [3/16] (narrow) %v15496_v20, 8  ;;  %v1698_v59 = vsel %vm1682_vm4, %v15497_v49, %v1697_v30  ;;  %v15503_v46 = vld [vmem:[#allocation57_spill] sm:$0xff] }
 0x301   : > { %v9148_v34 = vpack.c.bf16 %v2745_v40, %v2744_v31  ;;  %v1702_v48 = vsel %vm1682_vm4, %v1697_v30, %v15223_v42  ;;  %v11873_v38 = vmul.f32 %v11686_v44, %v11765_v39  ;;  %v3657_v21 = vrot.slane %v3655_v45, 2  ;;  %8660 = vmatmul.mubr.msk.f32.gmra.mrb[58].mxu0 %vm2880_vm9, %v15499_v1 }
 0x302   : > { %v3660_v8 = vrot.slane %v3658_v56, 3  ;;  %v3393_v12 = vrot.slane %v2248_v22, 5  ;;  %v3360_v52 = vpack.c.bf16 %v15498_v41, %v2248_v22  ;;  %v1789_v11 = vadd.f32 %v1698_v59, %v1561_v10  ;;  %8662 = vmatprep.mubr.msk.f32.mxu0 %vm2880_vm9, %v15503_v46 }
 0x303   : > { %3423 = vrot.lane.b32.xlu1 %v11852_v58, %s10102_s19  ;;  %9149 = vmatpush3.bf16.msra.mxu1 %v9148_v34  ;;  %v1791_v31 = vadd.f32 %v1702_v48, %v1563_v26  ;;  %v1912_v30 = vrot.slane %v11837_v19, 3  ;;  %v1916_v40 = vrot.slane %v11873_v38, 3  ;;  %v9556_v20 = vpop.eup %9555  ;;  %v15501_v45 = vrot.slane %v15498_v41, 5  ;;  %v15504_v19 = vld [vmem:[#allocation66_spill] sm:$0xff]  ;;  %v15518_v38 = vld [vmem:[#allocation69_spill] sm:$0xff] }
 0x304   : > { %v3661_v49 = vor.u32 %v3660_v8, %v3657_v21  ;;  %v11883_v42 = vsel %vm3284_vm7, %v3391_v50, %v3393_v12  ;;  %v3664_v22 = vshrl.u32 %v3360_v52, 16  ;;  %8628 = vmatprep.subr.mxu1 %v11515_v13  ;;  %v9558_v26 = vpop.eup %9557  ;;  %2749 = vxpose.xlu0.b32.cont [4/16] (narrow) %v15504_v19, 8  ;;  %v3667_v10 = vshll.u32 %v3360_v52, 16  ;;  %v15507_v52 = vld [vmem:[#allocation59_spill] sm:$0xff]  ;;  %v15509_v19 = vld [vmem:[#allocation68_spill] sm:$0xff] }
 0x305   : > { %15500 = vst [vmem:[#allocation52_spill] sm:$0xff] %v11883_v42  ;;  %v11888_v56 = vsel %vm3284_vm7, %v3393_v12, %v15501_v45  ;;  %v2139_v34 = vadd.f32 1.0, %v9556_v20  ;;  %v15505_v50 = vor.u32 %v11738_v43, %v11701_v53  ;;  %v15225_v21 = vmov 0.0   ;;  %v1234_v12 = vld [vmem:[#allocation3 + $0x60] sm:$0xff]  ;;  %8663 = vmatmul.mubr.msk.f32.gmra.mrb[60].mxu0 %vm2880_vm9, %v15507_v52  ;;  %v15508_v20 = vld [vmem:[#allocation55_spill] sm:$0xff] }
 0x306   : > { %15502 = vst [vmem:[#allocation64_spill] sm:$0xff] %v11888_v56  ;;  %v3666_v48 = vrot.slane %v3664_v22, 2  ;;  %8625 = vmatprep.mubr.msk.f32.mxu1 %vm10104_vm11, %v15225_v21  ;;  %v2137_v13 = vadd.f32 1.0, %v9558_v26  ;;  %v15506_v46 = vrot.slane %v11727_v35, 3  ;;  %v9560_v41 = vpop.eup %9559  ;;  %v3669_v53 = vrot.slane %v3667_v10, 3  ;;  %v1236_v35 = vld [vmem:[#allocation3 + $0x70] sm:$0xff]  ;;  %8665 = vmatprep.mubr.msk.f32.mxu0 %vm2880_vm9, %v15508_v20 }
 0x307   : > { %v11898_v59 = vsel %vm3645_vm8, %v15505_v50, %v3661_v49  ;;  %3425 = vrot.lane.b32.xlu1 %v11883_v42, %s10102_s19  ;;  %9561 = vrcp.f32 %v2139_v34  ;;  %v1917_v1 = vsel %vm1901_vm5, %v1912_v30, %v1916_v40  ;;  %v2141_v45 = vadd.f32 1.0, %v9560_v41 }
 0x308   : > { %v1913_v8 = vsel %vm1901_vm5, %v15506_v46, %v1912_v30  ;;  %9194 = vmatprep.subr.msk.bf16.mxu0 %vm3451_vm10, %v11898_v59  ;;  %v3767_v43 = vsel %vm3451_vm10, %v11898_v59, 0  ;;  %9563 = vrcp.f32 %v2137_v13  ;;  %v11920_v26 = vadd.f32 %v1917_v1, %v1791_v31  ;;  %2750 = vxpose.xlu0.b32.cont [5/16] (narrow) %v15509_v19, 8  ;;  %v11964_v19 = vld [vmem:[#allocation3 + $0x80] sm:$0xff] }
 0x309   : > { %8709 = vmatpush3.bf16.xpose.msra.mxu0 %v3767_v43  ;;  %v11918_v22 = vadd.f32 %v1913_v8, %v1789_v11  ;;  %v3670_v10 = vor.u32 %v3669_v53, %v3666_v48  ;;  %v1287_v34 = vmul.f32 %v10618_v54, %v11765_v39  ;;  %v1289_v50 = vmul.f32 %v10618_v54, %v1234_v12  ;;  %v15511_v8 = vld [vmem:[#allocation58_spill] sm:$0xff]  ;;  %v15512_v43 = vld [vmem:[#allocation61_spill] sm:$0xff] }
 0x30a   : > { %v1398_v30 = vmul.f32 %v15475_v23, %v1234_v12  ;;  %9565 = vrcp.f32 %v2141_v45  ;;  %v7956_v11 = vmul.f32 -1.442695, %v11920_v26  ;;  %v11932_v31 = vmul.f32 %v15475_v23, %v1236_v35  ;;  %8666 = vmatmul.mubr.msk.f32.gmra.mrb[62].mxu0 %vm2880_vm9, %v15511_v8 }
 0x30b   : > { %3427 = vrot.lane.b32.xlu1 %v11888_v56, %s10102_s19  ;;  %v7954_v13 = vmul.f32 -1.442695, %v11918_v22  ;;  %v15510_v48 = vor.u32 %v11675_v16, %v11650_v63  ;;  %v11942_v46 = vsel %vm3645_vm8, %v3661_v49, %v3670_v10  ;;  %v1340_v41 = vadd.f32 %v15474_v2, %v1287_v34  ;;  %v15513_v63 = vld [vmem:[#allocation62_spill] sm:$0xff] }
 0x30c   : > { %v1342_v53 = vadd.f32 %v15474_v2, %v1289_v50  ;;  %v11950_v52 = vsel %vm3645_vm8, %v3670_v10, %v15512_v43  ;;  %9195 = vmatprep.subr.msk.bf16.mxu0 %vm3451_vm10, %v11942_v46  ;;  %v3770_v16 = vsel %vm3451_vm10, %v11942_v46, 0  ;;  %8668 = vmatprep.mubr.msk.f32.mxu0 %vm2880_vm9, %v15513_v63  ;;  %v15514_v49 = vld [vmem:[#allocation70_spill] sm:$0xff]  ;;  %v1481_v1 = vrot.slane %v11932_v31, 1 }
 0x30d   : > { %v11939_v39 = vsel %vm3645_vm8, %v11769_v3, %v15510_v48  ;;  %9567 = vpow2.f32 %v7954_v13  ;;  %v1477_v3 = vrot.slane %v1398_v30, 1  ;;  %2751 = vxpose.xlu0.b32.cont [6/16] (narrow) %v15514_v49, 8  ;;  %v1626_v20 = vmul.f32 %v11486_v24, %v1234_v12  ;;  %v15516_v49 = vld [vmem:[#allocation71_spill] sm:$0xff] }
 0x30e   : > { %9569 = vpow2.f32 %v7956_v11  ;;  %v11962_v45 = vmul.f32 %v11486_v24, %v1236_v35  ;;  %v15515_v10 = vrot.slane %v11804_v17, 1  ;;  %v1847_v50 = vmul.f32 %v11686_v44, %v1234_v12  ;;  %8669 = vmatmul.mubr.msk.f32.gmra.mrb[64].mxu0 %vm2880_vm9, %v11176_v4 }
 0x30f   : > { %3738 = vrot.lane.b32.xlu1 %v11814_v61, %s10102_s19  ;;  %v11973_v30 = vmul.f32 %v11686_v44, %v1236_v35  ;;  %v1291_v13 = vmul.f32 %v10618_v54, %v1236_v35  ;;  %v1482_v11 = vsel %vm1454_vm3, %v1477_v3, %v1481_v1  ;;  %v1705_v8 = vrot.slane %v1626_v20, 2  ;;  %8671 = vmatprep.mubr.msk.f32.mxu0 %vm2880_vm9, %v11102_v62 }
 0x310   : > { %v1478_v34 = vsel %vm1454_vm3, %v15515_v10, %v1477_v3  ;;  %v1709_v17 = vrot.slane %v11962_v45, 2  ;;  %v1567_v12 = vadd.f32 %v1482_v11, %v1342_v53  ;;  %v1920_v43 = vrot.slane %v1847_v50, 3  ;;  %v1240_v50 = vld [vmem:[#allocation3 + $0x90] sm:$0xff] }
 0x311   : > { %v1565_v48 = vadd.f32 %v1478_v34, %v1340_v41  ;;  %8711 = vmatpush3.bf16.xpose.msra.mxu0 %v3770_v16  ;;  %v1924_v63 = vrot.slane %v11973_v30, 3  ;;  %v1293_v35 = vmul.f32 %v10618_v54, %v11964_v19  ;;  %v9562_v4 = vpop.eup %9561  ;;  %2752 = vxpose.xlu0.b32.cont [7/16] (narrow) %v15516_v49, 8  ;;  %v15517_v41 = vrot.slane %v11833_v5, 2 }
 0x312   : > { %9196 = vmatprep.subr.msk.bf16.mxu0 %vm3451_vm10, %v11950_v52  ;;  %v1710_v62 = vsel %vm1682_vm4, %v1705_v8, %v1709_v17  ;;  %v1344_v53 = vadd.f32 %v15474_v2, %v1291_v13  ;;  %v9564_v3 = vpop.eup %9563  ;;  %v2241_v20 = vmul.f32 %v9562_v4, %v11760_v36  ;;  %v1921_v5 = vsel %vm1901_vm5, %v1916_v40, %v1920_v43  ;;  %v15519_v4 = vld [vmem:[#allocation72_spill] sm:$0xff] }
 0x313   : > { %v1706_v16 = vsel %vm1682_vm4, %v15517_v41, %v1705_v8  ;;  %3740 = vrot.lane.b32.xlu1 %v11939_v39, %s10102_s19  ;;  %v1795_v34 = vadd.f32 %v1710_v62, %v1567_v12  ;;  %8672 = vmatmul.mubr.msk.f32.gmra.mrb[66].mxu0 %vm2880_vm9, %v11164_v33  ;;  %v12006_v11 = vmul.f32 %v9564_v3, %v11763_v57  ;;  %v12018_v40 = vsel %vm3451_vm10, %v15518_v38, 0 }
 0x314   : > { %v1793_v10 = vadd.f32 %v1706_v16, %v1565_v48  ;;  %v1925_v13 = vsel %vm1901_vm5, %v1920_v43, %v1924_v63  ;;  %v1346_v8 = vadd.f32 %v15474_v2, %v1293_v35  ;;  %v1402_v36 = vmul.f32 %v15475_v23, %v11964_v19  ;;  %v9566_v48 = vpop.eup %9565  ;;  %8674 = vmatprep.mubr.msk.f32.mxu0 %vm2880_vm9, %v11189_v60 }
 0x315   : > { %v3286_v33 = vrot.slane %v2241_v20, 5  ;;  %v12022_v12 = vadd.f32 %v1925_v13, %v1795_v34  ;;  %2753 = vxpose.xlu0.b32.cont [8/16] (narrow) %v15519_v4, 8  ;;  %v12027_v43 = vsel %vm3451_vm10, %v11429_v25, 0  ;;  %v12030_v35 = vmul.f32 %v9566_v48, %v11793_v27 }
 0x316   : > { %v12020_v57 = vadd.f32 %v1921_v5, %v1793_v10  ;;  %v3285_v60 = vrot.slane %v12006_v11, 5  ;;  %v12034_v49 = vmul.f32 %v15475_v23, %v1240_v50  ;;  %v12040_v16 = vsel %vm3451_vm10, %v11673_v29, 0 }
 0x317   : > { %v9568_v41 = vpop.eup %9567  ;;  %3726 = vrot.lane.b32.xlu1 %v11898_v59, %s10102_s19  ;;  %v7960_v3 = vmul.f32 -1.442695, %v12022_v12  ;;  %v1485_v10 = vrot.slane %v1402_v36, 1  ;;  %v3773_v34 = vsel %vm3451_vm10, %v11950_v52, 0  ;;  %8675 = vmatmul.mubr.msk.f32.gmra.mrb[68].mxu0 %vm2880_vm9, %v11412_v14  ;;  %v12050_v5 = vsel %vm3451_vm10, %v11814_v61, 0 }
 0x318   : > { %v7958_v62 = vmul.f32 -1.442695, %v12020_v57  ;;  %v9570_v27 = vpop.eup %9569  ;;  %v3288_v59 = vrot.slane %v12030_v35, 5  ;;  %v12054_v13 = vsel %vm3284_vm7, %v3285_v60, %v3286_v33  ;;  %8677 = vmatprep.mubr.msk.f32.mxu0 %vm2880_vm9, %v11184_v55  ;;  %v12061_v36 = vld [vmem:[%s15104_s10] ss:$0 sm:$0xff]  ;;  %v2143_v48 = vadd.f32 1.0, %v9568_v41 }
 0x319   : > { %8713 = vmatpush3.bf16.xpose.msra.mxu0 %v3773_v34  ;;  %v2145_v14 = vadd.f32 1.0, %v9570_v27  ;;  %v1486_v4 = vsel %vm1454_vm3, %v1481_v1, %v1485_v10  ;;  %2754 = vxpose.xlu0.b32.cont [9/16] (narrow) %v11354_v15, 8  ;;  %v12075_v60 = vmul.f32 %v12061_v36, %v2241_v20  ;;  %v1489_v41 = vrot.slane %v12034_v49, 1 }
 0x31a   : > { %9571 = vpow2.f32 %v7958_v62  ;;  %9197 = vmatprep.subr.msk.bf16.mxu0 %vm3451_vm10, %v15518_v38  ;;  %v12072_v55 = vsel %vm3284_vm7, %v3286_v33, %v3288_v59  ;;  %v1569_v31 = vadd.f32 %v1486_v4, %v1344_v53  ;;  %v1630_v15 = vmul.f32 %v11486_v24, %v11964_v19  ;;  %v1242_v38 = vld [vmem:[#allocation3 + $0xa0] sm:$0xff] }
 0x31b   : > { %9573 = vpow2.f32 %v7960_v3  ;;  %3728 = vrot.lane.b32.xlu1 %v11942_v46, %s10102_s19  ;;  %v1632_v1 = vmul.f32 %v11486_v24, %v1240_v50  ;;  %8678 = vmatmul.mubr.msk.f32.gmra.mrb[70].mxu0 %vm2880_vm9, %v11197_v18  ;;  %v1490_v20 = vsel %vm1454_vm3, %v1485_v10, %v1489_v41  ;;  %v1851_v33 = vmul.f32 %v11686_v44, %v11964_v19  ;;  %v12091_v46 = vld [vmem:[#allocation3 + $0xb0] sm:$0xff] }
 0x31c   : > { %9575 = vrcp.f32 %v2143_v48  ;;  %v12089_v49 = vmul.f32 %v11686_v44, %v1240_v50  ;;  %v1571_v53 = vadd.f32 %v1490_v20, %v1346_v8  ;;  %v1713_v62 = vrot.slane %v1630_v15, 2 }
 0x31d   : > { %9577 = vrcp.f32 %v2145_v14  ;;  %v1717_v3 = vrot.slane %v1632_v1, 2  ;;  %v1295_v27 = vmul.f32 %v10618_v54, %v1240_v50  ;;  %2755 = vxpose.xlu0.b32.cont [10/16] (narrow) %v11370_v6, 8  ;;  %v1928_v34 = vrot.slane %v1851_v33, 3 }
 0x31e   : > { %v1932_v18 = vrot.slane %v12089_v49, 3  ;;  %v1297_v10 = vmul.f32 %v10618_v54, %v1242_v38  ;;  %v1406_v48 = vmul.f32 %v15475_v23, %v1242_v38  ;;  %v1714_v19 = vsel %vm1682_vm4, %v1709_v17, %v1713_v62  ;;  %v12132_v49 = vpop.permute.xlu1 %3429 }
 0x31f   : > { %3730 = vrot.lane.b32.xlu1 %v11950_v52, %s10102_s19  ;;  %v1718_v8 = vsel %vm1682_vm4, %v1713_v62, %v1717_v3  ;;  %v1348_v50 = vadd.f32 %v15474_v2, %v1295_v27  ;;  %v12107_v6 = vmul.f32 %v15475_v23, %v12091_v46  ;;  %v1797_v14 = vadd.f32 %v1714_v19, %v1569_v31 }
 0x320   : > { %v1799_v4 = vadd.f32 %v1718_v8, %v1571_v53  ;;  %v1929_v15 = vsel %vm1901_vm5, %v1924_v63, %v1928_v34  ;;  %v1933_v52 = vsel %vm1901_vm5, %v1928_v34, %v1932_v18  ;;  %v1350_v45 = vadd.f32 %v15474_v2, %v1297_v10 }
 0x321   : > { %8715 = vmatpush3.bf16.xpose.msra.mxu0 %v12018_v40  ;;  %v1493_v17 = vrot.slane %v1406_v48, 1  ;;  %v1497_v1 = vrot.slane %v12107_v6, 1  ;;  %v1634_v20 = vmul.f32 %v11486_v24, %v1242_v38  ;;  %2756 = vxpose.xlu0.b32.cont [11/16] (narrow) %v11374_v28, 8  ;;  %v12122_v30 = vsel %vm3451_vm10, %v11939_v39, 0 }
 0x322   : > { %9198 = vmatprep.subr.msk.bf16.mxu0 %vm3451_vm10, %v11429_v25  ;;  %v12124_v63 = vadd.f32 %v1929_v15, %v1797_v14  ;;  %v12126_v31 = vadd.f32 %v1933_v52, %v1799_v4  ;;  %v12130_v40 = vmul.f32 %v11486_v24, %v12091_v46  ;;  %v1855_v62 = vmul.f32 %v11686_v44, %v1242_v38 }
 0x323   : > { %v1494_v28 = vsel %vm1454_vm3, %v1489_v41, %v1493_v17  ;;  %v1498_v25 = vsel %vm1454_vm3, %v1493_v17, %v1497_v1  ;;  %v1721_v53 = vrot.slane %v1634_v20, 2  ;;  %v12147_v20 = vmul.f32 %v11686_v44, %v12091_v46 }
 0x324   : > { %v9572_v33 = vpop.eup %9571  ;;  %v7962_v10 = vmul.f32 -1.442695, %v12124_v63  ;;  %v7964_v48 = vmul.f32 -1.442695, %v12126_v31  ;;  %v1573_v19 = vadd.f32 %v1494_v28, %v1348_v50  ;;  %v1575_v4 = vadd.f32 %v1498_v25, %v1350_v45  ;;  %v1246_v28 = vld [vmem:[#allocation3 + $0xc0] sm:$0xff]  ;;  %v12159_v25 = vpop.permute.xlu1 %3431 }
 0x325   : > { %v9574_v27 = vpop.eup %9573  ;;  %v2147_v34 = vadd.f32 1.0, %v9572_v33  ;;  %v1722_v15 = vsel %vm1682_vm4, %v1717_v3, %v1721_v53  ;;  %v1725_v41 = vrot.slane %v12130_v40, 2  ;;  %2757 = vxpose.xlu0.b32.cont [12/16] (narrow) %v11394_v51, 8  ;;  %v1936_v45 = vrot.slane %v1855_v62, 3  ;;  %v1248_v62 = vld [vmem:[#allocation3 + $0xd0] sm:$0xff]  ;;  %v1250_v40 = vld [vmem:[#allocation3 + $0xe0] sm:$0xff] }
 0x326   : > { %v9576_v8 = vpop.eup %9575  ;;  %v2149_v14 = vadd.f32 1.0, %v9574_v27  ;;  %v1801_v38 = vadd.f32 %v1722_v15, %v1573_v19  ;;  %v12157_v51 = vmul.f32 %v12061_v36, %v12006_v11  ;;  %v12170_v11 = vmul.f32 %v12061_v36, %v12030_v35 }
 0x327   : > { %v9578_v52 = vpop.eup %9577  ;;  %v2245_v17 = vmul.f32 %v9576_v8, %v11918_v22  ;;  %9579 = vrcp.f32 %v2147_v34  ;;  %v1726_v3 = vsel %vm1682_vm4, %v1721_v53, %v1725_v41  ;;  %v1937_v53 = vsel %vm1901_vm5, %v1932_v18, %v1936_v45 }
 0x328   : > { %v12150_v50 = vmul.f32 %v9578_v52, %v11920_v26  ;;  %9581 = vrcp.f32 %v2149_v14  ;;  %v1803_v33 = vadd.f32 %v1726_v3, %v1575_v4  ;;  %v1940_v34 = vrot.slane %v12147_v20, 3  ;;  %v12209_v3 = vpop.permute.xlu1 %3433 }
 0x329   : > { %v3290_v22 = vrot.slane %v2245_v17, 5  ;;  %9583 = vpow2.f32 %v7962_v10  ;;  %8717 = vmatpush3.bf16.xpose.msra.mxu0 %v12027_v43  ;;  %2758 = vxpose.xlu0.b32.cont [13/16] (narrow) %v11457_v47, 8  ;;  %v12178_v10 = vadd.f32 %v1937_v53, %v1801_v38  ;;  %v1299_v18 = vmul.f32 %v10618_v54, %v12091_v46 }
 0x32a   : > { %v3292_v27 = vrot.slane %v12150_v50, 5  ;;  %9585 = vpow2.f32 %v7964_v48  ;;  %9199 = vmatprep.subr.msk.bf16.mxu0 %vm3451_vm10, %v11673_v29  ;;  %v12186_v29 = vmul.f32 %v12061_v36, %v2245_v17  ;;  %v1301_v35 = vmul.f32 %v10618_v54, %v1246_v28 }
 0x32b   : > { %v12175_v43 = vsel %vm3284_vm7, %v3288_v59, %v3290_v22  ;;  %v1941_v59 = vsel %vm1901_vm5, %v1936_v45, %v1940_v34  ;;  %v7966_v48 = vmul.f32 -1.442695, %v12178_v10  ;;  %v1410_v19 = vmul.f32 %v15475_v23, %v1246_v28 }
 0x32c   : > { %v12183_v47 = vsel %vm3284_vm7, %v3290_v22, %v3292_v27  ;;  %v12197_v8 = vmul.f32 %v15475_v23, %v1248_v62  ;;  %v12199_v14 = vadd.f32 %v1941_v59, %v1803_v33  ;;  %v1352_v4 = vadd.f32 %v15474_v2, %v1299_v18 }
 0x32d   : > { %v1354_v15 = vadd.f32 %v15474_v2, %v1301_v35  ;;  %v1638_v46 = vmul.f32 %v11486_v24, %v1246_v28  ;;  %2759 = vxpose.xlu0.b32.cont [14/16] (narrow) %v11461_v37, 8  ;;  %9587 = vpow2.f32 %v7966_v48  ;;  %v1501_v52 = vrot.slane %v1410_v19, 1 }
 0x32e   : > { %v1505_v17 = vrot.slane %v12197_v8, 1  ;;  %v12207_v38 = vmul.f32 %v11486_v24, %v1248_v62  ;;  %v12213_v45 = vmul.f32 %v12061_v36, %v12150_v50  ;;  %v7968_v22 = vmul.f32 -1.442695, %v12199_v14 }
 0x32f   : > { %v1729_v33 = vrot.slane %v1638_v46, 2  ;;  %v1859_v53 = vmul.f32 %v11686_v44, %v1246_v28  ;;  %v1502_v37 = vsel %vm1454_vm3, %v1497_v1, %v1501_v52  ;;  %v12225_v48 = vmul.f32 %v11686_v44, %v1248_v62 }
 0x330   : > { %v1506_v35 = vsel %vm1454_vm3, %v1501_v52, %v1505_v17  ;;  %v1733_v59 = vrot.slane %v12207_v38, 2  ;;  %9589 = vpow2.f32 %v7968_v22  ;;  %v1577_v28 = vadd.f32 %v1502_v37, %v1352_v4 }
 0x331   : > { %v9580_v18 = vpop.eup %9579  ;;  %8719 = vmatpush3.bf16.xpose.msra.mxu0 %v12040_v16  ;;  %v1579_v21 = vadd.f32 %v1506_v35, %v1354_v15  ;;  %2760 = vxpose.xlu0.b32.cont [15/16] (narrow) %v11467_v9, 8  ;;  %v1730_v52 = vsel %vm1682_vm4, %v1725_v41, %v1729_v33  ;;  %v1944_v26 = vrot.slane %v1859_v53, 3  ;;  %v1303_v16 = vmul.f32 %v10618_v54, %v1248_v62  ;;  %v12244_v35 = vpop.permute.xlu1 %3435 }
 0x332   : > { %v9582_v19 = vpop.eup %9581  ;;  %v2249_v46 = vmul.f32 %v9580_v18, %v12020_v57  ;;  %9200 = vmatprep.subr.msk.bf16.mxu0 %vm3451_vm10, %v11814_v61  ;;  %v1734_v9 = vsel %vm1682_vm4, %v1729_v33, %v1733_v59  ;;  %v1805_v15 = vadd.f32 %v1730_v52, %v1577_v28  ;;  %v1252_v33 = vld [vmem:[#allocation3 + $0xf0] sm:$0xff]  ;;  %v1948_v50 = vrot.slane %v12225_v48, 3 }
 0x333   : > { %v9584_v6 = vpop.eup %9583  ;;  %v12233_v1 = vmul.f32 %v9582_v19, %v12022_v12  ;;  %v1807_v37 = vadd.f32 %v1734_v9, %v1579_v21  ;;  %v1945_v28 = vsel %vm1901_vm5, %v1940_v34, %v1944_v26  ;;  %v12274_v20 = vmul.f32 %v11486_v24, %v1252_v33 }
 0x334   : > { %v9586_v57 = vpop.eup %9585  ;;  %v3294_v22 = vrot.slane %v2249_v46, 5  ;;  %v2151_v4 = vadd.f32 1.0, %v9584_v6  ;;  %v1305_v6 = vmul.f32 %v10618_v54, %v1250_v40  ;;  %v1949_v48 = vsel %vm1901_vm5, %v1944_v26, %v1948_v50 }
 0x335   : > { %v3296_v12 = vrot.slane %v12233_v1, 5  ;;  %v2153_v18 = vadd.f32 1.0, %v9586_v57  ;;  %2761 = vxpose.xlu0.b32.end [16/16] (narrow) %v11471_v32, 8  ;;  %v1356_v32 = vadd.f32 %v15474_v2, %v1303_v16  ;;  %v1414_v57 = vmul.f32 %v15475_v23, %v1250_v40  ;;  %v12285_v41 = vpop.permute.xlu1 %3732 }
 0x336   : > { %v12251_v53 = vsel %vm3284_vm7, %v3292_v27, %v3294_v22  ;;  %9591 = vrcp.f32 %v2151_v4  ;;  %v12264_v27 = vadd.f32 %v1945_v28, %v1805_v15  ;;  %v12270_v4 = vmul.f32 %v15475_v23, %v1252_v33 }
 0x337   : > { %v12258_v21 = vsel %vm3284_vm7, %v3294_v22, %v3296_v12  ;;  %9593 = vrcp.f32 %v2153_v18  ;;  %v9588_v52 = vpop.eup %9587  ;;  %v1642_v22 = vmul.f32 %v11486_v24, %v1250_v40  ;;  %v1358_v16 = vadd.f32 %v15474_v2, %v1305_v6 }
 0x338   : > { %v2155_v34 = vadd.f32 1.0, %v9588_v52  ;;  %v7970_v9 = vmul.f32 -1.442695, %v12264_v27  ;;  %v12282_v15 = vadd.f32 %v1949_v48, %v1807_v37  ;;  %v1509_v18 = vrot.slane %v1414_v57, 1 }
 0x339   : > { %8721 = vmatpush3.bf16.xpose.msra.mxu0 %v12050_v5  ;;  %v1513_v28 = vrot.slane %v12270_v4, 1  ;;  %v1737_v19 = vrot.slane %v1642_v22, 2  ;;  %v12288_v5 = vmul.f32 %v12061_v36, %v2249_v46  ;;  %v1741_v26 = vrot.slane %v12274_v20, 2 }
 0x33a   : > { %9201 = vmatprep.subr.msk.bf16.mxu0 %vm3451_vm10, %v11939_v39  ;;  %v9590_v61 = vpop.eup %9589  ;;  %9595 = vrcp.f32 %v2155_v34  ;;  %v1863_v6 = vmul.f32 %v11686_v44, %v1250_v40  ;;  %v7972_v39 = vmul.f32 -1.442695, %v12282_v15  ;;  %v1510_v37 = vsel %vm1454_vm3, %v1505_v17, %v1509_v18  ;;  %v1254_v17 = vld [vmem:[#allocation3 + $0x100] sm:$0x1f] }
 0x33b   : > { %v2157_v52 = vadd.f32 1.0, %v9590_v61  ;;  %9597 = vpow2.f32 %v7970_v9  ;;  %v12298_v57 = vmul.f32 %v12061_v36, %v12233_v1  ;;  %v1514_v46 = vsel %vm1454_vm3, %v1509_v18, %v1513_v28  ;;  %v1366_v18 = vld [vmem:[#allocation3 + $0x100] sm:$0x3f] }
 0x33c   : > { %v1581_v22 = vadd.f32 %v1510_v37, %v1356_v32  ;;  %v1738_v61 = vsel %vm1682_vm4, %v1733_v59, %v1737_v19  ;;  %v1583_v40 = vadd.f32 %v1514_v46, %v1358_v16  ;;  %v12307_v34 = vmul.f32 %v11686_v44, %v1252_v33 }
 0x33d   : > { %9599 = vrcp.f32 %v2157_v52  ;;  %v1952_v8 = vrot.slane %v1863_v6, 3  ;;  %v1742_v9 = vsel %vm1682_vm4, %v1737_v19, %v1741_v26  ;;  %v1307_v32 = vmul.f32 %v10618_v54, %v1252_v33  ;;  %v12316_v6 = vpop.permute.xlu1 %3437 }
 0x33e   : > { %9601 = vpow2.f32 %v7972_v39  ;;  %v1809_v62 = vadd.f32 %v1738_v61, %v1581_v22  ;;  %v1811_v52 = vadd.f32 %v1742_v9, %v1583_v40  ;;  %v1956_v37 = vrot.slane %v12307_v34, 3 }
 0x33f   : > { %v1953_v16 = vsel %vm1901_vm5, %v1948_v50, %v1952_v8  ;;  %v1309_v19 = vmul.f32 %v10618_v54, %v1254_v17  ;;  %v1360_v33 = vadd.f32 %v15474_v2, %v1307_v32  ;;  %v1418_v61 = vmul.f32 %v15475_v23, %v1366_v18 }
 0x340   : > { %v9592_v48 = vpop.eup %9591  ;;  %v12320_v46 = vadd.f32 %v1953_v16, %v1809_v62  ;;  %v1957_v50 = vsel %vm1901_vm5, %v1952_v8, %v1956_v37  ;;  %v6784_v40 = vrot.slane %v12288_v5, 5  ;;  %v1591_v62 = vld [vmem:[#allocation3 + $0x100] sm:$0x7f]  ;;  %v15235_v58 = vmov 3  }
 0x341   : > { %v9594_v38 = vpop.eup %9593  ;;  %v2253_v59 = vmul.f32 %v9592_v48, %v12124_v63  ;;  %8723 = vmatpush3.bf16.xpose.msra.mxu0 %v12122_v30  ;;  %v6786_v30 = vrot.slane %v12298_v57, 5  ;;  %v1817_v48 = vld [vmem:[#allocation3 + $0x100] sm:$0xff]  ;;  %v1362_v23 = vadd.f32 %v15474_v2, %v1309_v19  ;;  %v1517_v18 = vrot.slane %v1418_v61, 1 }
 0x342   : > { %v2255_v39 = vmul.f32 %v9594_v38, %v12126_v31  ;;  %v12331_v31 = vadd.f32 %v1957_v50, %v1811_v52  ;;  %v7974_v8 = vmul.f32 -1.442695, %v12320_v46  ;;  %v1646_v1 = vmul.f32 %v11486_v24, %v1591_v62  ;;  %v12349_v52 = vpop.permute.xlu1 %3439 }
 0x343   : > { %v3298_v22 = vrot.slane %v2253_v59, 5  ;;  %v12325_v63 = vmul.f32 %v12061_v36, %v2253_v59  ;;  %v1518_v16 = vsel %vm1454_vm3, %v1513_v28, %v1517_v18  ;;  %v15520_v62 = vrot.slane %v12186_v29, 5 }
 0x344   : > { %v3300_v34 = vrot.slane %v2255_v39, 5  ;;  %v6749_v54 = vmul.f32 %v12061_v36, %v2255_v39  ;;  %v9596_v9 = vpop.eup %9595  ;;  %v7976_v32 = vmul.f32 -1.442695, %v12331_v31  ;;  %9603 = vpow2.f32 %v7974_v8 }
 0x345   : > { %v12337_v17 = vsel %vm3284_vm7, %v3296_v12, %v3298_v22  ;;  %v6788_v57 = vrot.slane %v12325_v63, 5  ;;  %v9598_v38 = vpop.eup %9597  ;;  %v2257_v59 = vmul.f32 %v9596_v9, %v12178_v10  ;;  %v1867_v12 = vmul.f32 %v11686_v44, %v1817_v48 }
 0x346   : > { %v12342_v5 = vsel %vm3284_vm7, %v3298_v22, %v3300_v34  ;;  %v2159_v2 = vadd.f32 1.0, %v9598_v38  ;;  %9605 = vpow2.f32 %v7976_v32  ;;  %v1587_v39 = vadd.f32 %v1517_v18, %v1362_v23 }
 0x347   : > { %v9600_v19 = vpop.eup %9599  ;;  %v3302_v22 = vrot.slane %v2257_v59, 5  ;;  %v6750_v63 = vmul.f32 %v12061_v36, %v2257_v59  ;;  %v1585_v50 = vadd.f32 %v1518_v16, %v1360_v33  ;;  %v1745_v10 = vrot.slane %v1646_v1, 2 }
 0x348   : > { %v9602_v61 = vpop.eup %9601  ;;  %v2259_v24 = vmul.f32 %v9600_v19, %v12199_v14  ;;  %9607 = vrcp.f32 %v2159_v2  ;;  %v1960_v44 = vrot.slane %v1867_v12, 3  ;;  %v15521_v48 = vrot.slane %v12170_v11, 5  ;;  %v12378_v12 = vpop.permute.xlu1 %3734 }
 0x349   : > { %v6790_v28 = vrot.slane %v6749_v54, 5  ;;  %v6792_v8 = vrot.slane %v6750_v63, 5  ;;  %v12364_v23 = vsel %vm3284_vm7, %v3300_v34, %v3302_v22  ;;  %v2161_v9 = vadd.f32 1.0, %v9602_v61 }
 0x34a   : > { %v12361_v4 = vsel %vm3284_vm7, %v15521_v48, %v15520_v62  ;;  %v3304_v33 = vrot.slane %v2259_v24, 5  ;;  %v6751_v32 = vmul.f32 %v12061_v36, %v2259_v24  ;;  %v1746_v14 = vsel %vm1682_vm4, %v1741_v26, %v1745_v10 }
 0x34b   : > { %15522 = vst [vmem:[#allocation54_spill] sm:$0xff] %v12361_v4  ;;  %v1815_v18 = vadd.f32 %v1745_v10, %v1587_v39  ;;  %9609 = vrcp.f32 %v2161_v9  ;;  %v1813_v38 = vadd.f32 %v1746_v14, %v1585_v50  ;;  %v1961_v59 = vsel %vm1901_vm5, %v1956_v37, %v1960_v44 }
 0x34c   : > { %v15523_v1 = vrot.slane %v12075_v60, 5  ;;  %v15524_v54 = vrot.slane %v12157_v51, 5  ;;  %v12381_v2 = vsel %vm3284_vm7, %v3302_v22, %v3304_v33  ;;  %v6794_v20 = vrot.slane %v6751_v32, 5 }
 0x34d   : > { %v12383_v16 = vadd.f32 %v1960_v44, %v1815_v18  ;;  %v15526_v26 = vmov %v15521_v48  ;;  %v2028_v19 = vadd.f32 %v1961_v59, %v1813_v38  ;;  %v12393_v51 = vsel %vm3284_vm7, %v6786_v30, %v6788_v57  ;;  %v12420_v18 = vpop.permute.xlu1 %3441 }
 0x34e   : > { %v12376_v34 = vsel %vm3284_vm7, %v15524_v54, %v15523_v1  ;;  %v15527_v39 = vmov %v15523_v1  ;;  %15529 = vst [vmem:[#allocation49_spill] sm:$0xff] %v12393_v51  ;;  %v15530_v63 = vrot.slane %v12213_v45, 5  ;;  %v15531_v50 = vmov %v15520_v62  ;;  %v9604_v29 = vpop.eup %9603 }
 0x34f   : > { %15525 = vst [vmem:[#allocation51_spill] sm:$0xff] %v12376_v34  ;;  %v12390_v37 = vsel %vm3284_vm7, %v15527_v39, %v15526_v26  ;;  %v7980_v60 = vmul.f32 -1.442695, %v12383_v16  ;;  %v12409_v61 = vsel %vm3284_vm7, %v6784_v40, %v6786_v30  ;;  %v12412_v24 = vsel %vm3284_vm7, %v6788_v57, %v6790_v28 }
 0x350   : > { %15528 = vst [vmem:[#allocation65_spill] sm:$0xff] %v12390_v37  ;;  %v12400_v22 = vsel %vm3284_vm7, %v15531_v50, %v15530_v63  ;;  %v15533_v10 = vmov %v15530_v63  ;;  %15535 = vst [vmem:[#allocation66_spill] sm:$0xff] %v12409_v61  ;;  %v12415_v44 = vsel %vm3284_vm7, %v6790_v28, %v6792_v8  ;;  %v7978_v62 = vmul.f32 -1.442695, %v2028_v19  ;;  %v9606_v45 = vpop.eup %9605 }
 0x351   : > { %15532 = vst [vmem:[#allocation53_spill] sm:$0xff] %v12400_v22  ;;  %v12405_v11 = vsel %vm3284_vm7, %v15533_v10, %v6784_v40  ;;  %15536 = vst [vmem:[#allocation59_spill] sm:$0xff] %v12412_v24  ;;  %v12418_v48 = vsel %vm3284_vm7, %v6792_v8, %v6794_v20  ;;  %v2163_v9 = vadd.f32 1.0, %v9604_v29  ;;  %9611 = vpow2.f32 %v7980_v60  ;;  %v12428_v1 = vpop.permute.xlu1 %3443 }
 0x352   : > { %15534 = vst [vmem:[#allocation57_spill] sm:$0xff] %v12405_v11  ;;  %15537 = vst [vmem:[#allocation55_spill] sm:$0xff] %v12415_v44  ;;  %v2165_v32 = vadd.f32 1.0, %v9606_v45  ;;  %9613 = vpow2.f32 %v7978_v62  ;;  %v9608_v14 = vpop.eup %9607  ;;  %v15557_v44 = vmov 4   ;;  %v15561_v11 = vmov 5  }
 0x353   : > { %15538 = vst [vmem:[#allocation68_spill] sm:$0xff] %v12418_v48  ;;  %9615 = vrcp.f32 %v2163_v9  ;;  %v2261_v40 = vmul.f32 %v9608_v14, %v12264_v27  ;;  %v15239_v48 = vmov 5   ;;  %v15567_v34 = vmov 2  }
 0x354   : > { %9617 = vrcp.f32 %v2165_v32  ;;  %vm7803_vm3 = vcmask 519168  }
 0x355   : > { %v9610_v30 = vpop.eup %9609  ;;  %v3306_v57 = vrot.slane %v2261_v40, 5  ;;  %v6752_v28 = vmul.f32 %v12061_v36, %v2261_v40 }
 0x356   : > { %v2263_v38 = vmul.f32 %v9610_v30, %v12282_v15 }
 0x357   : > { %v6796_v8 = vrot.slane %v6752_v28, 5  ;;  %v12426_v59 = vsel %vm3284_vm7, %v3304_v33, %v3306_v57 }
 0x358   : > { %v3308_v54 = vrot.slane %v2263_v38, 5  ;;  %v6753_v26 = vmul.f32 %v12061_v36, %v2263_v38 }
 0x359   : > { %v12432_v39 = vsel %vm3284_vm7, %v6794_v20, %v6796_v8  ;;  %v15227_v20 = vmov 1  }
 0x35a   : > { %15539 = vst [vmem:[#allocation58_spill] sm:$0xff] %v12432_v39  ;;  %v12435_v63 = vsel %vm3284_vm7, %v3306_v57, %v3308_v54  ;;  %v6798_v50 = vrot.slane %v6753_v26, 5 }
 0x35b   : > { %v9612_v27 = vpop.eup %9611 }
 0x35c   : > { %v9614_v10 = vpop.eup %9613  ;;  %v2169_v60 = vadd.f32 1.0, %v9612_v27  ;;  %v12438_v33 = vsel %vm3284_vm7, %v6796_v8, %v6798_v50  ;;  %v12441_v9 = vpop.permute.xlu1 %3419 }
 0x35d   : > { %v9616_v15 = vpop.eup %9615  ;;  %v2167_v29 = vadd.f32 1.0, %v9614_v10  ;;  %15540 = vst [vmem:[#allocation61_spill] sm:$0xff] %v12438_v33 }
 0x35e   : > { %v9618_v62 = vpop.eup %9617  ;;  %v2265_v45 = vmul.f32 %v9616_v15, %v12320_v46  ;;  %9619 = vrcp.f32 %v2169_v60  ;;  %9269 = vset.pattern.permute.xlu0 %v15227_v20 }
 0x35f   : > { %v2267_v32 = vmul.f32 %v9618_v62, %v12331_v31  ;;  %9621 = vrcp.f32 %v2167_v29 }
 0x360   : > { %v3310_v14 = vrot.slane %v2265_v45, 5  ;;  %v6754_v40 = vmul.f32 %v12061_v36, %v2265_v45  ;;  %v3737_v46 = vpop.permute.xlu1 %3736 }
 0x361   : > { %v3312_v30 = vrot.slane %v2267_v32, 5  ;;  %v6755_v57 = vmul.f32 %v12061_v36, %v2267_v32 }
 0x362   : > { %v6800_v28 = vrot.slane %v6754_v40, 5  ;;  %v12448_v38 = vsel %vm3284_vm7, %v3308_v54, %v3310_v14 }
 0x363   : > { %v12451_v8 = vsel %vm3284_vm7, %v3310_v14, %v3312_v30  ;;  %v6802_v26 = vrot.slane %v6755_v57, 5 }
 0x364   : > { %v12454_v27 = vsel %vm3284_vm7, %v6798_v50, %v6800_v28 }
 0x365   : > { %15541 = vst [vmem:[#allocation62_spill] sm:$0xff] %v12454_v27  ;;  %v12457_v31 = vsel %vm3284_vm7, %v6800_v28, %v6802_v26 }
 0x366   : > { %15542 = vst [vmem:[#allocation70_spill] sm:$0xff] %v12457_v31 }
 0x367   : > { %v12459_v60 = vpop.permute.xlu1 %3445 }
 0x368   : > { %v9620_v10 = vpop.eup %9619 }
 0x369   : > { %v9622_v15 = vpop.eup %9621  ;;  %v2271_v29 = vmul.f32 %v9620_v10, %v12383_v16 }
 0x36a   : > { %v2269_v62 = vmul.f32 %v9622_v15, %v2028_v19  ;;  %v3367_v15 = vld [vmem:[#allocation2] sm:$0xff] }
 0x36b   : > { %v3316_v54 = vrot.slane %v2271_v29, 5  ;;  %v6757_v45 = vmul.f32 %v12061_v36, %v2271_v29  ;;  %v3368_v29 = vld [vmem:[#allocation2 + $0x8] sm:$0xff] }
 0x36c   : > { %v3314_v32 = vrot.slane %v2269_v62, 5  ;;  %v6756_v14 = vmul.f32 %v12061_v36, %v2269_v62  ;;  %v12482_v36 = vpop.permute.xlu0 %3449 }
 0x36d   : > { %v12464_v40 = vpop.permute.xlu1 %3421  ;;  %v6806_v50 = vrot.slane %v6757_v45, 5 }
 0x36e   : > { %v12467_v57 = vsel %vm3284_vm7, %v3314_v32, %v3316_v54  ;;  %v6804_v28 = vrot.slane %v6756_v14, 5  ;;  %v12470_v20 = vsel %vm3284_vm7, %v3312_v30, %v3314_v32  ;;  %v12486_v54 = vpack.c.bf16 %v3368_v29, %v3367_v15 }
 0x370   : > { %v12473_v56 = vsel %vm3284_vm7, %v6802_v26, %v6804_v28  ;;  %v12476_v16 = vsel %vm3284_vm7, %v6804_v28, %v6806_v50  ;;  %v10040_v26 = vld [vmem:[%s15109_s15] sm:$0xff] }
 0x371   : > { %15543 = vst [vmem:[#allocation71_spill] sm:$0xff] %v12473_v56  ;;  %15544 = vst [vmem:[#allocation69_spill] sm:$0xff] %v12476_v16  ;;  %v12478_v19 = vpop.permute.xlu1 %3447 }
 0x375   : > { %v12480_v10 = vpop.permute.xlu1 %3423 }
 0x379   : > { %v12484_v62 = vpop.permute.xlu1 %3425  ;;  %v2762_v30 = vpop.trf.xlu0 }
 0x37a   : > { %8626 = vmatmul.mubr.f32.vlgmr.msra.gmra.mrb[24].mxu1 %v2762_v30 }
 0x37b   : > { %8629 = vmatpush3.msra.mxu1 %v10040_v26 }
 0x37c   : > { %9151 = vmatprep.subr.bf16.mxu1 %v12486_v54 }
 0x37d   : > { %v12491_v45 = vpop.permute.xlu1 %3427 }
 0x381   : > { %v3739_v32 = vpop.permute.xlu1 %3738 }
 0x385   : > { %v3741_v14 = vpop.permute.xlu1 %3740 }
 0x389   : > { %v3727_v50 = vpop.permute.xlu1 %3726 }
 0x38a   : > { %8724 = vmatprep.mubr.msk.bf16.mxu0 %vm3451_vm10, %v3727_v50 }
 0x38d   : > { %v3729_v28 = vpop.permute.xlu1 %3728 }
 0x38e   : > { %8725 = vmatmul.mubr.msk.bf16.vlgmr.msra.gmra.mrb[72].mxu0 %vm3451_vm10, %v3729_v28  ;;  %v15233_v28 = vmov 2  }
 0x391   : > { %v3731_v15 = vpop.permute.xlu1 %3730 }
 0x392   : > { %8728 = vmatprep.mubr.msk.bf16.mxu0 %vm3451_vm10, %v3731_v15 }
 0x396   : > { %8729 = vmatmul.mubr.msk.bf16.gmra.mrb[76].mxu0 %vm3451_vm10, %v12285_v41 }
 0x397   : > { %8732 = vmatprep.mubr.msk.bf16.mxu0 %vm3451_vm10, %v12378_v12 }
 0x39e   : > { %8733 = vmatmul.mubr.msk.bf16.gmra.mrb[80].mxu0 %vm3451_vm10, %v3737_v46 }
 0x39f   : > { %8736 = vmatprep.mubr.msk.bf16.mxu0 %vm3451_vm10, %v3739_v32  ;;  %v15549_v32 = vmov 1  }
 0x3a6   : > { %8737 = vmatmul.mubr.msk.bf16.gmra.mrb[84].mxu0 %vm3451_vm10, %v3741_v14 }
 0x3b0   : > { %v12504_v29 = vpop.f32.mrb[40].mxu0 }
 0x3b1   : > { %15545 = vst [vmem:[#allocation72_spill] sm:$0xff] %v12504_v29  ;;  %v2850_v30 = vmul.f32 1.442695, %v12504_v29  ;;  %v12507_v26 = vpop.f32.mrb[41].mxu0  ;;  %3910 = vperm.xlu1 %9262, %v12504_v29  }
 0x3b2   : > { %15546 = vst [vmem:[#allocation78_spill] sm:$0xff] %v12507_v26  ;;  %v2848_v50 = vmul.f32 1.442695, %v12507_v26  ;;  %4189 = vperm.xlu0 %9269, %v12507_v26  }
 0x3b4   : > { %9623 = vpow2.f32 %v2848_v50  ;;  %v12512_v41 = vpop.f32.mrb[42].mxu0 }
 0x3b5   : > { %15547 = vst [vmem:[#allocation79_spill] sm:$0xff] %v12512_v41  ;;  %9625 = vpow2.f32 %v2850_v30  ;;  %v2854_v12 = vmul.f32 1.442695, %v12512_v41  ;;  %v12515_v46 = vpop.f32.mrb[43].mxu0  ;;  %9263 = vset.pattern.permute.xlu1 %v15549_v32 }
 0x3b6   : > { %15548 = vst [vmem:[#allocation80_spill] sm:$0xff] %v12515_v46  ;;  %v2852_v14 = vmul.f32 1.442695, %v12515_v46  ;;  %9270 = vset.pattern.permute.xlu0 %v15233_v28  ;;  %4193 = vperm.xlu1 %9263, %v12504_v29  }
 0x3b7   : > { %9627 = vpow2.f32 %v2854_v12  ;;  %4555 = vperm.xlu0 %9270, %v12507_v26  }
 0x3b8   : > { %9629 = vpow2.f32 %v2852_v14  ;;  %v12522_v15 = vpop.f32.mrb[44].mxu0 }
 0x3b9   : > { %15550 = vst [vmem:[#allocation81_spill] sm:$0xff] %v12522_v15  ;;  %v2858_v30 = vmul.f32 1.442695, %v12522_v15  ;;  %v12525_v50 = vpop.f32.mrb[45].mxu0 }
 0x3ba   : > { %15551 = vst [vmem:[#allocation82_spill] sm:$0xff] %v12525_v50  ;;  %v2856_v42 = vmul.f32 1.442695, %v12525_v50  ;;  %9264 = vset.pattern.permute.xlu1 %v15233_v28 }
 0x3bb   : > { %9631 = vpow2.f32 %v2858_v30  ;;  %9271 = vset.pattern.permute.xlu0 %v15235_v58  ;;  %4559 = vperm.xlu1 %9264, %v12504_v29   ;;  %v15237_v30 = vmov 4  }
 0x3bc   : > { %9633 = vpow2.f32 %v2856_v42  ;;  %4913 = vperm.xlu0 %9271, %v12507_v26   ;;  %v12532_v12 = vpop.f32.mrb[46].mxu0 }
 0x3bd   : > { %15552 = vst [vmem:[#allocation83_spill] sm:$0xff] %v12532_v12  ;;  %v2862_v14 = vmul.f32 1.442695, %v12532_v12  ;;  %v12535_v7 = vpop.f32.mrb[47].mxu0 }
 0x3be   : > { %15553 = vst [vmem:[#allocation84_spill] sm:$0xff] %v12535_v7  ;;  %v9624_v16 = vpop.eup %9623  ;;  %v2860_v27 = vmul.f32 1.442695, %v12535_v7 }
 0x3bf   : > { %v9626_v31 = vpop.eup %9625  ;;  %9635 = vpow2.f32 %v2862_v14  ;;  %8630 = vmatprep.mubr.msk.f32.mxu1 %vm2880_vm9, %v9624_v16  ;;  %9265 = vset.pattern.permute.xlu1 %v15235_v58 }
 0x3c0   : > { %9637 = vpow2.f32 %v2860_v27  ;;  %9272 = vset.pattern.permute.xlu0 %v15237_v30  ;;  %v12541_v42 = vpop.f32.mrb[48].mxu0  ;;  %8631 = vmatmul.mubr.msk.f32.vlgmr.msra.gmra.mrb[26].mxu1 %vm2880_vm9, %v9626_v31 }
 0x3c1   : > { %15554 = vst [vmem:[#allocation85_spill] sm:$0xff] %v12541_v42  ;;  %v9628_v28 = vpop.eup %9627  ;;  %v2866_v56 = vmul.f32 1.442695, %v12541_v42  ;;  %4917 = vperm.xlu1 %9265, %v12504_v29   ;;  %5271 = vperm.xlu0 %9272, %v12507_v26   ;;  %v12547_v14 = vpop.f32.mrb[49].mxu0 }
 0x3c2   : > { %15555 = vst [vmem:[#allocation86_spill] sm:$0xff] %v12547_v14  ;;  %v9630_v16 = vpop.eup %9629  ;;  %v2864_v58 = vmul.f32 1.442695, %v12547_v14  ;;  %9153 = vmatpush3.bf16.msra.mxu1 %v12486_v54 }
 0x3c3   : > { %9639 = vpow2.f32 %v2866_v56  ;;  %8633 = vmatprep.mubr.msk.f32.mxu1 %vm2880_vm9, %v9630_v16 }
 0x3c4   : > { %9641 = vpow2.f32 %v2864_v58  ;;  %v12552_v27 = vpop.f32.mrb[50].mxu0  ;;  %8634 = vmatmul.mubr.msk.f32.gmra.mrb[28].mxu1 %vm2880_vm9, %v9628_v28 }
 0x3c5   : > { %15556 = vst [vmem:[#allocation87_spill] sm:$0xff] %v12552_v27  ;;  %v9632_v31 = vpop.eup %9631  ;;  %v2870_v30 = vmul.f32 1.442695, %v12552_v27  ;;  %9266 = vset.pattern.permute.xlu1 %v15557_v44  ;;  %9273 = vset.pattern.permute.xlu0 %v15239_v48  ;;  %v12558_v39 = vpop.f32.mrb[51].mxu0 }
 0x3c6   : > { %15558 = vst [vmem:[#allocation88_spill] sm:$0xff] %v12558_v39  ;;  %v9634_v33 = vpop.eup %9633  ;;  %v2868_v56 = vmul.f32 1.442695, %v12558_v39  ;;  %5275 = vperm.xlu1 %9266, %v12504_v29   ;;  %5629 = vperm.xlu0 %9273, %v12507_v26  }
 0x3c7   : > { %9643 = vpow2.f32 %v2870_v30  ;;  %8636 = vmatprep.mubr.msk.f32.mxu1 %vm2880_vm9, %v9634_v33 }
 0x3c8   : > { %9645 = vpow2.f32 %v2868_v56  ;;  %v12564_v58 = vpop.f32.mrb[52].mxu0  ;;  %8637 = vmatmul.mubr.msk.f32.gmra.mrb[30].mxu1 %vm2880_vm9, %v9632_v31  ;;  %v15563_v56 = vld [vmem:[#allocation36_spill] sm:$0xff] }
 0x3c9   : > { %15559 = vst [vmem:[#allocation89_spill] sm:$0xff] %v12564_v58  ;;  %v9636_v54 = vpop.eup %9635  ;;  %v2874_v28 = vmul.f32 1.442695, %v12564_v58  ;;  %v12568_v16 = vpop.f32.mrb[53].mxu0 }
 0x3ca   : > { %15560 = vst [vmem:[#allocation90_spill] sm:$0xff] %v12568_v16  ;;  %v9638_v48 = vpop.eup %9637  ;;  %v2872_v61 = vmul.f32 1.442695, %v12568_v16  ;;  %9267 = vset.pattern.permute.xlu1 %v15561_v11  ;;  %9274 = vset.pattern.permute.xlu0 %v15549_v32 }
 0x3cb   : > { %9647 = vpow2.f32 %v2874_v28  ;;  %5633 = vperm.xlu1 %9267, %v12504_v29   ;;  %4201 = vperm.xlu0 %9274, %v12512_v41  }
 0x3cc   : > { %9649 = vpow2.f32 %v2872_v61  ;;  %8639 = vmatprep.mubr.msk.f32.mxu1 %vm2880_vm9, %v9638_v48  ;;  %v12576_v33 = vpop.f32.mrb[54].mxu0  ;;  %v15566_v48 = vmov 0  }
 0x3cd   : > { %15562 = vst [vmem:[#allocation91_spill] sm:$0xff] %v12576_v33  ;;  %v9640_v30 = vpop.eup %9639  ;;  %v2878_v31 = vmul.f32 1.442695, %v12576_v33  ;;  %v12581_v24 = vrot.slane %v12576_v33, %v15563_v56  ;;  %8640 = vmatmul.mubr.msk.f32.gmra.mrb[32].mxu1 %vm2880_vm9, %v9636_v54  ;;  %v12584_v51 = vpop.f32.mrb[55].mxu0  ;;  %v15570_v33 = vmov 3  }
 0x3ce   : > { %15565 = vst [vmem:[#allocation93_spill] sm:$0xff] %v12584_v51  ;;  %v9642_v28 = vpop.eup %9641  ;;  %v2876_v37 = vmul.f32 1.442695, %v12584_v51 }
 0x3cf   : > { %15564 = vst [vmem:[#allocation92_spill] sm:$0xff] %v12581_v24  ;;  %9651 = vpow2.f32 %v2878_v31  ;;  %9268 = vset.pattern.permute.xlu1 %v15566_v48  ;;  %9275 = vset.pattern.permute.xlu0 %v15567_v34 }
 0x3d0   : > { %9653 = vpow2.f32 %v2876_v37  ;;  %8642 = vmatprep.mubr.msk.f32.mxu1 %vm2880_vm9, %v9642_v28  ;;  %3905 = vperm.xlu1 %9268, %v12507_v26   ;;  %v8658_v22 = vpop.f32.mrb[56].mxu0 }
 0x3d1   : > { %v9644_v54 = vpop.eup %9643  ;;  %4567 = vperm.xlu0 %9275, %v12512_v41   ;;  %8643 = vmatmul.mubr.msk.f32.gmra.mrb[34].mxu1 %vm2880_vm9, %v9640_v30  ;;  %v12596_v31 = vmul.f32 %v8658_v22, %v12072_v55  ;;  %v3188_v4 = vpop.f32.mrb[57].mxu0 }
 0x3d2   : > { %v9646_v61 = vpop.eup %9645  ;;  %v12599_v56 = vmul.f32 %v12054_v13, %v3188_v4 }
 0x3d3   : > { %15568 = vst [vmem:[#allocation94_spill] sm:$0xff] %v12596_v31  ;;  %8645 = vmatprep.mubr.msk.f32.mxu1 %vm2880_vm9, %v9646_v61 }
 0x3d4   : > { %15569 = vst [vmem:[#allocation95_spill] sm:$0xff] %v12599_v56  ;;  %v12604_v37 = vpack.c.bf16 %v12596_v31, %v12599_v56  ;;  %3920 = vperm.xlu1 %9268, %v12512_v41   ;;  %v8661_v28 = vpop.f32.mrb[58].mxu0  ;;  %v15603_v56 = vld [vmem:[#allocation91_spill] sm:$0xff] }
 0x3d5   : > { %v9648_v51 = vpop.eup %9647  ;;  %9276 = vset.pattern.permute.xlu0 %v15570_v33  ;;  %8646 = vmatmul.mubr.msk.f32.gmra.mrb[36].mxu1 %vm2880_vm9, %v9644_v54  ;;  %v12610_v55 = vmul.f32 %v8661_v28, %v12183_v47  ;;  %v3198_v22 = vpop.f32.mrb[59].mxu0 }
 0x3d6   : > { %v9650_v13 = vpop.eup %9649  ;;  %4925 = vperm.xlu0 %9276, %v12512_v41   ;;  %v12614_v4 = vmul.f32 %v12175_v43, %v3198_v22  ;;  %8740 = vmatprep.subr.bf16.mxu1 %v12604_v37 }
 0x3d7   : > { %15571 = vst [vmem:[#allocation96_spill] sm:$0xff] %v12610_v55  ;;  %8648 = vmatprep.mubr.msk.f32.mxu1 %vm2880_vm9, %v9650_v13 }
 0x3d8   : > { %15572 = vst [vmem:[#allocation97_spill] sm:$0xff] %v12614_v4  ;;  %3915 = vperm.xlu1 %9268, %v12515_v46   ;;  %v8664_v30 = vpop.f32.mrb[60].mxu0 }
 0x3d9   : > { %v12619_v61 = vpop.eup %9651  ;;  %8649 = vmatmul.mubr.msk.f32.gmra.mrb[38].mxu1 %vm2880_vm9, %v9648_v51  ;;  %v12623_v47 = vmul.f32 %v8664_v30, %v12258_v21  ;;  %v3208_v54 = vpop.f32.mrb[61].mxu0  ;;  %v12647_v30 = vpack.c.bf16 %v12610_v55, %v12614_v4  ;;  %v10042_v4 = vld [vmem:[%s15107_s13 + $0x8] sm:$0xff] }
 0x3da   : > { %15573 = vst [vmem:[#allocation98_spill] sm:$0xff] %v12619_v61  ;;  %v9654_v28 = vpop.eup %9653  ;;  %9277 = vset.pattern.permute.xlu0 %v15557_v44  ;;  %v12627_v43 = vmul.f32 %v12251_v53, %v3208_v54 }
 0x3db   : > { %15574 = vst [vmem:[#allocation99_spill] sm:$0xff] %v12623_v47  ;;  %5283 = vperm.xlu0 %9277, %v12512_v41   ;;  %8651 = vmatprep.mubr.msk.f32.mxu1 %vm2880_vm9, %v9654_v28 }
 0x3dc   : > { %15575 = vst [vmem:[#allocation100_spill] sm:$0xff] %v12627_v43  ;;  %9279 = vset.pattern.permute.xlu1 %v15549_v32 }
 0x3dd   : > { %v8667_v22 = vpop.f32.mrb[62].mxu0  ;;  %8652 = vmatmul.mubr.msk.f32.gmra.mrb[40].mxu1 %vm2880_vm9, %v12619_v61  ;;  %4197 = vperm.xlu1 %9279, %v12515_v46   ;;  %v10043_v61 = vld [vmem:[%s15107_s13 + $0x10] sm:$0xff] }
 0x3de   : > { %v12635_v21 = vmul.f32 %v8667_v22, %v12342_v5  ;;  %v3218_v51 = vpop.f32.mrb[63].mxu0  ;;  %8684 = vmatprep.mubr.msk.f32.mxu1 %vm3451_vm10, %v12441_v9 }
 0x3df   : > { %v12639_v13 = vmul.f32 %v12337_v17, %v3218_v51  ;;  %9278 = vset.pattern.permute.xlu0 %v15561_v11 }
 0x3e0   : > { %15576 = vst [vmem:[#allocation101_spill] sm:$0xff] %v12635_v21  ;;  %5641 = vperm.xlu0 %9278, %v12512_v41  }
 0x3e1   : > { %15577 = vst [vmem:[#allocation102_spill] sm:$0xff] %v12639_v13  ;;  %v8670_v53 = vpop.f32.mrb[64].mxu0  ;;  %8685 = vmatmul.mubr.msk.f32.vlgmr.msra.gmra.mrb[42].mxu1 %vm3451_vm10, %v12464_v40  ;;  %9280 = vset.pattern.permute.xlu1 %v15567_v34  ;;  %v12666_v40 = vpack.c.bf16 %v12623_v47, %v12627_v43  ;;  %v12685_v28 = vpack.c.bf16 %v12635_v21, %v12639_v13 }
 0x3e2   : > { %v12650_v5 = vmul.f32 %v8670_v53, %v12381_v2  ;;  %v3228_v17 = vpop.f32.mrb[65].mxu0  ;;  %8741 = vmatpush3.bf16.msra.mxu1 %v12604_v37  ;;  %8687 = vmatprep.mubr.msk.f32.mxu1 %vm3451_vm10, %v12480_v10 }
 0x3e3   : > { %v12657_v9 = vmul.f32 %v12364_v23, %v3228_v17  ;;  %8742 = vmatprep.subr.bf16.mxu1 %v12647_v30  ;;  %4563 = vperm.xlu1 %9280, %v12515_v46  }
 0x3e4   : > { %15578 = vst [vmem:[#allocation103_spill] sm:$0xff] %v12650_v5  ;;  %9285 = vset.pattern.permute.xlu0 %v15549_v32 }
 0x3e5   : > { %15579 = vst [vmem:[#allocation104_spill] sm:$0xff] %v12657_v9  ;;  %4209 = vperm.xlu0 %9285, %v12522_v15   ;;  %8688 = vmatmul.mubr.msk.f32.gmra.mrb[44].mxu1 %vm3451_vm10, %v12484_v62  ;;  %v12704_v22 = vpack.c.bf16 %v12650_v5, %v12657_v9 }
 0x3e6   : > { %v8673_v2 = vpop.f32.mrb[66].mxu0  ;;  %8743 = vmatpush3.bf16.msra.mxu1 %v12647_v30  ;;  %8690 = vmatprep.mubr.msk.f32.mxu1 %vm3451_vm10, %v12491_v45 }
 0x3e7   : > { %v12670_v54 = vmul.f32 %v8673_v2, %v12435_v63  ;;  %v3238_v23 = vpop.f32.mrb[67].mxu0  ;;  %8744 = vmatprep.subr.bf16.mxu1 %v12666_v40  ;;  %9281 = vset.pattern.permute.xlu1 %v15570_v33 }
 0x3e8   : > { %v12676_v10 = vmul.f32 %v12426_v59, %v3238_v23  ;;  %4921 = vperm.xlu1 %9281, %v12515_v46  }
 0x3e9   : > { %15580 = vst [vmem:[#allocation105_spill] sm:$0xff] %v12670_v54  ;;  %9292 = vset.pattern.permute.xlu0 %v15567_v34  ;;  %8691 = vmatmul.mubr.msk.f32.gmra.mrb[46].mxu1 %vm3451_vm10, %v12132_v49 }
 0x3ea   : > { %15581 = vst [vmem:[#allocation106_spill] sm:$0xff] %v12676_v10  ;;  %v8676_v63 = vpop.f32.mrb[68].mxu0  ;;  %8745 = vmatpush3.bf16.msra.mxu1 %v12666_v40  ;;  %4571 = vperm.xlu0 %9292, %v12525_v50  }
 0x3eb   : > { %v12689_v62 = vmul.f32 %v8676_v63, %v12451_v8  ;;  %v3248_v59 = vpop.f32.mrb[69].mxu0  ;;  %8693 = vmatprep.mubr.msk.f32.mxu1 %vm3451_vm10, %v12159_v25  ;;  %8746 = vmatprep.subr.bf16.mxu1 %v12685_v28 }
 0x3ec   : > { %v12696_v45 = vmul.f32 %v12448_v38, %v3248_v59  ;;  %9282 = vset.pattern.permute.xlu1 %v15557_v44 }
 0x3ed   : > { %15582 = vst [vmem:[#allocation107_spill] sm:$0xff] %v12689_v62  ;;  %5279 = vperm.xlu1 %9282, %v12515_v46   ;;  %8694 = vmatmul.mubr.msk.f32.gmra.mrb[48].mxu1 %vm3451_vm10, %v12209_v3 }
 0x3ee   : > { %15583 = vst [vmem:[#allocation108_spill] sm:$0xff] %v12696_v45  ;;  %v8679_v8 = vpop.f32.mrb[70].mxu0  ;;  %8747 = vmatpush3.bf16.msra.mxu1 %v12685_v28  ;;  %9293 = vset.pattern.permute.xlu0 %v15570_v33  ;;  %v12736_v3 = vpack.c.bf16 %v12689_v62, %v12696_v45 }
 0x3ef   : > { %v12708_v49 = vmul.f32 %v8679_v8, %v12467_v57  ;;  %v3258_v38 = vpop.f32.mrb[71].mxu0  ;;  %8696 = vmatprep.mubr.msk.f32.mxu1 %vm3451_vm10, %v12244_v35  ;;  %8748 = vmatprep.subr.bf16.mxu1 %v12704_v22  ;;  %v12723_v57 = vpack.c.bf16 %v12670_v54, %v12676_v10  ;;  %v15595_v10 = vld [vmem:[#allocation25_spill] sm:$0xff] }
 0x3f0   : > { %v12715_v25 = vmul.f32 %v12470_v20, %v3258_v38  ;;  %4929 = vperm.xlu0 %9293, %v12525_v50  }
 0x3f1   : > { %15584 = vst [vmem:[#allocation109_spill] sm:$0xff] %v12708_v49  ;;  %9283 = vset.pattern.permute.xlu1 %v15561_v11  ;;  %8697 = vmatmul.mubr.msk.f32.gmra.mrb[50].mxu1 %vm3451_vm10, %v12316_v6 }
 0x3f2   : > { %15585 = vst [vmem:[#allocation110_spill] sm:$0xff] %v12715_v25  ;;  %8749 = vmatpush3.bf16.msra.mxu1 %v12704_v22  ;;  %5637 = vperm.xlu1 %9283, %v12515_v46   ;;  %v12749_v35 = vpack.c.bf16 %v12708_v49, %v12715_v25 }
 0x3f3   : > { %8699 = vmatprep.mubr.msk.f32.mxu1 %vm3451_vm10, %v12349_v52  ;;  %8750 = vmatprep.subr.bf16.mxu1 %v12723_v57 }
 0x3f4   : > { %9294 = vset.pattern.permute.xlu0 %v15557_v44 }
 0x3f5   : > { %5287 = vperm.xlu0 %9294, %v12525_v50   ;;  %8700 = vmatmul.mubr.msk.f32.gmra.mrb[52].mxu1 %vm3451_vm10, %v12420_v18 }
 0x3f6   : > { %8751 = vmatpush3.bf16.msra.mxu1 %v12723_v57  ;;  %9284 = vset.pattern.permute.xlu1 %v15566_v48 }
 0x3f7   : > { %8702 = vmatprep.mubr.msk.f32.mxu1 %vm3451_vm10, %v12428_v1  ;;  %8752 = vmatprep.subr.bf16.mxu1 %v12736_v3 }
 0x3f8   : > { %3930 = vperm.xlu1 %9284, %v12522_v15  }
 0x3f9   : > { %9295 = vset.pattern.permute.xlu0 %v15561_v11  ;;  %8703 = vmatmul.mubr.msk.f32.gmra.mrb[54].mxu1 %vm3451_vm10, %v12459_v60 }
 0x3fa   : > { %5645 = vperm.xlu0 %9295, %v12525_v50   ;;  %8753 = vmatpush3.bf16.msra.mxu1 %v12736_v3 }
 0x3fb   : > { %8705 = vmatprep.mubr.msk.f32.mxu1 %vm3451_vm10, %v12478_v19  ;;  %8754 = vmatprep.subr.bf16.mxu1 %v12749_v35 }
 0x3fc   : > { %9286 = vset.pattern.permute.xlu1 %v15567_v34 }
 0x3fd   : > { %4575 = vperm.xlu1 %9286, %v12522_v15   ;;  %8706 = vmatmul.mubr.msk.f32.gmra.mrb[56].mxu1 %vm3451_vm10, %v12482_v36 }
 0x3fe   : > { %9297 = vset.pattern.permute.xlu0 %v15549_v32  ;;  %8755 = vmatpush3.bf16.msra.mxu1 %v12749_v35 }
 0x3ff   : > { %4217 = vperm.xlu0 %9297, %v12532_v12  }
 0x401   : > { %9287 = vset.pattern.permute.xlu1 %v15570_v33 }
 0x402   : > { %4933 = vperm.xlu1 %9287, %v12522_v15  }
 0x403   : > { %9298 = vset.pattern.permute.xlu0 %v15567_v34 }
 0x404   : > { %4583 = vperm.xlu0 %9298, %v12532_v12  }
 0x406   : > { %9288 = vset.pattern.permute.xlu1 %v15557_v44 }
 0x407   : > { %5291 = vperm.xlu1 %9288, %v12522_v15  }
 0x408   : > { %9299 = vset.pattern.permute.xlu0 %v15570_v33 }
 0x409   : > { %4941 = vperm.xlu0 %9299, %v12532_v12  }
 0x40b   : > { %9289 = vset.pattern.permute.xlu1 %v15561_v11 }
 0x40c   : > { %5649 = vperm.xlu1 %9289, %v12522_v15  }
 0x40d   : > { %9300 = vset.pattern.permute.xlu0 %v15557_v44 }
 0x40e   : > { %5299 = vperm.xlu0 %9300, %v12532_v12  }
 0x410   : > { %9290 = vset.pattern.permute.xlu1 %v15566_v48 }
 0x411   : > { %3925 = vperm.xlu1 %9290, %v12525_v50  }
 0x412   : > { %9301 = vset.pattern.permute.xlu0 %v15561_v11 }
 0x413   : > { %5657 = vperm.xlu0 %9301, %v12532_v12  }
 0x415   : > { %9291 = vset.pattern.permute.xlu1 %v15549_v32 }
 0x416   : > { %4205 = vperm.xlu1 %9291, %v12525_v50  }
 0x417   : > { %9308 = vset.pattern.permute.xlu0 %v15549_v32 }
 0x418   : > { %4225 = vperm.xlu0 %9308, %v12541_v42  }
 0x41a   : > { %9296 = vset.pattern.permute.xlu1 %v15566_v48 }
 0x41b   : > { %3940 = vperm.xlu1 %9296, %v12532_v12  }
 0x41c   : > { %9315 = vset.pattern.permute.xlu0 %v15567_v34 }
 0x41d   : > { %4587 = vperm.xlu0 %9315, %v12547_v14  }
 0x41f   : > { %3935 = vperm.xlu1 %9296, %v12535_v7  }
 0x421   : > { %9316 = vset.pattern.permute.xlu0 %v15570_v33 }
 0x422   : > { %4945 = vperm.xlu0 %9316, %v12547_v14  }
 0x423   : > { %9302 = vset.pattern.permute.xlu1 %v15549_v32 }
 0x424   : > { %4213 = vperm.xlu1 %9302, %v12535_v7  }
 0x426   : > { %9317 = vset.pattern.permute.xlu0 %v15557_v44 }
 0x427   : > { %5303 = vperm.xlu0 %9317, %v12547_v14  }
 0x428   : > { %9303 = vset.pattern.permute.xlu1 %v15567_v34 }
 0x429   : > { %4579 = vperm.xlu1 %9303, %v12535_v7  }
 0x42b   : > { %9318 = vset.pattern.permute.xlu0 %v15561_v11 }
 0x42c   : > { %5661 = vperm.xlu0 %9318, %v12547_v14  }
 0x42d   : > { %9304 = vset.pattern.permute.xlu1 %v15570_v33 }
 0x42e   : > { %4937 = vperm.xlu1 %9304, %v12535_v7  }
 0x430   : > { %9319 = vset.pattern.permute.xlu0 %v15566_v48  ;;  %v12816_v19 = vpop.permute.xlu1 %3910 }
 0x431   : > { %3960 = vperm.xlu0 %9319, %v12552_v27   ;;  %v12819_v36 = vpop.permute.xlu0 %4189 }
 0x432   : > { %9305 = vset.pattern.permute.xlu1 %v15557_v44 }
 0x433   : > { %5295 = vperm.xlu1 %9305, %v12535_v7  }
 0x435   : > { %9320 = vset.pattern.permute.xlu0 %v15549_v32  ;;  %v12824_v51 = vpop.permute.xlu1 %4193 }
 0x436   : > { %4233 = vperm.xlu0 %9320, %v12552_v27   ;;  %v4556_v53 = vpop.permute.xlu0 %4555 }
 0x437   : > { %9306 = vset.pattern.permute.xlu1 %v15561_v11 }
 0x438   : > { %5653 = vperm.xlu1 %9306, %v12535_v7  }
 0x43a   : > { %9321 = vset.pattern.permute.xlu0 %v15567_v34  ;;  %v4560_v17 = vpop.permute.xlu1 %4559 }
 0x43b   : > { %4599 = vperm.xlu0 %9321, %v12552_v27   ;;  %v12831_v2 = vpop.permute.xlu0 %4913 }
 0x43c   : > { %15586 = vst [vmem:[#allocation111_spill] sm:$0xff] %v12831_v2  ;;  %9307 = vset.pattern.permute.xlu1 %v15566_v48 }
 0x43d   : > { %3950 = vperm.xlu1 %9307, %v12541_v42  }
 0x43f   : > { %9322 = vset.pattern.permute.xlu0 %v15570_v33 }
 0x440   : > { %4957 = vperm.xlu0 %9322, %v12552_v27   ;;  %v12837_v23 = vpop.permute.xlu1 %4917  ;;  %v12839_v63 = vpop.permute.xlu0 %5271 }
 0x441   : > { %15587 = vst [vmem:[#allocation112_spill] sm:$0xff] %v12837_v23  ;;  %15588 = vst [vmem:[#allocation113_spill] sm:$0xff] %v12839_v63  ;;  %9309 = vset.pattern.permute.xlu1 %v15567_v34 }
 0x442   : > { %4591 = vperm.xlu1 %9309, %v12541_v42  }
 0x444   : > { %9323 = vset.pattern.permute.xlu0 %v15557_v44 }
 0x445   : > { %5315 = vperm.xlu0 %9323, %v12552_v27   ;;  %v12845_v59 = vpop.permute.xlu1 %5275  ;;  %v12847_v8 = vpop.permute.xlu0 %5629 }
 0x446   : > { %15589 = vst [vmem:[#allocation114_spill] sm:$0xff] %v12845_v59  ;;  %15590 = vst [vmem:[#allocation115_spill] sm:$0xff] %v12847_v8  ;;  %9310 = vset.pattern.permute.xlu1 %v15570_v33 }
 0x447   : > { %4949 = vperm.xlu1 %9310, %v12541_v42  }
 0x449   : > { %9324 = vset.pattern.permute.xlu0 %v15561_v11 }
 0x44a   : > { %5673 = vperm.xlu0 %9324, %v12552_v27   ;;  %v12857_v20 = vpop.permute.xlu1 %5633  ;;  %v12859_v1 = vpop.permute.xlu0 %4201 }
 0x44b   : > { %15591 = vst [vmem:[#allocation116_spill] sm:$0xff] %v12857_v20  ;;  %15592 = vst [vmem:[#allocation117_spill] sm:$0xff] %v12859_v1  ;;  %9311 = vset.pattern.permute.xlu1 %v15557_v44 }
 0x44c   : > { %5307 = vperm.xlu1 %9311, %v12541_v42  }
 0x44d   : > { %v12861_v18 = vpop.f32.mrb[24].mxu1 }
 0x44e   : > { %v12866_v38 = vrot.slane %v12861_v18, %v10666_v0  ;;  %v8627_v60 = vpop.f32.mrb[25].mxu1  ;;  %9332 = vset.pattern.permute.xlu0 %v15549_v32 }
 0x44f   : > { %4241 = vperm.xlu0 %9332, %v12564_v58   ;;  %v3906_v25 = vpop.permute.xlu1 %3905  ;;  %v12879_v60 = vrot.slane %v12861_v18, %v15595_v10 }
 0x450   : > { %15593 = vst [vmem:[#allocation118_spill] sm:$0xff] %v12866_v38  ;;  %v4622_v52 = vsub.f32 %v4556_v53, %v12866_v38  ;;  %v4623_v6 = vsub.f32 %v4560_v17, %v12866_v38  ;;  %9312 = vset.pattern.permute.xlu1 %v15561_v11  ;;  %v12874_v62 = vpop.permute.xlu0 %4567 }
 0x451   : > { %15594 = vst [vmem:[#allocation119_spill] sm:$0xff] %v12874_v62  ;;  %5665 = vperm.xlu1 %9312, %v12541_v42  }
 0x452   : > { %v4638_v49 = vmin.f32 %v4622_v52, 0.0  ;;  %v4639_v45 = vmin.f32 %v4623_v6, 0.0  ;;  %v3987_v52 = vsub.f32 %v3906_v25, %v12879_v60  ;;  %v3988_v25 = vsub.f32 %v12816_v19, %v12879_v60 }
 0x453   : > { %9338 = vset.pattern.permute.xlu0 %v15567_v34  ;;  %v3921_v17 = vpop.permute.xlu1 %3920 }
 0x454   : > { %v4654_v0 = vmul.f32 1.442695, %v4638_v49  ;;  %v4656_v53 = vmul.f32 1.442695, %v4639_v45  ;;  %4603 = vperm.xlu0 %9338, %v12568_v16   ;;  %v3990_v54 = vsub.f32 %v3921_v17, %v12879_v60  ;;  %v4003_v10 = vmin.f32 %v3987_v52, 0.0 }
 0x455   : > { %9313 = vset.pattern.permute.xlu1 %v15566_v48  ;;  %v12885_v6 = vpop.permute.xlu0 %4925 }
 0x456   : > { %15596 = vst [vmem:[#allocation120_spill] sm:$0xff] %v12885_v6  ;;  %9655 = vpow2.f32 %v4654_v0  ;;  %3945 = vperm.xlu1 %9313, %v12547_v14   ;;  %v4006_v9 = vmin.f32 %v3990_v54, 0.0 }
 0x457   : > { %9657 = vpow2.f32 %v4656_v53  ;;  %v3916_v49 = vpop.permute.xlu1 %3915  ;;  %v4019_v53 = vmul.f32 1.442695, %v4003_v10 }
 0x458   : > { %9339 = vset.pattern.permute.xlu0 %v15570_v33  ;;  %v3989_v45 = vsub.f32 %v3916_v49, %v12879_v60  ;;  %v4025_v52 = vmul.f32 1.442695, %v4006_v9  ;;  %v4004_v49 = vmin.f32 %v3988_v25, 0.0 }
 0x459   : > { %4961 = vperm.xlu0 %9339, %v12568_v16   ;;  %9659 = vpow2.f32 %v4019_v53 }
 0x45a   : > { %v4005_v5 = vmin.f32 %v3989_v45, 0.0  ;;  %9314 = vset.pattern.permute.xlu1 %v15549_v32  ;;  %v12895_v0 = vpop.permute.xlu0 %5283  ;;  %9661 = vpow2.f32 %v4025_v52  ;;  %v4021_v9 = vmul.f32 1.442695, %v4004_v49 }
 0x45b   : > { %15597 = vst [vmem:[#allocation121_spill] sm:$0xff] %v12895_v0  ;;  %4221 = vperm.xlu1 %9314, %v12547_v14  }
 0x45c   : > { %v12898_v17 = vpop.permute.xlu1 %4197  ;;  %v4023_v13 = vmul.f32 1.442695, %v4005_v5  ;;  %v10041_v5 = vld [vmem:[%s15107_s13] sm:$0xff] }
 0x45d   : > { %15598 = vst [vmem:[#allocation122_spill] sm:$0xff] %v12898_v17  ;;  %9340 = vset.pattern.permute.xlu0 %v15557_v44 }
 0x45e   : > { %5319 = vperm.xlu0 %9340, %v12568_v16   ;;  %9663 = vpow2.f32 %v4023_v13 }
 0x45f   : > { %9325 = vset.pattern.permute.xlu1 %v15566_v48  ;;  %v12903_v19 = vpop.permute.xlu0 %5641  ;;  %9665 = vpow2.f32 %v4021_v9 }
 0x460   : > { %15599 = vst [vmem:[#allocation123_spill] sm:$0xff] %v12903_v19  ;;  %v9656_v45 = vpop.eup %9655  ;;  %3955 = vperm.xlu1 %9325, %v12558_v39  }
 0x461   : > { %v8726_v54 = vpop.f32.mrb[72].mxu0  ;;  %v9658_v10 = vpop.eup %9657 }
 0x462   : > { %v3824_v21 = vpop.f32.mrb[73].mxu0  ;;  %9342 = vset.pattern.permute.xlu0 %v15549_v32  ;;  %v12917_v53 = vpop.permute.xlu1 %4563 }
 0x463   : > { %v8727_v43 = vpop.f32.mrb[74].mxu0  ;;  %v12909_v25 = vmul.f32 %v10041_v5, %v3824_v21  ;;  %15602 = vst [vmem:[#allocation126_spill] sm:$0xff] %v12917_v53  ;;  %4249 = vperm.xlu0 %9342, %v15603_v56  }
 0x464   : > { %v3827_v47 = vpop.f32.mrb[75].mxu0  ;;  %9326 = vset.pattern.permute.xlu1 %v15549_v32  ;;  %v12923_v21 = vpop.permute.xlu0 %4209 }
 0x465   : > { %15600 = vst [vmem:[#allocation124_spill] sm:$0xff] %v12909_v25  ;;  %v12914_v55 = vmul.f32 %v10042_v4, %v3827_v47  ;;  %v4686_v52 = vmul.f32 %v9656_v45, %v12909_v25  ;;  %15604 = vst [vmem:[#allocation127_spill] sm:$0xff] %v12923_v21  ;;  %4229 = vperm.xlu1 %9326, %v12558_v39  }
 0x467   : > { %15601 = vst [vmem:[#allocation125_spill] sm:$0xff] %v12914_v55  ;;  %v4687_v49 = vmul.f32 %v9658_v10, %v12914_v55  ;;  %9343 = vset.pattern.permute.xlu0 %v15567_v34  ;;  %v12931_v5 = vpop.permute.xlu1 %4921 }
 0x468   : > { %15605 = vst [vmem:[#allocation128_spill] sm:$0xff] %v12931_v5  ;;  %4615 = vperm.xlu0 %9343, %v15603_v56  }
 0x469   : > { %v12926_v4 = vpop.f32.mrb[76].mxu0  ;;  %v4702_v47 = vpack.c.bf16 %v4687_v49, %v4686_v52  ;;  %9327 = vset.pattern.permute.xlu1 %v15567_v34  ;;  %v12941_v9 = vpop.permute.xlu0 %4571 }
 0x46a   : > { %v12928_v13 = vpop.f32.mrb[77].mxu0  ;;  %15606 = vst [vmem:[#allocation129_spill] sm:$0xff] %v12941_v9  ;;  %v9660_v52 = vpop.eup %9659  ;;  %4595 = vperm.xlu1 %9327, %v12558_v39   ;;  %v10044_v9 = vld [vmem:[%s15107_s13 + $0x18] sm:$0xff] }
 0x46b   : > { %v12933_v31 = vpop.f32.mrb[78].mxu0  ;;  %8820 = vmatprep.mubr.bf16.mxu0 %v4702_v47  ;;  %v9662_v49 = vpop.eup %9661  ;;  %v12947_v47 = vmul.f32 %v10043_v61, %v8726_v54  ;;  %v12957_v19 = vmul.f32 %v10044_v9, %v8727_v43  ;;  %v4051_v54 = vmul.f32 %v9660_v52, %v12909_v25 }
 0x46c   : > { %v12938_v10 = vpop.f32.mrb[79].mxu0  ;;  %v9664_v5 = vpop.eup %9663  ;;  %9344 = vset.pattern.permute.xlu0 %v15570_v33 }
 0x46d   : > { %15607 = vst [vmem:[#allocation130_spill] sm:$0xff] %v12947_v47  ;;  %v12950_v45 = vpop.permute.xlu1 %5279  ;;  %15609 = vst [vmem:[#allocation132_spill] sm:$0xff] %v12957_v19  ;;  %4973 = vperm.xlu0 %9344, %v15603_v56   ;;  %v4053_v0 = vmul.f32 %v9664_v5, %v12947_v47  ;;  %v4054_v53 = vmul.f32 %v9662_v49, %v12957_v19 }
 0x46e   : > { %15608 = vst [vmem:[#allocation131_spill] sm:$0xff] %v12950_v45  ;;  %9328 = vset.pattern.permute.xlu1 %v15570_v33  ;;  %v9666_v45 = vpop.eup %9665 }
 0x46f   : > { %4953 = vperm.xlu1 %9328, %v12558_v39   ;;  %v12969_v62 = vpop.permute.xlu0 %4929  ;;  %v4052_v9 = vmul.f32 %v9666_v45, %v12914_v55  ;;  %v4068_v38 = vpack.c.bf16 %v4054_v53, %v4053_v0  ;;  %v15613_v45 = vld [vmem:[#allocation93_spill] sm:$0xff] }
 0x470   : > { %15610 = vst [vmem:[#allocation133_spill] sm:$0xff] %v12969_v62 }
 0x471   : > { %v12961_v61 = vpop.f32.mrb[80].mxu0  ;;  %9345 = vset.pattern.permute.xlu0 %v15557_v44  ;;  %v12977_v52 = vpop.permute.xlu1 %5637  ;;  %v4067_v20 = vpack.c.bf16 %v4052_v9, %v4051_v54 }
 0x472   : > { %v12965_v6 = vpop.f32.mrb[81].mxu0  ;;  %15611 = vst [vmem:[#allocation134_spill] sm:$0xff] %v12977_v52  ;;  %5331 = vperm.xlu0 %9345, %v15603_v56  }
 0x473   : > { %v12971_v43 = vpop.f32.mrb[82].mxu0  ;;  %9329 = vset.pattern.permute.xlu1 %v15557_v44  ;;  %8756 = vmatprep.mubr.bf16.mxu1 %v4067_v20 }
 0x474   : > { %v12974_v5 = vpop.f32.mrb[83].mxu0  ;;  %5311 = vperm.xlu1 %9329, %v12558_v39   ;;  %v12982_v49 = vpop.permute.xlu0 %5287  ;;  %8757 = vmatmul.mubr.bf16.vlgmr.msra.gmra.mrb[60].mxu1 %v4068_v38 }
 0x475   : > { %15612 = vst [vmem:[#allocation135_spill] sm:$0xff] %v12982_v49 }
 0x476   : > { %9346 = vset.pattern.permute.xlu0 %v15566_v48 }
 0x477   : > { %v3931_v53 = vpop.permute.xlu1 %3930  ;;  %3975 = vperm.xlu0 %9346, %v15613_v45  }
 0x478   : > { %9330 = vset.pattern.permute.xlu1 %v15561_v11 }
 0x479   : > { %v12984_v62 = vpop.f32.mrb[84].mxu0  ;;  %5669 = vperm.xlu1 %9330, %v12558_v39   ;;  %v12996_v20 = vpop.permute.xlu0 %5645 }
 0x47a   : > { %v12987_v0 = vpop.f32.mrb[85].mxu0  ;;  %15614 = vst [vmem:[#allocation136_spill] sm:$0xff] %v12996_v20 }
 0x47b   : > { %v12990_v54 = vpop.f32.mrb[86].mxu0  ;;  %4710 = vrot.lane.b32.xlu0 %v12604_v37, %s10111_s21 }
 0x47c   : > { %v12993_v9 = vpop.f32.mrb[87].mxu0  ;;  %v13000_v38 = vpop.permute.xlu1 %4575  ;;  %9351 = vset.pattern.permute.xlu0 %v15561_v11 }
 0x47d   : > { %15615 = vst [vmem:[#allocation137_spill] sm:$0xff] %v13000_v38  ;;  %9331 = vset.pattern.permute.xlu1 %v15566_v48 }
 0x47e   : > { %3970 = vperm.xlu1 %9331, %v12564_v58   ;;  %v13005_v49 = vpop.permute.xlu0 %4217 }
 0x47f   : > { %15616 = vst [vmem:[#allocation138_spill] sm:$0xff] %v13005_v49  ;;  %5426 = vrot.lane.b32.xlu0 %v12604_v37, %s10112_s22 }
 0x481   : > { %v13009_v52 = vpop.permute.xlu1 %4933 }
 0x482   : > { %15617 = vst [vmem:[#allocation139_spill] sm:$0xff] %v13009_v52  ;;  %9333 = vset.pattern.permute.xlu1 %v15567_v34  ;;  %v3992_v52 = vsub.f32 %v3931_v53, %v12879_v60 }
 0x483   : > { %4607 = vperm.xlu1 %9333, %v12564_v58   ;;  %v13013_v20 = vpop.permute.xlu0 %4583  ;;  %4354 = vrot.lane.b32.xlu0 %v12647_v30, %s10102_s19 }
 0x484   : > { %15618 = vst [vmem:[#allocation140_spill] sm:$0xff] %v13013_v20 }
 0x486   : > { %v13017_v38 = vpop.permute.xlu1 %5291 }
 0x487   : > { %15619 = vst [vmem:[#allocation141_spill] sm:$0xff] %v13017_v38  ;;  %9334 = vset.pattern.permute.xlu1 %v15570_v33  ;;  %4714 = vrot.lane.b32.xlu0 %v12666_v40, %s10111_s21  ;;  %v4008_v38 = vmin.f32 %v3992_v52, 0.0 }
 0x488   : > { %4965 = vperm.xlu1 %9334, %v12564_v58   ;;  %v13023_v8 = vpop.permute.xlu0 %4941 }
 0x489   : > { %15620 = vst [vmem:[#allocation142_spill] sm:$0xff] %v13023_v8  ;;  %v4029_v59 = vmul.f32 1.442695, %v4008_v38 }
 0x48b   : > { %v13030_v63 = vpop.permute.xlu1 %5649  ;;  %5430 = vrot.lane.b32.xlu0 %v12666_v40, %s10112_s22  ;;  %9667 = vpow2.f32 %v4029_v59 }
 0x48c   : > { %15621 = vst [vmem:[#allocation143_spill] sm:$0xff] %v13030_v63  ;;  %9335 = vset.pattern.permute.xlu1 %v15557_v44 }
 0x48d   : > { %5323 = vperm.xlu1 %9335, %v12564_v58   ;;  %v13036_v19 = vpop.permute.xlu0 %5299 }
 0x48e   : > { %15622 = vst [vmem:[#allocation144_spill] sm:$0xff] %v13036_v19 }
 0x48f   : > { %4358 = vrot.lane.b32.xlu0 %v12685_v28, %s10102_s19 }
 0x490   : > { %v3926_v53 = vpop.permute.xlu1 %3925 }
 0x491   : > { %v3991_v8 = vsub.f32 %v3926_v53, %v12879_v60  ;;  %9336 = vset.pattern.permute.xlu1 %v15566_v48 }
 0x492   : > { %3965 = vperm.xlu1 %9336, %v12568_v16   ;;  %v13043_v20 = vpop.permute.xlu0 %5657 }
 0x493   : > { %15623 = vst [vmem:[#allocation145_spill] sm:$0xff] %v13043_v20  ;;  %v4007_v63 = vmin.f32 %v3991_v8, 0.0  ;;  %4718 = vrot.lane.b32.xlu0 %v12704_v22, %s10111_s21  ;;  %v13047_v52 = vpop.f32.mrb[26].mxu1 }
 0x494   : > { %v13049_v19 = vpop.f32.mrb[27].mxu1 }
 0x495   : > { %v4027_v2 = vmul.f32 1.442695, %v4007_v63  ;;  %v13051_v47 = vpop.permute.xlu1 %4205  ;;  %v9668_v21 = vpop.eup %9667 }
 0x496   : > { %15624 = vst [vmem:[#allocation146_spill] sm:$0xff] %v13051_v47  ;;  %9337 = vset.pattern.permute.xlu1 %v15549_v32 }
 0x497   : > { %9669 = vpow2.f32 %v4027_v2  ;;  %4237 = vperm.xlu1 %9337, %v12568_v16   ;;  %v13055_v38 = vpop.permute.xlu0 %4225  ;;  %5434 = vrot.lane.b32.xlu0 %v12704_v22, %s10112_s22  ;;  %v13059_v8 = vpop.f32.mrb[28].mxu1 }
 0x498   : > { %15625 = vst [vmem:[#allocation147_spill] sm:$0xff] %v13055_v38  ;;  %v13061_v53 = vpop.f32.mrb[29].mxu1 }
 0x49a   : > { %v3941_v20 = vpop.permute.xlu1 %3940 }
 0x49b   : > { %v3994_v59 = vsub.f32 %v3941_v20, %v12879_v60  ;;  %9341 = vset.pattern.permute.xlu1 %v15566_v48  ;;  %4362 = vrot.lane.b32.xlu0 %v12723_v57, %s10102_s19  ;;  %v13067_v2 = vpop.f32.mrb[30].mxu1  ;;  %v10045_v48 = vld [vmem:[%s15107_s13 + $0x20] sm:$0xff] }
 0x49c   : > { %3980 = vperm.xlu1 %9341, %v15603_v56   ;;  %v13070_v63 = vpop.permute.xlu0 %4587  ;;  %v13072_v23 = vpop.f32.mrb[31].mxu1  ;;  %v13081_v20 = vmul.f32 %v10045_v48, %v12928_v13 }
 0x49d   : > { %15626 = vst [vmem:[#allocation148_spill] sm:$0xff] %v13070_v63  ;;  %v4010_v38 = vmin.f32 %v3994_v59, 0.0  ;;  %v10046_v63 = vld [vmem:[%s15107_s13 + $0x28] sm:$0xff] }
 0x49e   : > { %v3936_v49 = vpop.permute.xlu1 %3935  ;;  %15627 = vst [vmem:[#allocation149_spill] sm:$0xff] %v13081_v20  ;;  %v13087_v59 = vmul.f32 %v10046_v63, %v12938_v10 }
 0x49f   : > { %v4033_v1 = vmul.f32 1.442695, %v4010_v38  ;;  %v3993_v47 = vsub.f32 %v3936_v49, %v12879_v60  ;;  %4722 = vrot.lane.b32.xlu0 %v12736_v3, %s10111_s21 }
 0x4a0   : > { %15628 = vst [vmem:[#allocation150_spill] sm:$0xff] %v13087_v59  ;;  %9347 = vset.pattern.permute.xlu1 %v15549_v32  ;;  %v13090_v49 = vpop.f32.mrb[32].mxu1  ;;  %v4056_v48 = vmul.f32 %v9668_v21, %v13087_v59 }
 0x4a1   : > { %v9670_v38 = vpop.eup %9669  ;;  %v4009_v17 = vmin.f32 %v3993_v47, 0.0  ;;  %4245 = vperm.xlu1 %9347, %v15613_v45   ;;  %v13093_v39 = vpop.permute.xlu0 %4945  ;;  %9671 = vpow2.f32 %v4033_v1 }
 0x4a2   : > { %15629 = vst [vmem:[#allocation151_spill] sm:$0xff] %v13093_v39  ;;  %v13095_v42 = vpop.f32.mrb[33].mxu1  ;;  %v4055_v13 = vmul.f32 %v9670_v38, %v13081_v20 }
 0x4a3   : > { %v4031_v7 = vmul.f32 1.442695, %v4009_v17  ;;  %v13099_v10 = vpop.permute.xlu1 %4213  ;;  %5438 = vrot.lane.b32.xlu0 %v12736_v3, %s10112_s22 }
 0x4a4   : > { %v4069_v32 = vpack.c.bf16 %v4056_v48, %v4055_v13  ;;  %v13103_v63 = vpop.f32.mrb[34].mxu1 }
 0x4a5   : > { %9673 = vpow2.f32 %v4031_v7  ;;  %9348 = vset.pattern.permute.xlu1 %v15567_v34  ;;  %v13106_v47 = vpop.f32.mrb[35].mxu1  ;;  %v10047_v7 = vld [vmem:[%s15107_s13 + $0x30] sm:$0xff] }
 0x4a6   : > { %4611 = vperm.xlu1 %9348, %v15613_v45   ;;  %8760 = vmatprep.mubr.bf16.mxu1 %v4069_v32  ;;  %v13109_v38 = vpop.permute.xlu0 %5303  ;;  %v13138_v21 = vmul.f32 %v10047_v7, %v12926_v4 }
 0x4a7   : > { %15630 = vst [vmem:[#allocation152_spill] sm:$0xff] %v13109_v38  ;;  %4366 = vrot.lane.b32.xlu0 %v12749_v35, %s10102_s19 }
 0x4a8   : > { %v13113_v1 = vpop.permute.xlu1 %4579  ;;  %v13115_v17 = vpop.f32.mrb[36].mxu1 }
 0x4a9   : > { %15631 = vst [vmem:[#allocation153_spill] sm:$0xff] %v13113_v1  ;;  %v13121_v34 = vpop.f32.mrb[37].mxu1 }
 0x4aa   : > { %9349 = vset.pattern.permute.xlu1 %v15570_v33  ;;  %v10048_v33 = vld [vmem:[%s15107_s13 + $0x38] sm:$0xff] }
 0x4ab   : > { %4969 = vperm.xlu1 %9349, %v15613_v45   ;;  %v13125_v13 = vpop.permute.xlu0 %5661  ;;  %5677 = vperm.xlu0 %9351, %v12568_v16   ;;  %v9672_v32 = vpop.eup %9671  ;;  %v13144_v24 = vmul.f32 %v10048_v33, %v12933_v31 }
 0x4ac   : > { %15632 = vst [vmem:[#allocation154_spill] sm:$0xff] %v13125_v13  ;;  %v13128_v48 = vpop.f32.mrb[38].mxu1 }
 0x4ad   : > { %v13130_v1 = vpop.permute.xlu1 %4937  ;;  %v13132_v38 = vpop.f32.mrb[39].mxu1  ;;  %15634 = vst [vmem:[#allocation156_spill] sm:$0xff] %v13144_v24  ;;  %v4058_v7 = vmul.f32 %v9672_v32, %v13144_v24  ;;  %v15282_v32 = vmov 6  }
 0x4ae   : > { %15633 = vst [vmem:[#allocation155_spill] sm:$0xff] %v13130_v1 }
 0x4af   : > { %v9674_v13 = vpop.eup %9673  ;;  %9350 = vset.pattern.permute.xlu1 %v15557_v44  ;;  %5689 = vperm.xlu0 %9351, %v15603_v56  }
 0x4b0   : > { %5327 = vperm.xlu1 %9350, %v15613_v45   ;;  %v13149_v1 = vpop.permute.xlu0 %3960  ;;  %v13151_v39 = vpop.f32.mrb[40].mxu1  ;;  %v4057_v4 = vmul.f32 %v9674_v13, %v13138_v21 }
 0x4b1   : > { %v13155_v59 = vpop.f32.mrb[41].mxu1 }
 0x4b2   : > { %v13157_v20 = vpop.permute.xlu1 %5295  ;;  %v4070_v31 = vpack.c.bf16 %v4058_v7, %v4057_v4 }
 0x4b3   : > { %6142 = vrot.lane.b32.xlu0 %v12604_v37, %s10113_s20 }
 0x4b4   : > { %4352 = vrot.lane.b32.xlu1 %v12604_v37, %s10102_s19  ;;  %8761 = vmatmul.mubr.bf16.gmra.mrb[64].mxu1 %v4070_v31  ;;  %v8686_v44 = vpop.f32.mrb[42].mxu1 }
 0x4b5   : > { %v13163_v33 = vpop.permute.xlu0 %4233  ;;  %v13166_v13 = vmul.f32 %v8686_v44, %v13047_v52  ;;  %9353 = vset.pattern.permute.xlu0 %v15282_v32  ;;  %v3550_v24 = vpop.f32.mrb[43].mxu1  ;;  %9352 = vset.pattern.permute.xlu1 %v15561_v11 }
 0x4b6   : > { %v13171_v4 = vmul.f32 %v3550_v24, %v13049_v19 }
 0x4b7   : > { %15635 = vst [vmem:[#allocation157_spill] sm:$0xff] %v13166_v13  ;;  %v13173_v7 = vpop.permute.xlu1 %5653  ;;  %5987 = vperm.xlu0 %9353, %v12507_v26  }
 0x4b8   : > { %15636 = vst [vmem:[#allocation158_spill] sm:$0xff] %v13171_v4  ;;  %5068 = vrot.lane.b32.xlu1 %v12604_v37, %s10115_s24  ;;  %v8689_v31 = vpop.f32.mrb[44].mxu1 }
 0x4b9   : > { %v13179_v52 = vmul.f32 %v8689_v31, %v13059_v8  ;;  %v3560_v44 = vpop.f32.mrb[45].mxu1 }
 0x4ba   : > { %v13181_v32 = vpop.permute.xlu0 %4599  ;;  %v13184_v11 = vmul.f32 %v3560_v44, %v13061_v53 }
 0x4bb   : > { %15637 = vst [vmem:[#allocation159_spill] sm:$0xff] %v13179_v52  ;;  %5999 = vperm.xlu0 %9353, %v12512_v41  }
 0x4bc   : > { %15638 = vst [vmem:[#allocation160_spill] sm:$0xff] %v13184_v11  ;;  %5784 = vrot.lane.b32.xlu1 %v12604_v37, %s10116_s26  ;;  %v3951_v24 = vpop.permute.xlu1 %3950  ;;  %v8692_v19 = vpop.f32.mrb[46].mxu1 }
 0x4bd   : > { %v13190_v13 = vmul.f32 %v8692_v19, %v13067_v2  ;;  %v3570_v4 = vpop.f32.mrb[47].mxu1 }
 0x4be   : > { %v13193_v8 = vmul.f32 %v3570_v4, %v13072_v23 }
 0x4bf   : > { %15639 = vst [vmem:[#allocation161_spill] sm:$0xff] %v13190_v13  ;;  %v13195_v31 = vpop.permute.xlu0 %4957  ;;  %6146 = vrot.lane.b32.xlu0 %v12666_v40, %s10113_s20 }
 0x4c0   : > { %15640 = vst [vmem:[#allocation162_spill] sm:$0xff] %v13193_v8  ;;  %4712 = vrot.lane.b32.xlu1 %v12647_v30, %s10111_s21  ;;  %v8695_v53 = vpop.f32.mrb[48].mxu1 }
 0x4c1   : > { %v13201_v44 = vpop.permute.xlu1 %4591  ;;  %v13204_v52 = vmul.f32 %v8695_v53, %v13090_v49  ;;  %v3580_v2 = vpop.f32.mrb[49].mxu1 }
 0x4c2   : > { %v13207_v19 = vmul.f32 %v3580_v2, %v13095_v42 }
 0x4c3   : > { %15641 = vst [vmem:[#allocation163_spill] sm:$0xff] %v13204_v52  ;;  %6003 = vperm.xlu0 %9353, %v12525_v50  }
 0x4c4   : > { %15642 = vst [vmem:[#allocation164_spill] sm:$0xff] %v13207_v19  ;;  %5070 = vrot.lane.b32.xlu1 %v12647_v30, %s10115_s24  ;;  %v13212_v23 = vpop.permute.xlu0 %5315  ;;  %v8698_v4 = vpop.f32.mrb[50].mxu1 }
 0x4c5   : > { %v13215_v13 = vmul.f32 %v8698_v4, %v13103_v63  ;;  %v3590_v8 = vpop.f32.mrb[51].mxu1 }
 0x4c6   : > { %v13217_v11 = vpop.permute.xlu1 %4949  ;;  %v13220_v49 = vmul.f32 %v3590_v8, %v13106_v47 }
 0x4c7   : > { %15643 = vst [vmem:[#allocation165_spill] sm:$0xff] %v13215_v13  ;;  %6015 = vperm.xlu0 %9353, %v12532_v12  }
 0x4c8   : > { %15644 = vst [vmem:[#allocation166_spill] sm:$0xff] %v13220_v49  ;;  %5428 = vrot.lane.b32.xlu1 %v12647_v30, %s10112_s22  ;;  %v8701_v42 = vpop.f32.mrb[52].mxu1 }
 0x4c9   : > { %v13225_v53 = vpop.permute.xlu0 %5673  ;;  %v13228_v2 = vmul.f32 %v8701_v42, %v13115_v17  ;;  %v3600_v52 = vpop.f32.mrb[53].mxu1  ;;  %v3996_v17 = vsub.f32 %v3951_v24, %v12879_v60 }
 0x4ca   : > { %15645 = vst [vmem:[#allocation167_spill] sm:$0xff] %v13225_v53  ;;  %v13231_v63 = vmul.f32 %v3600_v52, %v13121_v34 }
 0x4cb   : > { %15646 = vst [vmem:[#allocation168_spill] sm:$0xff] %v13228_v2  ;;  %v13233_v4 = vpop.permute.xlu1 %5307  ;;  %6150 = vrot.lane.b32.xlu0 %v12704_v22, %s10113_s20 }
 0x4cc   : > { %15647 = vst [vmem:[#allocation169_spill] sm:$0xff] %v13231_v63  ;;  %15648 = vst [vmem:[#allocation170_spill] sm:$0xff] %v13233_v4  ;;  %5786 = vrot.lane.b32.xlu1 %v12647_v30, %s10116_s26  ;;  %v8704_v47 = vpop.f32.mrb[54].mxu1 }
 0x4cd   : > { %v13240_v8 = vmul.f32 %v8704_v47, %v13128_v48  ;;  %v3610_v49 = vpop.f32.mrb[55].mxu1  ;;  %v4012_v47 = vmin.f32 %v3996_v17, 0.0 }
 0x4ce   : > { %v13243_v42 = vpop.permute.xlu0 %4241  ;;  %v13246_v34 = vmul.f32 %v3610_v49, %v13132_v38 }
 0x4cf   : > { %15649 = vst [vmem:[#allocation171_spill] sm:$0xff] %v13240_v8  ;;  %6019 = vperm.xlu0 %9353, %v12547_v14   ;;  %v4037_v49 = vmul.f32 1.442695, %v4012_v47 }
 0x4d0   : > { %15650 = vst [vmem:[#allocation172_spill] sm:$0xff] %v13246_v34  ;;  %4356 = vrot.lane.b32.xlu1 %v12666_v40, %s10102_s19  ;;  %v13251_v52 = vpop.permute.xlu1 %5665  ;;  %v8707_v13 = vpop.f32.mrb[56].mxu1 }
 0x4d1   : > { %15651 = vst [vmem:[#allocation173_spill] sm:$0xff] %v13251_v52  ;;  %v13254_v63 = vmul.f32 %v8707_v13, %v13151_v39  ;;  %v3620_v48 = vpop.f32.mrb[57].mxu1  ;;  %v3998_v39 = vsub.f32 %v13149_v1, %v12879_v60  ;;  %9675 = vpow2.f32 %v4037_v49 }
 0x4d2   : > { %v13257_v24 = vmul.f32 %v3620_v48, %v13155_v59 }
 0x4d3   : > { %15652 = vst [vmem:[#allocation174_spill] sm:$0xff] %v13254_v63  ;;  %v13259_v8 = vpop.permute.xlu0 %4603  ;;  %6031 = vperm.xlu0 %9353, %v12552_v27   ;;  %v4014_v47 = vmin.f32 %v3998_v39, 0.0 }
 0x4d4   : > { %15653 = vst [vmem:[#allocation175_spill] sm:$0xff] %v13257_v24  ;;  %5072 = vrot.lane.b32.xlu1 %v12666_v40, %s10115_s24  ;;  %v15284_v24 = vmov 7  }
 0x4d5   : > { %v3946_v38 = vpop.permute.xlu1 %3945 }
 0x4d6   : > { %v3995_v34 = vsub.f32 %v3946_v38, %v12879_v60 }
 0x4d7   : > { %6154 = vrot.lane.b32.xlu0 %v12736_v3, %s10113_s20 }
 0x4d8   : > { %v4011_v13 = vmin.f32 %v3995_v34, 0.0  ;;  %5788 = vrot.lane.b32.xlu1 %v12666_v40, %s10116_s26  ;;  %v13271_v59 = vpop.permute.xlu0 %4961  ;;  %v4041_v34 = vmul.f32 1.442695, %v4014_v47  ;;  %v10049_v47 = vld [vmem:[%s15107_s13 + $0x40] sm:$0xff] }
 0x4da   : > { %v4035_v17 = vmul.f32 1.442695, %v4011_v13  ;;  %v13273_v48 = vpop.permute.xlu1 %4221 }
 0x4db   : > { %6035 = vperm.xlu0 %9353, %v12568_v16   ;;  %v9676_v39 = vpop.eup %9675 }
 0x4dc   : > { %9677 = vpow2.f32 %v4035_v17  ;;  %4716 = vrot.lane.b32.xlu1 %v12685_v28, %s10111_s21 }
 0x4dd   : > { %v13278_v38 = vpop.permute.xlu0 %5319  ;;  %9679 = vpow2.f32 %v4041_v34 }
 0x4de   : > { %15654 = vst [vmem:[#allocation176_spill] sm:$0xff] %v13278_v38 }
 0x4df   : > { %v3956_v1 = vpop.permute.xlu1 %3955  ;;  %6047 = vperm.xlu0 %9353, %v15603_v56  }
 0x4e0   : > { %v3997_v63 = vsub.f32 %v3956_v1, %v12879_v60  ;;  %5074 = vrot.lane.b32.xlu1 %v12685_v28, %s10115_s24  ;;  %v10050_v1 = vld [vmem:[%s15107_s13 + $0x48] sm:$0xff] }
 0x4e1   : > { %v13302_v34 = vmul.f32 %v10050_v1, %v12974_v5 }
 0x4e2   : > { %v4013_v49 = vmin.f32 %v3997_v63, 0.0  ;;  %v13284_v13 = vpop.permute.xlu0 %4249  ;;  %v13296_v63 = vmul.f32 %v10049_v47, %v12965_v6 }
 0x4e3   : > { %9361 = vset.pattern.permute.xlu0 %v15284_v24 }
 0x4e4   : > { %v4039_v17 = vmul.f32 1.442695, %v4013_v49  ;;  %5432 = vrot.lane.b32.xlu1 %v12685_v28, %s10112_s22  ;;  %v13289_v2 = vpop.permute.xlu1 %4229  ;;  %6345 = vperm.xlu0 %9361, %v12507_v26   ;;  %15655 = vst [vmem:[#allocation177_spill] sm:$0xff] %v13296_v63  ;;  %v4060_v26 = vmul.f32 %v9676_v39, %v13302_v34  ;;  %v10051_v39 = vld [vmem:[%s15107_s13 + $0x50] sm:$0xff] }
 0x4e6   : > { %v9678_v49 = vpop.eup %9677  ;;  %9681 = vpow2.f32 %v4039_v17 }
 0x4e7   : > { %v13304_v24 = vpop.permute.xlu0 %4615  ;;  %v4059_v19 = vmul.f32 %v9678_v49, %v13296_v63  ;;  %v9680_v17 = vpop.eup %9679  ;;  %v13324_v49 = vmul.f32 %v10051_v39, %v12961_v61 }
 0x4e8   : > { %15656 = vst [vmem:[#allocation178_spill] sm:$0xff] %v13304_v24  ;;  %5790 = vrot.lane.b32.xlu1 %v12685_v28, %s10116_s26  ;;  %6357 = vperm.xlu0 %9361, %v12512_v41  }
 0x4e9   : > { %v13311_v6 = vpop.permute.xlu1 %4595  ;;  %v4071_v47 = vpack.c.bf16 %v4060_v26, %v4059_v19  ;;  %v10052_v26 = vld [vmem:[%s15107_s13 + $0x58] sm:$0xff] }
 0x4ea   : > { %v13330_v19 = vmul.f32 %v10052_v26, %v12971_v43 }
 0x4eb   : > { %8764 = vmatprep.mubr.bf16.mxu1 %v4071_v47 }
 0x4ec   : > { %4360 = vrot.lane.b32.xlu1 %v12704_v22, %s10102_s19  ;;  %v13315_v5 = vpop.permute.xlu0 %4973  ;;  %6361 = vperm.xlu0 %9361, %v12525_v50   ;;  %15658 = vst [vmem:[#allocation180_spill] sm:$0xff] %v13330_v19  ;;  %v4062_v61 = vmul.f32 %v9680_v17, %v13330_v19 }
 0x4ed   : > { %15657 = vst [vmem:[#allocation179_spill] sm:$0xff] %v13315_v5 }
 0x4ee   : > { %v13318_v1 = vpop.permute.xlu1 %4953 }
 0x4f0   : > { %v9682_v47 = vpop.eup %9681  ;;  %5076 = vrot.lane.b32.xlu1 %v12704_v22, %s10115_s24  ;;  %6373 = vperm.xlu0 %9361, %v12532_v12  }
 0x4f1   : > { %v13335_v50 = vpop.permute.xlu0 %5331  ;;  %v4061_v41 = vmul.f32 %v9682_v47, %v13324_v49 }
 0x4f2   : > { %15659 = vst [vmem:[#allocation181_spill] sm:$0xff] %v13335_v50 }
 0x4f3   : > { %v13339_v39 = vpop.permute.xlu1 %5311  ;;  %v4072_v38 = vpack.c.bf16 %v4062_v61, %v4061_v41 }
 0x4f4   : > { %15660 = vst [vmem:[#allocation182_spill] sm:$0xff] %v13339_v39  ;;  %5792 = vrot.lane.b32.xlu1 %v12704_v22, %s10116_s26  ;;  %6377 = vperm.xlu0 %9361, %v12547_v14  }
 0x4f5   : > { %8765 = vmatmul.mubr.bf16.gmra.mrb[68].mxu1 %v4072_v38 }
 0x4f6   : > { %v3976_v43 = vpop.permute.xlu0 %3975 }
 0x4f8   : > { %4720 = vrot.lane.b32.xlu1 %v12723_v57, %s10111_s21  ;;  %v13346_v26 = vpop.permute.xlu1 %5669  ;;  %6389 = vperm.xlu0 %9361, %v12552_v27  }
 0x4f9   : > { %15661 = vst [vmem:[#allocation183_spill] sm:$0xff] %v13346_v26 }
 0x4fa   : > { %v4711_v47 = vpop.permute.xlu0 %4710 }
 0x4fb   : > { %8804 = vmatprep.subr.bf16.mxu0 %v4711_v47 }
 0x4fc   : > { %5078 = vrot.lane.b32.xlu1 %v12723_v57, %s10115_s24  ;;  %6393 = vperm.xlu0 %9361, %v12568_v16   ;;  %v15663_v16 = vld [vmem:[#allocation33_spill] sm:$0xff] }
 0x4fd   : > { %v3971_v41 = vpop.permute.xlu1 %3970  ;;  %8805 = vmatpush3.bf16.msra.mxu0 %v4711_v47 }
 0x4fe   : > { %v4000_v61 = vsub.f32 %v3971_v41, %v12879_v60 }
 0x500   : > { %5436 = vrot.lane.b32.xlu1 %v12723_v57, %s10112_s22  ;;  %6405 = vperm.xlu0 %9361, %v15603_v56   ;;  %v13370_v56 = vrot.slane %v12861_v18, %v15663_v16  ;;  %v4016_v27 = vmin.f32 %v4000_v61, 0.0 }
 0x502   : > { %v13355_v38 = vpop.permute.xlu1 %4607  ;;  %v4257_v12 = vsub.f32 %v12824_v51, %v13370_v56  ;;  %v4045_v26 = vmul.f32 1.442695, %v4016_v27  ;;  %v4256_v50 = vsub.f32 %v12819_v36, %v13370_v56 }
 0x504   : > { %5794 = vrot.lane.b32.xlu1 %v12723_v57, %s10116_s26  ;;  %v4273_v16 = vmin.f32 %v4257_v12, 0.0  ;;  %9683 = vpow2.f32 %v4045_v26  ;;  %v4272_v5 = vmin.f32 %v4256_v50, 0.0  ;;  %v15664_v12 = vmov 6  }
 0x506   : > { %v4290_v27 = vmul.f32 1.442695, %v4273_v16  ;;  %v4288_v51 = vmul.f32 1.442695, %v4272_v5 }
 0x507   : > { %v13359_v17 = vpop.permute.xlu1 %4965 }
 0x508   : > { %4364 = vrot.lane.b32.xlu1 %v12736_v3, %s10102_s19 }
 0x50c   : > { %5080 = vrot.lane.b32.xlu1 %v12736_v3, %s10115_s24  ;;  %v13366_v47 = vpop.permute.xlu1 %5323 }
 0x50d   : > { %15662 = vst [vmem:[#allocation184_spill] sm:$0xff] %v13366_v47  ;;  %v4001_v47 = vsub.f32 %v3976_v43, %v12879_v60 }
 0x50e   : > { %v9684_v50 = vpop.eup %9683 }
 0x50f   : > { %v4017_v52 = vmin.f32 %v4001_v47, 0.0 }
 0x510   : > { %5796 = vrot.lane.b32.xlu1 %v12736_v3, %s10116_s26 }
 0x511   : > { %v3966_v14 = vpop.permute.xlu1 %3965  ;;  %v4047_v4 = vmul.f32 1.442695, %v4017_v52 }
 0x512   : > { %v3999_v41 = vsub.f32 %v3966_v14, %v12879_v60 }
 0x514   : > { %v4015_v39 = vmin.f32 %v3999_v41, 0.0  ;;  %5681 = vperm.xlu1 %9352, %v12564_v58  }
 0x516   : > { %v4043_v61 = vmul.f32 1.442695, %v4015_v39  ;;  %v13381_v53 = vpop.permute.xlu1 %4237 }
 0x518   : > { %9685 = vpow2.f32 %v4043_v61  ;;  %5685 = vperm.xlu1 %9352, %v15613_v45  }
 0x519   : > { %9687 = vpow2.f32 %v4290_v27 }
 0x51a   : > { %9689 = vpow2.f32 %v4288_v51 }
 0x51b   : > { %v3981_v14 = vpop.permute.xlu1 %3980  ;;  %9691 = vpow2.f32 %v4047_v4 }
 0x51c   : > { %v4002_v36 = vsub.f32 %v3981_v14, %v12879_v60  ;;  %6500 = vrot.lane.b32.xlu1 %v12604_v37, %s10118_s30  ;;  %v10053_v60 = vld [vmem:[%s15107_s13 + $0x60] sm:$0xff]  ;;  %v10054_v37 = vld [vmem:[%s15107_s13 + $0x68] sm:$0xff]  ;;  %v15665_v14 = vmov 7  }
 0x51d   : > { %9354 = vset.pattern.permute.xlu1 %v15664_v12  ;;  %v13395_v52 = vmul.f32 %v10053_v60, %v12987_v0  ;;  %v13401_v5 = vmul.f32 %v10054_v37, %v12993_v9 }
 0x51e   : > { %v4018_v39 = vmin.f32 %v4002_v36, 0.0  ;;  %v10055_v36 = vld [vmem:[%s15107_s13 + $0x70] sm:$0xff] }
 0x51f   : > { %v4064_v41 = vmul.f32 %v9684_v50, %v13401_v5  ;;  %v10056_v50 = vld [vmem:[%s15107_s13 + $0x78] sm:$0xff] }
 0x520   : > { %v4049_v43 = vmul.f32 1.442695, %v4018_v39  ;;  %5991 = vperm.xlu1 %9354, %v12504_v29   ;;  %v13389_v26 = vpop.permute.xlu1 %4245  ;;  %v13417_v39 = vmul.f32 %v10055_v36, %v12984_v62  ;;  %v13430_v62 = vpop.permute.xlu0 %5426 }
 0x521   : > { %15668 = vst [vmem:[#allocation186_spill] sm:$0xff] %v13430_v62  ;;  %v15687_v62 = vld [vmem:[#allocation147_spill] sm:$0xff] }
 0x522   : > { %v9686_v4 = vpop.eup %9685  ;;  %9693 = vpow2.f32 %v4049_v43  ;;  %v13423_v43 = vmul.f32 %v10056_v50, %v12990_v54 }
 0x523   : > { %v4063_v47 = vmul.f32 %v9686_v4, %v13395_v52  ;;  %v9688_v0 = vpop.eup %9687 }
 0x524   : > { %5995 = vperm.xlu1 %9354, %v12515_v46   ;;  %v9690_v27 = vpop.eup %9689  ;;  %15667 = vst [vmem:[#allocation185_spill] sm:$0xff] %v13423_v43  ;;  %v4321_v4 = vmul.f32 %v9688_v0, %v12914_v55  ;;  %v4355_v0 = vpop.permute.xlu0 %4354 }
 0x525   : > { %v13406_v16 = vpop.permute.xlu1 %4611  ;;  %v4073_v61 = vpack.c.bf16 %v4064_v41, %v4063_v47  ;;  %v9692_v9 = vpop.eup %9691  ;;  %v4320_v37 = vmul.f32 %v9690_v27, %v12909_v25 }
 0x526   : > { %v4065_v47 = vmul.f32 %v9692_v9, %v13417_v39 }
 0x527   : > { %8768 = vmatprep.mubr.bf16.mxu1 %v4073_v61  ;;  %v4336_v54 = vpack.c.bf16 %v4321_v4, %v4320_v37  ;;  %v15671_v37 = vld [vmem:[#allocation84_spill] sm:$0xff] }
 0x528   : > { %6144 = vrot.lane.b32.xlu1 %v12647_v30, %s10113_s20 }
 0x529   : > { %9355 = vset.pattern.permute.xlu1 %v15665_v14 }
 0x52a   : > { %v13411_v51 = vpop.permute.xlu1 %4969 }
 0x52b   : > { %15666 = vst [vmem:[#allocation33_spill] sm:$0xff] %v13411_v51 }
 0x52c   : > { %v9694_v60 = vpop.eup %9693  ;;  %6349 = vperm.xlu1 %9355, %v12504_v29   ;;  %v15681_v29 = vld [vmem:[#allocation122_spill] sm:$0xff] }
 0x52d   : > { %v4066_v41 = vmul.f32 %v9694_v60, %v13423_v43 }
 0x52f   : > { %v13432_v61 = vpop.permute.xlu1 %5327  ;;  %v4074_v36 = vpack.c.bf16 %v4066_v41, %v4065_v47 }
 0x530   : > { %15669 = vst [vmem:[#allocation187_spill] sm:$0xff] %v13432_v61  ;;  %6353 = vperm.xlu1 %9355, %v12515_v46   ;;  %v4258_v61 = vsub.f32 %v15681_v29, %v13370_v56 }
 0x531   : > { %8769 = vmatmul.mubr.bf16.gmra.mrb[72].mxu1 %v4074_v36 }
 0x532   : > { %8788 = vmatprep.mubr.bf16.mxu1 %v4336_v54 }
 0x533   : > { %v4353_v50 = vpop.permute.xlu1 %4352 }
 0x534   : > { %6502 = vrot.lane.b32.xlu1 %v12647_v30, %s10118_s30  ;;  %8772 = vmatprep.subr.bf16.mxu1 %v4353_v50  ;;  %v4715_v30 = vpop.permute.xlu0 %4714 }
 0x535   : > { %8773 = vmatpush3.bf16.msra.mxu1 %v4353_v50  ;;  %9356 = vset.pattern.permute.xlu1 %v15664_v12 }
 0x536   : > { %8774 = vmatprep.subr.bf16.mxu1 %v4355_v0 }
 0x537   : > { %v13438_v27 = vpop.permute.xlu1 %5068 }
 0x538   : > { %6504 = vrot.lane.b32.xlu1 %v12666_v40, %s10118_s30  ;;  %v13455_v36 = vpop.permute.xlu0 %5430 }
 0x539   : > { %8775 = vmatpush3.bf16.msra.mxu1 %v4355_v0  ;;  %15673 = vst [vmem:[#allocation190_spill] sm:$0xff] %v13455_v36 }
 0x53b   : > { %v13442_v9 = vpop.permute.xlu1 %5784 }
 0x53c   : > { %15670 = vst [vmem:[#allocation188_spill] sm:$0xff] %v13442_v9  ;;  %6007 = vperm.xlu1 %9356, %v12522_v15  }
 0x53f   : > { %v4713_v60 = vpop.permute.xlu1 %4712 }
 0x540   : > { %6011 = vperm.xlu1 %9356, %v15671_v37   ;;  %8806 = vmatprep.subr.bf16.mxu0 %v4713_v60 }
 0x541   : > { %8807 = vmatpush3.bf16.msra.mxu0 %v4713_v60 }
 0x542   : > { %8808 = vmatprep.subr.bf16.mxu0 %v4715_v30 }
 0x543   : > { %v13446_v4 = vpop.permute.xlu1 %5070 }
 0x544   : > { %6148 = vrot.lane.b32.xlu1 %v12685_v28, %s10113_s20 }
 0x545   : > { %8809 = vmatpush3.bf16.msra.mxu0 %v4715_v30  ;;  %9357 = vset.pattern.permute.xlu1 %v15665_v14  ;;  %v4359_v30 = vpop.permute.xlu0 %4358 }
 0x547   : > { %v13451_v40 = vpop.permute.xlu1 %5428  ;;  %v8758_v47 = vpop.f32.mrb[60].mxu1 }
 0x548   : > { %15672 = vst [vmem:[#allocation189_spill] sm:$0xff] %v13451_v40  ;;  %6365 = vperm.xlu1 %9357, %v12522_v15   ;;  %4174 = vst.msk [vmem:[#allocation4 + $0x10] sm:$0xff] %vm3451_vm10, %v8758_v47  ;;  %v4109_v41 = vpop.f32.mrb[61].mxu1 }
 0x549   : > { %4172 = vst.msk [vmem:[#allocation4] sm:$0xff] %vm3451_vm10, %v4109_v41  ;;  %v8759_v54 = vpop.f32.mrb[62].mxu1 }
 0x54a   : > { %4175 = vst.msk [vmem:[#allocation4 + $0x18] sm:$0xff] %vm3451_vm10, %v8759_v54  ;;  %v4112_v50 = vpop.f32.mrb[63].mxu1 }
 0x54b   : > { %v13459_v0 = vpop.permute.xlu1 %5786  ;;  %4173 = vst.msk [vmem:[#allocation4 + $0x8] sm:$0xff] %vm3451_vm10, %v4112_v50 }
 0x54c   : > { %15674 = vst [vmem:[#allocation191_spill] sm:$0xff] %v13459_v0  ;;  %6369 = vperm.xlu1 %9357, %v15671_v37   ;;  %v4274_v0 = vmin.f32 %v4258_v61, 0.0  ;;  %v4264_v61 = vsub.f32 %v13273_v48, %v13370_v56 }
 0x54f   : > { %v4357_v60 = vpop.permute.xlu1 %4356 }
 0x550   : > { %6506 = vrot.lane.b32.xlu1 %v12685_v28, %s10118_s30  ;;  %8776 = vmatprep.subr.bf16.mxu1 %v4357_v60  ;;  %v4719_v28 = vpop.permute.xlu0 %4718 }
 0x551   : > { %8777 = vmatpush3.bf16.msra.mxu1 %v4357_v60  ;;  %9358 = vset.pattern.permute.xlu1 %v15664_v12  ;;  %v15676_v60 = vld [vmem:[#allocation85_spill] sm:$0xff] }
 0x552   : > { %8778 = vmatprep.subr.bf16.mxu1 %v4359_v30 }
 0x553   : > { %v13466_v47 = vpop.permute.xlu1 %5072 }
 0x554   : > { %4724 = vrot.lane.b32.xlu1 %v12749_v35, %s10111_s21  ;;  %v13482_v15 = vpop.permute.xlu0 %5434 }
 0x555   : > { %8779 = vmatpush3.bf16.msra.mxu1 %v4359_v30  ;;  %v15678_v30 = vld [vmem:[#allocation88_spill] sm:$0xff]  ;;  %15679 = vst [vmem:[#allocation194_spill] sm:$0xff] %v13482_v15  ;;  %v15682_v15 = vld [vmem:[#allocation146_spill] sm:$0xff] }
 0x557   : > { %v13470_v41 = vpop.permute.xlu1 %5788 }
 0x558   : > { %15675 = vst [vmem:[#allocation192_spill] sm:$0xff] %v13470_v41  ;;  %5082 = vrot.lane.b32.xlu1 %v12749_v35, %s10115_s24 }
 0x55b   : > { %v4717_v54 = vpop.permute.xlu1 %4716 }
 0x55c   : > { %6508 = vrot.lane.b32.xlu1 %v12704_v22, %s10118_s30  ;;  %8810 = vmatprep.subr.bf16.mxu0 %v4717_v54 }
 0x55d   : > { %8811 = vmatpush3.bf16.msra.mxu0 %v4717_v54  ;;  %v4363_v54 = vpop.permute.xlu0 %4362 }
 0x55e   : > { %8812 = vmatprep.subr.bf16.mxu0 %v4719_v28 }
 0x55f   : > { %v13476_v50 = vpop.permute.xlu1 %5074 }
 0x560   : > { %6023 = vperm.xlu1 %9358, %v15676_v60  }
 0x561   : > { %8813 = vmatpush3.bf16.msra.mxu0 %v4719_v28 }
 0x563   : > { %v13479_v37 = vpop.permute.xlu1 %5432 }
 0x564   : > { %15677 = vst [vmem:[#allocation193_spill] sm:$0xff] %v13479_v37  ;;  %6027 = vperm.xlu1 %9358, %v15678_v30   ;;  %v15683_v37 = vld [vmem:[#allocation117_spill] sm:$0xff] }
 0x565   : > { %v4259_v41 = vsub.f32 %v15683_v37, %v13370_v56  ;;  %v4262_v37 = vsub.f32 %v13099_v10, %v13370_v56 }
 0x567   : > { %v13484_v46 = vpop.permute.xlu1 %5790  ;;  %v4275_v29 = vmin.f32 %v4259_v41, 0.0  ;;  %v4278_v10 = vmin.f32 %v4262_v37, 0.0 }
 0x568   : > { %15680 = vst [vmem:[#allocation195_spill] sm:$0xff] %v13484_v46  ;;  %6152 = vrot.lane.b32.xlu1 %v12723_v57, %s10113_s20  ;;  %v4260_v46 = vsub.f32 %v15682_v15, %v13370_v56  ;;  %v4292_v15 = vmul.f32 1.442695, %v4274_v0  ;;  %v4265_v0 = vsub.f32 %v15687_v62, %v13370_v56  ;;  %v4266_v62 = vsub.f32 %v13289_v2, %v13370_v56 }
 0x569   : > { %9359 = vset.pattern.permute.xlu1 %v15665_v14 }
 0x56a   : > { %9695 = vpow2.f32 %v4292_v15  ;;  %v4267_v15 = vsub.f32 %v13163_v33, %v13370_v56  ;;  %v4282_v2 = vmin.f32 %v4266_v62, 0.0  ;;  %v4270_v62 = vsub.f32 %v13389_v26, %v13370_v56 }
 0x56b   : > { %v4361_v22 = vpop.permute.xlu1 %4360  ;;  %v4271_v26 = vsub.f32 %v13284_v13, %v13370_v56 }
 0x56c   : > { %6381 = vperm.xlu1 %9359, %v15676_v60   ;;  %8780 = vmatprep.subr.bf16.mxu1 %v4361_v22  ;;  %v15685_v60 = vld [vmem:[#allocation127_spill] sm:$0xff] }
 0x56d   : > { %8781 = vmatpush3.bf16.msra.mxu1 %v4361_v22  ;;  %v4261_v22 = vsub.f32 %v15685_v60, %v13370_v56 }
 0x56e   : > { %8782 = vmatprep.subr.bf16.mxu1 %v4363_v54 }
 0x56f   : > { %v13490_v28 = vpop.permute.xlu1 %5076  ;;  %v4277_v40 = vmin.f32 %v4261_v22, 0.0 }
 0x570   : > { %6385 = vperm.xlu1 %9359, %v15678_v30   ;;  %v4276_v30 = vmin.f32 %v4260_v46, 0.0  ;;  %v15686_v46 = vld [vmem:[#allocation138_spill] sm:$0xff] }
 0x571   : > { %8783 = vmatpush3.bf16.msra.mxu1 %v4363_v54  ;;  %v4263_v41 = vsub.f32 %v15686_v46, %v13370_v56  ;;  %v4298_v9 = vmul.f32 1.442695, %v4277_v40  ;;  %v4300_v40 = vmul.f32 1.442695, %v4278_v10  ;;  %v15691_v10 = vld [vmem:[#allocation40_spill] sm:$0xff] }
 0x572   : > { %v4296_v60 = vmul.f32 1.442695, %v4276_v30  ;;  %v4280_v30 = vmin.f32 %v4264_v61, 0.0 }
 0x573   : > { %v13499_v36 = vpop.permute.xlu1 %5792  ;;  %v4279_v48 = vmin.f32 %v4263_v41, 0.0 }
 0x574   : > { %15684 = vst [vmem:[#allocation122_spill] sm:$0xff] %v13499_v36  ;;  %5440 = vrot.lane.b32.xlu1 %v12749_v35, %s10112_s22  ;;  %v4723_v36 = vpop.permute.xlu0 %4722  ;;  %9697 = vpow2.f32 %v4296_v60  ;;  %v4304_v46 = vmul.f32 1.442695, %v4280_v30  ;;  %v13539_v30 = vrot.slane %v12861_v18, %v15691_v10  ;;  %v15693_v10 = vld [vmem:[#allocation130_spill] sm:$0xff] }
 0x575   : > { %9360 = vset.pattern.permute.xlu1 %v15664_v12  ;;  %v4294_v12 = vmul.f32 1.442695, %v4275_v29 }
 0x577   : > { %v4721_v54 = vpop.permute.xlu1 %4720  ;;  %9699 = vpow2.f32 %v4294_v12  ;;  %v9696_v12 = vpop.eup %9695 }
 0x578   : > { %5798 = vrot.lane.b32.xlu1 %v12749_v35, %s10116_s26  ;;  %8814 = vmatprep.subr.bf16.mxu0 %v4721_v54  ;;  %9701 = vpow2.f32 %v4298_v9  ;;  %v13530_v37 = vpop.permute.xlu0 %5438 }
 0x579   : > { %8815 = vmatpush3.bf16.msra.mxu0 %v4721_v54  ;;  %v4281_v54 = vmin.f32 %v4265_v0, 0.0  ;;  %15689 = vst [vmem:[#allocation117_spill] sm:$0xff] %v13530_v37  ;;  %9703 = vpow2.f32 %v4300_v40  ;;  %v4308_v40 = vmul.f32 1.442695, %v4282_v2  ;;  %v4322_v37 = vmul.f32 %v9696_v12, %v15693_v10 }
 0x57a   : > { %8816 = vmatprep.subr.bf16.mxu0 %v4723_v36  ;;  %9705 = vpow2.f32 %v4304_v46  ;;  %v4286_v12 = vmin.f32 %v4270_v62, 0.0 }
 0x57b   : > { %v13514_v22 = vpop.permute.xlu1 %5078  ;;  %v4306_v9 = vmul.f32 1.442695, %v4281_v54 }
 0x57c   : > { %6510 = vrot.lane.b32.xlu1 %v12723_v57, %s10118_s30  ;;  %v4268_v57 = vsub.f32 %v13381_v53, %v13370_v56  ;;  %v4283_v53 = vmin.f32 %v4267_v15, 0.0  ;;  %v4367_v46 = vpop.permute.xlu0 %4366  ;;  %v15692_v15 = vld [vmem:[#allocation112_spill] sm:$0xff]  ;;  %v4316_v62 = vmul.f32 1.442695, %v4286_v12 }
 0x57d   : > { %8817 = vmatpush3.bf16.msra.mxu0 %v4723_v36  ;;  %v4302_v36 = vmul.f32 1.442695, %v4279_v48 }
 0x57e   : > { %v4284_v61 = vmin.f32 %v4268_v57, 0.0  ;;  %v9698_v33 = vpop.eup %9697  ;;  %v4310_v2 = vmul.f32 1.442695, %v4283_v53 }
 0x57f   : > { %v13520_v29 = vpop.permute.xlu1 %5436  ;;  %9707 = vpow2.f32 %v4302_v36 }
 0x580   : > { %15688 = vst [vmem:[#allocation146_spill] sm:$0xff] %v13520_v29  ;;  %6512 = vrot.lane.b32.xlu1 %v12736_v3, %s10118_s30  ;;  %v4269_v3 = vsub.f32 %v13243_v42, %v13370_v56  ;;  %9709 = vpow2.f32 %v4306_v9  ;;  %v4981_v9 = vsub.f32 %v15692_v15, %v13539_v30  ;;  %v15695_v29 = vld [vmem:[#allocation111_spill] sm:$0xff]  ;;  %v15697_v56 = vld [vmem:[#allocation150_spill] sm:$0xff] }
 0x581   : > { %v9700_v54 = vpop.eup %9699  ;;  %v4980_v15 = vsub.f32 %v15695_v29, %v13539_v30  ;;  %9711 = vpow2.f32 %v4308_v40  ;;  %v4287_v29 = vmin.f32 %v4271_v26, 0.0 }
 0x582   : > { %v4285_v48 = vmin.f32 %v4269_v3, 0.0  ;;  %v9702_v36 = vpop.eup %9701  ;;  %v4312_v3 = vmul.f32 1.442695, %v4284_v61  ;;  %v4997_v53 = vmin.f32 %v4981_v9, 0.0 }
 0x583   : > { %v13532_v60 = vpop.permute.xlu1 %5794  ;;  %v4325_v13 = vmul.f32 %v9702_v36, %v15697_v56 }
 0x584   : > { %15690 = vst [vmem:[#allocation127_spill] sm:$0xff] %v13532_v60  ;;  %6039 = vperm.xlu1 %9360, %v12564_v58   ;;  %v4314_v61 = vmul.f32 1.442695, %v4285_v48  ;;  %9713 = vpow2.f32 %v4312_v3  ;;  %v5014_v36 = vmul.f32 1.442695, %v4997_v53 }
 0x585   : > { %9715 = vpow2.f32 %v4310_v2  ;;  %v15699_v2 = vld [vmem:[#allocation156_spill] sm:$0xff] }
 0x586   : > { %9717 = vpow2.f32 %v4314_v61 }
 0x587   : > { %v4365_v41 = vpop.permute.xlu1 %4364  ;;  %v8762_v0 = vpop.f32.mrb[64].mxu1  ;;  %9719 = vpow2.f32 %v4316_v62 }
 0x588   : > { %4178 = vst.msk [vmem:[#allocation4 + $0x30] sm:$0xff] %vm3451_vm10, %v8762_v0  ;;  %6043 = vperm.xlu1 %9360, %v15613_v45   ;;  %v4125_v42 = vpop.f32.mrb[65].mxu1  ;;  %8784 = vmatprep.subr.bf16.mxu1 %v4365_v41  ;;  %9721 = vpow2.f32 %v5014_v36 }
 0x589   : > { %4176 = vst.msk [vmem:[#allocation4 + $0x20] sm:$0xff] %vm3451_vm10, %v4125_v42  ;;  %v8763_v57 = vpop.f32.mrb[66].mxu1  ;;  %8785 = vmatpush3.bf16.msra.mxu1 %v4365_v41  ;;  %v15694_v41 = vld [vmem:[#allocation149_spill] sm:$0xff] }
 0x58a   : > { %4179 = vst.msk [vmem:[#allocation4 + $0x38] sm:$0xff] %vm3451_vm10, %v8763_v57  ;;  %v4128_v0 = vpop.f32.mrb[67].mxu1  ;;  %8786 = vmatprep.subr.bf16.mxu1 %v4367_v46  ;;  %v4324_v60 = vmul.f32 %v9698_v33, %v15694_v41  ;;  %v15696_v57 = vld [vmem:[#allocation132_spill] sm:$0xff] }
 0x58b   : > { %4177 = vst.msk [vmem:[#allocation4 + $0x28] sm:$0xff] %vm3451_vm10, %v4128_v0  ;;  %v13553_v42 = vpop.permute.xlu1 %5080  ;;  %v4323_v51 = vmul.f32 %v9700_v54, %v15696_v57  ;;  %v9704_v0 = vpop.eup %9703  ;;  %v4996_v54 = vmin.f32 %v4980_v15, 0.0 }
 0x58c   : > { %9362 = vset.pattern.permute.xlu1 %v15665_v14  ;;  %v4338_v14 = vpack.c.bf16 %v4325_v13, %v4324_v60  ;;  %v9706_v24 = vpop.eup %9705 }
 0x58d   : > { %6397 = vperm.xlu1 %9362, %v12564_v58   ;;  %8787 = vmatpush3.bf16.msra.mxu1 %v4367_v46  ;;  %v4337_v33 = vpack.c.bf16 %v4323_v51, %v4322_v37  ;;  %v9708_v40 = vpop.eup %9707  ;;  %v4326_v51 = vmul.f32 %v9704_v0, %v13138_v21  ;;  %v4318_v37 = vmul.f32 1.442695, %v4287_v29  ;;  %v4328_v60 = vmul.f32 %v9706_v24, %v13296_v63  ;;  %v15701_v29 = vld [vmem:[#allocation24_spill] sm:$0xff] }
 0x58e   : > { %8836 = vmatprep.subr.bf16.mxu1 %v13438_v27  ;;  %v9710_v46 = vpop.eup %9709  ;;  %v5012_v3 = vmul.f32 1.442695, %v4996_v54  ;;  %v4327_v26 = vmul.f32 %v9708_v40, %v15699_v2  ;;  %v15705_v36 = vsub.s32 5, %v15701_v29  ;;  %v15715_v58 = vld [vmem:[#allocation120_spill] sm:$0xff] }
 0x58f   : > { %v13563_v48 = vpop.permute.xlu1 %5796  ;;  %v4329_v15 = vmul.f32 %v9710_v46, %v13302_v34  ;;  %v9712_v12 = vpop.eup %9711  ;;  %9723 = vpow2.f32 %v4318_v37 }
 0x590   : > { %15698 = vst [vmem:[#allocation138_spill] sm:$0xff] %v13563_v48  ;;  %8789 = vmatmul.mubr.bf16.vlgmr.msra.gmra.mrb[76].mxu1 %v4337_v33  ;;  %v4339_v61 = vpack.c.bf16 %v4327_v26, %v4326_v51  ;;  %v9714_v53 = vpop.eup %9713  ;;  %9725 = vpow2.f32 %v5012_v3  ;;  %v15706_v3 = vld [vmem:[#allocation113_spill] sm:$0xff]  ;;  %v15718_v48 = vld [vmem:[#allocation126_spill] sm:$0xff] }
 0x591   : > { %6401 = vperm.xlu1 %9362, %v15613_v45   ;;  %8792 = vmatprep.mubr.bf16.mxu1 %v4338_v14  ;;  %v4340_v13 = vpack.c.bf16 %v4329_v15, %v4328_v60  ;;  %v9716_v33 = vpop.eup %9715  ;;  %v15702_v14 = vsub.s32 4, %v15701_v29  ;;  %v4332_v62 = vmul.f32 %v9714_v53, %v13395_v52  ;;  %v15713_v45 = vld [vmem:[#allocation119_spill] sm:$0xff] }
 0x592   : > { %8837 = vmatpush3.bf16.msra.mxu1 %v13438_v27  ;;  %v13576_v27 = vpop.permute.xlu0 %5677  ;;  %v9718_v0 = vpop.eup %9717 }
 0x593   : > { %8838 = vmatprep.subr.bf16.mxu1 %v13446_v4  ;;  %v13569_v9 = vpop.permute.xlu1 %5681  ;;  %v13589_v54 = vrot.slane %v12861_v18, %v15702_v14  ;;  %v4333_v51 = vmul.f32 %v9718_v0, %v13401_v5  ;;  %v9720_v60 = vpop.eup %9719  ;;  %v15709_v0 = vld [vmem:[#allocation115_spill] sm:$0xff] }
 0x595   : > { %6156 = vrot.lane.b32.xlu1 %v12749_v35, %s10113_s20  ;;  %v5338_v26 = vsub.f32 %v15706_v3, %v13589_v54  ;;  %v15712_v3 = vld [vmem:[#allocation118_spill] sm:$0xff] }
 0x596   : > { %8839 = vmatpush3.bf16.msra.mxu1 %v13446_v4  ;;  %v4330_v4 = vmul.f32 %v9712_v12, %v13324_v49  ;;  %v13595_v46 = vpop.permute.xlu0 %5689  ;;  %v9722_v12 = vpop.eup %9721 }
 0x597   : > { %8840 = vmatprep.subr.bf16.mxu1 %v13466_v47  ;;  %v13580_v24 = vpop.permute.xlu1 %5685  ;;  %15704 = vst [vmem:[#allocation112_spill] sm:$0xff] %v13595_v46 }
 0x598   : > { %15700 = vst [vmem:[#allocation147_spill] sm:$0xff] %v13580_v24  ;;  %8793 = vmatmul.mubr.bf16.gmra.mrb[80].mxu1 %v4339_v61  ;;  %v4342_v61 = vpack.c.bf16 %v4333_v51, %v4332_v62  ;;  %v4334_v62 = vmul.f32 %v9720_v60, %v13417_v39  ;;  %v5354_v51 = vmin.f32 %v5338_v26, 0.0 }
 0x599   : > { %6514 = vrot.lane.b32.xlu1 %v12749_v35, %s10118_s30  ;;  %8796 = vmatprep.mubr.bf16.mxu1 %v4340_v13  ;;  %v4331_v35 = vmul.f32 %v9716_v33, %v13330_v19  ;;  %v15708_v13 = vld [vmem:[#allocation114_spill] sm:$0xff]  ;;  %v9724_v33 = vpop.eup %9723 }
 0x59a   : > { %8841 = vmatpush3.bf16.msra.mxu1 %v13466_v47  ;;  %v13601_v47 = vrot.slane %v12861_v18, %v15705_v36  ;;  %v5339_v53 = vsub.f32 %v15708_v13, %v13589_v54  ;;  %v13616_v36 = vpop.permute.xlu0 %6142  ;;  %v4625_v13 = vsub.f32 %v15713_v45, %v15712_v3  ;;  %v15717_v45 = vld [vmem:[#allocation123_spill] sm:$0xff] }
 0x59b   : > { %8842 = vmatprep.subr.bf16.mxu1 %v13476_v50  ;;  %v13592_v40 = vpop.permute.xlu1 %6500  ;;  %v4341_v37 = vpack.c.bf16 %v4331_v35, %v4330_v4  ;;  %v15710_v4 = vld [vmem:[#allocation116_spill] sm:$0xff]  ;;  %15711 = vst [vmem:[#allocation150_spill] sm:$0xff] %v13616_v36 }
 0x59c   : > { %15703 = vst [vmem:[#allocation40_spill] sm:$0xff] %v13592_v40  ;;  %v5696_v14 = vsub.f32 %v15709_v0, %v13601_v47  ;;  %v5697_v35 = vsub.f32 %v15710_v4, %v13601_v47  ;;  %v5355_v0 = vmin.f32 %v5339_v53, 0.0  ;;  %v4983_v4 = vsub.f32 %v15715_v58, %v13539_v30 }
 0x59d   : > { %v4335_v40 = vmul.f32 %v9724_v33, %v13423_v43  ;;  %v4641_v53 = vmin.f32 %v4625_v13, 0.0  ;;  %v4624_v58 = vsub.f32 %v15718_v48, %v15712_v3 }
 0x59e   : > { %8843 = vmatpush3.bf16.msra.mxu1 %v13476_v50  ;;  %v9726_v50 = vpop.eup %9725  ;;  %v5712_v36 = vmin.f32 %v5696_v14, 0.0  ;;  %v5713_v24 = vmin.f32 %v5697_v35, 0.0  ;;  %v4999_v46 = vmin.f32 %v4983_v4, 0.0  ;;  %v13642_v43 = vpop.permute.xlu0 %5987  ;;  %v15724_v4 = vld [vmem:[#allocation133_spill] sm:$0xff] }
 0x59f   : > { %8844 = vmatprep.subr.bf16.mxu1 %v13490_v28  ;;  %v13608_v15 = vpop.permute.xlu1 %5991  ;;  %v5044_v26 = vmul.f32 %v9726_v50, %v12909_v25  ;;  %v15720_v50 = vld [vmem:[#allocation128_spill] sm:$0xff]  ;;  %15721 = vst [vmem:[#allocation114_spill] sm:$0xff] %v13642_v43 }
 0x5a0   : > { %15707 = vst [vmem:[#allocation111_spill] sm:$0xff] %v13608_v15  ;;  %8797 = vmatmul.mubr.bf16.gmra.mrb[84].mxu1 %v4341_v37  ;;  %v5699_v15 = vsub.f32 %v15717_v45, %v13601_v47  ;;  %v4982_v35 = vsub.f32 %v15720_v50, %v13539_v30  ;;  %v5730_v48 = vmul.f32 1.442695, %v5713_v24  ;;  %v15723_v45 = vld [vmem:[#allocation131_spill] sm:$0xff] }
 0x5a1   : > { %8800 = vmatprep.mubr.bf16.mxu1 %v4342_v61  ;;  %v5045_v61 = vmul.f32 %v9722_v12, %v12914_v55  ;;  %v5370_v12 = vmul.f32 1.442695, %v5354_v51 }
 0x5a2   : > { %8845 = vmatpush3.bf16.msra.mxu1 %v13490_v28  ;;  %v15716_v28 = vld [vmem:[#allocation121_spill] sm:$0xff]  ;;  %v5715_v13 = vmin.f32 %v5699_v15, 0.0 }
 0x5a3   : > { %8846 = vmatprep.subr.bf16.mxu1 %v13514_v22  ;;  %v13623_v37 = vpop.permute.xlu1 %5995  ;;  %v5341_v60 = vsub.f32 %v15716_v28, %v13589_v54  ;;  %v5060_v14 = vpack.c.bf16 %v5045_v61, %v5044_v26  ;;  %v5372_v28 = vmul.f32 1.442695, %v5355_v0  ;;  %9727 = vpow2.f32 %v5370_v12 }
 0x5a4   : > { %15714 = vst [vmem:[#allocation24_spill] sm:$0xff] %v13623_v37  ;;  %v4343_v37 = vpack.c.bf16 %v4335_v40, %v4334_v62  ;;  %v15722_v62 = vld [vmem:[#allocation129_spill] sm:$0xff]  ;;  %v4660_v61 = vmul.f32 1.442695, %v4641_v53  ;;  %v4640_v0 = vmin.f32 %v4624_v58, 0.0  ;;  %v4984_v26 = vsub.f32 %v15724_v4, %v13539_v30  ;;  %v15728_v58 = vld [vmem:[#allocation136_spill] sm:$0xff]  ;;  %v13659_v4 = vpop.permute.xlu0 %5999 }
 0x5a5   : > { %v5357_v40 = vmin.f32 %v5341_v60, 0.0  ;;  %v4626_v51 = vsub.f32 %v15722_v62, %v15712_v3  ;;  %9729 = vpow2.f32 %v5372_v28  ;;  %v4998_v60 = vmin.f32 %v4982_v35, 0.0  ;;  %v15727_v62 = vld [vmem:[#allocation135_spill] sm:$0xff]  ;;  %15729 = vst [vmem:[#allocation116_spill] sm:$0xff] %v13659_v4  ;;  %v15730_v35 = vld [vmem:[#allocation137_spill] sm:$0xff] }
 0x5a6   : > { %8847 = vmatpush3.bf16.msra.mxu1 %v13514_v22  ;;  %v5728_v22 = vmul.f32 1.442695, %v5712_v36  ;;  %v5018_v36 = vmul.f32 1.442695, %v4999_v46  ;;  %v5734_v12 = vmul.f32 1.442695, %v5715_v13 }
 0x5a7   : > { %8848 = vmatprep.subr.bf16.mxu1 %v13553_v42  ;;  %v13638_v33 = vpop.permute.xlu1 %6144  ;;  %v5376_v15 = vmul.f32 1.442695, %v5357_v40  ;;  %v4642_v50 = vmin.f32 %v4626_v51, 0.0  ;;  %v4658_v46 = vmul.f32 1.442695, %v4640_v0  ;;  %v5000_v28 = vmin.f32 %v4984_v26, 0.0 }
 0x5a8   : > { %15719 = vst [vmem:[#allocation113_spill] sm:$0xff] %v13638_v33  ;;  %8801 = vmatmul.mubr.bf16.gmra.mrb[88].mxu1 %v4343_v37  ;;  %v5340_v33 = vsub.f32 %v15723_v45, %v13589_v54  ;;  %9731 = vpow2.f32 %v5728_v22  ;;  %v5700_v45 = vsub.f32 %v15728_v58, %v13601_v47  ;;  %v5016_v40 = vmul.f32 1.442695, %v4998_v60  ;;  %v15733_v58 = vld [vmem:[#allocation140_spill] sm:$0xff]  ;;  %v15734_v26 = vld [vmem:[#allocation141_spill] sm:$0xff]  ;;  %v15735_v60 = vld [vmem:[#allocation142_spill] sm:$0xff] }
 0x5a9   : > { %8852 = vmatprep.mubr.bf16.mxu1 %v5060_v14  ;;  %v15726_v14 = vld [vmem:[#allocation134_spill] sm:$0xff]  ;;  %9733 = vpow2.f32 %v5730_v48  ;;  %v15732_v48 = vld [vmem:[#allocation139_spill] sm:$0xff] }
 0x5aa   : > { %8849 = vmatpush3.bf16.msra.mxu1 %v13553_v42  ;;  %v5698_v24 = vsub.f32 %v15726_v14, %v13601_v47  ;;  %v5342_v42 = vsub.f32 %v15727_v62, %v13589_v54  ;;  %v5356_v53 = vmin.f32 %v5340_v33, 0.0  ;;  %9735 = vpow2.f32 %v4660_v61 }
 0x5ab   : > { %v13651_v37 = vpop.permute.xlu1 %6349  ;;  %v4627_v14 = vsub.f32 %v15730_v35, %v15712_v3  ;;  %9737 = vpow2.f32 %v5018_v36  ;;  %v4985_v13 = vsub.f32 %v15732_v48, %v13539_v30  ;;  %v4662_v33 = vmul.f32 1.442695, %v4642_v50 }
 0x5ac   : > { %15725 = vst [vmem:[#allocation115_spill] sm:$0xff] %v13651_v37  ;;  %v5714_v51 = vmin.f32 %v5698_v24, 0.0  ;;  %9739 = vpow2.f32 %v5376_v15  ;;  %v5358_v62 = vmin.f32 %v5342_v42, 0.0  ;;  %v4629_v37 = vsub.f32 %v15733_v58, %v15712_v3  ;;  %v15737_v42 = vld [vmem:[#allocation143_spill] sm:$0xff] }
 0x5ad   : > { %9741 = vpow2.f32 %v5734_v12  ;;  %v5374_v61 = vmul.f32 1.442695, %v5356_v53  ;;  %v5716_v0 = vmin.f32 %v5700_v45, 0.0  ;;  %v5343_v35 = vsub.f32 %v15734_v26, %v13589_v54  ;;  %v13677_v12 = vpop.permute.xlu0 %6146  ;;  %v9728_v53 = vpop.eup %9727  ;;  %v15739_v26 = vld [vmem:[#allocation144_spill] sm:$0xff] }
 0x5ae   : > { %9743 = vpow2.f32 %v4658_v46  ;;  %v4643_v36 = vmin.f32 %v4627_v14, 0.0  ;;  %v4987_v24 = vsub.f32 %v15735_v60, %v13539_v30  ;;  %v5732_v15 = vmul.f32 1.442695, %v5714_v51  ;;  %15738 = vst [vmem:[#allocation120_spill] sm:$0xff] %v13677_v12 }
 0x5af   : > { %v13663_v22 = vpop.permute.xlu1 %6353  ;;  %9745 = vpow2.f32 %v5016_v40  ;;  %v5001_v50 = vmin.f32 %v4985_v13, 0.0  ;;  %v5701_v48 = vsub.f32 %v15737_v42, %v13601_v47  ;;  %v5378_v45 = vmul.f32 1.442695, %v5358_v62  ;;  %v9730_v46 = vpop.eup %9729  ;;  %v15740_v13 = vld [vmem:[#allocation145_spill] sm:$0xff] }
 0x5b0   : > { %15731 = vst [vmem:[#allocation118_spill] sm:$0xff] %v13663_v22  ;;  %v5020_v22 = vmul.f32 1.442695, %v5000_v28  ;;  %9747 = vpow2.f32 %v4662_v33  ;;  %v4645_v58 = vmin.f32 %v4629_v37, 0.0  ;;  %v5736_v28 = vmul.f32 1.442695, %v5716_v0 }
 0x5b1   : > { %9749 = vpow2.f32 %v5374_v61  ;;  %v5359_v14 = vmin.f32 %v5343_v35, 0.0  ;;  %v5345_v60 = vsub.f32 %v15739_v26, %v13589_v54  ;;  %v4664_v40 = vmul.f32 1.442695, %v4643_v36 }
 0x5b2   : > { %9751 = vpow2.f32 %v5020_v22  ;;  %v5003_v51 = vmin.f32 %v4987_v24, 0.0  ;;  %v5703_v42 = vsub.f32 %v15740_v13, %v13601_v47  ;;  %v5022_v33 = vmul.f32 1.442695, %v5001_v50  ;;  %v15743_v22 = vld [vmem:[#allocation148_spill] sm:$0xff] }
 0x5b3   : > { %v13673_v4 = vpop.permute.xlu1 %6502  ;;  %9753 = vpow2.f32 %v5732_v15  ;;  %v5717_v37 = vmin.f32 %v5701_v48, 0.0  ;;  %v15742_v61 = vsub.s32 6, %v15701_v29  ;;  %v4668_v35 = vmul.f32 1.442695, %v4645_v58 }
 0x5b4   : > { %15736 = vst [vmem:[#allocation119_spill] sm:$0xff] %v13673_v4  ;;  %v9732_v4 = vpop.eup %9731  ;;  %9755 = vpow2.f32 %v5378_v45  ;;  %v4630_v36 = vsub.f32 %v15743_v22, %v15712_v3  ;;  %v5380_v26 = vmul.f32 1.442695, %v5359_v14  ;;  %v5361_v13 = vmin.f32 %v5345_v60, 0.0 }
 0x5b5   : > { %v9734_v12 = vpop.eup %9733  ;;  %v13688_v0 = vrot.slane %v12861_v18, %v15742_v61  ;;  %9757 = vpow2.f32 %v5736_v28  ;;  %v13695_v15 = vmul.f32 %v9730_v46, %v12914_v55  ;;  %v5026_v29 = vmul.f32 1.442695, %v5003_v51  ;;  %v15747_v28 = vld [vmem:[#allocation151_spill] sm:$0xff] }
 0x5b6   : > { %v9736_v62 = vpop.eup %9735  ;;  %9759 = vpow2.f32 %v4664_v40  ;;  %v5719_v48 = vmin.f32 %v5703_v42, 0.0  ;;  %v13700_v45 = vmul.f32 %v9734_v12, %v12914_v55  ;;  %v5738_v22 = vmul.f32 1.442695, %v5717_v37  ;;  %v15752_v37 = vld [vmem:[#allocation152_spill] sm:$0xff] }
 0x5b7   : > { %v13683_v43 = vpop.permute.xlu1 %6504  ;;  %v9738_v24 = vpop.eup %9737  ;;  %9761 = vpow2.f32 %v5022_v33  ;;  %v4988_v14 = vsub.f32 %v15747_v28, %v13539_v30  ;;  %v13705_v60 = vmul.f32 %v9728_v53, %v12909_v25  ;;  %v4646_v51 = vmin.f32 %v4630_v36, 0.0 }
 0x5b8   : > { %15741 = vst [vmem:[#allocation121_spill] sm:$0xff] %v13683_v43  ;;  %v13692_v43 = vpop.permute.xlu0 %6003  ;;  %v9740_v50 = vpop.eup %9739  ;;  %15746 = vst [vmem:[#allocation128_spill] sm:$0xff] %v13700_v45  ;;  %9763 = vpow2.f32 %v4668_v35  ;;  %v13712_v42 = vmul.f32 %v9732_v4, %v12909_v25  ;;  %v5384_v33 = vmul.f32 1.442695, %v5361_v13  ;;  %v5346_v55 = vsub.f32 %v15752_v37, %v13589_v54  ;;  %v15755_v13 = vld [vmem:[#allocation154_spill] sm:$0xff] }
 0x5b9   : > { %15744 = vst [vmem:[#allocation123_spill] sm:$0xff] %v13692_v43  ;;  %v9742_v58 = vpop.eup %9741  ;;  %15748 = vst [vmem:[#allocation129_spill] sm:$0xff] %v13705_v60  ;;  %v15749_v43 = vld [vmem:[#allocation36_spill] sm:$0xff]  ;;  %9765 = vpow2.f32 %v5380_v26  ;;  %v5004_v26 = vmin.f32 %v4988_v14, 0.0  ;;  %v5704_v37 = vsub.f32 %v15755_v13, %v13601_v47  ;;  %v13729_v53 = vmul.f32 %v9736_v62, %v15696_v57 }
 0x5ba   : > { %v9744_v46 = vpop.eup %9743  ;;  %v13709_v40 = vrot.slane %v12861_v18, %v15749_v43  ;;  %15751 = vst [vmem:[#allocation133_spill] sm:$0xff] %v13712_v42  ;;  %9767 = vpow2.f32 %v5026_v29  ;;  %v15753_v18 = vld [vmem:[#allocation153_spill] sm:$0xff]  ;;  %v13737_v4 = vmul.f32 %v9738_v24, %v15696_v57  ;;  %v5362_v14 = vmin.f32 %v5346_v55, 0.0 }
 0x5bb   : > { %v13697_v61 = vpop.permute.xlu1 %6007  ;;  %v9746_v12 = vpop.eup %9745  ;;  %v4628_v43 = vsub.f32 %v15753_v18, %v15712_v3  ;;  %9769 = vpow2.f32 %v5738_v22  ;;  %v15757_v18 = vld [vmem:[#allocation155_spill] sm:$0xff]  ;;  %v4631_v13 = vsub.f32 %v13201_v44, %v15712_v3  ;;  %v13749_v24 = vmul.f32 %v9740_v50, %v15696_v57 }
 0x5bc   : > { %15745 = vst [vmem:[#allocation126_spill] sm:$0xff] %v13697_v61  ;;  %15750 = vst [vmem:[#allocation131_spill] sm:$0xff] %v13709_v40  ;;  %v9748_v28 = vpop.eup %9747  ;;  %v5742_v61 = vmul.f32 1.442695, %v5719_v48  ;;  %v13726_v25 = vpop.permute.xlu0 %6015  ;;  %v4670_v48 = vmul.f32 1.442695, %v4646_v51  ;;  %v4986_v40 = vsub.f32 %v15757_v18, %v13539_v30  ;;  %9771 = vpow2.f32 %v5384_v33 }
 0x5bd   : > { %v9750_v36 = vpop.eup %9749  ;;  %15756 = vst [vmem:[#allocation135_spill] sm:$0xff] %v13726_v25  ;;  %v13742_v62 = vmul.f32 %v9746_v12, %v15693_v10  ;;  %v4644_v51 = vmin.f32 %v4628_v43, 0.0  ;;  %v5344_v18 = vsub.f32 %v13157_v20, %v13589_v54  ;;  %v5028_v55 = vmul.f32 1.442695, %v5004_v26 }
 0x5be   : > { %v9752_v29 = vpop.eup %9751  ;;  %9773 = vpow2.f32 %v5742_v61  ;;  %v5720_v33 = vmin.f32 %v5704_v37, 0.0  ;;  %v13754_v44 = vmul.f32 %v9750_v36, %v15693_v10  ;;  %v13757_v12 = vmul.f32 %v9742_v58, %v15696_v57 }
 0x5bf   : > { %v13720_v35 = vpop.permute.xlu1 %6011  ;;  %v9754_v22 = vpop.eup %9753  ;;  %9775 = vpow2.f32 %v4670_v48  ;;  %v5002_v43 = vmin.f32 %v4986_v40, 0.0  ;;  %v5702_v20 = vsub.f32 %v13173_v7, %v13601_v47  ;;  %v5386_v25 = vmul.f32 1.442695, %v5362_v14 }
 0x5c0   : > { %15754 = vst [vmem:[#allocation134_spill] sm:$0xff] %v13720_v35  ;;  %v13734_v35 = vmul.f32 %v9744_v46, %v15693_v10  ;;  %v9756_v42 = vpop.eup %9755  ;;  %15759 = vst [vmem:[#allocation137_spill] sm:$0xff] %v13754_v44  ;;  %v4647_v60 = vmin.f32 %v4631_v13, 0.0  ;;  %v4989_v26 = vsub.f32 %v13217_v11, %v13539_v30  ;;  %v13765_v36 = vpop.permute.xlu0 %6150  ;;  %v4666_v40 = vmul.f32 1.442695, %v4644_v51 }
 0x5c1   : > { %v13751_v45 = vpop.eup %9757  ;;  %15760 = vst [vmem:[#allocation139_spill] sm:$0xff] %v13757_v12  ;;  %15761 = vst [vmem:[#allocation140_spill] sm:$0xff] %v13765_v36  ;;  %v5360_v48 = vmin.f32 %v5344_v18, 0.0  ;;  %v13774_v7 = vmul.f32 %v9748_v28, %v15694_v41  ;;  %v13777_v14 = vmul.f32 %v9754_v22, %v15693_v10  ;;  %9777 = vpow2.f32 %v5028_v55 }
 0x5c2   : > { %v9760_v61 = vpop.eup %9759  ;;  %v5744_v11 = vmul.f32 1.442695, %v5720_v33  ;;  %v4633_v50 = vsub.f32 %v13181_v32, %v15712_v3  ;;  %v5024_v36 = vmul.f32 1.442695, %v5002_v43  ;;  %v4632_v28 = vsub.f32 %v13311_v6, %v15712_v3 }
 0x5c3   : > { %v13746_v46 = vpop.permute.xlu1 %6148  ;;  %15763 = vst [vmem:[#allocation142_spill] sm:$0xff] %v13777_v14  ;;  %v13791_v55 = vmul.f32 %v9752_v29, %v15694_v41  ;;  %9779 = vpow2.f32 %v5386_v25  ;;  %v4672_v32 = vmul.f32 1.442695, %v4647_v60  ;;  %v5005_v10 = vmin.f32 %v4989_v26, 0.0 }
 0x5c4   : > { %15758 = vst [vmem:[#allocation136_spill] sm:$0xff] %v13746_v46  ;;  %v9762_v46 = vpop.eup %9761  ;;  %v4635_v51 = vsub.f32 %v13355_v38, %v15712_v3  ;;  %9781 = vpow2.f32 %v4666_v40  ;;  %v13802_v29 = vmul.f32 %v9756_v42, %v15694_v41  ;;  %v4649_v38 = vmin.f32 %v4633_v50, 0.0  ;;  %v13810_v40 = vpop.permute.xlu0 %6019 }
 0x5c5   : > { %v13769_v37 = vpop.eup %9763  ;;  %9783 = vpow2.f32 %v5744_v11  ;;  %v4634_v26 = vsub.f32 %v13259_v8, %v15712_v3  ;;  %v4990_v25 = vsub.f32 %v13318_v1, %v13539_v30  ;;  %v5030_v50 = vmul.f32 1.442695, %v5005_v10 }
 0x5c6   : > { %v13779_v13 = vpop.eup %9765  ;;  %9785 = vpow2.f32 %v5024_v36  ;;  %v4651_v11 = vmin.f32 %v4635_v51, 0.0  ;;  %v4993_v8 = vsub.f32 %v13359_v17, %v13539_v30  ;;  %v13833_v1 = vmul.f32 %v13751_v45, %v15694_v41  ;;  %v15766_v41 = vld [vmem:[#allocation178_spill] sm:$0xff] }
 0x5c7   : > { %v13771_v57 = vpop.permute.xlu1 %6365  ;;  %v13785_v18 = vpop.eup %9767  ;;  %9787 = vpow2.f32 %v4672_v32  ;;  %v4676_v10 = vmul.f32 1.442695, %v4649_v38  ;;  %v4650_v36 = vmin.f32 %v4634_v26, 0.0  ;;  %v4992_v17 = vsub.f32 %v13271_v59, %v13539_v30 }
 0x5c8   : > { %15762 = vst [vmem:[#allocation141_spill] sm:$0xff] %v13771_v57  ;;  %v8766_v58 = vpop.f32.mrb[68].mxu1  ;;  %v5718_v57 = vmin.f32 %v5702_v20, 0.0  ;;  %v13793_v33 = vpop.eup %9769  ;;  %v5382_v20 = vmul.f32 1.442695, %v5360_v48  ;;  %v13814_v48 = vmul.f32 %v9760_v61, %v15697_v56  ;;  %v4991_v61 = vsub.f32 %v13195_v31, %v13539_v30 }
 0x5c9   : > { %4182 = vst.msk [vmem:[#allocation4 + $0x50] sm:$0xff] %vm3451_vm10, %v8766_v58  ;;  %v4141_v22 = vpop.f32.mrb[69].mxu1  ;;  %v13806_v60 = vpop.eup %9771  ;;  %v5006_v31 = vmin.f32 %v4990_v25, 0.0  ;;  %v4636_v32 = vsub.f32 %v13406_v16, %v15712_v3  ;;  %v5349_v45 = vsub.f32 %v13212_v23, %v13589_v54  ;;  %v5009_v38 = vmin.f32 %v4993_v8, 0.0  ;;  %v15767_v23 = vld [vmem:[#allocation170_spill] sm:$0xff] }
 0x5ca   : > { %4180 = vst.msk [vmem:[#allocation4 + $0x40] sm:$0xff] %vm3451_vm10, %v4141_v22  ;;  %v8767_v43 = vpop.f32.mrb[70].mxu1  ;;  %v13816_v22 = vpop.eup %9773  ;;  %v5740_v42 = vmul.f32 1.442695, %v5718_v57  ;;  %9789 = vpow2.f32 %v5382_v20  ;;  %v13829_v57 = vmul.f32 %v9762_v46, %v15697_v56  ;;  %v4704_v51 = vpack.c.bf16 %v13814_v48, %v13774_v7 }
 0x5cb   : > { %4183 = vst.msk [vmem:[#allocation4 + $0x58] sm:$0xff] %vm3451_vm10, %v8767_v43  ;;  %v13799_v6 = vpop.permute.xlu1 %6369  ;;  %v4144_v58 = vpop.f32.mrb[71].mxu1  ;;  %v4648_v43 = vmin.f32 %v4632_v28, 0.0  ;;  %v4680_v20 = vmul.f32 1.442695, %v4651_v11  ;;  %v5007_v59 = vmin.f32 %v4991_v61, 0.0  ;;  %v4637_v7 = vsub.f32 %v15766_v41, %v15712_v3 }
 0x5cc   : > { %15764 = vst [vmem:[#allocation143_spill] sm:$0xff] %v13799_v6  ;;  %4181 = vst.msk [vmem:[#allocation4 + $0x48] sm:$0xff] %vm3451_vm10, %v4144_v58  ;;  %v13822_v6 = vpop.eup %9775  ;;  %9791 = vpow2.f32 %v5740_v42  ;;  %v13845_v26 = vpop.permute.xlu0 %6031  ;;  %v5062_v25 = vpack.c.bf16 %v13829_v57, %v13791_v55  ;;  %v13853_v16 = vmul.f32 %v13769_v37, %v15699_v2  ;;  %v5008_v11 = vmin.f32 %v4992_v17, 0.0  ;;  %v15768_v61 = vld [vmem:[#allocation33_spill] sm:$0xff] }
 0x5cd   : > { %v4674_v28 = vmul.f32 1.442695, %v4648_v43  ;;  %v13841_v46 = vpop.eup %9777  ;;  %9793 = vpow2.f32 %v5030_v50  ;;  %v5347_v43 = vsub.f32 %v15767_v23, %v13589_v54  ;;  %v4678_v50 = vmul.f32 1.442695, %v4650_v36  ;;  %v15770_v23 = vld [vmem:[#allocation186_spill] sm:$0xff] }
 0x5ce   : > { %v13855_v42 = vpop.eup %9779  ;;  %9795 = vpow2.f32 %v4676_v10  ;;  %v5032_v41 = vmul.f32 1.442695, %v5006_v31  ;;  %v4652_v3 = vmin.f32 %v4636_v32, 0.0  ;;  %v4994_v55 = vsub.f32 %v15768_v61, %v13539_v30 }
 0x5cf   : > { %v13826_v58 = vpop.permute.xlu1 %6506  ;;  %v9782_v8 = vpop.eup %9781  ;;  %9797 = vpow2.f32 %v4674_v28  ;;  %v5365_v37 = vmin.f32 %v5349_v45, 0.0  ;;  %v5038_v14 = vmul.f32 1.442695, %v5009_v38  ;;  %v5034_v17 = vmul.f32 1.442695, %v5007_v59  ;;  %v15771_v28 = vld [vmem:[#allocation179_spill] sm:$0xff] }
 0x5d0   : > { %15765 = vst [vmem:[#allocation144_spill] sm:$0xff] %v13826_v58  ;;  %v13861_v57 = vpop.eup %9783  ;;  %v15769_v58 = vld [vmem:[#allocation173_spill] sm:$0xff]  ;;  %9799 = vpow2.f32 %v4680_v20  ;;  %v4653_v12 = vmin.f32 %v4637_v7, 0.0  ;;  %v4995_v31 = vsub.f32 %v15771_v28, %v13539_v30  ;;  %v15772_v45 = vld [vmem:[#allocation167_spill] sm:$0xff]  ;;  %v5036_v20 = vmul.f32 1.442695, %v5008_v11  ;;  %v13874_v38 = vpop.permute.xlu0 %6154 }
 0x5d1   : > { %v5705_v10 = vsub.f32 %v15769_v58, %v13601_v47  ;;  %v9786_v36 = vpop.eup %9785  ;;  %v5707_v44 = vsub.f32 %v15772_v45, %v13601_v47  ;;  %v5363_v58 = vmin.f32 %v5347_v43, 0.0  ;;  %9801 = vpow2.f32 %v4678_v50  ;;  %v15774_v11 = vld [vmem:[#allocation188_spill] sm:$0xff] }
 0x5d2   : > { %v9788_v61 = vpop.eup %9787  ;;  %v15773_v59 = vpack.c.bf16 %v13729_v53, %v13734_v35  ;;  %9803 = vpow2.f32 %v5032_v41  ;;  %v4682_v7 = vmul.f32 1.442695, %v4652_v3  ;;  %v13883_v28 = vmul.f32 %v13785_v18, %v15699_v2 }
 0x5d3   : > { %v4725_v48 = vpop.permute.xlu1 %4724  ;;  %v5392_v43 = vmul.f32 1.442695, %v5365_v37  ;;  %v5721_v50 = vmin.f32 %v5705_v10, 0.0  ;;  %9805 = vpow2.f32 %v5038_v14  ;;  %v4692_v53 = vmul.f32 %v9782_v8, %v13138_v21 }
 0x5d4   : > { %8818 = vmatprep.subr.bf16.mxu0 %v4725_v48  ;;  %v13879_v30 = vpop.eup %9789  ;;  %9807 = vpow2.f32 %v5034_v17  ;;  %v4684_v41 = vmul.f32 1.442695, %v4653_v12  ;;  %v5011_v3 = vmin.f32 %v4995_v31, 0.0  ;;  %v4695_v18 = vmul.f32 %v9788_v61, %v13302_v34  ;;  %v15778_v12 = vld [vmem:[#allocation182_spill] sm:$0xff] }
 0x5d5   : > { %8819 = vmatpush3.bf16.msra.mxu0 %v4725_v48  ;;  %v13870_v48 = vmul.f32 %v13779_v13, %v15697_v56  ;;  %v5010_v13 = vmin.f32 %v4994_v55, 0.0  ;;  %v5723_v10 = vmin.f32 %v5707_v44, 0.0  ;;  %v5388_v14 = vmul.f32 1.442695, %v5363_v58  ;;  %v13904_v58 = vpop.permute.xlu0 %6035 }
 0x5d6   : > { %8868 = vmatprep.subr.bf16.mxu0 %v15770_v23  ;;  %v13888_v35 = vpop.eup %9791  ;;  %9809 = vpow2.f32 %v5036_v20  ;;  %v15777_v8 = vpack.c.bf16 %v13737_v4, %v13742_v62  ;;  %v5348_v17 = vsub.f32 %v15778_v12, %v13589_v54  ;;  %v4694_v44 = vmul.f32 %v13822_v6, %v13296_v63  ;;  %v15779_v4 = vld [vmem:[#allocation191_spill] sm:$0xff] }
 0x5d7   : > { %v5083_v32 = vpop.permute.xlu1 %5082  ;;  %v9794_v37 = vpop.eup %9793  ;;  %9811 = vpow2.f32 %v4682_v7  ;;  %v5040_v31 = vmul.f32 1.442695, %v5010_v13  ;;  %v5746_v45 = vmul.f32 1.442695, %v5721_v50  ;;  %v4705_v62 = vpack.c.bf16 %v13853_v16, %v4692_v53  ;;  %v15780_v7 = vld [vmem:[#allocation190_spill] sm:$0xff] }
 0x5d8   : > { %8821 = vmatmul.mubr.bf16.vlgmr.msra.gmra.mrb[88].mxu0 %v15773_v59  ;;  %8850 = vmatprep.subr.bf16.mxu1 %v5083_v32  ;;  %v9796_v61 = vpop.eup %9795  ;;  %9813 = vpow2.f32 %v5392_v43  ;;  %v5050_v20 = vmul.f32 %v9786_v36, %v13138_v21  ;;  %v4706_v6 = vpack.c.bf16 %v4695_v18, %v4694_v44  ;;  %v5053_v43 = vmul.f32 %v9794_v37, %v13302_v34 }
 0x5d9   : > { %8824 = vmatprep.mubr.bf16.mxu0 %v4704_v51  ;;  %8851 = vmatpush3.bf16.msra.mxu1 %v5083_v32  ;;  %v15775_v51 = vld [vmem:[#allocation189_spill] sm:$0xff]  ;;  %v9798_v59 = vpop.eup %9797  ;;  %9815 = vpow2.f32 %v4684_v41  ;;  %v5364_v16 = vmin.f32 %v5348_v17, 0.0  ;;  %v5052_v36 = vmul.f32 %v13841_v46, %v13296_v63  ;;  %v13921_v53 = vmul.f32 %v13793_v33, %v15697_v56  ;;  %v15783_v46 = vld [vmem:[#allocation183_spill] sm:$0xff] }
 0x5da   : > { %8869 = vmatpush3.bf16.msra.mxu0 %v15770_v23  ;;  %8900 = vmatprep.subr.bf16.mxu1 %v15774_v11  ;;  %v15776_v23 = vld [vmem:[#allocation176_spill] sm:$0xff]  ;;  %v9800_v50 = vpop.eup %9799  ;;  %9817 = vpow2.f32 %v5388_v14  ;;  %v5063_v18 = vpack.c.bf16 %v13883_v28, %v5050_v20  ;;  %v4696_v37 = vmul.f32 %v9798_v59, %v13324_v49  ;;  %v15784_v33 = vld [vmem:[#allocation193_spill] sm:$0xff] }
 0x5db   : > { %8870 = vmatprep.subr.bf16.mxu0 %v15775_v51  ;;  %v13891_v55 = vpop.permute.xlu1 %6508  ;;  %v5350_v32 = vsub.f32 %v15776_v23, %v13589_v54  ;;  %v15781_v23 = vld [vmem:[#allocation181_spill] sm:$0xff]  ;;  %9819 = vpow2.f32 %v5040_v31  ;;  %v9802_v41 = vpop.eup %9801  ;;  %v5064_v17 = vpack.c.bf16 %v5053_v43, %v5052_v36  ;;  %v4699_v31 = vmul.f32 %v9800_v50, %v13401_v5  ;;  %v15785_v50 = vld [vmem:[#allocation195_spill] sm:$0xff] }
 0x5dc   : > { %8853 = vmatmul.mubr.bf16.vlgmr.msra.gmra.mrb[92].mxu1 %v15777_v8  ;;  %v5353_v8 = vsub.f32 %v15781_v23, %v13589_v54  ;;  %9821 = vpow2.f32 %v5746_v45  ;;  %v9804_v14 = vpop.eup %9803  ;;  %v5390_v59 = vmul.f32 1.442695, %v5364_v16  ;;  %v15786_v16 = vld [vmem:[#allocation184_spill] sm:$0xff] }
 0x5dd   : > { %8856 = vmatprep.mubr.bf16.mxu1 %v5062_v25  ;;  %8901 = vmatpush3.bf16.msra.mxu1 %v15774_v11  ;;  %v5042_v25 = vmul.f32 1.442695, %v5011_v3  ;;  %v5750_v11 = vmul.f32 1.442695, %v5723_v10  ;;  %v15782_v3 = vld [vmem:[#allocation192_spill] sm:$0xff]  ;;  %v9806_v44 = vpop.eup %9805  ;;  %v5351_v36 = vsub.f32 %v15786_v16, %v13589_v54 }
 0x5de   : > { %8871 = vmatpush3.bf16.msra.mxu0 %v15775_v51  ;;  %8902 = vmatprep.subr.bf16.mxu1 %v15779_v4  ;;  %v5366_v51 = vmin.f32 %v5350_v32, 0.0  ;;  %v5706_v32 = vsub.f32 %v15783_v46, %v13601_v47  ;;  %v5369_v45 = vmin.f32 %v5353_v8, 0.0  ;;  %v9808_v20 = vpop.eup %9807 }
 0x5df   : > { %8872 = vmatprep.subr.bf16.mxu0 %v15780_v7  ;;  %v13911_v13 = vpop.permute.xlu1 %6023  ;;  %9823 = vpow2.f32 %v5042_v25  ;;  %v4698_v25 = vmul.f32 %v9802_v41, %v13395_v52  ;;  %v15787_v41 = vld [vmem:[#allocation194_spill] sm:$0xff] }
 0x5e0   : > { %8825 = vmatmul.mubr.bf16.gmra.mrb[92].mxu0 %v4705_v62  ;;  %9825 = vpow2.f32 %v5750_v11  ;;  %v5394_v28 = vmul.f32 1.442695, %v5366_v51  ;;  %v4697_v62 = vmul.f32 %v9796_v61, %v13330_v19  ;;  %v9810_v43 = vpop.eup %9809  ;;  %v5054_v11 = vmul.f32 %v9804_v14, %v13324_v49 }
 0x5e1   : > { %8828 = vmatprep.mubr.bf16.mxu0 %v4706_v6  ;;  %8903 = vmatpush3.bf16.msra.mxu1 %v15779_v4  ;;  %v13935_v4 = vpop.permute.xlu0 %6047  ;;  %v13944_v6 = vmul.f32 %v13806_v60, %v15699_v2  ;;  %v13951_v51 = vmul.f32 %v13816_v22, %v15699_v2  ;;  %v9812_v23 = vpop.eup %9811  ;;  %v5722_v8 = vmin.f32 %v5706_v32, 0.0  ;;  %v5055_v14 = vmul.f32 %v9808_v20, %v13330_v19 }
 0x5e2   : > { %8873 = vmatpush3.bf16.msra.mxu0 %v15780_v7  ;;  %8904 = vmatprep.subr.bf16.mxu1 %v15782_v3  ;;  %v4707_v61 = vpack.c.bf16 %v4697_v62, %v4696_v37  ;;  %v9814_v46 = vpop.eup %9813  ;;  %9827 = vpow2.f32 %v5394_v28  ;;  %v5400_v37 = vmul.f32 1.442695, %v5369_v45  ;;  %v13962_v22 = vmul.f32 %v13879_v30, %v13138_v21  ;;  %v15788_v30 = vld [vmem:[#allocation122_spill] sm:$0xff]  ;;  %v15796_v7 = vld [vmem:[#allocation116_spill] sm:$0xff] }
 0x5e3   : > { %8874 = vmatprep.subr.bf16.mxu0 %v15784_v33  ;;  %v13932_v12 = vpop.permute.xlu1 %6027  ;;  %v9816_v32 = vpop.eup %9815  ;;  %9829 = vpow2.f32 %v5390_v59  ;;  %v5065_v45 = vpack.c.bf16 %v5055_v14, %v5054_v11  ;;  %v4700_v62 = vmul.f32 %v9812_v23, %v13417_v39  ;;  %v13981_v20 = vmul.f32 %v13861_v57, %v13296_v63  ;;  %v15790_v23 = vld [vmem:[#allocation185_spill] sm:$0xff] }
 0x5e4   : > { %8857 = vmatmul.mubr.bf16.gmra.mrb[96].mxu1 %v5063_v18  ;;  %v5057_v18 = vmul.f32 %v9806_v44, %v13401_v5  ;;  %v9818_v44 = vpop.eup %9817  ;;  %v5748_v59 = vmul.f32 1.442695, %v5722_v8  ;;  %9831 = vpow2.f32 %v5400_v37  ;;  %v5709_v11 = vsub.f32 %v13569_v9, %v13601_v47  ;;  %v15792_v37 = vld [vmem:[#allocation187_spill] sm:$0xff]  ;;  %v15795_v8 = vld [vmem:[#allocation117_spill] sm:$0xff] }
 0x5e5   : > { %8860 = vmatprep.mubr.bf16.mxu1 %v5064_v17  ;;  %8905 = vmatpush3.bf16.msra.mxu1 %v15782_v3  ;;  %v4708_v3 = vpack.c.bf16 %v4699_v31, %v4698_v25  ;;  %v13968_v17 = vmul.f32 %v13855_v42, %v13296_v63  ;;  %v13972_v31 = vmul.f32 %v13888_v35, %v13138_v21  ;;  %v13974_v28 = vpop.permute.xlu0 %6345  ;;  %v9820_v42 = vpop.eup %9819  ;;  %v5367_v25 = vmin.f32 %v5351_v36, 0.0 }
 0x5e6   : > { %8875 = vmatpush3.bf16.msra.mxu0 %v15784_v33  ;;  %8906 = vmatprep.subr.bf16.mxu1 %v15785_v50  ;;  %v5056_v33 = vmul.f32 %v9810_v43, %v13395_v52  ;;  %v5708_v35 = vsub.f32 %v13576_v27, %v13601_v47  ;;  %v15789_v43 = vld [vmem:[#allocation146_spill] sm:$0xff]  ;;  %v9822_v16 = vpop.eup %9821  ;;  %v4701_v57 = vmul.f32 %v9816_v32, %v15790_v23  ;;  %v15793_v32 = vld [vmem:[#allocation127_spill] sm:$0xff]  ;;  %9833 = vpow2.f32 %v5748_v59 }
 0x5e7   : > { %8876 = vmatprep.subr.bf16.mxu0 %v15787_v41  ;;  %v13956_v60 = vpop.permute.xlu1 %6152  ;;  %v5352_v14 = vsub.f32 %v15792_v37, %v13589_v54  ;;  %v6057_v54 = vsub.f32 %v15796_v7, %v13688_v0  ;;  %v14026_v7 = vmul.f32 %v9814_v46, %v13330_v19 }
 0x5e8   : > { %8829 = vmatmul.mubr.bf16.gmra.mrb[96].mxu0 %v4707_v61  ;;  %v5066_v61 = vpack.c.bf16 %v5057_v18, %v5056_v33  ;;  %v4709_v33 = vpack.c.bf16 %v4701_v57, %v4700_v62  ;;  %v15798_v57 = vld [vmem:[#allocation129_spill] sm:$0xff] }
 0x5e9   : > { %8832 = vmatprep.mubr.bf16.mxu0 %v4708_v3  ;;  %8907 = vmatpush3.bf16.msra.mxu1 %v15785_v50  ;;  %v9824_v36 = vpop.eup %9823  ;;  %v13997_v3 = vmul.f32 %v9818_v44, %v13302_v34  ;;  %v15794_v44 = vld [vmem:[#allocation114_spill] sm:$0xff]  ;;  %v14013_v37 = vpop.permute.xlu0 %6357 }
 0x5ea   : > { %8877 = vmatpush3.bf16.msra.mxu0 %v15787_v41  ;;  %8908 = vmatprep.subr.bf16.mxu1 %v15788_v30  ;;  %v15791_v41 = vld [vmem:[#allocation112_spill] sm:$0xff]  ;;  %v9826_v9 = vpop.eup %9825  ;;  %v5059_v62 = vmul.f32 %v9824_v36, %v15790_v23 }
 0x5eb   : > { %8878 = vmatprep.subr.bf16.mxu0 %v15789_v43  ;;  %v13986_v50 = vpop.permute.xlu1 %6381  ;;  %v5711_v27 = vsub.f32 %v15791_v41, %v13601_v47  ;;  %v6054_v41 = vsub.f32 %v15794_v44, %v13688_v0  ;;  %v15799_v44 = vpack.c.bf16 %v13695_v15, %v15798_v57 }
 0x5ec   : > { %8861 = vmatmul.mubr.bf16.gmra.mrb[100].mxu1 %v5065_v45  ;;  %v5058_v45 = vmul.f32 %v9820_v42, %v13417_v39  ;;  %v14017_v42 = vmul.f32 %v9822_v16, %v13302_v34  ;;  %v9828_v36 = vpop.eup %9827  ;;  %v15800_v16 = vld [vmem:[#allocation135_spill] sm:$0xff] }
 0x5ed   : > { %8864 = vmatprep.mubr.bf16.mxu1 %v5066_v61  ;;  %8909 = vmatpush3.bf16.msra.mxu1 %v15788_v30  ;;  %v5396_v61 = vmul.f32 1.442695, %v5367_v25  ;;  %v5724_v30 = vmin.f32 %v5708_v35, 0.0  ;;  %v5727_v59 = vmin.f32 %v5711_v27, 0.0  ;;  %v15797_v25 = vld [vmem:[#allocation123_spill] sm:$0xff]  ;;  %v6061_v27 = vsub.f32 %v15800_v16, %v13688_v0 }
 0x5ee   : > { %8879 = vmatpush3.bf16.msra.mxu0 %v15789_v43  ;;  %8910 = vmatprep.subr.bf16.mxu1 %v15793_v32  ;;  %v5725_v43 = vmin.f32 %v5709_v11, 0.0  ;;  %v6058_v35 = vsub.f32 %v15797_v25, %v13688_v0  ;;  %v14029_v11 = vmul.f32 %v9826_v9, %v13330_v19  ;;  %v15801_v25 = vld [vmem:[#allocation138_spill] sm:$0xff]  ;;  %v5067_v10 = vpack.c.bf16 %v5059_v62, %v5058_v45  ;;  %v15802_v9 = vld [vmem:[#allocation111_spill] sm:$0xff] }
 0x5ef   : > { %8880 = vmatprep.subr.bf16.mxu0 %v15795_v8  ;;  %v14009_v18 = vpop.permute.xlu1 %6385  ;;  %9835 = vpow2.f32 %v5396_v61  ;;  %v5752_v46 = vmul.f32 1.442695, %v5724_v30  ;;  %v6070_v57 = vmin.f32 %v6054_v41, 0.0  ;;  %v15803_v16 = vld [vmem:[#allocation147_spill] sm:$0xff]  ;;  %v5758_v45 = vmul.f32 1.442695, %v5727_v59  ;;  %v14054_v59 = vpop.permute.xlu0 %6361 }
 0x5f0   : > { %8833 = vmatmul.mubr.bf16.gmra.mrb[100].mxu0 %v4709_v33  ;;  %v5368_v33 = vmin.f32 %v5352_v14, 0.0  ;;  %v6073_v14 = vmin.f32 %v6057_v54, 0.0  ;;  %v5754_v63 = vmul.f32 1.442695, %v5725_v43  ;;  %v5710_v2 = vsub.f32 %v15803_v16, %v13601_v47  ;;  %v15804_v30 = vld [vmem:[#allocation128_spill] sm:$0xff]  ;;  %v15805_v41 = vld [vmem:[#allocation133_spill] sm:$0xff] }
 0x5f1   : > { %8884 = vmatprep.mubr.bf16.mxu0 %v15799_v44  ;;  %8911 = vmatpush3.bf16.msra.mxu1 %v15793_v32  ;;  %v9830_v32 = vpop.eup %9829  ;;  %v6055_v44 = vsub.f32 %v15802_v9, %v13688_v0  ;;  %v6074_v62 = vmin.f32 %v6058_v35, 0.0  ;;  %v6062_v61 = vsub.f32 %v13810_v40, %v13688_v0  ;;  %v15806_v9 = vpack.c.bf16 %v15804_v30, %v15805_v41  ;;  %v15807_v30 = vld [vmem:[#allocation131_spill] sm:$0xff] }
 0x5f2   : > { %8881 = vmatpush3.bf16.msra.mxu0 %v15795_v8  ;;  %8912 = vmatprep.subr.bf16.mxu1 %v15801_v25  ;;  %v14050_v54 = vmul.f32 %v9828_v36, %v13395_v52  ;;  %v9832_v47 = vpop.eup %9831  ;;  %v6077_v43 = vmin.f32 %v6061_v27, 0.0  ;;  %v6065_v16 = vsub.f32 %v13845_v26, %v13688_v0  ;;  %v14057_v40 = vmul.f32 %v9830_v32, %v13324_v49  ;;  %v15808_v41 = vld [vmem:[#allocation115_spill] sm:$0xff]  ;;  %v15809_v36 = vld [vmem:[#allocation150_spill] sm:$0xff] }
 0x5f3   : > { %v5441_v19 = vpop.permute.xlu1 %5440  ;;  %9837 = vpow2.f32 %v5752_v46  ;;  %v6086_v35 = vmul.f32 1.442695, %v6070_v57  ;;  %v6412_v27 = vsub.f32 %v13974_v28, %v15807_v30  ;;  %v5726_v26 = vmin.f32 %v5710_v2, 0.0  ;;  %v15810_v46 = vld [vmem:[#allocation137_spill] sm:$0xff]  ;;  %v15812_v28 = vld [vmem:[#allocation24_spill] sm:$0xff] }
 0x5f4   : > { %8865 = vmatmul.mubr.bf16.gmra.mrb[104].mxu1 %v5067_v10  ;;  %8882 = vmatprep.subr.bf16.mxu0 %v5441_v19  ;;  %v5398_v10 = vmul.f32 1.442695, %v5368_v33  ;;  %v6092_v33 = vmul.f32 1.442695, %v6073_v14  ;;  %9839 = vpow2.f32 %v5754_v63  ;;  %v6094_v32 = vmul.f32 1.442695, %v6074_v62 }
 0x5f5   : > { %8913 = vmatpush3.bf16.msra.mxu1 %v15801_v25  ;;  %8916 = vmatprep.mubr.bf16.mxu1 %v15806_v9  ;;  %v6071_v25 = vmin.f32 %v6055_v44, 0.0  ;;  %v6413_v9 = vsub.f32 %v15808_v41, %v15807_v30  ;;  %9841 = vpow2.f32 %v5758_v45  ;;  %v6078_v15 = vmin.f32 %v6062_v61, 0.0  ;;  %v15815_v61 = vld [vmem:[#allocation113_spill] sm:$0xff] }
 0x5f6   : > { %8883 = vmatpush3.bf16.msra.mxu0 %v5441_v19  ;;  %v9834_v19 = vpop.eup %9833  ;;  %v15811_v57 = vpack.c.bf16 %v13749_v24, %v15810_v46  ;;  %v14068_v44 = vmul.f32 %v9832_v47, %v15790_v23  ;;  %9843 = vpow2.f32 %v5398_v10  ;;  %v6100_v14 = vmul.f32 1.442695, %v6077_v43  ;;  %v15816_v47 = vld [vmem:[#allocation40_spill] sm:$0xff]  ;;  %v15818_v46 = vld [vmem:[#allocation142_spill] sm:$0xff] }
 0x5f7   : > { %8932 = vmatprep.subr.bf16.mxu0 %v15809_v36  ;;  %v5799_v8 = vpop.permute.xlu1 %5798  ;;  %v6081_v41 = vmin.f32 %v6065_v16, 0.0  ;;  %v6056_v63 = vsub.f32 %v15812_v28, %v13688_v0  ;;  %v15813_v2 = vpack.c.bf16 %v13870_v48, %v13802_v29  ;;  %9845 = vpow2.f32 %v6086_v35  ;;  %v14082_v16 = vpop.permute.xlu0 %6373  ;;  %v15817_v48 = vld [vmem:[#allocation139_spill] sm:$0xff] }
 0x5f8   : > { %8914 = vmatprep.subr.bf16.mxu1 %v5799_v8  ;;  %v6088_v45 = vmul.f32 1.442695, %v6071_v25  ;;  %v6429_v24 = vmin.f32 %v6413_v9, 0.0  ;;  %9847 = vpow2.f32 %v6092_v33  ;;  %v6428_v43 = vmin.f32 %v6412_v27, 0.0 }
 0x5f9   : > { %8885 = vmatmul.mubr.bf16.vlgmr.msra.gmra.mrb[104].mxu0 %v15811_v57  ;;  %8915 = vmatpush3.bf16.msra.mxu1 %v5799_v8  ;;  %v15814_v8 = vld [vmem:[#allocation126_spill] sm:$0xff]  ;;  %v5756_v29 = vmul.f32 1.442695, %v5726_v26  ;;  %v5423_v35 = vpack.c.bf16 %v14026_v7, %v14057_v40  ;;  %v9836_v25 = vpop.eup %9835  ;;  %9849 = vpow2.f32 %v6094_v32  ;;  %v6102_v9 = vmul.f32 1.442695, %v6078_v15  ;;  %v15822_v15 = vld [vmem:[#allocation119_spill] sm:$0xff] }
 0x5fa   : > { %8888 = vmatprep.mubr.bf16.mxu0 %v15813_v2  ;;  %8933 = vmatpush3.bf16.msra.mxu0 %v15809_v36  ;;  %v6059_v62 = vsub.f32 %v15814_v8, %v13688_v0  ;;  %v15819_v36 = vpack.c.bf16 %v15817_v48, %v15818_v46  ;;  %v6066_v57 = vsub.f32 %v13904_v58, %v13688_v0  ;;  %9851 = vpow2.f32 %v6100_v14  ;;  %v15821_v2 = vld [vmem:[#allocation118_spill] sm:$0xff] }
 0x5fb   : > { %8934 = vmatprep.subr.bf16.mxu0 %v15815_v61  ;;  %8964 = vmatprep.subr.bf16.mxu1 %v15816_v47  ;;  %v14080_v10 = vpop.permute.xlu1 %6510  ;;  %v15820_v33 = vpack.c.bf16 %v13921_v53, %v13833_v1  ;;  %v14096_v27 = vmul.f32 %v9834_v19, %v13324_v49  ;;  %v6108_v26 = vmul.f32 1.442695, %v6081_v41  ;;  %v6072_v28 = vmin.f32 %v6056_v63, 0.0  ;;  %v15823_v1 = vld [vmem:[#allocation141_spill] sm:$0xff] }
 0x5fc   : > { %8917 = vmatmul.mubr.bf16.vlgmr.msra.gmra.mrb[108].mxu1 %v15819_v36  ;;  %v6414_v8 = vsub.f32 %v15821_v2, %v15807_v30  ;;  %9853 = vpow2.f32 %v6088_v45  ;;  %v6446_v58 = vmul.f32 1.442695, %v6429_v24  ;;  %v6075_v32 = vmin.f32 %v6059_v62, 0.0  ;;  %v15826_v36 = vld [vmem:[#allocation134_spill] sm:$0xff] }
 0x5fd   : > { %8920 = vmatprep.mubr.bf16.mxu1 %v15820_v33  ;;  %8965 = vmatpush3.bf16.msra.mxu1 %v15816_v47  ;;  %v6417_v53 = vsub.f32 %v15823_v1, %v15807_v30  ;;  %v15824_v47 = vld [vmem:[#allocation120_spill] sm:$0xff]  ;;  %v6444_v14 = vmul.f32 1.442695, %v6428_v43  ;;  %v6415_v41 = vsub.f32 %v14013_v37, %v15807_v30  ;;  %9855 = vpow2.f32 %v5756_v29  ;;  %v14120_v29 = vpop.permute.xlu0 %6377 }
 0x5fe   : > { %8935 = vmatpush3.bf16.msra.mxu0 %v15815_v61  ;;  %8966 = vmatprep.subr.bf16.mxu1 %v15822_v15  ;;  %v14110_v63 = vmul.f32 %v9836_v25, %v13401_v5  ;;  %v9838_v61 = vpop.eup %9837  ;;  %9857 = vpow2.f32 %v6102_v9  ;;  %v6082_v45 = vmin.f32 %v6066_v57, 0.0  ;;  %v6416_v24 = vsub.f32 %v14054_v59, %v15807_v30  ;;  %v15828_v33 = vld [vmem:[#allocation136_spill] sm:$0xff] }
 0x5ff   : > { %8936 = vmatprep.subr.bf16.mxu0 %v15824_v47  ;;  %v14105_v19 = vpop.permute.xlu1 %6512  ;;  %v15825_v62 = vpack.c.bf16 %v13944_v6, %v13962_v22  ;;  %v5781_v43 = vpack.c.bf16 %v14029_v11, %v14096_v27  ;;  %v9840_v37 = vpop.eup %9839  ;;  %9859 = vpow2.f32 %v6108_v26  ;;  %v6090_v48 = vmul.f32 1.442695, %v6072_v28  ;;  %v15829_v26 = vld [vmem:[#allocation121_spill] sm:$0xff] }
 0x600   : > { %v6430_v46 = vmin.f32 %v6414_v8, 0.0  ;;  %v6060_v25 = vsub.f32 %v15826_v36, %v13688_v0  ;;  %v15827_v59 = vpack.c.bf16 %v13997_v3, %v13968_v17  ;;  %v9842_v6 = vpop.eup %9841  ;;  %9861 = vpow2.f32 %v6446_v58 }
 0x601   : > { %8889 = vmatmul.mubr.bf16.gmra.mrb[108].mxu0 %v15825_v62  ;;  %8967 = vmatpush3.bf16.msra.mxu1 %v15822_v15  ;;  %v6096_v22 = vmul.f32 1.442695, %v6075_v32  ;;  %v6433_v9 = vmin.f32 %v6417_v53, 0.0  ;;  %v6063_v57 = vsub.f32 %v13911_v13, %v13688_v0  ;;  %v9844_v2 = vpop.eup %9843  ;;  %v6069_v17 = vsub.f32 %v13935_v4, %v13688_v0 }
 0x602   : > { %8892 = vmatprep.mubr.bf16.mxu0 %v15827_v59  ;;  %8937 = vmatpush3.bf16.msra.mxu0 %v15824_v47  ;;  %9863 = vpow2.f32 %v6444_v14  ;;  %v6431_v3 = vmin.f32 %v6415_v41, 0.0  ;;  %v15830_v15 = vpack.c.bf16 %v13951_v51, %v13972_v31  ;;  %v5424_v13 = vpack.c.bf16 %v14110_v63, %v14050_v54  ;;  %v14141_v58 = vpop.eup %9845  ;;  %v15832_v41 = vld [vmem:[#allocation143_spill] sm:$0xff] }
 0x603   : > { %8938 = vmatprep.subr.bf16.mxu0 %v15828_v33  ;;  %8968 = vmatprep.subr.bf16.mxu1 %v15829_v26  ;;  %v14132_v28 = vpop.permute.xlu1 %6039  ;;  %v14143_v32 = vmul.f32 1.442695, %v6082_v45  ;;  %v6432_v1 = vmin.f32 %v6416_v24, 0.0  ;;  %v15831_v4 = vpack.c.bf16 %v14017_v42, %v13981_v20  ;;  %v5772_v51 = vmul.f32 %v9838_v61, %v13395_v52  ;;  %v14152_v47 = vpop.eup %9847  ;;  %v15833_v42 = vld [vmem:[#allocation144_spill] sm:$0xff] }
 0x604   : > { %v8770_v8 = vpop.f32.mrb[72].mxu1  ;;  %8921 = vmatmul.mubr.bf16.gmra.mrb[112].mxu1 %v15830_v15  ;;  %v5773_v31 = vmul.f32 %v9840_v37, %v13401_v5  ;;  %9865 = vpow2.f32 %v6090_v48  ;;  %v6448_v54 = vmul.f32 1.442695, %v6430_v46  ;;  %v6076_v14 = vmin.f32 %v6060_v25, 0.0  ;;  %v14159_v45 = vpop.eup %9849  ;;  %v15834_v37 = vld [vmem:[#allocation140_spill] sm:$0xff] }
 0x605   : > { %4186 = vst.msk [vmem:[#allocation4 + $0x70] sm:$0xff] %vm3451_vm10, %v8770_v8  ;;  %v4157_v53 = vpop.f32.mrb[73].mxu1  ;;  %8924 = vmatprep.mubr.bf16.mxu1 %v15831_v4  ;;  %8969 = vmatpush3.bf16.msra.mxu1 %v15829_v26  ;;  %v6418_v63 = vsub.f32 %v15832_v41, %v15807_v30  ;;  %9867 = vpow2.f32 %v6096_v22  ;;  %v6454_v61 = vmul.f32 1.442695, %v6433_v9  ;;  %v6079_v24 = vmin.f32 %v6063_v57, 0.0  ;;  %v14167_v36 = vpop.eup %9851 }
 0x606   : > { %4184 = vst.msk [vmem:[#allocation4 + $0x60] sm:$0xff] %vm3451_vm10, %v4157_v53  ;;  %8939 = vmatpush3.bf16.msra.mxu0 %v15828_v33  ;;  %v8771_v20 = vpop.f32.mrb[74].mxu1  ;;  %8970 = vmatprep.subr.bf16.mxu1 %v15833_v42  ;;  %v6421_v62 = vsub.f32 %v13986_v50, %v15807_v30  ;;  %v14169_v25 = vmin.f32 %v6069_v17, 0.0  ;;  %v6450_v59 = vmul.f32 1.442695, %v6431_v3  ;;  %v6419_v22 = vsub.f32 %v14082_v16, %v15807_v30  ;;  %v14173_v9 = vpop.permute.xlu0 %6389  ;;  %v15835_v53 = vld [vmem:[#allocation125_spill] sm:$0xff] }
 0x607   : > { %4187 = vst.msk [vmem:[#allocation4 + $0x78] sm:$0xff] %vm3451_vm10, %v8771_v20  ;;  %8940 = vmatprep.subr.bf16.mxu0 %v15834_v37  ;;  %v14165_v48 = vpop.permute.xlu1 %6043  ;;  %v4160_v46 = vpop.f32.mrb[75].mxu1  ;;  %v5416_v50 = vmul.f32 %v9844_v2, %v13417_v39  ;;  %v6452_v33 = vmul.f32 1.442695, %v6432_v1  ;;  %v6420_v26 = vsub.f32 %v14120_v29, %v15807_v30  ;;  %v5782_v17 = vpack.c.bf16 %v5773_v31, %v5772_v51  ;;  %v15836_v31 = vld [vmem:[#allocation124_spill] sm:$0xff] }
 0x608   : > { %4185 = vst.msk [vmem:[#allocation4 + $0x68] sm:$0xff] %vm3451_vm10, %v4160_v46  ;;  %v9854_v57 = vpop.eup %9853  ;;  %v14184_v16 = vmul.f32 %v9842_v6, %v15790_v23  ;;  %9869 = vpow2.f32 %v6448_v54  ;;  %v6098_v8 = vmul.f32 1.442695, %v6076_v14  ;;  %v6434_v15 = vmin.f32 %v6418_v63, 0.0 }
 0x609   : > { %8893 = vmatmul.mubr.bf16.gmra.mrb[112].mxu0 %v5423_v35  ;;  %8971 = vmatpush3.bf16.msra.mxu1 %v15833_v42  ;;  %v9856_v3 = vpop.eup %9855  ;;  %v6064_v2 = vsub.f32 %v13932_v12, %v13688_v0  ;;  %9871 = vpow2.f32 %v6454_v61  ;;  %v6104_v7 = vmul.f32 1.442695, %v6079_v24  ;;  %v6437_v40 = vmin.f32 %v6421_v62, 0.0 }
 0x60a   : > { %8896 = vmatprep.mubr.bf16.mxu0 %v5424_v13  ;;  %8941 = vmatpush3.bf16.msra.mxu0 %v15834_v37  ;;  %v14189_v29 = vpop.eup %9857  ;;  %v6067_v35 = vsub.f32 %v14132_v28, %v13688_v0  ;;  %9873 = vpow2.f32 %v6450_v59  ;;  %v6435_v1 = vmin.f32 %v6419_v22, 0.0  ;;  %v5425_v13 = vpack.c.bf16 %v14068_v44, %v5416_v50  ;;  %v6394_v63 = vpop.permute.xlu0 %6393 }
 0x60b   : > { %8942 = vmatprep.subr.bf16.mxu0 %v13956_v60  ;;  %8972 = vmatprep.subr.bf16.mxu1 %v13891_v55  ;;  %v14195_v6 = vpop.eup %9859  ;;  %v6119_v4 = vmul.f32 %v9854_v57, %v15835_v53  ;;  %9875 = vpow2.f32 %v6452_v33  ;;  %v6436_v28 = vmin.f32 %v6420_v26, 0.0  ;;  %v6118_v54 = vmul.f32 %v14141_v58, %v15836_v31 }
 0x60c   : > { %v6398_v12 = vpop.permute.xlu1 %6397  ;;  %8925 = vmatmul.mubr.bf16.gmra.mrb[116].mxu1 %v5781_v43  ;;  %v9862_v51 = vpop.eup %9861  ;;  %v5774_v14 = vmul.f32 %v9856_v3, %v13417_v39  ;;  %9877 = vpow2.f32 %v6098_v8  ;;  %v6456_v11 = vmul.f32 1.442695, %v6434_v15  ;;  %v6080_v27 = vmin.f32 %v6064_v2, 0.0 }
 0x60d   : > { %8928 = vmatprep.mubr.bf16.mxu1 %v5782_v17  ;;  %8973 = vmatpush3.bf16.msra.mxu1 %v13891_v55  ;;  %v9864_v41 = vpop.eup %9863  ;;  %v6422_v44 = vsub.f32 %v14009_v18, %v15807_v30  ;;  %9879 = vpow2.f32 %v6104_v7  ;;  %v6462_v43 = vmul.f32 1.442695, %v6437_v40  ;;  %v6083_v55 = vmin.f32 %v6067_v35, 0.0  ;;  %v15837_v17 = vld [vmem:[#allocation130_spill] sm:$0xff]  ;;  %v15839_v35 = vld [vmem:[#allocation149_spill] sm:$0xff] }
 0x60e   : > { %8943 = vmatpush3.bf16.msra.mxu0 %v13956_v60  ;;  %8974 = vmatprep.subr.bf16.mxu1 %v14080_v10  ;;  %v6425_v20 = vsub.f32 %v6398_v12, %v15807_v30  ;;  %v9866_v58 = vpop.eup %9865  ;;  %v6458_v42 = vmul.f32 1.442695, %v6435_v1  ;;  %v6423_v61 = vsub.f32 %v14173_v9, %v15807_v30  ;;  %v6134_v62 = vpack.c.bf16 %v6119_v4, %v6118_v54 }
 0x60f   : > { %8944 = vmatprep.subr.bf16.mxu0 %v13874_v38  ;;  %v6477_v18 = vmul.f32 %v9862_v51, %v15835_v53  ;;  %v9868_v60 = vpop.eup %9867  ;;  %v6460_v37 = vmul.f32 1.442695, %v6436_v28  ;;  %v6424_v46 = vsub.f32 %v6394_v63, %v15807_v30  ;;  %v5783_v59 = vpack.c.bf16 %v14184_v16, %v5774_v14 }
 0x610   : > { %v14214_v24 = vpop.permute.xlu1 %6401  ;;  %v6476_v22 = vmul.f32 %v9864_v41, %v15836_v31  ;;  %9881 = vpow2.f32 %v6456_v11  ;;  %v6106_v50 = vmul.f32 1.442695, %v6080_v27  ;;  %v6438_v57 = vmin.f32 %v6422_v44, 0.0 }
 0x611   : > { %8897 = vmatmul.mubr.bf16.gmra.mrb[116].mxu0 %v5425_v13  ;;  %8975 = vmatpush3.bf16.msra.mxu1 %v14080_v10  ;;  %v6068_v9 = vsub.f32 %v14165_v48, %v13688_v0  ;;  %9883 = vpow2.f32 %v6462_v43  ;;  %v6112_v33 = vmul.f32 1.442695, %v6083_v55  ;;  %v6441_v26 = vmin.f32 %v6425_v20, 0.0  ;;  %v15838_v48 = vld [vmem:[#allocation132_spill] sm:$0xff] }
 0x612   : > { %8945 = vmatpush3.bf16.msra.mxu0 %v13874_v38  ;;  %8948 = vmatprep.mubr.bf16.mxu0 %v6134_v62  ;;  %v6120_v10 = vmul.f32 %v9866_v58, %v15837_v17  ;;  %v9870_v3 = vpop.eup %9869  ;;  %9885 = vpow2.f32 %v6458_v42  ;;  %v6439_v16 = vmin.f32 %v6423_v61, 0.0  ;;  %v6492_v15 = vpack.c.bf16 %v6477_v18, %v6476_v22  ;;  %v6406_v38 = vpop.permute.xlu0 %6405  ;;  %v15842_v22 = vld [vmem:[#allocation177_spill] sm:$0xff] }
 0x613   : > { %8976 = vmatprep.subr.bf16.mxu1 %v14105_v19  ;;  %v6123_v2 = vmul.f32 %v9868_v60, %v15697_v56  ;;  %v9872_v7 = vpop.eup %9871  ;;  %9887 = vpow2.f32 %v6460_v37  ;;  %v6440_v0 = vmin.f32 %v6424_v46, 0.0  ;;  %v6121_v40 = vmul.f32 %v14152_v47, %v15838_v48  ;;  %v10057_v47 = vld [vmem:[%s15109_s15] sm:$0xff] }
 0x614   : > { %v6157_v8 = vpop.permute.xlu1 %6156  ;;  %8929 = vmatmul.mubr.bf16.gmra.mrb[120].mxu1 %v5783_v59  ;;  %v6122_v1 = vmul.f32 %v14159_v45, %v15839_v35  ;;  %v9874_v12 = vpop.eup %9873  ;;  %9889 = vpow2.f32 %v6106_v50  ;;  %v6464_v13 = vmul.f32 1.442695, %v6438_v57  ;;  %v6084_v53 = vmin.f32 %v6068_v9, 0.0  ;;  %v15841_v37 = vld [vmem:[#allocation156_spill] sm:$0xff] }
 0x615   : > { %8946 = vmatprep.subr.bf16.mxu0 %v6157_v8  ;;  %8977 = vmatpush3.bf16.msra.mxu1 %v14105_v19  ;;  %v6426_v4 = vsub.f32 %v14214_v24, %v15807_v30  ;;  %v9876_v51 = vpop.eup %9875  ;;  %9891 = vpow2.f32 %v6112_v33  ;;  %v6470_v28 = vmul.f32 1.442695, %v6441_v26  ;;  %v6135_v31 = vpack.c.bf16 %v6121_v40, %v6120_v10 }
 0x616   : > { %8980 = vmatprep.mubr.bf16.mxu1 %v6492_v15  ;;  %8947 = vmatpush3.bf16.msra.mxu0 %v6157_v8  ;;  %v6478_v19 = vmul.f32 %v9870_v3, %v15837_v17  ;;  %v9878_v45 = vpop.eup %9877  ;;  %v6466_v54 = vmul.f32 1.442695, %v6439_v16  ;;  %v6427_v14 = vsub.f32 %v6406_v38, %v15807_v30  ;;  %v6136_v63 = vpack.c.bf16 %v6123_v2, %v6122_v1  ;;  %v15846_v1 = vld [vmem:[#allocation180_spill] sm:$0xff] }
 0x617   : > { %8996 = vmatprep.subr.mxu0 %v10057_v47  ;;  %v6481_v11 = vmul.f32 %v9872_v7, %v15697_v56  ;;  %v9880_v27 = vpop.eup %9879  ;;  %9893 = vpow2.f32 %v14143_v32  ;;  %v6468_v44 = vmul.f32 1.442695, %v6440_v0  ;;  %v6479_v43 = vmul.f32 %v9874_v12, %v15838_v48  ;;  %v15843_v7 = vld [vmem:[#allocation92_spill] sm:$0xff] }
 0x618   : > { %v6515_v41 = vpop.permute.xlu1 %6514  ;;  %9895 = vpow2.f32 %v6464_v13  ;;  %v6114_v55 = vmul.f32 1.442695, %v6084_v53  ;;  %v6442_v20 = vmin.f32 %v6426_v4, 0.0  ;;  %v6480_v58 = vmul.f32 %v9876_v51, %v15839_v35 }
 0x619   : > { %8949 = vmatmul.mubr.bf16.vlgmr.msra.gmra.mrb[120].mxu0 %v6135_v31  ;;  %8978 = vmatprep.subr.bf16.mxu1 %v6515_v41  ;;  %v6116_v30 = vmul.f32 1.442695, %v14169_v25  ;;  %9897 = vpow2.f32 %v6470_v28  ;;  %v6493_v42 = vpack.c.bf16 %v6479_v43, %v6478_v19  ;;  %v6124_v56 = vmul.f32 %v9878_v45, %v13138_v21 }
 0x61a   : > { %8952 = vmatprep.mubr.bf16.mxu0 %v6136_v63  ;;  %8979 = vmatpush3.bf16.msra.mxu1 %v6515_v41  ;;  %v15840_v32 = vmov 0.0   ;;  %v9882_v61 = vpop.eup %9881  ;;  %9899 = vpow2.f32 %v6466_v54  ;;  %v6443_v24 = vmin.f32 %v6427_v14, 0.0  ;;  %v6494_v62 = vpack.c.bf16 %v6481_v11, %v6480_v58  ;;  %v15847_v14 = vld [vmem:[#allocation72_spill] sm:$0xff] }
 0x61b   : > { %8997 = vmatpush3.msra.mxu0 %v10057_v47  ;;  %9022 = vmatprep.subr.mxu1 %v15840_v32  ;;  %v6127_v18 = vmul.f32 %v9880_v27, %v13302_v34  ;;  %v9884_v60 = vpop.eup %9883  ;;  %9901 = vpow2.f32 %v6468_v44  ;;  %v6125_v46 = vmul.f32 %v14167_v36, %v15841_v37  ;;  %v6472_v59 = vmul.f32 1.442695, %v6442_v20 }
 0x61c   : > { %v9886_v25 = vpop.eup %9885  ;;  %9903 = vpow2.f32 %v6114_v55  ;;  %v6126_v50 = vmul.f32 %v14189_v29, %v15842_v22  ;;  %v6482_v33 = vmul.f32 %v9882_v61, %v13138_v21  ;;  %v6474_v17 = vmul.f32 1.442695, %v6443_v24  ;;  %v15844_v21 = vld [vmem:[#allocation78_spill] sm:$0xff] }
 0x61d   : > { %8981 = vmatmul.mubr.bf16.vlgmr.msra.gmra.mrb[124].mxu1 %v6493_v42  ;;  %v9888_v57 = vpop.eup %9887  ;;  %v6137_v9 = vpack.c.bf16 %v6125_v46, %v6124_v56  ;;  %9905 = vpow2.f32 %v6116_v30  ;;  %v6485_v3 = vmul.f32 %v9884_v60, %v13302_v34  ;;  %v6483_v36 = vmul.f32 %v9886_v25, %v15841_v37  ;;  %v15853_v24 = vld [vmem:[#allocation82_spill] sm:$0xff]  ;;  %v15855_v46 = vld [vmem:[#allocation81_spill] sm:$0xff] }
 0x61e   : > { %8984 = vmatprep.mubr.bf16.mxu1 %v6494_v62  ;;  %9023 = vmatpush3.msra.mxu1 %v10057_v47  ;;  %v9890_v26 = vpop.eup %9889  ;;  %v6138_v10 = vpack.c.bf16 %v6127_v18, %v6126_v50  ;;  %9907 = vpow2.f32 %v6472_v59  ;;  %v6484_v8 = vmul.f32 %v9888_v57, %v15842_v22  ;;  %v15845_v0 = vsub.f32 %v15843_v7, %v15844_v21 }
 0x61f   : > { %v9892_v16 = vpop.eup %9891  ;;  %v6495_v15 = vpack.c.bf16 %v6483_v36, %v6482_v33  ;;  %v6128_v2 = vmul.f32 %v9890_v26, %v13324_v49  ;;  %9909 = vpow2.f32 %v6474_v17  ;;  %v6129_v12 = vmul.f32 %v14195_v6, %v15846_v1  ;;  %v15861_v26 = vld [vmem:[#allocation86_spill] sm:$0xff]  ;;  %v15863_v36 = vld [vmem:[#allocation85_spill] sm:$0xff] }
 0x620   : > { %v6860_v38 = vmul.f32 1.442695, %v15845_v0  ;;  %v6496_v40 = vpack.c.bf16 %v6485_v3, %v6484_v8  ;;  %v6131_v34 = vmul.f32 %v9892_v16, %v13401_v5  ;;  %v15848_v41 = vsub.f32 %v15843_v7, %v15847_v14 }
 0x621   : > { %8953 = vmatmul.mubr.bf16.gmra.mrb[124].mxu0 %v6137_v9  ;;  %v9894_v29 = vpop.eup %9893  ;;  %v6139_v51 = vpack.c.bf16 %v6129_v12, %v6128_v2  ;;  %v15854_v62 = vsub.f32 %v15843_v7, %v15853_v24  ;;  %v15856_v25 = vsub.f32 %v15843_v7, %v15855_v46  ;;  %v15862_v17 = vsub.f32 %v15843_v7, %v15861_v26  ;;  %v15866_v2 = vld [vmem:[#allocation88_spill] sm:$0xff] }
 0x622   : > { %8956 = vmatprep.mubr.bf16.mxu0 %v6138_v10  ;;  %v9896_v48 = vpop.eup %9895  ;;  %v6130_v53 = vmul.f32 %v9894_v29, %v13395_v52  ;;  %9911 = vpow2.f32 %v6860_v38  ;;  %v6862_v63 = vmul.f32 1.442695, %v15848_v41  ;;  %v15865_v29 = vld [vmem:[#allocation98_spill] sm:$0xff]  ;;  %v15867_v21 = vsub.f32 %v15843_v7, %v15866_v2 }
 0x623   : > { %v9898_v35 = vpop.eup %9897  ;;  %v6486_v28 = vmul.f32 %v9896_v48, %v13324_v49  ;;  %v15849_v49 = vld [vmem:[#allocation80_spill] sm:$0xff]  ;;  %v6868_v18 = vmul.f32 1.442695, %v15854_v62  ;;  %v6870_v59 = vmul.f32 1.442695, %v15856_v25 }
 0x624   : > { %v9900_v13 = vpop.eup %9899  ;;  %v6140_v19 = vpack.c.bf16 %v6131_v34, %v6130_v53  ;;  %v6489_v47 = vmul.f32 %v9898_v35, %v13401_v5  ;;  %v15850_v44 = vsub.f32 %v15843_v7, %v15849_v49  ;;  %9913 = vpow2.f32 %v6862_v63 }
 0x625   : > { %8985 = vmatmul.mubr.bf16.gmra.mrb[128].mxu1 %v6495_v15  ;;  %v9902_v4 = vpop.eup %9901  ;;  %v6487_v45 = vmul.f32 %v9900_v13, %v15846_v1  ;;  %v6876_v10 = vmul.f32 1.442695, %v15862_v17  ;;  %v7085_v15 = vrot.slane %v15865_v29, 7  ;;  %v6880_v0 = vmul.f32 1.442695, %v15867_v21  ;;  %v15870_v1 = vld [vmem:[#allocation90_spill] sm:$0xff] }
 0x626   : > { %8988 = vmatprep.mubr.bf16.mxu1 %v6496_v40  ;;  %v9904_v31 = vpop.eup %9903  ;;  %v6488_v6 = vmul.f32 %v9902_v4, %v13395_v52  ;;  %v6864_v43 = vmul.f32 1.442695, %v15850_v44  ;;  %v15851_v52 = vld [vmem:[#allocation79_spill] sm:$0xff]  ;;  %v15871_v12 = vsub.f32 %v15843_v7, %v15870_v1 }
 0x627   : > { %v9906_v54 = vpop.eup %9905  ;;  %v6497_v11 = vpack.c.bf16 %v6487_v45, %v6486_v28  ;;  %v6132_v27 = vmul.f32 %v9904_v31, %v13417_v39  ;;  %v15852_v30 = vsub.f32 %v15843_v7, %v15851_v52  ;;  %v15868_v40 = vld [vmem:[#allocation87_spill] sm:$0xff]  ;;  %v15873_v31 = vld [vmem:[#allocation89_spill] sm:$0xff] }
 0x628   : > { %v9908_v55 = vpop.eup %9907  ;;  %v6498_v5 = vpack.c.bf16 %v6489_v47, %v6488_v6  ;;  %v6133_v20 = vmul.f32 %v9906_v54, %v15790_v23  ;;  %9915 = vpow2.f32 %v6864_v43  ;;  %v15869_v34 = vsub.f32 %v15843_v7, %v15868_v40  ;;  %v15875_v45 = vld [vmem:[#allocation93_spill] sm:$0xff] }
 0x629   : > { %8957 = vmatmul.mubr.bf16.gmra.mrb[128].mxu0 %v6139_v51  ;;  %v9910_v58 = vpop.eup %9909  ;;  %v6866_v42 = vmul.f32 1.442695, %v15852_v30  ;;  %v6490_v61 = vmul.f32 %v9908_v55, %v13417_v39  ;;  %v15857_v39 = vld [vmem:[#allocation84_spill] sm:$0xff]  ;;  %v6884_v13 = vmul.f32 1.442695, %v15871_v12  ;;  %v15872_v51 = vld [vmem:[#allocation91_spill] sm:$0xff]  ;;  %v15876_v54 = vsub.f32 %v15843_v7, %v15875_v45 }
 0x62a   : > { %8960 = vmatprep.mubr.bf16.mxu0 %v6140_v19  ;;  %v6141_v56 = vpack.c.bf16 %v6133_v20, %v6132_v27  ;;  %v6491_v37 = vmul.f32 %v9910_v58, %v15790_v23  ;;  %v15858_v50 = vsub.f32 %v15843_v7, %v15857_v39  ;;  %v15859_v23 = vld [vmem:[#allocation83_spill] sm:$0xff]  ;;  %v6882_v35 = vmul.f32 1.442695, %v15869_v34 }
 0x62b   : > { %9917 = vpow2.f32 %v6866_v42  ;;  %v15860_v9 = vsub.f32 %v15843_v7, %v15859_v23  ;;  %v6859_v28 = vsub.f32 %v15843_v7, %v15872_v51  ;;  %v15874_v19 = vsub.f32 %v15843_v7, %v15873_v31 }
 0x62c   : > { %v9912_v60 = vpop.eup %9911  ;;  %v6499_v22 = vpack.c.bf16 %v6491_v37, %v6490_v61  ;;  %9919 = vpow2.f32 %v6868_v18  ;;  %v6872_v57 = vmul.f32 1.442695, %v15858_v50  ;;  %v6888_v6 = vmul.f32 1.442695, %v15876_v54 }
 0x62d   : > { %8989 = vmatmul.mubr.bf16.gmra.mrb[132].mxu1 %v6497_v11  ;;  %9921 = vpow2.f32 %v6870_v59  ;;  %v6874_v33 = vmul.f32 1.442695, %v15860_v9  ;;  %v6886_v47 = vmul.f32 1.442695, %v15874_v19  ;;  %v6890_v63 = vmul.f32 1.442695, %v6859_v28 }
 0x62e   : > { %8992 = vmatprep.mubr.bf16.mxu1 %v6498_v5  ;;  %9923 = vpow2.f32 %v6872_v57  ;;  %v9914_v3 = vpop.eup %9913 }
 0x62f   : > { %9925 = vpow2.f32 %v6874_v33 }
 0x630   : > { %9927 = vpow2.f32 %v6876_v10 }
 0x631   : > { %8961 = vmatmul.mubr.bf16.gmra.mrb[132].mxu0 %v6141_v56 }
 0x632   : > { %8998 = vmatprep.mubr.msk.f32.mxu0 %vm2880_vm9, %v9912_v60  ;;  %v9916_v16 = vpop.eup %9915 }
 0x635   : > { %8993 = vmatmul.mubr.bf16.gmra.mrb[136].mxu1 %v6499_v22  ;;  %v9918_v38 = vpop.eup %9917 }
 0x636   : > { %9024 = vmatprep.mubr.msk.f32.mxu1 %vm10104_vm11, %v15840_v32  ;;  %v15864_v32 = vsub.f32 %v15843_v7, %v15863_v36  ;;  %v9920_v48 = vpop.eup %9919 }
 0x637   : > { %v9922_v53 = vpop.eup %9921 }
 0x638   : > { %v6878_v8 = vmul.f32 1.442695, %v15864_v32  ;;  %v9924_v4 = vpop.eup %9923 }
 0x639   : > { %8999 = vmatmul.mubr.msk.f32.vlgmr.msra.gmra.mrb[136].mxu0 %vm2880_vm9, %v9914_v3  ;;  %v9926_v14 = vpop.eup %9925 }
 0x63a   : > { %9001 = vmatprep.mubr.msk.f32.mxu0 %vm2880_vm9, %v9916_v16  ;;  %9929 = vpow2.f32 %v6878_v8  ;;  %v9928_v41 = vpop.eup %9927 }
 0x63b   : > { %9931 = vpow2.f32 %v6880_v0 }
 0x63c   : > { %9933 = vpow2.f32 %v6882_v35 }
 0x63d   : > { %9002 = vmatmul.mubr.msk.f32.gmra.mrb[138].mxu0 %vm2880_vm9, %v9918_v38  ;;  %9025 = vmatmul.mubr.msk.f32.vlgmr.msra.gmra.mrb[58].mxu1 %vm2880_vm9, %v7085_v15  ;;  %9935 = vpow2.f32 %v6884_v13 }
 0x63e   : > { %9004 = vmatprep.mubr.msk.f32.mxu0 %vm2880_vm9, %v9920_v48  ;;  %9937 = vpow2.f32 %v6886_v47 }
 0x63f   : > { %9939 = vpow2.f32 %v6888_v6 }
 0x640   : > { %9941 = vpow2.f32 %v6890_v63 }
 0x641   : > { %9005 = vmatmul.mubr.msk.f32.gmra.mrb[140].mxu0 %vm2880_vm9, %v9922_v53 }
 0x642   : > { %9007 = vmatprep.mubr.msk.f32.mxu0 %vm2880_vm9, %v9924_v4 }
 0x644   : > { %v9930_v11 = vpop.eup %9929 }
 0x645   : > { %9008 = vmatmul.mubr.msk.f32.gmra.mrb[142].mxu0 %vm2880_vm9, %v9926_v14  ;;  %v9932_v27 = vpop.eup %9931 }
 0x646   : > { %9010 = vmatprep.mubr.msk.f32.mxu0 %vm2880_vm9, %v9928_v41  ;;  %v9934_v49 = vpop.eup %9933 }
 0x647   : > { %v9936_v7 = vpop.eup %9935 }
 0x648   : > { %v9938_v44 = vpop.eup %9937 }
 0x649   : > { %9011 = vmatmul.mubr.msk.f32.gmra.mrb[144].mxu0 %vm2880_vm9, %v9930_v11  ;;  %v9940_v43 = vpop.eup %9939 }
 0x64a   : > { %9013 = vmatprep.mubr.msk.f32.mxu0 %vm2880_vm9, %v9932_v27  ;;  %v9942_v55 = vpop.eup %9941 }
 0x64d   : > { %9014 = vmatmul.mubr.msk.f32.gmra.mrb[146].mxu0 %vm2880_vm9, %v9934_v49 }
 0x64e   : > { %9016 = vmatprep.mubr.msk.f32.mxu0 %vm2880_vm9, %v9936_v7 }
 0x651   : > { %9017 = vmatmul.mubr.msk.f32.gmra.mrb[148].mxu0 %vm2880_vm9, %v9938_v44 }
 0x652   : > { %9019 = vmatprep.mubr.msk.f32.mxu0 %vm2880_vm9, %v9940_v43 }
 0x655   : > { %9020 = vmatmul.mubr.msk.f32.gmra.mrb[150].mxu0 %vm2880_vm9, %v9942_v55 }
 0x663   : > { %v8790_v5 = vpop.f32.mrb[76].mxu1 }
 0x664   : > { %4493 = vrot.lane.b32.xlu1 %v8790_v5, %s10118_s30  ;;  %v4410_v20 = vpop.f32.mrb[77].mxu1 }
 0x665   : > { %v8791_v58 = vpop.f32.mrb[78].mxu1 }
 0x666   : > { %v4413_v52 = vpop.f32.mrb[79].mxu1 }
 0x66b   : > { %v8794_v30 = vpop.f32.mrb[80].mxu1 }
 0x66c   : > { %v4426_v42 = vpop.f32.mrb[81].mxu1 }
 0x66d   : > { %v8795_v56 = vpop.f32.mrb[82].mxu1 }
 0x66e   : > { %v4429_v61 = vpop.f32.mrb[83].mxu1 }
 0x673   : > { %v14336_v24 = vpop.f32.mrb[84].mxu1 }
 0x674   : > { %v14338_v62 = vpop.f32.mrb[85].mxu1 }
 0x675   : > { %v14340_v18 = vpop.f32.mrb[86].mxu1 }
 0x676   : > { %v14342_v60 = vpop.f32.mrb[87].mxu1 }
 0x67b   : > { %v14344_v37 = vpop.f32.mrb[88].mxu1 }
 0x67c   : > { %v14346_v46 = vpop.f32.mrb[89].mxu1 }
 0x67d   : > { %v14348_v25 = vpop.f32.mrb[90].mxu1 }
 0x67e   : > { %v14350_v59 = vpop.f32.mrb[91].mxu1 }
 0x6ab   : > { %v8822_v22 = vpop.f32.mrb[88].mxu0 }
 0x6ac   : > { %4851 = vrot.lane.b32.xlu0 %v8822_v22, %s10113_s20  ;;  %v4768_v39 = vpop.f32.mrb[89].mxu0 }
 0x6ad   : > { %v8823_v50 = vpop.f32.mrb[90].mxu0 }
 0x6ae   : > { %v4771_v57 = vpop.f32.mrb[91].mxu0  ;;  %4853 = vrot.lane.b32.xlu1 %v8823_v50, %s10113_s20 }
 0x6af   : > { %v14354_v23 = vpop.f32.mrb[92].mxu1 }
 0x6b0   : > { %4847 = vrot.lane.b32.xlu0 %v4768_v39, %s10113_s20  ;;  %v14357_v9 = vpop.f32.mrb[93].mxu1 }
 0x6b1   : > { %v14359_v33 = vpop.f32.mrb[94].mxu1 }
 0x6b2   : > { %4489 = vrot.lane.b32.xlu1 %v4410_v20, %s10118_s30  ;;  %v14362_v26 = vpop.f32.mrb[95].mxu1 }
 0x6b3   : > { %v8826_v17 = vpop.f32.mrb[92].mxu0 }
 0x6b4   : > { %v4784_v10 = vpop.f32.mrb[93].mxu0  ;;  %4495 = vrot.lane.b32.xlu0 %v8791_v58, %s10118_s30 }
 0x6b5   : > { %v8827_v3 = vpop.f32.mrb[94].mxu0 }
 0x6b6   : > { %v4787_v16 = vpop.f32.mrb[95].mxu0  ;;  %4849 = vrot.lane.b32.xlu1 %v4771_v57, %s10113_s20 }
 0x6b7   : > { %v14366_v36 = vpop.f32.mrb[96].mxu1 }
 0x6b8   : > { %4491 = vrot.lane.b32.xlu0 %v4413_v52, %s10118_s30  ;;  %v14369_v32 = vpop.f32.mrb[97].mxu1 }
 0x6b9   : > { %v14371_v8 = vpop.f32.mrb[98].mxu1 }
 0x6ba   : > { %4501 = vrot.lane.b32.xlu1 %v8794_v30, %s10118_s30  ;;  %v14374_v29 = vpop.f32.mrb[99].mxu1 }
 0x6bb   : > { %v8830_v15 = vpop.f32.mrb[96].mxu0 }
 0x6bc   : > { %v4800_v2 = vpop.f32.mrb[97].mxu0  ;;  %4859 = vrot.lane.b32.xlu0 %v8826_v17, %s10113_s20 }
 0x6bd   : > { %v8831_v21 = vpop.f32.mrb[98].mxu0 }
 0x6be   : > { %v4803_v0 = vpop.f32.mrb[99].mxu0  ;;  %4861 = vrot.lane.b32.xlu1 %v8827_v3, %s10113_s20 }
 0x6bf   : > { %v14378_v38 = vpop.f32.mrb[100].mxu1 }
 0x6c0   : > { %4855 = vrot.lane.b32.xlu0 %v4784_v10, %s10113_s20  ;;  %v14381_v48 = vpop.f32.mrb[101].mxu1 }
 0x6c1   : > { %v14383_v40 = vpop.f32.mrb[102].mxu1 }
 0x6c2   : > { %4497 = vrot.lane.b32.xlu1 %v4426_v42, %s10118_s30  ;;  %v14386_v34 = vpop.f32.mrb[103].mxu1 }
 0x6c3   : > { %v8834_v35 = vpop.f32.mrb[100].mxu0 }
 0x6c4   : > { %v4816_v1 = vpop.f32.mrb[101].mxu0  ;;  %4503 = vrot.lane.b32.xlu0 %v8795_v56, %s10118_s30 }
 0x6c5   : > { %v8835_v12 = vpop.f32.mrb[102].mxu0 }
 0x6c6   : > { %v4819_v13 = vpop.f32.mrb[103].mxu0  ;;  %4857 = vrot.lane.b32.xlu1 %v4787_v16, %s10113_s20 }
 0x6c7   : > { %v14390_v53 = vpop.f32.mrb[104].mxu1 }
 0x6c8   : > { %4499 = vrot.lane.b32.xlu0 %v4429_v61, %s10118_s30  ;;  %v14393_v4 = vpop.f32.mrb[105].mxu1 }
 0x6c9   : > { %v14395_v51 = vpop.f32.mrb[106].mxu1 }
 0x6ca   : > { %4867 = vrot.lane.b32.xlu1 %v8830_v15, %s10113_s20  ;;  %v14398_v28 = vpop.f32.mrb[107].mxu1 }
 0x6cc   : > { %v8886_v31 = vpop.f32.mrb[104].mxu0  ;;  %4869 = vrot.lane.b32.xlu0 %v8831_v21, %s10113_s20 }
 0x6cd   : > { %v5484_v19 = vpop.f32.mrb[105].mxu0 }
 0x6ce   : > { %v8887_v47 = vpop.f32.mrb[106].mxu0  ;;  %4863 = vrot.lane.b32.xlu1 %v4800_v2, %s10113_s20 }
 0x6cf   : > { %v5487_v45 = vpop.f32.mrb[107].mxu0  ;;  %v14402_v54 = vpop.f32.mrb[108].mxu1 }
 0x6d0   : > { %4865 = vrot.lane.b32.xlu0 %v4803_v0, %s10113_s20  ;;  %v14405_v6 = vpop.f32.mrb[109].mxu1 }
 0x6d1   : > { %v14407_v14 = vpop.f32.mrb[110].mxu1 }
 0x6d2   : > { %4509 = vrot.lane.b32.xlu1 %v14336_v24, %s10118_s30  ;;  %v14411_v41 = vpop.f32.mrb[111].mxu1 }
 0x6d4   : > { %v14413_v63 = vpop.f32.mrb[108].mxu0  ;;  %4511 = vrot.lane.b32.xlu0 %v14340_v18, %s10118_s30 }
 0x6d5   : > { %v14417_v11 = vpop.f32.mrb[109].mxu0 }
 0x6d6   : > { %v8891_v27 = vpop.f32.mrb[110].mxu0  ;;  %v4494_v49 = vpop.permute.xlu1 %4493  ;;  %4505 = vrot.lane.b32.xlu1 %v14338_v62, %s10118_s30 }
 0x6d7   : > { %v5503_v7 = vpop.f32.mrb[111].mxu0  ;;  %4540 = vst.msk [vmem:[#allocation4 + $0x10] sm:$0xff] %vm4537_vm12, %v4494_v49  ;;  %v14422_v44 = vpop.f32.mrb[112].mxu1 }
 0x6d8   : > { %4507 = vrot.lane.b32.xlu0 %v14342_v60, %s10118_s30  ;;  %v14426_v43 = vpop.f32.mrb[113].mxu1 }
 0x6d9   : > { %v14428_v55 = vpop.f32.mrb[114].mxu1 }
 0x6da   : > { %4875 = vrot.lane.b32.xlu1 %v8834_v35, %s10113_s20  ;;  %v14431_v5 = vpop.f32.mrb[115].mxu1 }
 0x6dc   : > { %v14433_v20 = vpop.f32.mrb[112].mxu0  ;;  %4877 = vrot.lane.b32.xlu0 %v8835_v12, %s10113_s20 }
 0x6dd   : > { %v14436_v58 = vpop.f32.mrb[113].mxu0 }
 0x6de   : > { %v14438_v52 = vpop.f32.mrb[114].mxu0  ;;  %4871 = vrot.lane.b32.xlu1 %v4816_v1, %s10113_s20 }
 0x6df   : > { %v14441_v30 = vpop.f32.mrb[115].mxu0  ;;  %v14443_v42 = vpop.f32.mrb[116].mxu1 }
 0x6e0   : > { %4873 = vrot.lane.b32.xlu0 %v4819_v13, %s10113_s20  ;;  %v14446_v56 = vpop.f32.mrb[117].mxu1 }
 0x6e1   : > { %v14448_v61 = vpop.f32.mrb[118].mxu1 }
 0x6e2   : > { %4517 = vrot.lane.b32.xlu1 %v14344_v37, %s10118_s30  ;;  %v14452_v24 = vpop.f32.mrb[119].mxu1 }
 0x6e4   : > { %v14454_v62 = vpop.f32.mrb[116].mxu0  ;;  %4519 = vrot.lane.b32.xlu0 %v14348_v25, %s10118_s30 }
 0x6e5   : > { %v14458_v18 = vpop.f32.mrb[117].mxu0 }
 0x6e6   : > { %v14460_v60 = vpop.f32.mrb[118].mxu0  ;;  %4513 = vrot.lane.b32.xlu1 %v14346_v46, %s10118_s30 }
 0x6e7   : > { %v14464_v22 = vpop.f32.mrb[119].mxu0  ;;  %v14466_v39 = vpop.f32.mrb[120].mxu1 }
 0x6e8   : > { %4515 = vrot.lane.b32.xlu0 %v14350_v59, %s10118_s30  ;;  %v14470_v37 = vpop.f32.mrb[121].mxu1 }
 0x6e9   : > { %v14472_v50 = vpop.f32.mrb[122].mxu1 }
 0x6ea   : > { %5569 = vrot.lane.b32.xlu1 %v8887_v47, %s10112_s22  ;;  %v14475_v25 = vpop.f32.mrb[123].mxu1 }
 0x6ec   : > { %v14477_v57 = vpop.f32.mrb[120].mxu0  ;;  %5567 = vrot.lane.b32.xlu0 %v8886_v31, %s10112_s22 }
 0x6ed   : > { %v14480_v46 = vpop.f32.mrb[121].mxu0 }
 0x6ee   : > { %v14482_v17 = vpop.f32.mrb[122].mxu0  ;;  %5565 = vrot.lane.b32.xlu1 %v5487_v45, %s10112_s22 }
 0x6ef   : > { %v14485_v10 = vpop.f32.mrb[123].mxu0 }
 0x6f0   : > { %5563 = vrot.lane.b32.xlu0 %v5484_v19, %s10112_s22  ;;  %v14488_v59 = vpop.f32.mrb[124].mxu1 }
 0x6f1   : > { %v14490_v3 = vpop.f32.mrb[125].mxu1 }
 0x6f2   : > { %5211 = vrot.lane.b32.xlu1 %v14359_v33, %s10116_s26  ;;  %v14494_v16 = vpop.f32.mrb[126].mxu1 }
 0x6f3   : > { %v14496_v15 = vpop.f32.mrb[127].mxu1 }
 0x6f4   : > { %v14498_v2 = vpop.f32.mrb[124].mxu0  ;;  %5209 = vrot.lane.b32.xlu0 %v14354_v23, %s10116_s26 }
 0x6f5   : > { %v14502_v21 = vpop.f32.mrb[125].mxu0 }
 0x6f6   : > { %v14504_v0 = vpop.f32.mrb[126].mxu0  ;;  %5207 = vrot.lane.b32.xlu1 %v14362_v26, %s10116_s26 }
 0x6f7   : > { %v14508_v35 = vpop.f32.mrb[127].mxu0 }
 0x6f8   : > { %5205 = vrot.lane.b32.xlu0 %v14357_v9, %s10116_s26  ;;  %v14512_v33 = vpop.f32.mrb[128].mxu1 }
 0x6f9   : > { %15877 = vst [vmem:[#allocation145_spill] sm:$0xff] %v14512_v33  ;;  %v14514_v1 = vpop.f32.mrb[129].mxu1 }
 0x6fa   : > { %15878 = vst [vmem:[#allocation148_spill] sm:$0xff] %v14514_v1  ;;  %5577 = vrot.lane.b32.xlu1 %v8891_v27, %s10112_s22  ;;  %v14517_v12 = vpop.f32.mrb[130].mxu1 }
 0x6fb   : > { %15879 = vst [vmem:[#allocation151_spill] sm:$0xff] %v14517_v12  ;;  %v14519_v23 = vpop.f32.mrb[131].mxu1 }
 0x6fc   : > { %15880 = vst [vmem:[#allocation36_spill] sm:$0xff] %v14519_v23  ;;  %v14521_v13 = vpop.f32.mrb[128].mxu0  ;;  %5575 = vrot.lane.b32.xlu0 %v14413_v63, %s10112_s22  ;;  %v15891_v23 = vld [vmem:[#allocation95_spill] sm:$0xff] }
 0x6fd   : > { %v14525_v26 = vpop.f32.mrb[129].mxu0 }
 0x6fe   : > { %v14527_v31 = vpop.f32.mrb[130].mxu0  ;;  %5573 = vrot.lane.b32.xlu1 %v5503_v7, %s10112_s22 }
 0x6ff   : > { %v14530_v9 = vpop.f32.mrb[131].mxu0 }
 0x700   : > { %5571 = vrot.lane.b32.xlu0 %v14417_v11, %s10112_s22  ;;  %v14534_v19 = vpop.f32.mrb[132].mxu1 }
 0x701   : > { %15881 = vst [vmem:[#allocation152_spill] sm:$0xff] %v14534_v19  ;;  %v14536_v47 = vpop.f32.mrb[133].mxu1 }
 0x702   : > { %15882 = vst [vmem:[#allocation153_spill] sm:$0xff] %v14536_v47  ;;  %5219 = vrot.lane.b32.xlu1 %v14371_v8, %s10116_s26  ;;  %v14540_v45 = vpop.f32.mrb[134].mxu1 }
 0x703   : > { %15883 = vst [vmem:[#allocation154_spill] sm:$0xff] %v14540_v45  ;;  %v14542_v63 = vpop.f32.mrb[135].mxu1 }
 0x704   : > { %15884 = vst [vmem:[#allocation155_spill] sm:$0xff] %v14542_v63  ;;  %v14544_v27 = vpop.f32.mrb[132].mxu0  ;;  %5217 = vrot.lane.b32.xlu0 %v14366_v36, %s10116_s26 }
 0x705   : > { %v14548_v49 = vpop.f32.mrb[133].mxu0 }
 0x706   : > { %v14550_v7 = vpop.f32.mrb[134].mxu0  ;;  %5215 = vrot.lane.b32.xlu1 %v14374_v29, %s10116_s26  ;;  %v15890_v29 = vld [vmem:[#allocation94_spill] sm:$0xff] }
 0x707   : > { %15885 = vst [vmem:[#allocation178_spill] sm:$0xff] %v14550_v7  ;;  %v14554_v11 = vpop.f32.mrb[135].mxu0 }
 0x708   : > { %5213 = vrot.lane.b32.xlu0 %v14369_v32, %s10116_s26  ;;  %v14558_v8 = vpop.f32.mrb[136].mxu1 }
 0x709   : > { %15886 = vst [vmem:[#allocation170_spill] sm:$0xff] %v14558_v8  ;;  %v14560_v47 = vpop.f32.mrb[137].mxu1 }
 0x70a   : > { %15887 = vst [vmem:[#allocation33_spill] sm:$0xff] %v14560_v47  ;;  %5583 = vrot.lane.b32.xlu1 %v14433_v20, %s10112_s22  ;;  %v14564_v36 = vpop.f32.mrb[138].mxu1 }
 0x70b   : > { %15888 = vst [vmem:[#allocation173_spill] sm:$0xff] %v14564_v36  ;;  %v14566_v63 = vpop.f32.mrb[139].mxu1  ;;  %v15892_v36 = vld [vmem:[#allocation96_spill] sm:$0xff] }
 0x70c   : > { %15889 = vst [vmem:[#allocation186_spill] sm:$0xff] %v14566_v63  ;;  %v9000_v7 = vpop.f32.mrb[136].mxu0  ;;  %5585 = vrot.lane.b32.xlu0 %v14438_v52, %s10112_s22  ;;  %v15893_v52 = vld [vmem:[#allocation97_spill] sm:$0xff] }
 0x70d   : > { %v7165_v19 = vmul.f32 %v9000_v7, %v15890_v29  ;;  %v7006_v45 = vpop.f32.mrb[137].mxu0  ;;  %v15895_v7 = vld [vmem:[#allocation100_spill] sm:$0xff] }
 0x70e   : > { %v7164_v32 = vmul.f32 %v7006_v45, %v15891_v23  ;;  %5579 = vrot.lane.b32.xlu1 %v14436_v58, %s10112_s22 }
 0x710   : > { %v9154_v47 = vpack.c.bf16 %v7165_v19, %v7164_v32  ;;  %v9003_v8 = vpop.f32.mrb[138].mxu0  ;;  %5581 = vrot.lane.b32.xlu0 %v14441_v30, %s10112_s22  ;;  %v14576_v20 = vpop.f32.mrb[58].mxu1  ;;  %v15894_v19 = vld [vmem:[#allocation99_spill] sm:$0xff] }
 0x711   : > { %v7167_v63 = vmul.f32 %v9003_v8, %v15892_v36  ;;  %v7016_v1 = vpop.f32.mrb[139].mxu0  ;;  %v9026_v12 = vpop.f32.mrb[59].mxu1 }
 0x712   : > { %v7166_v33 = vmul.f32 %v7016_v1, %v15893_v52  ;;  %9155 = vmatprep.subr.bf16.mxu0 %v9154_v47  ;;  %5225 = vrot.lane.b32.xlu1 %v14378_v38, %s10116_s26  ;;  %v15896_v38 = vld [vmem:[#allocation101_spill] sm:$0xff] }
 0x713   : > { %9157 = vmatpush3.bf16.msra.mxu0 %v9154_v47 }
 0x714   : > { %v9158_v23 = vpack.c.bf16 %v7167_v63, %v7166_v33  ;;  %v9006_v58 = vpop.f32.mrb[140].mxu0  ;;  %5227 = vrot.lane.b32.xlu0 %v14383_v40, %s10116_s26  ;;  %v15897_v63 = vld [vmem:[#allocation102_spill] sm:$0xff] }
 0x715   : > { %v7169_v30 = vmul.f32 %v9006_v58, %v15894_v19  ;;  %v7026_v45 = vpop.f32.mrb[141].mxu0 }
 0x716   : > { %v7168_v29 = vmul.f32 %v7026_v45, %v15895_v7  ;;  %9159 = vmatprep.subr.bf16.mxu0 %v9158_v23  ;;  %5221 = vrot.lane.b32.xlu1 %v14381_v48, %s10116_s26  ;;  %v15898_v48 = vld [vmem:[#allocation103_spill] sm:$0xff] }
 0x717   : > { %9161 = vmatpush3.bf16.msra.mxu0 %v9158_v23 }
 0x718   : > { %v9162_v1 = vpack.c.bf16 %v7169_v30, %v7168_v29  ;;  %v9009_v12 = vpop.f32.mrb[142].mxu0  ;;  %5223 = vrot.lane.b32.xlu0 %v14386_v34, %s10116_s26  ;;  %v15899_v34 = vld [vmem:[#allocation104_spill] sm:$0xff]  ;;  %v15901_v29 = vld [vmem:[#allocation106_spill] sm:$0xff] }
 0x719   : > { %v7171_v33 = vmul.f32 %v9009_v12, %v15896_v38  ;;  %v7036_v47 = vpop.f32.mrb[143].mxu0 }
 0x71a   : > { %v7170_v40 = vmul.f32 %v7036_v47, %v15897_v63  ;;  %9163 = vmatprep.subr.bf16.mxu0 %v9162_v1  ;;  %5591 = vrot.lane.b32.xlu1 %v14454_v62, %s10112_s22  ;;  %v15902_v47 = vld [vmem:[#allocation107_spill] sm:$0xff] }
 0x71b   : > { %9165 = vmatpush3.bf16.msra.mxu0 %v9162_v1 }
 0x71c   : > { %v9166_v8 = vpack.c.bf16 %v7171_v33, %v7170_v40  ;;  %v9012_v36 = vpop.f32.mrb[144].mxu0  ;;  %5593 = vrot.lane.b32.xlu0 %v14460_v60, %s10112_s22  ;;  %v15900_v60 = vld [vmem:[#allocation105_spill] sm:$0xff]  ;;  %v15903_v40 = vld [vmem:[#allocation108_spill] sm:$0xff] }
 0x71d   : > { %v7173_v32 = vmul.f32 %v9012_v36, %v15898_v48  ;;  %v7046_v52 = vpop.f32.mrb[145].mxu0 }
 0x71e   : > { %v7172_v23 = vmul.f32 %v7046_v52, %v15899_v34  ;;  %v4852_v58 = vpop.permute.xlu0 %4851  ;;  %9167 = vmatprep.subr.bf16.mxu0 %v9166_v8  ;;  %5587 = vrot.lane.b32.xlu1 %v14458_v18, %s10112_s22 }
 0x71f   : > { %4898 = vst.msk [vmem:[#allocation4 + $0x10] sm:$0xff] %vm4895_vm13, %v4852_v58  ;;  %9169 = vmatpush3.bf16.msra.mxu0 %v9166_v8 }
 0x720   : > { %v9170_v62 = vpack.c.bf16 %v7173_v32, %v7172_v23  ;;  %v9015_v19 = vpop.f32.mrb[146].mxu0  ;;  %v4854_v30 = vpop.permute.xlu1 %4853  ;;  %5589 = vrot.lane.b32.xlu0 %v14464_v22, %s10112_s22  ;;  %v15904_v32 = vld [vmem:[#allocation109_spill] sm:$0xff]  ;;  %v15905_v23 = vld [vmem:[#allocation110_spill] sm:$0xff] }
 0x721   : > { %v7175_v45 = vmul.f32 %v9015_v19, %v15900_v60  ;;  %v7056_v7 = vpop.f32.mrb[147].mxu0 }
 0x722   : > { %v7174_v1 = vmul.f32 %v7056_v7, %v15901_v29  ;;  %v4848_v12 = vpop.permute.xlu0 %4847  ;;  %9171 = vmatprep.subr.bf16.mxu0 %v9170_v62  ;;  %5233 = vrot.lane.b32.xlu1 %v14390_v53, %s10116_s26  ;;  %v15908_v29 = vld [vmem:[#allocation148_spill] sm:$0xff] }
 0x723   : > { %9173 = vmatpush3.bf16.msra.mxu0 %v9170_v62 }
 0x724   : > { %v9174_v18 = vpack.c.bf16 %v7175_v45, %v7174_v1  ;;  %v9018_v38 = vpop.f32.mrb[148].mxu0  ;;  %v4490_v33 = vpop.permute.xlu1 %4489  ;;  %5235 = vrot.lane.b32.xlu0 %v14395_v51, %s10116_s26  ;;  %v15909_v1 = vld [vmem:[#allocation36_spill] sm:$0xff] }
 0x725   : > { %v7177_v63 = vmul.f32 %v9018_v38, %v15902_v47  ;;  %4538 = vst.msk [vmem:[#allocation4] sm:$0xff] %vm4537_vm12, %v4490_v33  ;;  %v7066_v22 = vpop.f32.mrb[149].mxu0  ;;  %v15911_v38 = vld [vmem:[#allocation152_spill] sm:$0xff]  ;;  %v15912_v47 = vld [vmem:[#allocation155_spill] sm:$0xff] }
 0x726   : > { %4896 = vst.msk [vmem:[#allocation4] sm:$0xff] %vm4895_vm13, %v4848_v12  ;;  %v7176_v8 = vmul.f32 %v7066_v22, %v15903_v40  ;;  %9175 = vmatprep.subr.bf16.mxu0 %v9174_v18  ;;  %v4496_v36 = vpop.permute.xlu0 %4495  ;;  %5229 = vrot.lane.b32.xlu1 %v14393_v4, %s10116_s26  ;;  %v15910_v12 = vld [vmem:[#allocation154_spill] sm:$0xff]  ;;  %v15913_v22 = vld [vmem:[#allocation153_spill] sm:$0xff] }
 0x727   : > { %4541 = vst.msk [vmem:[#allocation4 + $0x18] sm:$0xff] %vm4537_vm12, %v4496_v36  ;;  %9177 = vmatpush3.bf16.msra.mxu0 %v9174_v18 }
 0x728   : > { %v9178_v53 = vpack.c.bf16 %v7177_v63, %v7176_v8  ;;  %4899 = vst.msk [vmem:[#allocation4 + $0x18] sm:$0xff] %vm4895_vm13, %v4854_v30  ;;  %v9021_v51 = vpop.f32.mrb[150].mxu0  ;;  %v4850_v48 = vpop.permute.xlu1 %4849  ;;  %5231 = vrot.lane.b32.xlu0 %v14398_v28, %s10116_s26  ;;  %v15914_v8 = vld [vmem:[#allocation178_spill] sm:$0xff] }
 0x729   : > { %v7179_v52 = vmul.f32 %v9021_v51, %v15904_v32  ;;  %v7076_v34 = vpop.f32.mrb[151].mxu0 }
 0x72a   : > { %v7178_v58 = vmul.f32 %v7076_v34, %v15905_v23  ;;  %9179 = vmatprep.subr.bf16.mxu0 %v9178_v53  ;;  %v4492_v62 = vpop.permute.xlu0 %4491  ;;  %6285 = vrot.lane.b32.xlu1 %v14482_v17, %s10111_s21  ;;  %v15918_v23 = vld [vmem:[#allocation173_spill] sm:$0xff] }
 0x72b   : > { %4539 = vst.msk [vmem:[#allocation4 + $0x8] sm:$0xff] %vm4537_vm12, %v4492_v62  ;;  %9181 = vmatpush3.bf16.msra.mxu0 %v9178_v53  ;;  %v15915_v53 = vld [vmem:[#allocation170_spill] sm:$0xff] }
 0x72c   : > { %v9182_v4 = vpack.c.bf16 %v7179_v52, %v7178_v58  ;;  %4897 = vst.msk [vmem:[#allocation4 + $0x8] sm:$0xff] %vm4895_vm13, %v4850_v48  ;;  %v4502_v19 = vpop.permute.xlu1 %4501  ;;  %6283 = vrot.lane.b32.xlu0 %v14477_v57, %s10111_s21  ;;  %v15916_v48 = vld [vmem:[#allocation186_spill] sm:$0xff]  ;;  %v15917_v52 = vld [vmem:[#allocation33_spill] sm:$0xff] }
 0x72d   : > { %4544 = vst.msk [vmem:[#allocation4 + $0x30] sm:$0xff] %vm4537_vm12, %v4502_v19 }
 0x72e   : > { %9183 = vmatprep.subr.bf16.mxu0 %v9182_v4  ;;  %v4860_v28 = vpop.permute.xlu0 %4859  ;;  %6281 = vrot.lane.b32.xlu1 %v14485_v10, %s10111_s21 }
 0x72f   : > { %4902 = vst.msk [vmem:[#allocation4 + $0x30] sm:$0xff] %vm4895_vm13, %v4860_v28  ;;  %9185 = vmatpush3.bf16.msra.mxu0 %v9182_v4 }
 0x730   : > { %v4862_v17 = vpop.permute.xlu1 %4861  ;;  %6279 = vrot.lane.b32.xlu0 %v14480_v46, %s10111_s21 }
 0x732   : > { %v4856_v30 = vpop.permute.xlu0 %4855  ;;  %5927 = vrot.lane.b32.xlu1 %v14407_v14, %s10115_s24 }
 0x734   : > { %v4498_v60 = vpop.permute.xlu1 %4497  ;;  %5925 = vrot.lane.b32.xlu0 %v14402_v54, %s10115_s24 }
 0x735   : > { %4542 = vst.msk [vmem:[#allocation4 + $0x20] sm:$0xff] %vm4537_vm12, %v4498_v60 }
 0x736   : > { %4900 = vst.msk [vmem:[#allocation4 + $0x20] sm:$0xff] %vm4895_vm13, %v4856_v30  ;;  %v4504_v57 = vpop.permute.xlu0 %4503  ;;  %5923 = vrot.lane.b32.xlu1 %v14411_v41, %s10115_s24 }
 0x737   : > { %4545 = vst.msk [vmem:[#allocation4 + $0x38] sm:$0xff] %vm4537_vm12, %v4504_v57 }
 0x738   : > { %4903 = vst.msk [vmem:[#allocation4 + $0x38] sm:$0xff] %vm4895_vm13, %v4862_v17  ;;  %v4858_v46 = vpop.permute.xlu1 %4857  ;;  %5921 = vrot.lane.b32.xlu0 %v14405_v6, %s10115_s24 }
 0x73a   : > { %v4500_v14 = vpop.permute.xlu0 %4499  ;;  %6293 = vrot.lane.b32.xlu1 %v14504_v0, %s10111_s21 }
 0x73b   : > { %4543 = vst.msk [vmem:[#allocation4 + $0x28] sm:$0xff] %vm4537_vm12, %v4500_v14 }
 0x73c   : > { %4901 = vst.msk [vmem:[#allocation4 + $0x28] sm:$0xff] %vm4895_vm13, %v4858_v46  ;;  %v4868_v54 = vpop.permute.xlu1 %4867  ;;  %6291 = vrot.lane.b32.xlu0 %v14498_v2, %s10111_s21 }
 0x73e   : > { %v4870_v41 = vpop.permute.xlu0 %4869  ;;  %6289 = vrot.lane.b32.xlu1 %v14508_v35, %s10111_s21 }
 0x740   : > { %v4864_v10 = vpop.permute.xlu1 %4863  ;;  %6287 = vrot.lane.b32.xlu0 %v14502_v21, %s10111_s21 }
 0x742   : > { %v4866_v6 = vpop.permute.xlu0 %4865  ;;  %5935 = vrot.lane.b32.xlu1 %v14428_v55, %s10115_s24 }
 0x744   : > { %v4510_v0 = vpop.permute.xlu1 %4509  ;;  %5933 = vrot.lane.b32.xlu0 %v14422_v44, %s10115_s24 }
 0x745   : > { %4548 = vst.msk [vmem:[#allocation4 + $0x50] sm:$0xff] %vm4537_vm12, %v4510_v0 }
 0x746   : > { %4906 = vst.msk [vmem:[#allocation4 + $0x50] sm:$0xff] %vm4895_vm13, %v4868_v54  ;;  %v4512_v2 = vpop.permute.xlu0 %4511  ;;  %5931 = vrot.lane.b32.xlu1 %v14431_v5, %s10115_s24 }
 0x747   : > { %4549 = vst.msk [vmem:[#allocation4 + $0x58] sm:$0xff] %vm4537_vm12, %v4512_v2 }
 0x748   : > { %4907 = vst.msk [vmem:[#allocation4 + $0x58] sm:$0xff] %vm4895_vm13, %v4870_v41  ;;  %v4506_v21 = vpop.permute.xlu1 %4505  ;;  %5929 = vrot.lane.b32.xlu0 %v14426_v43, %s10115_s24 }
 0x749   : > { %4546 = vst.msk [vmem:[#allocation4 + $0x40] sm:$0xff] %vm4537_vm12, %v4506_v21 }
 0x74a   : > { %4904 = vst.msk [vmem:[#allocation4 + $0x40] sm:$0xff] %vm4895_vm13, %v4864_v10  ;;  %v4508_v44 = vpop.permute.xlu0 %4507  ;;  %6299 = vrot.lane.b32.xlu1 %v14521_v13, %s10111_s21 }
 0x74b   : > { %4547 = vst.msk [vmem:[#allocation4 + $0x48] sm:$0xff] %vm4537_vm12, %v4508_v44 }
 0x74c   : > { %4905 = vst.msk [vmem:[#allocation4 + $0x48] sm:$0xff] %vm4895_vm13, %v4866_v6  ;;  %v4876_v55 = vpop.permute.xlu1 %4875  ;;  %6301 = vrot.lane.b32.xlu0 %v14527_v31, %s10111_s21 }
 0x74e   : > { %v4878_v5 = vpop.permute.xlu0 %4877  ;;  %6295 = vrot.lane.b32.xlu1 %v14525_v26, %s10111_s21 }
 0x750   : > { %v4872_v43 = vpop.permute.xlu1 %4871  ;;  %6297 = vrot.lane.b32.xlu0 %v14530_v9, %s10111_s21 }
 0x752   : > { %v4874_v35 = vpop.permute.xlu0 %4873  ;;  %5941 = vrot.lane.b32.xlu1 %v14443_v42, %s10115_s24 }
 0x754   : > { %v4518_v13 = vpop.permute.xlu1 %4517  ;;  %5943 = vrot.lane.b32.xlu0 %v14448_v61, %s10115_s24 }
 0x755   : > { %4552 = vst.msk [vmem:[#allocation4 + $0x70] sm:$0xff] %vm4537_vm12, %v4518_v13 }
 0x756   : > { %4910 = vst.msk [vmem:[#allocation4 + $0x70] sm:$0xff] %vm4895_vm13, %v4876_v55  ;;  %v4520_v31 = vpop.permute.xlu0 %4519  ;;  %5937 = vrot.lane.b32.xlu1 %v14446_v56, %s10115_s24 }
 0x757   : > { %4553 = vst.msk [vmem:[#allocation4 + $0x78] sm:$0xff] %vm4537_vm12, %v4520_v31 }
 0x758   : > { %4911 = vst.msk [vmem:[#allocation4 + $0x78] sm:$0xff] %vm4895_vm13, %v4878_v5  ;;  %v4514_v26 = vpop.permute.xlu1 %4513  ;;  %5939 = vrot.lane.b32.xlu0 %v14452_v24, %s10115_s24 }
 0x759   : > { %4550 = vst.msk [vmem:[#allocation4 + $0x60] sm:$0xff] %vm4537_vm12, %v4514_v26 }
 0x75a   : > { %4908 = vst.msk [vmem:[#allocation4 + $0x60] sm:$0xff] %vm4895_vm13, %v4872_v43  ;;  %v4516_v42 = vpop.permute.xlu0 %4515  ;;  %6307 = vrot.lane.b32.xlu1 %v14544_v27, %s10111_s21 }
 0x75b   : > { %4551 = vst.msk [vmem:[#allocation4 + $0x68] sm:$0xff] %vm4537_vm12, %v4516_v42 }
 0x75c   : > { %4909 = vst.msk [vmem:[#allocation4 + $0x68] sm:$0xff] %vm4895_vm13, %v4874_v35  ;;  %v5570_v56 = vpop.permute.xlu1 %5569  ;;  %6305 = vrot.lane.b32.xlu0 %v14554_v11, %s10111_s21 }
 0x75e   : > { %v5568_v61 = vpop.permute.xlu0 %5567  ;;  %6303 = vrot.lane.b32.xlu1 %v14548_v49, %s10111_s21  ;;  %v15906_v49 = vld [vmem:[#allocation145_spill] sm:$0xff] }
 0x760   : > { %v5566_v24 = vpop.permute.xlu1 %5565  ;;  %5951 = vrot.lane.b32.xlu0 %v14472_v50, %s10115_s24 }
 0x762   : > { %v5564_v9 = vpop.permute.xlu0 %5563  ;;  %5949 = vrot.lane.b32.xlu1 %v14466_v39, %s10115_s24 }
 0x764   : > { %v5212_v27 = vpop.permute.xlu1 %5211  ;;  %5947 = vrot.lane.b32.xlu0 %v14475_v25, %s10115_s24 }
 0x765   : > { %5257 = vst.msk [vmem:[#allocation4 + $0x18] sm:$0xff] %vm5253_vm14, %v5212_v27  ;;  %v15920_v27 = vld [vmem:[#allocation29_spill] sm:$0xff] }
 0x766   : > { %v5210_v11 = vpop.permute.xlu0 %5209  ;;  %5945 = vrot.lane.b32.xlu1 %v14470_v37, %s10115_s24  ;;  %5615 = vst.msk [vmem:[#allocation4 + $0x18] sm:$0xff] %vm5611_vm15, %v5570_v56  ;;  %v15919_v56 = vld [vmem:[#allocation27_spill] sm:$0xff] }
 0x767   : > { %5256 = vst.msk [vmem:[#allocation4 + $0x10] sm:$0xff] %vm5253_vm14, %v5210_v11  ;;  %v8073_v11 = vmul.f32 -1.442695, %v15920_v27 }
 0x768   : > { %v5208_v50 = vpop.permute.xlu1 %5207  ;;  %6641 = vrot.lane.b32.xlu0 %v14488_v59, %s10102_s19  ;;  %5614 = vst.msk [vmem:[#allocation4 + $0x10] sm:$0xff] %vm5611_vm15, %v5568_v61  ;;  %v8072_v61 = vmul.f32 -1.442695, %v15919_v56 }
 0x769   : > { %5255 = vst.msk [vmem:[#allocation4 + $0x8] sm:$0xff] %vm5253_vm14, %v5208_v50 }
 0x76a   : > { %v5206_v39 = vpop.permute.xlu0 %5205  ;;  %6643 = vrot.lane.b32.xlu1 %v14494_v16, %s10102_s19  ;;  %5613 = vst.msk [vmem:[#allocation4 + $0x8] sm:$0xff] %vm5611_vm15, %v5566_v24  ;;  %v15907_v16 = vld [vmem:[#allocation151_spill] sm:$0xff]  ;;  %9943 = vpow2.f32 %v8072_v61 }
 0x76b   : > { %5254 = vst.msk [vmem:[#allocation4] sm:$0xff] %vm5253_vm14, %v5206_v39  ;;  %v15921_v39 = vld [vmem:[#allocation28_spill] sm:$0xff]  ;;  %9945 = vpow2.f32 %v8073_v11 }
 0x76c   : > { %v5578_v37 = vpop.permute.xlu1 %5577  ;;  %6637 = vrot.lane.b32.xlu0 %v14490_v3, %s10102_s19  ;;  %5612 = vst.msk [vmem:[#allocation4] sm:$0xff] %vm5611_vm15, %v5564_v9 }
 0x76e   : > { %v5576_v25 = vpop.permute.xlu0 %5575  ;;  %6639 = vrot.lane.b32.xlu1 %v14496_v15, %s10102_s19 }
 0x770   : > { %v5574_v59 = vpop.permute.xlu1 %5573  ;;  %6649 = vrot.lane.b32.xlu0 %v15906_v49, %s10102_s19 }
 0x772   : > { %v5572_v45 = vpop.permute.xlu0 %5571  ;;  %6651 = vrot.lane.b32.xlu1 %v15907_v16, %s10102_s19  ;;  %v15923_v16 = vld [vmem:[#allocation31_spill] sm:$0xff] }
 0x774   : > { %v5220_v7 = vpop.permute.xlu1 %5219  ;;  %6645 = vrot.lane.b32.xlu0 %v15908_v29, %s10102_s19 }
 0x775   : > { %5261 = vst.msk [vmem:[#allocation4 + $0x38] sm:$0xff] %vm5253_vm14, %v5220_v7  ;;  %v8076_v7 = vmul.f32 -1.442695, %v15923_v16 }
 0x776   : > { %v5218_v3 = vpop.permute.xlu0 %5217  ;;  %6647 = vrot.lane.b32.xlu1 %v15909_v1, %s10102_s19  ;;  %5619 = vst.msk [vmem:[#allocation4 + $0x38] sm:$0xff] %vm5611_vm15, %v5578_v37  ;;  %v8070_v37 = vmul.f32 -1.442695, %v15921_v39 }
 0x777   : > { %5260 = vst.msk [vmem:[#allocation4 + $0x30] sm:$0xff] %vm5253_vm14, %v5218_v3  ;;  %v15924_v3 = vld [vmem:[#allocation34_spill] sm:$0xff] }
 0x778   : > { %v5216_v15 = vpop.permute.xlu1 %5215  ;;  %6659 = vrot.lane.b32.xlu0 %v15910_v12, %s10102_s19  ;;  %5618 = vst.msk [vmem:[#allocation4 + $0x30] sm:$0xff] %vm5611_vm15, %v5576_v25  ;;  %9947 = vpow2.f32 %v8070_v37  ;;  %v8077_v1 = vmul.f32 -1.442695, %v15924_v3  ;;  %v15925_v12 = vld [vmem:[#allocation32_spill] sm:$0xff] }
 0x779   : > { %5259 = vst.msk [vmem:[#allocation4 + $0x28] sm:$0xff] %vm5253_vm14, %v5216_v15 }
 0x77a   : > { %v5214_v18 = vpop.permute.xlu0 %5213  ;;  %6657 = vrot.lane.b32.xlu1 %v15911_v38, %s10102_s19  ;;  %5617 = vst.msk [vmem:[#allocation4 + $0x28] sm:$0xff] %vm5611_vm15, %v5574_v59  ;;  %v15922_v59 = vld [vmem:[#allocation30_spill] sm:$0xff]  ;;  %v9944_v38 = vpop.eup %9943 }
 0x77b   : > { %5258 = vst.msk [vmem:[#allocation4 + $0x20] sm:$0xff] %vm5253_vm14, %v5214_v18  ;;  %v8071_v49 = vmul.f32 -1.442695, %v15922_v59  ;;  %v8074_v18 = vmul.f32 -1.442695, %v15925_v12 }
 0x77c   : > { %v5584_v33 = vpop.permute.xlu1 %5583  ;;  %6655 = vrot.lane.b32.xlu0 %v15912_v47, %s10102_s19  ;;  %5616 = vst.msk [vmem:[#allocation4 + $0x20] sm:$0xff] %vm5611_vm15, %v5572_v45  ;;  %v15926_v47 = vld [vmem:[#allocation35_spill] sm:$0xff] }
 0x77d   : > { %9949 = vpow2.f32 %v8071_v49 }
 0x77e   : > { %v5586_v63 = vpop.permute.xlu0 %5585  ;;  %6653 = vrot.lane.b32.xlu1 %v15913_v22, %s10102_s19  ;;  %9951 = vpow2.f32 %v8076_v7 }
 0x77f   : > { %9953 = vpow2.f32 %v8077_v1 }
 0x780   : > { %v5580_v40 = vpop.permute.xlu1 %5579  ;;  %6309 = vrot.lane.b32.xlu0 %v15914_v8, %s10111_s21  ;;  %v7357_v8 = vadd.f32 1.0, %v9944_v38  ;;  %9955 = vpow2.f32 %v8074_v18 }
 0x782   : > { %v5582_v36 = vpop.permute.xlu0 %5581  ;;  %6665 = vrot.lane.b32.xlu1 %v15915_v53, %s10102_s19 }
 0x784   : > { %v5226_v51 = vpop.permute.xlu1 %5225  ;;  %6663 = vrot.lane.b32.xlu0 %v15916_v48, %s10102_s19 }
 0x785   : > { %5264 = vst.msk [vmem:[#allocation4 + $0x50] sm:$0xff] %vm5253_vm14, %v5226_v51 }
 0x786   : > { %v5228_v32 = vpop.permute.xlu0 %5227  ;;  %6661 = vrot.lane.b32.xlu1 %v15917_v52, %s10102_s19  ;;  %5622 = vst.msk [vmem:[#allocation4 + $0x50] sm:$0xff] %vm5611_vm15, %v5584_v33 }
 0x787   : > { %5265 = vst.msk [vmem:[#allocation4 + $0x58] sm:$0xff] %vm5253_vm14, %v5228_v32  ;;  %v15928_v32 = vld [vmem:[#allocation37_spill] sm:$0xff] }
 0x788   : > { %v5222_v34 = vpop.permute.xlu1 %5221  ;;  %6667 = vrot.lane.b32.xlu0 %v15918_v23, %s10102_s19  ;;  %5623 = vst.msk [vmem:[#allocation4 + $0x58] sm:$0xff] %vm5611_vm15, %v5586_v63  ;;  %v8075_v63 = vmul.f32 -1.442695, %v15926_v47  ;;  %v8080_v52 = vmul.f32 -1.442695, %v15928_v32 }
 0x789   : > { %5262 = vst.msk [vmem:[#allocation4 + $0x40] sm:$0xff] %vm5253_vm14, %v5222_v34 }
 0x78a   : > { %v5224_v58 = vpop.permute.xlu0 %5223  ;;  %5620 = vst.msk [vmem:[#allocation4 + $0x40] sm:$0xff] %vm5611_vm15, %v5580_v40  ;;  %v9946_v40 = vpop.eup %9945  ;;  %9957 = vpow2.f32 %v8075_v63 }
 0x78b   : > { %5263 = vst.msk [vmem:[#allocation4 + $0x48] sm:$0xff] %vm5253_vm14, %v5224_v58  ;;  %v9948_v48 = vpop.eup %9947  ;;  %v7358_v34 = vadd.f32 1.0, %v9946_v40  ;;  %9959 = vrcp.f32 %v7357_v8  ;;  %v15929_v58 = vld [vmem:[#allocation38_spill] sm:$0xff] }
 0x78c   : > { %v5592_v62 = vpop.permute.xlu1 %5591  ;;  %5621 = vst.msk [vmem:[#allocation4 + $0x48] sm:$0xff] %vm5611_vm15, %v5582_v36  ;;  %v15927_v36 = vld [vmem:[#allocation39_spill] sm:$0xff]  ;;  %v15936_v40 = vld [vmem:[#allocation54_spill] sm:$0xff] }
 0x78d   : > { %v8081_v53 = vmul.f32 -1.442695, %v15927_v36 }
 0x78e   : > { %v5594_v4 = vpop.permute.xlu0 %5593 }
 0x78f   : > { %9961 = vpow2.f32 %v8081_v53  ;;  %v15937_v53 = vld [vmem:[#allocation159_spill] sm:$0xff] }
 0x790   : > { %v5588_v19 = vpop.permute.xlu1 %5587  ;;  %9963 = vpow2.f32 %v8080_v52 }
 0x791   : > { %9965 = vrcp.f32 %v7358_v34 }
 0x792   : > { %v5590_v28 = vpop.permute.xlu0 %5589 }
 0x794   : > { %v5234_v17 = vpop.permute.xlu1 %5233 }
 0x795   : > { %5268 = vst.msk [vmem:[#allocation4 + $0x70] sm:$0xff] %vm5253_vm14, %v5234_v17 }
 0x796   : > { %v5236_v30 = vpop.permute.xlu0 %5235  ;;  %5626 = vst.msk [vmem:[#allocation4 + $0x70] sm:$0xff] %vm5611_vm15, %v5592_v62  ;;  %v8078_v62 = vmul.f32 -1.442695, %v15929_v58 }
 0x797   : > { %5269 = vst.msk [vmem:[#allocation4 + $0x78] sm:$0xff] %vm5253_vm14, %v5236_v30  ;;  %v15930_v30 = vld [vmem:[#allocation41_spill] sm:$0xff] }
 0x798   : > { %v5230_v60 = vpop.permute.xlu1 %5229  ;;  %5627 = vst.msk [vmem:[#allocation4 + $0x78] sm:$0xff] %vm5611_vm15, %v5594_v4  ;;  %v9950_v4 = vpop.eup %9949  ;;  %9967 = vpow2.f32 %v8078_v62 }
 0x799   : > { %5266 = vst.msk [vmem:[#allocation4 + $0x60] sm:$0xff] %vm5253_vm14, %v5230_v60  ;;  %v9952_v17 = vpop.eup %9951  ;;  %v8079_v60 = vmul.f32 -1.442695, %v15930_v30 }
 0x79a   : > { %v5232_v57 = vpop.permute.xlu0 %5231  ;;  %5624 = vst.msk [vmem:[#allocation4 + $0x60] sm:$0xff] %vm5611_vm15, %v5588_v19  ;;  %v7355_v19 = vadd.f32 1.0, %v9948_v48 }
 0x79b   : > { %5267 = vst.msk [vmem:[#allocation4 + $0x68] sm:$0xff] %vm5253_vm14, %v5232_v57 }
 0x79c   : > { %v6286_v46 = vpop.permute.xlu1 %6285  ;;  %5625 = vst.msk [vmem:[#allocation4 + $0x68] sm:$0xff] %vm5611_vm15, %v5590_v28  ;;  %9969 = vrcp.f32 %v7355_v19 }
 0x79d   : > { %9971 = vpow2.f32 %v8079_v60 }
 0x79e   : > { %v6284_v14 = vpop.permute.xlu0 %6283 }
 0x7a0   : > { %v6282_v54 = vpop.permute.xlu1 %6281 }
 0x7a2   : > { %v6280_v41 = vpop.permute.xlu0 %6279 }
 0x7a4   : > { %v5928_v10 = vpop.permute.xlu1 %5927 }
 0x7a5   : > { %5973 = vst.msk [vmem:[#allocation4 + $0x18] sm:$0xff] %vm5969_vm0, %v5928_v10 }
 0x7a6   : > { %v5926_v6 = vpop.permute.xlu0 %5925  ;;  %6331 = vst.msk [vmem:[#allocation4 + $0x18] sm:$0xff] %vm6327_vm1, %v6286_v46  ;;  %v9954_v46 = vpop.eup %9953 }
 0x7a7   : > { %5972 = vst.msk [vmem:[#allocation4 + $0x10] sm:$0xff] %vm5969_vm0, %v5926_v6  ;;  %v9956_v10 = vpop.eup %9955  ;;  %v15931_v6 = vld [vmem:[#allocation42_spill] sm:$0xff] }
 0x7a8   : > { %v5924_v0 = vpop.permute.xlu1 %5923  ;;  %6330 = vst.msk [vmem:[#allocation4 + $0x10] sm:$0xff] %vm6327_vm1, %v6284_v14  ;;  %v7356_v14 = vadd.f32 1.0, %v9950_v4 }
 0x7a9   : > { %5971 = vst.msk [vmem:[#allocation4 + $0x8] sm:$0xff] %vm5969_vm0, %v5924_v0  ;;  %v8084_v0 = vmul.f32 -1.442695, %v15931_v6 }
 0x7aa   : > { %v5922_v2 = vpop.permute.xlu0 %5921  ;;  %6329 = vst.msk [vmem:[#allocation4 + $0x8] sm:$0xff] %vm6327_vm1, %v6282_v54  ;;  %v7361_v54 = vadd.f32 1.0, %v9952_v17  ;;  %9973 = vrcp.f32 %v7356_v14 }
 0x7ab   : > { %5970 = vst.msk [vmem:[#allocation4] sm:$0xff] %vm5969_vm0, %v5922_v2  ;;  %v7362_v2 = vadd.f32 1.0, %v9954_v46 }
 0x7ac   : > { %v6294_v21 = vpop.permute.xlu1 %6293  ;;  %6328 = vst.msk [vmem:[#allocation4] sm:$0xff] %vm6327_vm1, %v6280_v41  ;;  %9975 = vrcp.f32 %v7361_v54 }
 0x7ad   : > { %9977 = vpow2.f32 %v8084_v0 }
 0x7ae   : > { %v6292_v44 = vpop.permute.xlu0 %6291  ;;  %9979 = vrcp.f32 %v7362_v2  ;;  %v15941_v2 = vld [vmem:[#allocation157_spill] sm:$0xff] }
 0x7b0   : > { %v6290_v55 = vpop.permute.xlu1 %6289 }
 0x7b2   : > { %v6288_v5 = vpop.permute.xlu0 %6287 }
 0x7b4   : > { %v5936_v43 = vpop.permute.xlu1 %5935 }
 0x7b5   : > { %5977 = vst.msk [vmem:[#allocation4 + $0x38] sm:$0xff] %vm5969_vm0, %v5936_v43  ;;  %v7359_v43 = vadd.f32 1.0, %v9956_v10  ;;  %v15940_v10 = vld [vmem:[#allocation51_spill] sm:$0xff] }
 0x7b6   : > { %v5934_v35 = vpop.permute.xlu0 %5933  ;;  %6335 = vst.msk [vmem:[#allocation4 + $0x38] sm:$0xff] %vm6327_vm1, %v6294_v21 }
 0x7b7   : > { %5976 = vst.msk [vmem:[#allocation4 + $0x30] sm:$0xff] %vm5969_vm0, %v5934_v35 }
 0x7b8   : > { %v5932_v13 = vpop.permute.xlu1 %5931  ;;  %6334 = vst.msk [vmem:[#allocation4 + $0x30] sm:$0xff] %vm6327_vm1, %v6292_v44  ;;  %v15932_v44 = vld [vmem:[#allocation45_spill] sm:$0xff] }
 0x7b9   : > { %5975 = vst.msk [vmem:[#allocation4 + $0x28] sm:$0xff] %vm5969_vm0, %v5932_v13 }
 0x7ba   : > { %v5930_v31 = vpop.permute.xlu0 %5929  ;;  %6333 = vst.msk [vmem:[#allocation4 + $0x28] sm:$0xff] %vm6327_vm1, %v6290_v55  ;;  %v8083_v55 = vmul.f32 -1.442695, %v15932_v44 }
 0x7bb   : > { %5974 = vst.msk [vmem:[#allocation4 + $0x20] sm:$0xff] %vm5969_vm0, %v5930_v31  ;;  %v15933_v31 = vld [vmem:[#allocation43_spill] sm:$0xff] }
 0x7bc   : > { %v6300_v26 = vpop.permute.xlu1 %6299  ;;  %6332 = vst.msk [vmem:[#allocation4 + $0x20] sm:$0xff] %vm6327_vm1, %v6288_v5  ;;  %v9958_v5 = vpop.eup %9957  ;;  %9981 = vpow2.f32 %v8083_v55 }
 0x7bd   : > { %v9960_v13 = vpop.eup %9959  ;;  %9983 = vrcp.f32 %v7359_v43 }
 0x7be   : > { %v6302_v42 = vpop.permute.xlu0 %6301 }
 0x7c0   : > { %v6296_v24 = vpop.permute.xlu1 %6295 }
 0x7c2   : > { %v6298_v9 = vpop.permute.xlu0 %6297 }
 0x7c4   : > { %v5942_v50 = vpop.permute.xlu1 %5941 }
 0x7c5   : > { %5980 = vst.msk [vmem:[#allocation4 + $0x50] sm:$0xff] %vm5969_vm0, %v5942_v50  ;;  %v15934_v50 = vld [vmem:[#allocation44_spill] sm:$0xff] }
 0x7c6   : > { %v5944_v25 = vpop.permute.xlu0 %5943  ;;  %6338 = vst.msk [vmem:[#allocation4 + $0x50] sm:$0xff] %vm6327_vm1, %v6300_v26  ;;  %v8082_v26 = vmul.f32 -1.442695, %v15933_v31  ;;  %v8085_v37 = vmul.f32 -1.442695, %v15934_v50 }
 0x7c7   : > { %5981 = vst.msk [vmem:[#allocation4 + $0x58] sm:$0xff] %vm5969_vm0, %v5944_v25 }
 0x7c8   : > { %v5938_v45 = vpop.permute.xlu1 %5937  ;;  %6339 = vst.msk [vmem:[#allocation4 + $0x58] sm:$0xff] %vm6327_vm1, %v6302_v42  ;;  %v9962_v42 = vpop.eup %9961  ;;  %9985 = vpow2.f32 %v8082_v26 }
 0x7c9   : > { %5978 = vst.msk [vmem:[#allocation4 + $0x40] sm:$0xff] %vm5969_vm0, %v5938_v45  ;;  %v7366_v7 = vadd.f32 1.0, %v9962_v42  ;;  %v15942_v42 = vld [vmem:[#allocation65_spill] sm:$0xff] }
 0x7ca   : > { %v5940_v29 = vpop.permute.xlu0 %5939  ;;  %6336 = vst.msk [vmem:[#allocation4 + $0x40] sm:$0xff] %vm6327_vm1, %v6296_v24  ;;  %v9964_v24 = vpop.eup %9963 }
 0x7cb   : > { %5979 = vst.msk [vmem:[#allocation4 + $0x48] sm:$0xff] %vm5969_vm0, %v5940_v29  ;;  %v9966_v11 = vpop.eup %9965  ;;  %v15935_v29 = vld [vmem:[#allocation160_spill] sm:$0xff]  ;;  %v7365_v18 = vadd.f32 1.0, %v9964_v24 }
 0x7cc   : > { %v6308_v15 = vpop.permute.xlu1 %6307  ;;  %6337 = vst.msk [vmem:[#allocation4 + $0x48] sm:$0xff] %vm6327_vm1, %v6298_v9  ;;  %v7360_v9 = vadd.f32 1.0, %v9958_v5  ;;  %v9968_v45 = vpop.eup %9967  ;;  %v7406_v48 = vmul.f32 %v9966_v11, %v15920_v27  ;;  %v15943_v24 = vld [vmem:[#allocation164_spill] sm:$0xff] }
 0x7cd   : > { %v7363_v52 = vadd.f32 1.0, %v9968_v45 }
 0x7ce   : > { %v6306_v33 = vpop.permute.xlu0 %6305  ;;  %9987 = vrcp.f32 %v7360_v9 }
 0x7cf   : > { %9989 = vpow2.f32 %v8085_v37 }
 0x7d0   : > { %v6304_v22 = vpop.permute.xlu1 %6303  ;;  %9991 = vrcp.f32 %v7366_v7 }
 0x7d1   : > { %9993 = vrcp.f32 %v7365_v18  ;;  %v15945_v18 = vld [vmem:[#allocation163_spill] sm:$0xff] }
 0x7d2   : > { %v5952_v51 = vpop.permute.xlu0 %5951  ;;  %9995 = vrcp.f32 %v7363_v52  ;;  %v15947_v52 = vld [vmem:[#allocation59_spill] sm:$0xff] }
 0x7d3   : > { %5985 = vst.msk [vmem:[#allocation4 + $0x78] sm:$0xff] %vm5969_vm0, %v5952_v51 }
 0x7d4   : > { %v5950_v23 = vpop.permute.xlu1 %5949 }
 0x7d5   : > { %5984 = vst.msk [vmem:[#allocation4 + $0x70] sm:$0xff] %vm5969_vm0, %v5950_v23 }
 0x7d6   : > { %v5948_v28 = vpop.permute.xlu0 %5947  ;;  %6342 = vst.msk [vmem:[#allocation4 + $0x70] sm:$0xff] %vm6327_vm1, %v6308_v15  ;;  %v9970_v15 = vpop.eup %9969 }
 0x7d7   : > { %5983 = vst.msk [vmem:[#allocation4 + $0x68] sm:$0xff] %vm5969_vm0, %v5948_v28  ;;  %v9972_v63 = vpop.eup %9971  ;;  %v15939_v28 = vld [vmem:[#allocation53_spill] sm:$0xff] }
 0x7d8   : > { %v5946_v57 = vpop.permute.xlu1 %5945  ;;  %6341 = vst.msk [vmem:[#allocation4 + $0x68] sm:$0xff] %vm6327_vm1, %v6306_v33  ;;  %v9974_v62 = vpop.eup %9973  ;;  %v7364_v46 = vadd.f32 1.0, %v9972_v63 }
 0x7d9   : > { %5982 = vst.msk [vmem:[#allocation4 + $0x60] sm:$0xff] %vm5969_vm0, %v5946_v57  ;;  %v9976_v60 = vpop.eup %9975  ;;  %v7403_v57 = vmul.f32 %v9970_v15, %v15921_v39  ;;  %v7404_v43 = vmul.f32 %v9974_v62, %v15922_v59 }
 0x7da   : > { %v6642_v41 = vpop.permute.xlu0 %6641  ;;  %6340 = vst.msk [vmem:[#allocation4 + $0x60] sm:$0xff] %vm6327_vm1, %v6304_v22  ;;  %v7405_v22 = vmul.f32 %v9960_v13, %v15919_v56  ;;  %v15938_v56 = vld [vmem:[#allocation158_spill] sm:$0xff]  ;;  %v9978_v54 = vpop.eup %9977  ;;  %v7409_v37 = vmul.f32 %v9976_v60, %v15923_v16  ;;  %9997 = vrcp.f32 %v7364_v46  ;;  %v15948_v60 = vld [vmem:[#allocation57_spill] sm:$0xff] }
 0x7db   : > { %6688 = vst.msk [vmem:[#allocation4 + $0x10] sm:$0xff] %vm6685_vm2, %v6642_v41  ;;  %v9980_v5 = vpop.eup %9979  ;;  %v15949_v46 = vld [vmem:[#allocation161_spill] sm:$0xff] }
 0x7dc   : > { %v6644_v21 = vpop.permute.xlu1 %6643  ;;  %v9982_v13 = vpop.eup %9981 }
 0x7dd   : > { %6689 = vst.msk [vmem:[#allocation4 + $0x18] sm:$0xff] %vm6685_vm2, %v6644_v21  ;;  %v9984_v11 = vpop.eup %9983  ;;  %v7368_v63 = vadd.f32 1.0, %v9982_v13 }
 0x7de   : > { %v6638_v35 = vpop.permute.xlu0 %6637  ;;  %v9986_v45 = vpop.eup %9985  ;;  %v7407_v62 = vmul.f32 %v9984_v11, %v15925_v12 }
 0x7df   : > { %6686 = vst.msk [vmem:[#allocation4] sm:$0xff] %vm6685_vm2, %v6638_v35 }
 0x7e0   : > { %v6640_v61 = vpop.permute.xlu1 %6639 }
 0x7e1   : > { %6687 = vst.msk [vmem:[#allocation4 + $0x8] sm:$0xff] %vm6685_vm2, %v6640_v61 }
 0x7e2   : > { %v6650_v25 = vpop.permute.xlu0 %6649  ;;  %v6704_v49 = vld [vmem:[#allocation4 + $0x10] sm:$0xff] }
 0x7e3   : > { %6692 = vst.msk [vmem:[#allocation4 + $0x30] sm:$0xff] %vm6685_vm2, %v6650_v25  ;;  %v6720_v1 = vadd.f32 %v6704_v49, %v15935_v29  ;;  %v7369_v25 = vadd.f32 1.0, %v9978_v54 }
 0x7e4   : > { %v6652_v38 = vpop.permute.xlu1 %6651  ;;  %v6705_v33 = vld [vmem:[#allocation4 + $0x18] sm:$0xff] }
 0x7e5   : > { %6693 = vst.msk [vmem:[#allocation4 + $0x38] sm:$0xff] %vm6685_vm2, %v6652_v38  ;;  %v6826_v8 = vadd.f32 %v15936_v40, %v6720_v1  ;;  %v6721_v51 = vadd.f32 %v6705_v33, %v15937_v53  ;;  %v15944_v1 = vld [vmem:[#allocation49_spill] sm:$0xff]  ;;  %v7410_v33 = vmul.f32 %v9980_v5, %v15924_v3  ;;  %v9988_v40 = vpop.eup %9987  ;;  %9999 = vrcp.f32 %v7369_v25 }
 0x7e6   : > { %v6646_v34 = vpop.permute.xlu0 %6645  ;;  %v6702_v23 = vld [vmem:[#allocation4] sm:$0xff]  ;;  %v7367_v3 = vadd.f32 1.0, %v9986_v45  ;;  %v7408_v12 = vmul.f32 %v9988_v40, %v15926_v47  ;;  %10001 = vrcp.f32 %v7368_v63 }
 0x7e7   : > { %6690 = vst.msk [vmem:[#allocation4 + $0x20] sm:$0xff] %vm6685_vm2, %v6646_v34  ;;  %v14834_v4 = vmul.f32 %v7405_v22, %v6826_v8  ;;  %v6718_v19 = vadd.f32 %v6702_v23, %v15938_v56  ;;  %v6827_v17 = vadd.f32 %v15939_v28, %v6721_v51  ;;  %v15946_v51 = vld [vmem:[#allocation162_spill] sm:$0xff]  ;;  %v9990_v23 = vpop.eup %9989 }
 0x7e8   : > { %v6648_v27 = vpop.permute.xlu1 %6647  ;;  %v6703_v14 = vld [vmem:[#allocation4 + $0x8] sm:$0xff]  ;;  %v9992_v28 = vpop.eup %9991  ;;  %10003 = vrcp.f32 %v7367_v3  ;;  %v7370_v13 = vadd.f32 1.0, %v9990_v23 }
 0x7e9   : > { %6691 = vst.msk [vmem:[#allocation4 + $0x28] sm:$0xff] %vm6685_vm2, %v6648_v27  ;;  %v7437_v41 = vmul.f32 %v14834_v4, %v14834_v4  ;;  %v6824_v0 = vadd.f32 %v15940_v10, %v6718_v19  ;;  %v6719_v21 = vadd.f32 %v6703_v14, %v15941_v2  ;;  %v14844_v55 = vmul.f32 %v7406_v48, %v6827_v17  ;;  %v9994_v54 = vpop.eup %9993 }
 0x7ea   : > { %v6660_v39 = vpop.permute.xlu0 %6659  ;;  %v6708_v35 = vld [vmem:[#allocation4 + $0x30] sm:$0xff]  ;;  %v7413_v45 = vmul.f32 %v9994_v54, %v15928_v32  ;;  %10005 = vrcp.f32 %v7370_v13  ;;  %v9384_v54 = vld [vmem:[%s15106_s12 + $0x8] sm:$0xff]  }
 0x7eb   : > { %6697 = vst.msk [vmem:[#allocation4 + $0x58] sm:$0xff] %vm6685_vm2, %v6660_v39  ;;  %7455 = vadd.xlane.f32.xlu0 %v7437_v41  ;;  %v14848_v26 = vmul.f32 %v7403_v57, %v6824_v0  ;;  %v6825_v61 = vadd.f32 %v15942_v42, %v6719_v21  ;;  %v6724_v9 = vadd.f32 %v6708_v35, %v15943_v24  ;;  %v15950_v21 = vld [vmem:[#allocation66_spill] sm:$0xff]  ;;  %v9996_v24 = vpop.eup %9995 }
 0x7ec   : > { %v6658_v49 = vpop.permute.xlu1 %6657  ;;  %v6709_v59 = vld [vmem:[#allocation4 + $0x38] sm:$0xff]  ;;  %v7438_v0 = vmul.f32 %v14844_v55, %v14844_v55  ;;  %v7414_v35 = vmul.f32 %v9992_v28, %v15927_v36  ;;  %v15953_v36 = vld [vmem:[#allocation61_spill] sm:$0xff] }
 0x7ed   : > { %6696 = vst.msk [vmem:[#allocation4 + $0x50] sm:$0xff] %vm6685_vm2, %v6658_v49  ;;  %v7435_v7 = vmul.f32 %v14848_v26, %v14848_v26  ;;  %v14856_v29 = vmul.f32 %v7404_v43, %v6825_v61  ;;  %v6830_v15 = vadd.f32 %v15944_v1, %v6724_v9  ;;  %v6725_v38 = vadd.f32 %v6709_v59, %v15945_v18  ;;  %v15951_v43 = vld [vmem:[#allocation168_spill] sm:$0xff]  ;;  %v9998_v59 = vpop.eup %9997  ;;  %v15954_v18 = vld [vmem:[#allocation58_spill] sm:$0xff] }
 0x7ee   : > { %v6656_v16 = vpop.permute.xlu0 %6655  ;;  %v6706_v22 = vld [vmem:[#allocation4 + $0x20] sm:$0xff]  ;;  %v7412_v32 = vmul.f32 %v9998_v59, %v15930_v30  ;;  %v15964_v59 = vld [vmem:[#allocation62_spill] sm:$0xff] }
 0x7ef   : > { %6695 = vst.msk [vmem:[#allocation4 + $0x48] sm:$0xff] %vm6685_vm2, %v6656_v16  ;;  %7451 = vadd.xlane.f32.xlu1 %v7435_v7  ;;  %v7436_v8 = vmul.f32 %v14856_v29, %v14856_v29  ;;  %v14864_v53 = vmul.f32 %v7409_v37, %v6830_v15  ;;  %v6722_v48 = vadd.f32 %v6706_v22, %v15946_v51  ;;  %v9383_v61 = vld [vmem:[%s15106_s12] sm:$0xff]   ;;  %v15952_v37 = vld [vmem:[#allocation169_spill] sm:$0xff]  ;;  %v15956_v51 = vld [vmem:[#allocation166_spill] sm:$0xff]  ;;  %v10000_v23 = vpop.eup %9999 }
 0x7f0   : > { %v6831_v34 = vadd.f32 %v15947_v52, %v6725_v38  ;;  %v6654_v56 = vpop.permute.xlu1 %6653  ;;  %v6707_v19 = vld [vmem:[#allocation4 + $0x28] sm:$0xff]  ;;  %9062 = vmatprep.subr.bf16.mxu1 %v9383_v61  ;;  %v15957_v52 = vld [vmem:[#allocation68_spill] sm:$0xff] }
 0x7f1   : > { %6694 = vst.msk [vmem:[#allocation4 + $0x40] sm:$0xff] %vm6685_vm2, %v6654_v56  ;;  %7453 = vadd.xlane.f32.xlu0 %v7436_v8  ;;  %v7441_v17 = vmul.f32 %v14864_v53, %v14864_v53  ;;  %v6828_v57 = vadd.f32 %v15948_v60, %v6722_v48  ;;  %v6723_v27 = vadd.f32 %v6707_v19, %v15949_v46  ;;  %v15958_v19 = vld [vmem:[#allocation55_spill] sm:$0xff]  ;;  %v10002_v60 = vpop.eup %10001 }
 0x7f2   : > { %v14874_v14 = vmul.f32 %v7410_v33, %v6831_v34  ;;  %v6310_v41 = vpop.permute.xlu0 %6309  ;;  %v6713_v10 = vld [vmem:[#allocation4 + $0x58] sm:$0xff]  ;;  %v15955_v33 = vld [vmem:[#allocation165_spill] sm:$0xff]  ;;  %9063 = vmatpush3.bf16.msra.mxu1 %v9383_v61  ;;  %v7416_v13 = vmul.f32 %v10002_v60, %v15932_v44  ;;  %v15973_v60 = vld [vmem:[#allocation56_spill] sm:$0xff] }
 0x7f3   : > { %6343 = vst.msk [vmem:[#allocation4 + $0x78] sm:$0xff] %vm6327_vm1, %v6310_v41  ;;  %7463 = vadd.xlane.f32.xlu1 %v7441_v17  ;;  %v14880_v2 = vmul.f32 %v7407_v62, %v6828_v57  ;;  %v6829_v5 = vadd.f32 %v15950_v21, %v6723_v27  ;;  %v6729_v39 = vadd.f32 %v6713_v10, %v15951_v43 }
 0x7f4   : > { %v6666_v47 = vpop.permute.xlu1 %6665  ;;  %v6712_v42 = vld [vmem:[#allocation4 + $0x50] sm:$0xff]  ;;  %v7411_v62 = vmul.f32 %v9996_v24, %v15929_v58  ;;  %v7442_v30 = vmul.f32 %v14874_v14, %v14874_v14  ;;  %v15959_v58 = vld [vmem:[#allocation175_spill] sm:$0xff]  ;;  %v7417_v41 = vmul.f32 %v10000_v23, %v15931_v6  ;;  %9064 = vmatprep.subr.bf16.mxu1 %v9384_v54  ;;  %v15962_v6 = vld [vmem:[#allocation172_spill] sm:$0xff] }
 0x7f5   : > { %6700 = vst.msk [vmem:[#allocation4 + $0x70] sm:$0xff] %vm6685_vm2, %v6666_v47  ;;  %7457 = vadd.xlane.f32.xlu0 %v7438_v0  ;;  %v7439_v9 = vmul.f32 %v14880_v2, %v14880_v2  ;;  %v14891_v11 = vmul.f32 %v7408_v12, %v6829_v5  ;;  %v6728_v25 = vadd.f32 %v6712_v42, %v15952_v37  ;;  %v10004_v12 = vpop.eup %10003  ;;  %v15960_v5 = vld [vmem:[#allocation71_spill] sm:$0xff]  ;;  %v15963_v24 = vld [vmem:[#allocation70_spill] sm:$0xff] }
 0x7f6   : > { %v6835_v49 = vadd.f32 %v15953_v36, %v6729_v39  ;;  %v6664_v7 = vpop.permute.xlu0 %6663  ;;  %v6711_v1 = vld [vmem:[#allocation4 + $0x48] sm:$0xff]  ;;  %v15961_v39 = vld [vmem:[#allocation171_spill] sm:$0xff]  ;;  %9065 = vmatpush3.bf16.msra.mxu1 %v9384_v54  ;;  %v10006_v37 = vpop.eup %10005  ;;  %v15977_v54 = vld [vmem:[#allocation74_spill] sm:$0xff] }
 0x7f7   : > { %6699 = vst.msk [vmem:[#allocation4 + $0x68] sm:$0xff] %vm6685_vm2, %v6664_v7  ;;  %7459 = vadd.xlane.f32.xlu1 %v7439_v9  ;;  %v7440_v15 = vmul.f32 %v14891_v11, %v14891_v11  ;;  %v6834_v38 = vadd.f32 %v15954_v18, %v6728_v25  ;;  %v6727_v63 = vadd.f32 %v6711_v1, %v15955_v33  ;;  %v15965_v1 = vld [vmem:[#allocation174_spill] sm:$0xff]  ;;  %v15966_v33 = vld [vmem:[#allocation69_spill] sm:$0xff]  ;;  %v9390_v23 = vld [vmem:[%s15106_s12 + $0x38] sm:$0xff]  }
 0x7f8   : > { %v14901_v16 = vmul.f32 %v7414_v35, %v6835_v49  ;;  %v6662_v22 = vpop.permute.xlu1 %6661  ;;  %v6710_v40 = vld [vmem:[#allocation4 + $0x40] sm:$0xff]  ;;  %v7415_v25 = vmul.f32 %v10004_v12, %v15933_v31  ;;  %v9385_v18 = vld [vmem:[%s15106_s12 + $0x10] sm:$0xff]   ;;  %v15978_v12 = vld [vmem:[#allocation75_spill] sm:$0xff] }
 0x7f9   : > { %6698 = vst.msk [vmem:[#allocation4 + $0x60] sm:$0xff] %vm6685_vm2, %v6662_v22  ;;  %7461 = vadd.xlane.f32.xlu0 %v7440_v15  ;;  %v14905_v8 = vmul.f32 %v7413_v45, %v6834_v38  ;;  %v6726_v48 = vadd.f32 %v6710_v40, %v15956_v51  ;;  %v6833_v34 = vadd.f32 %v15957_v52, %v6727_v63  ;;  %v9388_v52 = vld [vmem:[%s15106_s12 + $0x28] sm:$0xff]  }
 0x7fa   : > { %v6668_v3 = vpop.permute.xlu0 %6667  ;;  %v7446_v36 = vmul.f32 %v14901_v16, %v14901_v16  ;;  %v7418_v38 = vmul.f32 %v10006_v37, %v15934_v50  ;;  %9066 = vmatprep.subr.bf16.mxu1 %v9385_v18  ;;  %v9386_v50 = vld [vmem:[%s15106_s12 + $0x18] sm:$0xff]  }
 0x7fb   : > { %6701 = vst.msk [vmem:[#allocation4 + $0x78] sm:$0xff] %vm6685_vm2, %v6668_v3  ;;  %v7445_v56 = vmul.f32 %v14905_v8, %v14905_v8  ;;  %v6832_v28 = vadd.f32 %v15958_v19, %v6726_v48  ;;  %v14916_v17 = vmul.f32 %v7412_v32, %v6833_v34  ;;  %9067 = vmatpush3.bf16.msra.mxu1 %v9385_v18  ;;  %v9387_v48 = vld [vmem:[%s15106_s12 + $0x20] sm:$0xff]   ;;  %v9389_v34 = vld [vmem:[%s15106_s12 + $0x30] sm:$0xff]   ;;  %v15968_v3 = vld [vmem:[#allocation47_spill] sm:$0xff] }
 0x7fc   : > { %v6716_v57 = vld [vmem:[#allocation4 + $0x70] sm:$0xff]  ;;  %9068 = vmatprep.subr.bf16.mxu1 %v9386_v50  ;;  %v15971_v19 = vld [vmem:[#allocation64_spill] sm:$0xff] }
 0x7fd   : > { %7471 = vadd.xlane.f32.xlu1 %v7445_v56  ;;  %7465 = vadd.xlane.f32.xlu0 %v7442_v30  ;;  %v14918_v46 = vmul.f32 %v7411_v62, %v6832_v28  ;;  %v6732_v27 = vadd.f32 %v6716_v57, %v15959_v58  ;;  %v7444_v21 = vmul.f32 %v14916_v17, %v14916_v17  ;;  %v15967_v62 = vld [vmem:[#allocation26_spill] sm:$0xff]  ;;  %v15969_v56 = vld [vmem:[#allocation63_spill] sm:$0xff]  ;;  %v15970_v30 = vld [vmem:[#allocation52_spill] sm:$0xff] }
 0x7fe   : > { %v6715_v10 = vld [vmem:[#allocation4 + $0x68] sm:$0xff]  ;;  %v15972_v28 = vld [vmem:[#allocation50_spill] sm:$0xff]  ;;  %v15974_v57 = vld [vmem:[#allocation60_spill] sm:$0xff] }
 0x7ff   : > { %v7443_v0 = vmul.f32 %v14918_v46, %v14918_v46  ;;  %v6838_v43 = vadd.f32 %v15960_v5, %v6732_v27  ;;  %v6731_v35 = vadd.f32 %v6715_v10, %v15961_v39  ;;  %9069 = vmatpush3.bf16.msra.mxu1 %v9386_v50  ;;  %v15975_v58 = vld [vmem:[#allocation67_spill] sm:$0xff]  ;;  %v15976_v27 = vld [vmem:[#allocation73_spill] sm:$0xff]  ;;  %v15980_v10 = vld [vmem:[#allocation46_spill] sm:$0xff] }
 0x800   : > { %v6714_v47 = vld [vmem:[#allocation4 + $0x60] sm:$0xff]  ;;  %9070 = vmatprep.subr.bf16.mxu1 %v9387_v48 }
 0x801   : > { %7467 = vadd.xlane.f32.xlu1 %v7443_v0  ;;  %7469 = vadd.xlane.f32.xlu0 %v7444_v21  ;;  %v14932_v42 = vmul.f32 %v7417_v41, %v6838_v43  ;;  %v6730_v61 = vadd.f32 %v6714_v47, %v15962_v6  ;;  %v6837_v9 = vadd.f32 %v15963_v24, %v6731_v35  ;;  %v15979_v41 = vld [vmem:[#allocation77_spill] sm:$0xff]  ;;  %v15981_v0 = vld [vmem:[#allocation48_spill] sm:$0xff] }
 0x802   : > { %v6717_v49 = vld [vmem:[#allocation4 + $0x78] sm:$0xff]  ;;  %v15982_v21 = vld [vmem:[#allocation76_spill] sm:$0xff] }
 0x803   : > { %v7449_v44 = vmul.f32 %v14932_v42, %v14932_v42  ;;  %v6836_v45 = vadd.f32 %v15964_v59, %v6730_v61  ;;  %v14942_v7 = vmul.f32 %v7416_v13, %v6837_v9  ;;  %v6733_v15 = vadd.f32 %v6717_v49, %v15965_v1  ;;  %9071 = vmatpush3.bf16.msra.mxu1 %v9387_v48  ;;  %v7548_v18 = vld [vmem:[%s15105_s11] sm:$0x1] }
 0x804   : > { %9072 = vmatprep.subr.bf16.mxu1 %v9388_v52 }
 0x805   : > { %7479 = vadd.xlane.f32.xlu1 %v7449_v44  ;;  %7473 = vadd.xlane.f32.xlu0 %v7446_v36  ;;  %v14949_v31 = vmul.f32 %v7415_v25, %v6836_v45  ;;  %v6839_v63 = vadd.f32 %v15966_v33, %v6733_v15  ;;  %v7448_v40 = vmul.f32 %v14942_v7, %v14942_v7 }
 0x807   : > { %v7447_v22 = vmul.f32 %v14949_v31, %v14949_v31  ;;  %v14956_v32 = vmul.f32 %v7418_v38, %v6839_v63  ;;  %9073 = vmatpush3.bf16.msra.mxu1 %v9388_v52 }
 0x808   : > { %9074 = vmatprep.subr.bf16.mxu1 %v9389_v34 }
 0x809   : > { %7475 = vadd.xlane.f32.xlu1 %v7447_v22  ;;  %7477 = vadd.xlane.f32.xlu0 %v7448_v40  ;;  %v7450_v51 = vmul.f32 %v14956_v32, %v14956_v32  ;;  %v7549_v40 = vunpack.c.l.bf16 %v7548_v18 }
 0x80b   : > { %9075 = vmatpush3.bf16.msra.mxu1 %v9389_v34 }
 0x80c   : > { %9076 = vmatprep.subr.bf16.mxu1 %v9390_v23 }
 0x80d   : > { %7481 = vadd.xlane.f32.xlu0 %v7450_v51 }
 0x80f   : > { %9077 = vmatpush3.bf16.msra.mxu1 %v9390_v23 }
 0x83c   : > { %7196 = vxpose.xlu1.b32.start [1/16] (narrow) %v15967_v62, 16 }
 0x840   : > { %7197 = vxpose.xlu1.b32.cont [2/16] (narrow) %v15968_v3, 16 }
 0x844   : > { %7198 = vxpose.xlu1.b32.cont [3/16] (narrow) %v15969_v56, 16 }
 0x848   : > { %7199 = vxpose.xlu1.b32.cont [4/16] (narrow) %v15970_v30, 16 }
 0x84c   : > { %7200 = vxpose.xlu1.b32.cont [5/16] (narrow) %v15971_v19, 16 }
 0x850   : > { %7201 = vxpose.xlu1.b32.cont [6/16] (narrow) %v15972_v28, 16  ;;  %v15983_v28 = vld [vmem:[#allocation25_spill] sm:$0xff] }
 0x854   : > { %7202 = vxpose.xlu1.b32.cont [7/16] (narrow) %v15973_v60, 16  ;;  %v14997_v60 = vrot.slane %v7549_v40, %v15983_v28 }
 0x858   : > { %7203 = vxpose.xlu1.b32.cont [8/16] (narrow) %v15974_v57, 16 }
 0x85c   : > { %7204 = vxpose.xlu1.b32.cont [9/16] (narrow) %v15975_v58, 16 }
 0x860   : > { %7205 = vxpose.xlu1.b32.cont [10/16] (narrow) %v15976_v27, 16 }
 0x864   : > { %7206 = vxpose.xlu1.b32.cont [11/16] (narrow) %v15977_v54, 16 }
 0x868   : > { %7207 = vxpose.xlu1.b32.cont [12/16] (narrow) %v15978_v12, 16 }
 0x86c   : > { %7208 = vxpose.xlu1.b32.cont [13/16] (narrow) %v15979_v41, 16 }
 0x870   : > { %7209 = vxpose.xlu1.b32.cont [14/16] (narrow) %v15980_v10, 16 }
 0x874   : > { %7210 = vxpose.xlu1.b32.cont [15/16] (narrow) %v15981_v0, 16 }
 0x878   : > { %7211 = vxpose.xlu1.b32.end [16/16] (narrow) %v15982_v21, 16  ;;  %v7456_v5 = vpop.xlane.xlu0 %7455 }
 0x879   : > { %v7486_v43 = vmul.f32 0.0078125, %v7456_v5 }
 0x87b   : > { %v7502_v13 = vadd.f32 1e-05, %v7486_v43 }
 0x87c   : > { %v7452_v39 = vpop.xlane.xlu1 %7451 }
 0x87d   : > { %v7484_v35 = vmul.f32 0.0078125, %v7452_v39 }
 0x87e   : > { %v7454_v47 = vpop.xlane.xlu0 %7453 }
 0x87f   : > { %v7500_v6 = vadd.f32 1e-05, %v7484_v35  ;;  %v7485_v61 = vmul.f32 0.0078125, %v7454_v47 }
 0x880   : > { %v7464_v24 = vpop.xlane.xlu1 %7463 }
 0x881   : > { %10007 = vrsqrt.f32 %v7500_v6  ;;  %v7501_v9 = vadd.f32 1e-05, %v7485_v61  ;;  %v7490_v36 = vmul.f32 0.0078125, %v7464_v24 }
 0x882   : > { %10009 = vrsqrt.f32 %v7502_v13  ;;  %v7458_v37 = vpop.xlane.xlu0 %7457 }
 0x883   : > { %10011 = vrsqrt.f32 %v7501_v9  ;;  %v7487_v25 = vmul.f32 0.0078125, %v7458_v37  ;;  %v7506_v38 = vadd.f32 1e-05, %v7490_v36 }
 0x884   : > { %v7460_v49 = vpop.xlane.xlu1 %7459 }
 0x885   : > { %v7503_v44 = vadd.f32 1e-05, %v7487_v25  ;;  %v7488_v59 = vmul.f32 0.0078125, %v7460_v49 }
 0x886   : > { %v7462_v45 = vpop.xlane.xlu0 %7461 }
 0x887   : > { %10013 = vrsqrt.f32 %v7503_v44  ;;  %v7504_v1 = vadd.f32 1e-05, %v7488_v59  ;;  %v7489_v15 = vmul.f32 0.0078125, %v7462_v45 }
 0x889   : > { %10015 = vrsqrt.f32 %v7504_v1  ;;  %v7505_v33 = vadd.f32 1e-05, %v7489_v15 }
 0x88a   : > { %v7472_v63 = vpop.xlane.xlu1 %7471  ;;  %v7466_v22 = vpop.xlane.xlu0 %7465 }
 0x88b   : > { %v10008_v50 = vpop.eup %10007  ;;  %10017 = vrsqrt.f32 %v7505_v33  ;;  %v7494_v51 = vmul.f32 0.0078125, %v7472_v63  ;;  %v7491_v48 = vmul.f32 0.0078125, %v7466_v22 }
 0x88c   : > { %v10010_v52 = vpop.eup %10009  ;;  %10019 = vrsqrt.f32 %v7506_v38  ;;  %v7532_v34 = vmul.f32 %v10008_v50, %v14848_v26 }
 0x88d   : > { %v10012_v23 = vpop.eup %10011  ;;  %v7507_v62 = vadd.f32 1e-05, %v7491_v48  ;;  %v7510_v3 = vadd.f32 1e-05, %v7494_v51  ;;  %v7534_v12 = vmul.f32 %v10010_v52, %v14834_v4 }
 0x88e   : > { %v7468_v56 = vpop.xlane.xlu1 %7467  ;;  %v7470_v30 = vpop.xlane.xlu0 %7469  ;;  %v7533_v19 = vmul.f32 %v10012_v23, %v14856_v29  ;;  %v7554_v27 = vmul.f32 %v14997_v60, %v7532_v34 }
 0x88f   : > { %v7492_v57 = vmul.f32 0.0078125, %v7468_v56  ;;  %v7493_v58 = vmul.f32 0.0078125, %v7470_v30  ;;  %10021 = vrsqrt.f32 %v7507_v62  ;;  %v7556_v13 = vmul.f32 %v14997_v60, %v7534_v12 }
 0x890   : > { %v7555_v54 = vmul.f32 %v14997_v60, %v7533_v19  ;;  %10023 = vrsqrt.f32 %v7510_v3 }
 0x891   : > { %v10014_v26 = vpop.eup %10013  ;;  %v7508_v41 = vadd.f32 1e-05, %v7492_v57  ;;  %v7509_v10 = vadd.f32 1e-05, %v7493_v58 }
 0x892   : > { %v7480_v0 = vpop.xlane.xlu1 %7479  ;;  %v7474_v21 = vpop.xlane.xlu0 %7473  ;;  %v7570_v5 = vpack.c.bf16 %v7555_v54, %v7554_v27  ;;  %v7535_v29 = vmul.f32 %v10014_v26, %v14844_v55 }
 0x893   : > { %v10016_v43 = vpop.eup %10015  ;;  %10025 = vrsqrt.f32 %v7508_v41  ;;  %v7498_v39 = vmul.f32 0.0078125, %v7480_v0  ;;  %v7495_v35 = vmul.f32 0.0078125, %v7474_v21 }
 0x894   : > { %10027 = vrsqrt.f32 %v7509_v10  ;;  %9078 = vmatprep.mubr.bf16.mxu1 %v7570_v5  ;;  %v7557_v47 = vmul.f32 %v14997_v60, %v7535_v29  ;;  %v7536_v4 = vmul.f32 %v10016_v43, %v14880_v2 }
 0x895   : > { %v10018_v6 = vpop.eup %10017  ;;  %v7511_v61 = vadd.f32 1e-05, %v7495_v35  ;;  %v7514_v9 = vadd.f32 1e-05, %v7498_v39  ;;  %v15984_v39 = vld [vmem:[#allocation9_spill] sm:$0xff] }
 0x896   : > { %v10020_v24 = vpop.eup %10019  ;;  %v7476_v37 = vpop.xlane.xlu1 %7475  ;;  %v7571_v36 = vpack.c.bf16 %v7557_v47, %v7556_v13  ;;  %v7537_v55 = vmul.f32 %v10018_v6, %v14891_v11  ;;  %v7558_v59 = vmul.f32 %v14997_v60, %v7536_v4  ;;  %v15985_v13 = vld [vmem:[#allocation8_spill] sm:$0xff]  ;;  %v15986_v6 = vld [vmem:[#allocation11_spill] sm:$0xff] }
 0x897   : > { %v7478_v25 = vpop.xlane.xlu0 %7477  ;;  %v7496_v49 = vmul.f32 0.0078125, %v7476_v37  ;;  %10029 = vrsqrt.f32 %v7511_v61  ;;  %v7538_v2 = vmul.f32 %v10020_v24, %v14864_v53  ;;  %v15987_v37 = vld [vmem:[#allocation10_spill] sm:$0xff] }
 0x898   : > { %v7497_v44 = vmul.f32 0.0078125, %v7478_v25  ;;  %9079 = vmatmul.mubr.bf16.vlgmr.msra.gmra.mrb[140].mxu1 %v7571_v36  ;;  %v7559_v45 = vmul.f32 %v14997_v60, %v7537_v55  ;;  %10031 = vrsqrt.f32 %v7514_v9 }
 0x899   : > { %v7512_v1 = vadd.f32 1e-05, %v7496_v49  ;;  %v10022_v18 = vpop.eup %10021  ;;  %v7560_v51 = vmul.f32 %v14997_v60, %v7538_v2 }
 0x89a   : > { %v7513_v15 = vadd.f32 1e-05, %v7497_v44  ;;  %v7572_v33 = vpack.c.bf16 %v7559_v45, %v7558_v59  ;;  %v7539_v11 = vmul.f32 %v10022_v18, %v14874_v14  ;;  %v10024_v22 = vpop.eup %10023  ;;  %v15988_v44 = vld [vmem:[#allocation14_spill] sm:$0xff] }
 0x89b   : > { %v7482_v38 = vpop.xlane.xlu0 %7481  ;;  %10033 = vrsqrt.f32 %v7512_v1  ;;  %v7542_v3 = vmul.f32 %v10024_v22, %v14905_v8  ;;  %v15989_v1 = vld [vmem:[#allocation12_spill] sm:$0xff]  ;;  %v15991_v22 = vld [vmem:[#allocation13_spill] sm:$0xff] }
 0x89c   : > { %v7499_v63 = vmul.f32 0.0078125, %v7482_v38  ;;  %10035 = vrsqrt.f32 %v7513_v15  ;;  %9082 = vmatprep.mubr.bf16.mxu1 %v7572_v33  ;;  %v7561_v48 = vmul.f32 %v14997_v60, %v7539_v11  ;;  %v15990_v38 = vld [vmem:[#allocation15_spill] sm:$0xff] }
 0x89d   : > { %v10026_v40 = vpop.eup %10025 }
 0x89e   : > { %v7515_v50 = vadd.f32 1e-05, %v7499_v63  ;;  %v10028_v52 = vpop.eup %10027  ;;  %v7540_v53 = vmul.f32 %v10026_v40, %v14918_v46  ;;  %v7573_v34 = vpack.c.bf16 %v7561_v48, %v7560_v51  ;;  %v7564_v46 = vmul.f32 %v14997_v60, %v7542_v3 }
 0x89f   : > { %v7541_v23 = vmul.f32 %v10028_v52, %v14916_v17  ;;  %v15992_v52 = vld [vmem:[#allocation18_spill] sm:$0xff] }
 0x8a0   : > { %10037 = vrsqrt.f32 %v7515_v50  ;;  %v7562_v62 = vmul.f32 %v14997_v60, %v7540_v53  ;;  %9083 = vmatmul.mubr.bf16.gmra.mrb[144].mxu1 %v7573_v34 }
 0x8a1   : > { %v7563_v14 = vmul.f32 %v14997_v60, %v7541_v23  ;;  %v10030_v56 = vpop.eup %10029  ;;  %v15993_v23 = vld [vmem:[#allocation16_spill] sm:$0xff] }
 0x8a2   : > { %v7543_v19 = vmul.f32 %v10030_v56, %v14901_v16  ;;  %v10032_v57 = vpop.eup %10031  ;;  %v15994_v56 = vld [vmem:[#allocation19_spill] sm:$0xff] }
 0x8a3   : > { %v7574_v30 = vpack.c.bf16 %v7563_v14, %v7562_v62  ;;  %v7546_v8 = vmul.f32 %v10032_v57, %v14932_v42 }
 0x8a4   : > { %v7565_v27 = vmul.f32 %v14997_v60, %v7543_v19 }
 0x8a5   : > { %v10034_v58 = vpop.eup %10033  ;;  %9086 = vmatprep.mubr.bf16.mxu1 %v7574_v30  ;;  %v7568_v5 = vmul.f32 %v14997_v60, %v7546_v8  ;;  %v15997_v8 = vld [vmem:[#allocation20_spill] sm:$0xff] }
 0x8a6   : > { %v10036_v54 = vpop.eup %10035  ;;  %v7544_v17 = vmul.f32 %v10034_v58, %v14949_v31  ;;  %v7575_v12 = vpack.c.bf16 %v7565_v27, %v7564_v46  ;;  %v15995_v58 = vld [vmem:[#allocation17_spill] sm:$0xff] }
 0x8a7   : > { %v7545_v26 = vmul.f32 %v10036_v54, %v14942_v7 }
 0x8a8   : > { %v7566_v41 = vmul.f32 %v14997_v60, %v7544_v17  ;;  %9087 = vmatmul.mubr.bf16.gmra.mrb[148].mxu1 %v7575_v12  ;;  %v15996_v12 = vld [vmem:[#allocation22_spill] sm:$0xff] }
 0x8a9   : > { %v7567_v16 = vmul.f32 %v14997_v60, %v7545_v26 }
 0x8aa   : > { %v10038_v10 = vpop.eup %10037 }
 0x8ab   : > { %v7547_v0 = vmul.f32 %v10038_v10, %v14956_v32  ;;  %v7576_v21 = vpack.c.bf16 %v7567_v16, %v7566_v41 }
 0x8ad   : > { %v7569_v29 = vmul.f32 %v14997_v60, %v7547_v0  ;;  %9090 = vmatprep.mubr.bf16.mxu1 %v7576_v21  ;;  %v15998_v21 = vld [vmem:[#allocation23_spill] sm:$0xff] }
 0x8af   : > { %v7577_v31 = vpack.c.bf16 %v7569_v29, %v7568_v5 }
 0x8b1   : > { %9091 = vmatmul.mubr.bf16.gmra.mrb[152].mxu1 %v7577_v31 }
 0x8bc   : > { %v7212_v7 = vpop.trf.xlu1 }
 0x8bd   : > { %9059 = vmatprep.mubr.f32.mxu0 %v7212_v7  ;;  %v15999_v7 = vld [vmem:[#allocation21_spill] sm:$0xff] }
 0x8c0   : > { %v7213_v43 = vpop.trf.xlu1 }
 0x8c1   : > { %9060 = vmatmul.mubr.f32.vlgmr.msra.gmra.mrb[152].mxu0 %v7213_v43 }
 0x96b   : > { %v9080_v42 = vpop.f32.mrb[140].mxu1 }
 0x96c   : > { %v7685_v35 = vadd.f32 %v9080_v42, %v15984_v39  ;;  %v7676_v32 = vpop.f32.mrb[141].mxu1 }
 0x96d   : > { %v7677_v47 = vadd.f32 %v15985_v13, %v7676_v32  ;;  %v9081_v4 = vpop.f32.mrb[142].mxu1  ;;  %v10058_v32 = vld [vmem:[#allocation2 + $0x8] sm:$0xff] }
 0x96e   : > { %v8114_v60 = vpack.c.bf16 %v7685_v35, %v7685_v35  ;;  %v7688_v61 = vadd.f32 %v9081_v4, %v15986_v6  ;;  %v7679_v24 = vpop.f32.mrb[143].mxu1  ;;  %v7161_v35 = vrot.slane %v14576_v20, %v15983_v28  ;;  %v10059_v4 = vld [vmem:[#allocation2] sm:$0xff] }
 0x96f   : > { %v8112_v9 = vpack.c.bf16 %v7677_v47, %v7677_v47  ;;  %v7680_v25 = vadd.f32 %v15987_v37, %v7679_v24 }
 0x970   : > { %7806 = vst.msk [vmem:[%s10242_s23 + $0x8] sm:$0xf] %vm7803_vm3, %v8114_v60  ;;  %v8115_v36 = vpack.c.bf16 %v7688_v61, %v7688_v61  ;;  %v7163_v13 = vmul.f32 %v10058_v32, %v7161_v35  ;;  %v7162_v60 = vmul.f32 %v10059_v4, %v7161_v35 }
 0x971   : > { %7804 = vst.msk [vmem:[%s10242_s23] sm:$0xf] %vm7803_vm3, %v8112_v9  ;;  %v8113_v55 = vpack.c.bf16 %v7680_v25, %v7680_v25 }
 0x972   : > { %7807 = vst.msk [vmem:[%s10242_s23 + $0xc] sm:$0xf] %vm7803_vm3, %v8115_v36 }
 0x973   : > { %7805 = vst.msk [vmem:[%s10242_s23 + $0x4] sm:$0xf] %vm7803_vm3, %v8113_v55  ;;  %v9084_v49 = vpop.f32.mrb[144].mxu1 }
 0x974   : > { %v7701_v59 = vadd.f32 %v9084_v49, %v15988_v44  ;;  %v7692_v45 = vpop.f32.mrb[145].mxu1 }
 0x975   : > { %v7693_v15 = vadd.f32 %v15989_v1, %v7692_v45  ;;  %v9085_v2 = vpop.f32.mrb[146].mxu1 }
 0x976   : > { %v8118_v18 = vpack.c.bf16 %v7701_v59, %v7701_v59  ;;  %v7704_v33 = vadd.f32 %v9085_v2, %v15990_v38  ;;  %v7695_v63 = vpop.f32.mrb[147].mxu1 }
 0x977   : > { %v8116_v11 = vpack.c.bf16 %v7693_v15, %v7693_v15  ;;  %v7696_v40 = vadd.f32 %v15991_v22, %v7695_v63 }
 0x978   : > { %7810 = vst.msk [vmem:[%s10242_s23 + $0x18] sm:$0xf] %vm7803_vm3, %v8118_v18  ;;  %v8119_v50 = vpack.c.bf16 %v7704_v33, %v7704_v33 }
 0x979   : > { %7808 = vst.msk [vmem:[%s10242_s23 + $0x10] sm:$0xf] %vm7803_vm3, %v8116_v11  ;;  %v8117_v51 = vpack.c.bf16 %v7696_v40, %v7696_v40 }
 0x97a   : > { %7811 = vst.msk [vmem:[%s10242_s23 + $0x1c] sm:$0xf] %vm7803_vm3, %v8119_v50 }
 0x97b   : > { %7809 = vst.msk [vmem:[%s10242_s23 + $0x14] sm:$0xf] %vm7803_vm3, %v8117_v51  ;;  %v9088_v48 = vpop.f32.mrb[148].mxu1 }
 0x97c   : > { %v7717_v53 = vadd.f32 %v9088_v48, %v15992_v52  ;;  %v7708_v34 = vpop.f32.mrb[149].mxu1 }
 0x97d   : > { %v7709_v62 = vadd.f32 %v15993_v23, %v7708_v34  ;;  %v9089_v14 = vpop.f32.mrb[150].mxu1 }
 0x97e   : > { %v8122_v3 = vpack.c.bf16 %v7717_v53, %v7717_v53  ;;  %v7720_v30 = vadd.f32 %v9089_v14, %v15994_v56  ;;  %v7711_v19 = vpop.f32.mrb[151].mxu1 }
 0x97f   : > { %v8120_v57 = vpack.c.bf16 %v7709_v62, %v7709_v62  ;;  %v7712_v46 = vadd.f32 %v15995_v58, %v7711_v19 }
 0x980   : > { %7814 = vst.msk [vmem:[%s10242_s23 + $0x28] sm:$0xf] %vm7803_vm3, %v8122_v3  ;;  %v8123_v27 = vpack.c.bf16 %v7720_v30, %v7720_v30 }
 0x981   : > { %7812 = vst.msk [vmem:[%s10242_s23 + $0x20] sm:$0xf] %vm7803_vm3, %v8120_v57  ;;  %v8121_v54 = vpack.c.bf16 %v7712_v46, %v7712_v46 }
 0x982   : > { %7815 = vst.msk [vmem:[%s10242_s23 + $0x2c] sm:$0xf] %vm7803_vm3, %v8123_v27 }
 0x983   : > { %7813 = vst.msk [vmem:[%s10242_s23 + $0x24] sm:$0xf] %vm7803_vm3, %v8121_v54 }
 0x984   : > { %v9092_v17 = vpop.f32.mrb[152].mxu1 }
 0x985   : > { %v7733_v26 = vadd.f32 %v9092_v17, %v15996_v12  ;;  %v7724_v41 = vpop.f32.mrb[153].mxu1 }
 0x986   : > { %v7725_v10 = vadd.f32 %v15997_v8, %v7724_v41  ;;  %v9093_v16 = vpop.f32.mrb[154].mxu1 }
 0x987   : > { %v8126_v0 = vpack.c.bf16 %v7733_v26, %v7733_v26  ;;  %v7736_v5 = vadd.f32 %v9093_v16, %v15998_v21  ;;  %v7727_v29 = vpop.f32.mrb[155].mxu1 }
 0x988   : > { %v8124_v31 = vpack.c.bf16 %v7725_v10, %v7725_v10  ;;  %v7728_v43 = vadd.f32 %v15999_v7, %v7727_v29 }
 0x989   : > { %7818 = vst.msk [vmem:[%s10242_s23 + $0x38] sm:$0xf] %vm7803_vm3, %v8126_v0  ;;  %v8127_v42 = vpack.c.bf16 %v7736_v5, %v7736_v5 }
 0x98a   : > { %7816 = vst.msk [vmem:[%s10242_s23 + $0x30] sm:$0xf] %vm7803_vm3, %v8124_v31  ;;  %v8125_v39 = vpack.c.bf16 %v7728_v43, %v7728_v43 }
 0x98b   : > { %7819 = vst.msk [vmem:[%s10242_s23 + $0x3c] sm:$0xf] %vm7803_vm3, %v8127_v42 }
 0x98c   : > { %7817 = vst.msk [vmem:[%s10242_s23 + $0x34] sm:$0xf] %vm7803_vm3, %v8125_v39 }
 0x994   : > { %v9061_v47 = vpop.f32.mrb[152].mxu0 }
 0x995   : > { %v7304_v6 = vadd.f32 %v9061_v47, %v7163_v13  ;;  %v7294_v61 = vpop.f32.mrb[153].mxu0 }
 0x996   : > { %v7303_v24 = vadd.f32 %v7294_v61, %v7162_v60 }
 0x997   : > { %7306 = vst [vmem:[#allocation2 + $0x8] sm:$0xff] %v7304_v6 }
 0x998   : > { %7305 = vst [vmem:[#allocation2] sm:$0xff] %v7303_v24 }
 0x999 PF: > { %s26_s25 = sadd.s32 1, %s10098_s25   ;;  %s16000_s21 = sld [smem:[#allocation5_spill]] }
 0x99a   : > { %p23_p8 = scmp.ge.s32.totalorder %s26_s25, 8   ;;  %s16001_s22 = sld [smem:[#allocation6_spill]] }
 0x99b   : > { %s16002_s23 = sld [smem:[#allocation7_spill]]  ;;  %s16003_s24 = smov %s16009_s27 }
 0x99c   :  { %25 = sbr.rel (!%p23_p8) target bundleno = 3 (0x3), region = 118 }

</bundles_post_ra>
